<compile_context>
chip_gen: v7x
topology: tpu7x:2x2x1
jax: 0.10.0
libtpu: 0.0.40
codegen_flags: <defaults>
</compile_context>

<pallas_src>
import functools
import math

import jax
import jax.numpy as jnp
from jax.experimental import pallas as pl
from jax.experimental.pallas import tpu as pltpu

_MASK_VALUE = -1e30      # finite "-inf": keeps the online-softmax max/exp NaN-free
_LN_EPS = 1e-5           # torch.nn.LayerNorm default eps


def _layernorm(h, g, b):
    mu = jnp.mean(h, axis=-1, keepdims=True)
    var = jnp.mean((h - mu) ** 2, axis=-1, keepdims=True)
    return (h - mu) * jax.lax.rsqrt(var + _LN_EPS) * g + b


def _const_index_map(ndim, *_):
    return (0,) * ndim


def _nbytes(shape, dtype):
    return math.prod(shape) * jnp.dtype(dtype).itemsize


# --------------------- call 1: LN1 + fused K/V projection ---------------------
def _kv_kernel(x_ref, ln1g_ref, ln1b_ref, wkv_ref, kT_ref, v_ref,
               *, n_head: int, head_size: int):
    T, C = x_ref.shape[1], x_ref.shape[2]
    xn = _layernorm(x_ref[0].astype(jnp.float32),
                    ln1g_ref[...], ln1b_ref[...]).astype(jnp.bfloat16)
    kv = jnp.dot(xn, wkv_ref[...], preferred_element_type=jnp.float32)     # (T, 2C)
    # K stored transposed & head-major: (H, hs, T) -> score matmul is (tq,hs)x(hs,T),
    # contraction on hs with a lane-dense T output (single 2-D transpose, once per batch).
    kT_ref[0] = kv[:, :C].T.reshape(n_head, head_size, T).astype(jnp.bfloat16)
    # V head-major: (H, T, hs)
    v_ref[0] = (kv[:, C:].astype(jnp.bfloat16)
                .reshape(T, n_head, head_size).swapaxes(0, 1))


# ------------- call 2: per-tile attention + projection + FFN ------------------
def _block_kernel(x_ref, kT_ref, v_ref,
                  ln1g_ref, ln1b_ref, wq_ref, wp3_ref, bp_ref,
                  ln2g_ref, ln2b_ref, w1_ref, b1_ref, w2_ref, b2_ref,
                  o_ref, *, n_head: int, head_size: int):
    qi = pl.program_id(1)
    tq, C = x_ref.shape[1], x_ref.shape[2]
    tk = tq
    scale = float(head_size) ** -0.5

    x_t = x_ref[0].astype(jnp.float32)                                     # (tq, C)

    # ---- LN1 on this tile + Q projection (1/sqrt(hs) folded into Q) ----
    xn1 = _layernorm(x_t, ln1g_ref[...], ln1b_ref[...]).astype(jnp.bfloat16)
    q = jnp.dot(xn1, wq_ref[...], preferred_element_type=jnp.float32) * scale
    q3 = q.astype(jnp.bfloat16).reshape(tq, n_head, head_size).swapaxes(0, 1)  # (H,tq,hs)

    # ---- flash-style causal attention over the visible key blocks 0..qi ----
    rows = qi * tq + jax.lax.broadcasted_iota(jnp.int32, (tq, tk), 0)

    def kv_step(kj, carry):
        m_p, l_p, acc_p = carry
        ks = pl.multiple_of(kj * tk, tk)
        kb = kT_ref[0, :, :, pl.ds(ks, tk)]                                # (H, hs, tk)
        vb = v_ref[0, :, pl.ds(ks, tk), :]                                 # (H, tk, hs)
        s = jnp.einsum('hqd,hdk->hqk', q3, kb,
                       preferred_element_type=jnp.float32)                 # (H, tq, tk)
        cols = ks + jax.lax.broadcasted_iota(jnp.int32, (tq, tk), 1)
        # every row has at least the diagonal key visible, so the running max stays finite
        s = jnp.where((cols <= rows)[None, :, :], s, _MASK_VALUE)
        m_n = jnp.maximum(m_p, jnp.max(s, axis=-1, keepdims=True))
        alpha = jnp.exp(m_p - m_n)
        p = jnp.exp(s - m_n)
        l_n = alpha * l_p + jnp.sum(p, axis=-1, keepdims=True)
        acc_n = alpha * acc_p + jnp.einsum('hqk,hkd->hqd',
                                           p.astype(jnp.bfloat16), vb,
                                           preferred_element_type=jnp.float32)
        return m_n, l_n, acc_n

    carry0 = (jnp.full((n_head, tq, 1), _MASK_VALUE, jnp.float32),
              jnp.zeros((n_head, tq, 1), jnp.float32),
              jnp.zeros((n_head, tq, head_size), jnp.float32))
    _, l_f, acc_f = jax.lax.fori_loop(0, qi + 1, kv_step, carry0)

    # deferred normalization: one (H,tq,hs) scale instead of an (H,tq,T) one
    o3 = (acc_f * pl.reciprocal(l_f, approx=True)).astype(jnp.bfloat16)

    # ---- output projection via head-major weight (H,hs,C): accumulate straight
    # ---- into a lane-dense (tq, C) result (no cross-lane transpose per tile) ----
    sa = jnp.einsum('hqd,hdc->hqc', o3, wp3_ref[...],
                    preferred_element_type=jnp.float32).sum(axis=0) + bp_ref[...]
    x1 = x_t + sa                                                          # residual 1

    # ---- LN2 + FFN + residual ----
    xn2 = _layernorm(x1, ln2g_ref[...], ln2b_ref[...]).astype(jnp.bfloat16)
    hdn = jnp.dot(xn2, w1_ref[...], preferred_element_type=jnp.float32) + b1_ref[...]
    hdn = jnp.maximum(hdn, 0.0).astype(jnp.bfloat16)                       # ReLU
    ff = jnp.dot(hdn, w2_ref[...], preferred_element_type=jnp.float32) + b2_ref[...]
    o_ref[0] = (x1 + ff).astype(o_ref.dtype)                               # residual 2


# ---------------------------------- wrapper -----------------------------------
def transformer_block(x, params, *, n_head: int, tq: int = 256):
    B, T, C = x.shape
    assert C % n_head == 0, "n_embd must be divisible by n_head"
    hs = C // n_head
    tq = min(tq, T)
    assert T % tq == 0, "sequence length must be divisible by the query tile"
    nq = T // tq
    hid = params["w1"].shape[1]
    f32, bf16 = jnp.float32, jnp.bfloat16

    # right-size the VMEM limit per generation instead of a blanket constant
    try:
        vmem_cap = int(pltpu.get_tpu_info().vmem_capacity_bytes)
    except Exception:
        vmem_cap = 64 << 20            # conservative (v7x per-TC) fallback

    def vmem_limit(need):
        return int(min(max(need, 16 << 20), (vmem_cap * 3) // 4))

    ln1_g = params["ln1_g"].astype(f32)
    ln1_b = params["ln1_b"].astype(f32)

    # ------------------------- call 1: K/V projection -------------------------
    wkv = jnp.concatenate([params["wk"], params["wv"]], axis=1).astype(bf16)   # (C, 2C)
    kv_params = [ln1_g, ln1_b, wkv]
    kv_param_bytes = sum(int(p.size) * p.dtype.itemsize for p in kv_params)
    kv_need = (2 * _nbytes((T, C), f32)                       # x block (double-buffered)
               + 4 * _nbytes((n_head, T, hs), bf16)           # kT + v out blocks (x2)
               + 2 * kv_param_bytes
               + 4 * _nbytes((T, 2 * C), f32)                 # in-kernel temporaries
               + (6 << 20))

    kT, v = pl.pallas_call(
        functools.partial(_kv_kernel, n_head=n_head, head_size=hs),
        out_shape=(jax.ShapeDtypeStruct((B, n_head, hs, T), bf16),
                   jax.ShapeDtypeStruct((B, n_head, T, hs), bf16)),
        grid_spec=pltpu.PrefetchScalarGridSpec(
            num_scalar_prefetch=0,
            grid=(B,),
            in_specs=[pl.BlockSpec((1, T, C), lambda b: (b, 0, 0))]
                    + [pl.BlockSpec(p.shape, functools.partial(_const_index_map, p.ndim))
                       for p in kv_params],
            out_specs=(pl.BlockSpec((1, n_head, hs, T), lambda b: (b, 0, 0, 0)),
                       pl.BlockSpec((1, n_head, T, hs), lambda b: (b, 0, 0, 0))),
        ),
        compiler_params=pltpu.CompilerParams(
            dimension_semantics=("parallel",),
            vmem_limit_bytes=vmem_limit(kv_need)),
    )(x, *kv_params)

    # ---------------- call 2: attention + projection + FFN --------------------
    main_params = [
        ln1_g, ln1_b,
        params["wq"].astype(bf16),
        params["wp"].astype(bf16).reshape(n_head, hs, C),     # head-major proj weight
        params["bp"].astype(f32),
        params["ln2_g"].astype(f32), params["ln2_b"].astype(f32),
        params["w1"].astype(bf16), params["b1"].astype(f32),
        params["w2"].astype(bf16), params["b2"].astype(f32),
    ]
    main_param_bytes = sum(int(p.size) * p.dtype.itemsize for p in main_params)
    main_need = (4 * _nbytes((tq, C), f32)                    # x + out tiles (x2 buffers)
                 + 4 * _nbytes((n_head, T, hs), bf16)         # kT + v blocks (x2 buffers)
                 + 2 * main_param_bytes                       # double-buffered weights
                 + 3 * _nbytes((n_head, tq, tq), f32)         # scores / probs temporaries
                 + _nbytes((n_head, tq, C), f32)              # per-head projection partials
                 + 3 * _nbytes((tq, hid), f32)                # FFN hidden temporaries
                 + (8 << 20))

    param_specs = [pl.BlockSpec(p.shape, functools.partial(_const_index_map, p.ndim))
                   for p in main_params]

    # advisory cost estimate for XLA scheduling
    flops = B * (2 * T * C * C                                # Q projection
                 + 2 * T * T * C                              # QK^T + PV (causal ~halved)
                 + 2 * T * C * C                              # output projection
                 + 4 * T * C * hid)                           # FFN
    transcendentals = B * n_head * T * T // 2
    bytes_accessed = (2 * x.size * x.dtype.itemsize
                      + 2 * B * 2 * T * C * 2
                      + B * main_param_bytes)

    return pl.pallas_call(
        functools.partial(_block_kernel, n_head=n_head, head_size=hs),
        out_shape=jax.ShapeDtypeStruct((B, T, C), x.dtype),
        grid_spec=pltpu.PrefetchScalarGridSpec(
            num_scalar_prefetch=0,
            grid=(B, nq),
            in_specs=[pl.BlockSpec((1, tq, C), lambda b, q: (b, q, 0)),
                      pl.BlockSpec((1, n_head, hs, T), lambda b, q: (b, 0, 0, 0)),
                      pl.BlockSpec((1, n_head, T, hs), lambda b, q: (b, 0, 0, 0))]
                    + param_specs,
            out_specs=pl.BlockSpec((1, tq, C), lambda b, q: (b, q, 0)),
        ),
        compiler_params=pltpu.CompilerParams(
            # no scratch carry -> the query-tile axis is independent too (v7x dual-TC)
            dimension_semantics=("parallel", "parallel"),
            vmem_limit_bytes=vmem_limit(main_need)),
        cost_estimate=pl.CostEstimate(
            flops=int(flops),
            transcendentals=int(transcendentals),
            bytes_accessed=int(bytes_accessed)),
    )(x, kT, v, *main_params)


# ---------------------------- pure-JAX reference ------------------------------
def reference_block(x, params, *, n_head: int):
    C = x.shape[-1]
    hs = C // n_head

    def ln(h, g, b):
        mu = jnp.mean(h, -1, keepdims=True)
        var = jnp.mean((h - mu) ** 2, -1, keepdims=True)
        return (h - mu) / jnp.sqrt(var + 1e-5) * g + b

    xn = ln(x, params["ln1_g"], params["ln1_b"])
    q = xn @ params["wq"]
    k = xn @ params["wk"]
    v = xn @ params["wv"]
    T = x.shape[1]
    mask = jnp.tril(jnp.ones((T, T), bool))
    outs = []
    for h in range(n_head):
        sl = slice(h * hs, (h + 1) * hs)
        s = (q[..., sl] @ jnp.swapaxes(k[..., sl], -1, -2)) * (hs ** -0.5)
        s = jnp.where(mask, s, -jnp.inf)
        w = jax.nn.softmax(s, axis=-1)
        outs.append(w @ v[..., sl])
    att = jnp.concatenate(outs, -1)
    x1 = x + (att @ params["wp"] + params["bp"])
    xn2 = ln(x1, params["ln2_g"], params["ln2_b"])
    ff = jnp.maximum(xn2 @ params["w1"] + params["b1"], 0.0) @ params["w2"] + params["b2"]
    return x1 + ff


# ----------------------------------- main --------------------------------------
if __name__ == "__main__":
    # Module constants: n_embd=384, n_head=6; T <= block_size(512).
    # tq=128 -> 2 query tiles per batch element, exercising both the fully-visible
    # and the diagonal (masked) key-block paths of the flash loop.
    B, T, C = 2, 256, 384
    N_HEAD = 6
    HID = 4 * C
    TQ = 128

    key = jax.random.PRNGKey(0)
    ks = jax.random.split(key, 10)

    params = {
        "ln1_g": jnp.ones((1, C), jnp.float32),
        "ln1_b": jnp.zeros((1, C), jnp.float32),
        "wq": 0.02 * jax.random.normal(ks[0], (C, C), jnp.float32),
        "wk": 0.02 * jax.random.normal(ks[1], (C, C), jnp.float32),
        "wv": 0.02 * jax.random.normal(ks[2], (C, C), jnp.float32),
        "wp": 0.02 * jax.random.normal(ks[3], (C, C), jnp.float32),
        "bp": 0.01 * jax.random.normal(ks[4], (1, C), jnp.float32),
        "ln2_g": jnp.ones((1, C), jnp.float32),
        "ln2_b": jnp.zeros((1, C), jnp.float32),
        "w1": 0.02 * jax.random.normal(ks[5], (C, HID), jnp.float32),
        "b1": 0.01 * jax.random.normal(ks[6], (1, HID), jnp.float32),
        "w2": 0.02 * jax.random.normal(ks[7], (HID, C), jnp.float32),
        "b2": 0.01 * jax.random.normal(ks[8], (1, C), jnp.float32),
    }

    x = jax.random.normal(ks[9], (B, T, C), jnp.float32)

    out = transformer_block(x, params, n_head=N_HEAD, tq=TQ)
    out = jax.block_until_ready(out)

    ref = reference_block(x, params, n_head=N_HEAD)
    assert out.shape == (B, T, C)
    # tolerance loosened vs pure-f32: bf16 matmul operands (f32 accumulate) + approx reciprocal
    assert jnp.allclose(out, ref, atol=3e-2, rtol=3e-2), "mismatch vs reference"

    print("KERNEL_OK")
</pallas_src>

<mosaic_0001>
module attributes {stable_mosaic.version = 11 : i64} {
  func.func @_kv_kernel(%arg0: i32, %arg1: memref<1x256x384xf32, #tpu.memory_space<vmem>>, %arg2: memref<1x384xf32, #tpu.memory_space<vmem>>, %arg3: memref<1x384xf32, #tpu.memory_space<vmem>>, %arg4: memref<384x768xbf16, #tpu.memory_space<vmem>>, %arg5: memref<1x6x64x256xbf16, #tpu.memory_space<vmem>>, %arg6: memref<1x6x256x64xbf16, #tpu.memory_space<vmem>>) attributes {dimension_semantics = [#tpu.dimension_semantics<parallel>], iteration_bounds = array<i64: 2>, scalar_prefetch = 0 : i64, scratch_operands = 0 : i64, tpu.core_type = #tpu.core_type<tc>, window_params = [{transform_indices = @transform_0, window_bounds = array<i64: 1, 256, 384>}, {pipeline_mode = #tpu.pipeline_mode<synchronous>, transform_indices = @transform_1, window_bounds = array<i64: 1, 384>}, {pipeline_mode = #tpu.pipeline_mode<synchronous>, transform_indices = @transform_2, window_bounds = array<i64: 1, 384>}, {pipeline_mode = #tpu.pipeline_mode<synchronous>, transform_indices = @transform_3, window_bounds = array<i64: 384, 768>}, {transform_indices = @transform_4, window_bounds = array<i64: 1, 6, 64, 256>}, {transform_indices = @transform_5, window_bounds = array<i64: 1, 6, 256, 64>}]} {
    %c0 = arith.constant 0 : index
    %c0_0 = arith.constant 0 : index
    %c0_1 = arith.constant 0 : index
    %0 = vector.load %arg1[%c0, %c0_0, %c0_1] : memref<1x256x384xf32, #tpu.memory_space<vmem>>, vector<1x256x384xf32>
    %1 = vector.shape_cast %0 : vector<1x256x384xf32> to vector<256x384xf32>
    %c0_2 = arith.constant 0 : index
    %c0_3 = arith.constant 0 : index
    %2 = vector.load %arg2[%c0_2, %c0_3] : memref<1x384xf32, #tpu.memory_space<vmem>>, vector<1x384xf32>
    %c0_4 = arith.constant 0 : index
    %c0_5 = arith.constant 0 : index
    %3 = vector.load %arg3[%c0_4, %c0_5] : memref<1x384xf32, #tpu.memory_space<vmem>>, vector<1x384xf32>
    %cst = arith.constant dense<0.000000e+00> : vector<256xf32>
    %4 = vector.multi_reduction <add>, %1, %cst [1] : vector<256x384xf32> to vector<256xf32>
    %5 = vector.shape_cast %4 : vector<256xf32> to vector<256x1xf32>
    %cst_6 = arith.constant 3.840000e+02 : f32
    %6 = vector.broadcast %cst_6 : f32 to vector<256x1xf32>
    %7 = arith.divf %5, %6 : vector<256x1xf32>
    %8 = vector.broadcast %7 : vector<256x1xf32> to vector<256x384xf32>
    %9 = arith.subf %1, %8 : vector<256x384xf32>
    %10 = arith.mulf %9, %9 : vector<256x384xf32>
    %cst_7 = arith.constant dense<0.000000e+00> : vector<256xf32>
    %11 = vector.multi_reduction <add>, %10, %cst_7 [1] : vector<256x384xf32> to vector<256xf32>
    %12 = vector.shape_cast %11 : vector<256xf32> to vector<256x1xf32>
    %cst_8 = arith.constant 3.840000e+02 : f32
    %13 = vector.broadcast %cst_8 : f32 to vector<256x1xf32>
    %14 = arith.divf %12, %13 : vector<256x1xf32>
    %15 = vector.broadcast %7 : vector<256x1xf32> to vector<256x384xf32>
    %16 = arith.subf %1, %15 : vector<256x384xf32>
    %cst_9 = arith.constant 9.99999974E-6 : f32
    %17 = vector.broadcast %cst_9 : f32 to vector<256x1xf32>
    %18 = arith.addf %14, %17 : vector<256x1xf32>
    %19 = math.rsqrt %18 : vector<256x1xf32>
    %20 = vector.broadcast %19 : vector<256x1xf32> to vector<256x384xf32>
    %21 = arith.mulf %16, %20 : vector<256x384xf32>
    %22 = vector.broadcast %2 : vector<1x384xf32> to vector<256x384xf32>
    %23 = arith.mulf %21, %22 : vector<256x384xf32>
    %24 = vector.broadcast %3 : vector<1x384xf32> to vector<256x384xf32>
    %25 = arith.addf %23, %24 : vector<256x384xf32>
    %26 = arith.truncf %25 : vector<256x384xf32> to vector<256x384xbf16>
    %c0_10 = arith.constant 0 : index
    %c0_11 = arith.constant 0 : index
    %27 = vector.load %arg4[%c0_10, %c0_11] : memref<384x768xbf16, #tpu.memory_space<vmem>>, vector<384x768xbf16>
    %cst_12 = arith.constant dense<0.000000e+00> : vector<256x768xf32>
    %28 = tpu.matmul %26, %27, %cst_12 {dimension_numbers = #tpu.dot_dimension_numbers<[1], [0], [0], [1], [0, 0, 1, 1], [], []>} : vector<256x384xbf16>, vector<384x768xbf16>, vector<256x768xf32> -> vector<256x768xf32>
    %29 = vector.extract_strided_slice %28 {offsets = [0, 0], sizes = [256, 384], strides = [1, 1]} : vector<256x768xf32> to vector<256x384xf32>
    %30 = tpu.transpose %29, [1, 0] : vector<256x384xf32> -> vector<384x256xf32>
    %31 = vector.shape_cast %30 : vector<384x256xf32> to vector<6x64x256xf32>
    %32 = arith.truncf %31 : vector<6x64x256xf32> to vector<6x64x256xbf16>
    %c0_13 = arith.constant 0 : index
    %c0_14 = arith.constant 0 : index
    %c0_15 = arith.constant 0 : index
    %c0_16 = arith.constant 0 : index
    %33 = vector.load %arg5[%c0_13, %c0_14, %c0_15, %c0_16] : memref<1x6x64x256xbf16, #tpu.memory_space<vmem>>, vector<1x6x64x256xbf16>
    %34 = vector.shape_cast %33 : vector<1x6x64x256xbf16> to vector<6x64x256xbf16>
    %35 = vector.shape_cast %32 : vector<6x64x256xbf16> to vector<1x6x64x256xbf16>
    tpu.vector_store %arg5[%c0_13, %c0_14, %c0_15, %c0_16], %35 {strides = array<i32>} : memref<1x6x64x256xbf16, #tpu.memory_space<vmem>>, vector<1x6x64x256xbf16>,
    %36 = vector.extract_strided_slice %28 {offsets = [0, 384], sizes = [256, 384], strides = [1, 1]} : vector<256x768xf32> to vector<256x384xf32>
    %37 = arith.truncf %36 : vector<256x384xf32> to vector<256x384xbf16>
    %38 = vector.shape_cast %37 : vector<256x384xbf16> to vector<256x6x64xbf16>
    %39 = tpu.transpose %38, [1, 0, 2] : vector<256x6x64xbf16> -> vector<6x256x64xbf16>
    %c0_17 = arith.constant 0 : index
    %c0_18 = arith.constant 0 : index
    %c0_19 = arith.constant 0 : index
    %c0_20 = arith.constant 0 : index
    %40 = vector.load %arg6[%c0_17, %c0_18, %c0_19, %c0_20] : memref<1x6x256x64xbf16, #tpu.memory_space<vmem>>, vector<1x6x256x64xbf16>
    %41 = vector.shape_cast %40 : vector<1x6x256x64xbf16> to vector<6x256x64xbf16>
    %42 = vector.shape_cast %39 : vector<6x256x64xbf16> to vector<1x6x256x64xbf16>
    tpu.vector_store %arg6[%c0_17, %c0_18, %c0_19, %c0_20], %42 {strides = array<i32>} : memref<1x6x256x64xbf16, #tpu.memory_space<vmem>>, vector<1x6x256x64xbf16>,
    return
  }
  func.func @transform_0(%arg0: i32) -> (i32, i32, i32) {
    %c0_i32 = arith.constant 0 : i32
    %c0_i32_0 = arith.constant 0 : i32
    %c0_i32_1 = arith.constant 0 : i32
    return %arg0, %c0_i32, %c0_i32_0 : i32, i32, i32
  }
  func.func @transform_1(%arg0: i32) -> (i32, i32) {
    %c0_i32 = arith.constant 0 : i32
    %c0_i32_0 = arith.constant 0 : i32
    %c0_i32_1 = arith.constant 0 : i32
    return %c0_i32, %c0_i32_0 : i32, i32
  }
  func.func @transform_2(%arg0: i32) -> (i32, i32) {
    %c0_i32 = arith.constant 0 : i32
    %c0_i32_0 = arith.constant 0 : i32
    %c0_i32_1 = arith.constant 0 : i32
    return %c0_i32, %c0_i32_0 : i32, i32
  }
  func.func @transform_3(%arg0: i32) -> (i32, i32) {
    %c0_i32 = arith.constant 0 : i32
    %c0_i32_0 = arith.constant 0 : i32
    %c0_i32_1 = arith.constant 0 : i32
    return %c0_i32, %c0_i32_0 : i32, i32
  }
  func.func @transform_4(%arg0: i32) -> (i32, i32, i32, i32) {
    %c0_i32 = arith.constant 0 : i32
    %c0_i32_0 = arith.constant 0 : i32
    %c0_i32_1 = arith.constant 0 : i32
    %c0_i32_2 = arith.constant 0 : i32
    return %arg0, %c0_i32, %c0_i32_0, %c0_i32_1 : i32, i32, i32, i32
  }
  func.func @transform_5(%arg0: i32) -> (i32, i32, i32, i32) {
    %c0_i32 = arith.constant 0 : i32
    %c0_i32_0 = arith.constant 0 : i32
    %c0_i32_1 = arith.constant 0 : i32
    %c0_i32_2 = arith.constant 0 : i32
    return %arg0, %c0_i32, %c0_i32_0, %c0_i32_1 : i32, i32, i32, i32
  }
}

</mosaic_0001>

<bundles_post_ra>
// kernel: tpu_custom_call.1
= control target key start
LH: loop header
LB: loop body
LE: loop exit
PB: predicated region body
PF: predicated region fallthrough
CT: control target
= control target key end

     0   :  { %11 = vsyncpa [#allocation3], 0  ;;  %s15663_s0 = inlined_call_operand.hbm [shape: f32[2,256,384], index: 0, kind: input, shape index: {}]   ;;  %s15664_s1 = inlined_call_operand.vmem [shape: f32[1,384], index: 1, kind: input, shape index: {}]   ;;  %s15665_s2 = inlined_call_operand.vmem [shape: f32[1,384], index: 2, kind: input, shape index: {}]   ;;  %s15666_s3 = inlined_call_operand.hbm [shape: bf16[384,768], index: 3, kind: input, shape index: {}]   ;;  %s15667_s4 = inlined_call_operand.hbm [shape: bf16[2,6,64,256], index: 4, kind: output, shape index: {0}]   ;;  %s15668_s5 = inlined_call_operand.vmem [shape: bf16[2,6,256,64], index: 5, kind: output, shape index: {1}]  }
   0x1   :  { %13 = vsyncpa [#allocation3 + $0x1], 0 }
   0x2   :  { %14 = vsyncpa [#allocation6], 0 }
   0x3   :  { %15 = vsyncpa [#allocation4], 0 }
   0x4   :  { %17 = vsyncpa [#allocation4 + $0x1], 0  ;;  %s11479_s18 = smov 0   ;;  %s11481_s19 = smov 0  }
   0x5   :  { %s11483_s20 = smov 0   ;;  %s11485_s21 = smov 0  }
   0x6 LB: > { %s11500_s22 = sadd.s32 4294967295, %s11436_s21   ;;  %s9922_s23 = sadd.s32 4294967294, %s11436_s21   ;;  %s11436_s21 = sphi %s11485_s21, %s16580_s21   ;;  %s11432_s20 = sphi %s11483_s20, %s16579_s20   ;;  %s11428_s19 = sphi %s11481_s19, %s16578_s19   ;;  %s11424_s18 = sphi %s11479_s18, %s16577_s18  }
   0x7   : > { %p43_p0 = scmp.ne.s32.totalorder %s11428_s19, %s11424_s18  ;;  %p15669_p1 = scmp.eq.s32.totalorder %s11500_s22, 0 }
   0x8   : > { %p136_p3 = scmp.eq.s32.totalorder %s9922_s23, 1  ;;  %p9923_p5 = scmp.ge.s32.totalorder %s11436_s21, 1 }
   0x9   : > { %p11509_p4 = por %p15669_p1, %p43_p0  ;;  %p169_p7 = scmp.lt.s32.totalorder %s11436_s21, 3 }
   0xa   : > { %p11514_p6 = por %p136_p3, %p43_p0  ;;  %s11438_s27 = smov [#allocation5]  }
   0xb   : > { %s15961_s24 = scalar_select %p11509_p4, 1, 0 }
   0xc   : > { %s15962_s25 = scalar_select %p11514_p6, 1, 0 }
   0xd   : > { %p11519_p8 = pnand %p9923_p5, %p169_p7  ;;  %s187_s28 = sshll.u32 %s11438_s27, 4  ;;  %s11523_s28 = int_to_ptr.vmem [resolvable:$true] %s187_s28 }
   0xe   : > { %s11535_s30 = sadd.s32 1, %s11436_s21   ;;  %s30_s6 = sadd.s32 1, %s11432_s20 }
   0xf   : > { %s15963_s26 = scalar_select %p11519_p8, 1, 0 }
  0x10   : > { %p10635_p9 = pneg %p11519_p8  ;;  %s27_s7 = ssub.s32 %s11436_s21, %s11535_s30 }
  0x11   : > { %s11308_s10 = scalar_lea.hbm %s15666_s3, 18432 }
  0x12   : > { %p11530_p11 = pnand %p10635_p9, %p15669_p1  ;;  %p11309_p12 = scmp.ne.s32.totalorder %s15666_s3, %s11308_s10 }
  0x13   : > { %p11315_p5 = scmp.lt.u32.totalorder %s11308_s10, %s15666_s3 }
  0x14   : > { %p11310_p13 = pneg %p11530_p11 }
  0x16   : > { %p11311_p0 = pnand %p11310_p13, %p11309_p12 }
  0x18   : > { %p11312_p3 = pneg %p11311_p0 }
  0x1a   : > { %p11317_p7 = pnand %p11315_p5, %p11312_p3 }
  0x1c   : > { %11320 = shalt.err (!%p11317_p7)
}
  0x1d   : > { %s11321_s15 = scalar_lea.vmem %s11523_s28, 18432  ;;  %p11329_p2 = scmp.lt.s32.totalorder %s11523_s28, %s11523_s28 }
  0x1e   : > { %p11322_p9 = scmp.ne.s32.totalorder %s11523_s28, %s11321_s15  ;;  %p11330_p6 = scmp.lt.s32.totalorder %s11321_s15, %s11321_s15 }
  0x20   : > { %p11324_p10 = pnand %p11322_p9, %p11310_p13  ;;  %p11331_p4 = por %p11330_p6, %p11329_p2 }
  0x22   : > { %p11325_p1 = pneg %p11324_p10 }
  0x24   : > { %p11332_p8 = pnand %p11331_p4, %p11325_p1 }
  0x26   : > { %11335 = shalt.err (!%p11332_p8)
}
  0x27   : > { %s15672_s16 = smov 384   ;;  %s11440_s17 = smov 24  }
  0x28   : > { %10638 = dma.hbm_to_vmem [thread:$0]  (!%p11530_p11), %s15666_s3, 18432, %s11523_s28, [#allocation6], %s15672_s16, %s15672_s16, %s11440_s17  }
  0x29   : > { %p28_p1 = scmp.eq.s32.totalorder %s27_s7, 0  ;;  %p37_p2 = scmp.ne.s32.totalorder %s11432_s20, %s11428_s19 }
  0x2a   : > { %p38_p4 = scmp.eq.s32.totalorder %s11436_s21, 0  ;;  %p10648_p6 = scmp.lt.s32.totalorder %s11436_s21, 2 }
  0x2b   : > { %s11569_s8 = scalar_select %p28_p1, %s11432_s20, %s30_s6  }
  0x2c   : > { %p39_p8 = por %p38_p4, %p37_p2  ;;  %p15965_p10 = scmp.eq.s32.totalorder %s11500_s22, 1 }
  0x2d   : > { %s201_s29 = sand.u32 1, %s11432_s20   ;;  %s10622_s10 = smul.u32 12288, %s11436_s21 }
  0x2e   : > { %p11573_p12 = por %p15965_p10, %p37_p2  ;;  %s10621_s11 = smul.u32 768, %s201_s29 }
  0x2f   : > { %p11579_p13 = pnand %p10648_p6, %p39_p8  ;;  %s11586_s6 = scalar_lea.hbm %s15663_s0, %s10622_s10 }
  0x30   : > { %s205_s13 = scalar_lea.vmem [#allocation2], %s10621_s11  ;;  %s11590_s15 = scalar_lea.sflag [#allocation3], %s201_s29 }
  0x31   : > { %s212_s14 = sshll.u32 %s205_s13, 4  ;;  %s11336_s23 = scalar_lea.hbm %s11586_s6, 12288  ;;  %s11588_s14 = int_to_ptr.vmem [resolvable:$true] %s212_s14 }
  0x32   : > { %p11337_p11 = scmp.ne.s32.totalorder %s11586_s6, %s11336_s23  ;;  %p11338_p0 = pneg %p11579_p13 }
  0x33   : > { %s11341_s28 = scalar_lea.hbm %s15663_s0, 24576  ;;  %p11342_p7 = scmp.lt.u32.totalorder %s11586_s6, %s15663_s0 }
  0x34   : > { %p11339_p3 = pnand %p11338_p0, %p11337_p11  ;;  %p11343_p9 = scmp.lt.u32.totalorder %s11341_s28, %s11336_s23 }
  0x35   : > { %p11345_p2 = scmp.lt.u32.totalorder %s11336_s23, %s11586_s6 }
  0x36   : > { %p11340_p5 = pneg %p11339_p3  ;;  %p11344_p1 = por %p11343_p9, %p11342_p7 }
  0x38   : > { %p11346_p4 = por %p11345_p2, %p11344_p1 }
  0x3a   : > { %p11347_p6 = pnand %p11346_p4, %p11340_p5 }
  0x3c   : > { %11350 = shalt.err (!%p11347_p6)
}
  0x3d   : > { %s11351_s29 = scalar_lea.vmem %s11588_s14, 12288  ;;  %s11441_s11 = smov [#allocation2]  }
  0x3e   : > { %p11352_p8 = scmp.ne.s32.totalorder %s11588_s14, %s11351_s29  ;;  %s11356_s13 = sshll.u32 %s11441_s11, 4  ;;  %s11357_s13 = int_to_ptr.vmem [resolvable:$false] %s11356_s13 }
  0x3f   : > { %s11358_s16 = scalar_lea.vmem %s11357_s13, 24576  ;;  %p11359_p3 = scmp.lt.s32.totalorder %s11588_s14, %s11357_s13 }
  0x40   : > { %p11354_p10 = pnand %p11352_p8, %p11338_p0  ;;  %p11360_p7 = scmp.lt.s32.totalorder %s11358_s16, %s11351_s29 }
  0x42   : > { %p11355_p11 = pneg %p11354_p10  ;;  %p11361_p9 = por %p11360_p7, %p11359_p3 }
  0x44   : > { %p11362_p1 = pnand %p11361_p9, %p11355_p11 }
  0x46   : > { %11365 = shalt.err (!%p11362_p1)
}
  0x47   : > { %s15968_s23 = smov 384   ;;  %p15969_p0 = scmp.ne.s32.totalorder %s15963_s26, 0 }
  0x48   : > { %10642 = dma.hbm_to_vmem [thread:$0]  (!%p11579_p13), %s11586_s6, 12288, %s11588_s14, %s11590_s15, %s15968_s23, %s15968_s23, %s11440_s17  }
  0x49   : > { %224 = sbr.rel (%p15969_p0) target bundleno = 1575 (0x627), region = 36 }
  0x50   : > { %s11624_s27 = sand.u32 1, %s11428_s19   ;;  %p15970_p5 = scmp.ne.s32.totalorder %s15961_s24, 0 }
  0x51   : > { %s10623_s10 = smul.u32 768, %s11624_s27  ;;  %s227_s28 = scalar_lea.sflag [#allocation3], %s11624_s27 }
  0x53   : > { %s11628_s7 = scalar_lea.vmem [#allocation2], %s10623_s10 }
  0x54   : > { %11411 = dma.done.wait (%p15970_p5), %s227_s28, 12288  }
  0x55   : > { %11413 = vsyncadd (%p15970_p5), %s227_s28, 4294955008  ;;  %p15971_p13 = scmp.eq.s32.totalorder %s11500_s22, 0 }
  0x57   : > { %11415 = dma.done.wait (%p15971_p13), [#allocation6], 18432   ;;  %p15972_p2 = pmov %p15971_p13 }
  0x58   : > { %v11639_v0 = vld [vmem:[%s11628_s7] sm:$0xff]  ;;  %v11642_v1 = vld [vmem:[%s11628_s7 + $0x8] sm:$0xff]  ;;  %v11645_v2 = vld [vmem:[%s11628_s7 + $0x10] sm:$0xff]  ;;  %s11443_s6 = smov 64   ;;  %p266_p4 = scmp.lt.s32.totalorder %s11500_s22, 1  ;;  %vm9599_vm0 = vcmask 519168  }
  0x59   : > { %11417 = vsyncadd (%p15972_p2), [#allocation6], 4294948864  ;;  %v370_v3 = vadd.f32 %v11642_v1, %v11639_v0  ;;  %v11650_v4 = vld [vmem:[%s11628_s7 + $0x18] sm:$0xff]  ;;  %v11653_v5 = vld [vmem:[%s11628_s7 + $0x20] sm:$0xff]  ;;  %s10624_s16 = smul.u32 384, %s11624_s27  ;;  %s9793_s26 = scalar_lea.sflag [#allocation4], %s11624_s27 }
  0x5a   : > { %v11656_v6 = vld [vmem:[%s11628_s7 + $0x28] sm:$0xff]  ;;  %v374_v7 = vadd.f32 %v11653_v5, %v11650_v4  ;;  %v11661_v8 = vld [vmem:[%s11628_s7 + $0x30] sm:$0xff]  ;;  %v11664_v9 = vld [vmem:[%s11628_s7 + $0x38] sm:$0xff]  ;;  %s13729_s14 = scalar_select %p266_p4, %s11500_s22, 1 }
  0x5b   : > { %v11667_v10 = vld [vmem:[%s11628_s7 + $0x40] sm:$0xff]  ;;  %v371_v11 = vadd.f32 %v370_v3, %v11645_v2  ;;  %v378_v12 = vadd.f32 %v11664_v9, %v11661_v8  ;;  %v11673_v13 = vld [vmem:[%s11628_s7 + $0x48] sm:$0xff]  ;;  %v11676_v14 = vld [vmem:[%s11628_s7 + $0x50] sm:$0xff]  ;;  %s14722_s23 = scalar_lea.vmem [#allocation7], %s10624_s16  ;;  %s10626_s10 = smul.u32 6144, %s11500_s22 }
  0x5c   : > { %v11679_v15 = vld [vmem:[%s11628_s7 + $0x58] sm:$0xff]  ;;  %v382_v16 = vadd.f32 %v11676_v14, %v11673_v13  ;;  %v11684_v17 = vld [vmem:[%s11628_s7 + $0x60] sm:$0xff]  ;;  %v11687_v18 = vld [vmem:[%s11628_s7 + $0x68] sm:$0xff]  ;;  %v375_v19 = vadd.f32 %v374_v7, %v11656_v6  ;;  %s10625_s15 = smul.u32 768, %s13729_s14  ;;  %s9811_s28 = sshll.u32 %s14722_s23, 4  ;;  %s15191_s28 = int_to_ptr.vmem [resolvable:$true] %s9811_s28 }
  0x5d   : > { %372 = vadd.xlane.f32.xlu0 %v371_v11  ;;  %v379_v20 = vadd.f32 %v378_v12, %v11667_v10  ;;  %v386_v21 = vadd.f32 %v11687_v18, %v11684_v17  ;;  %v11694_v22 = vld [vmem:[%s11628_s7 + $0x78] sm:$0xff]  ;;  %v11697_v23 = vld [vmem:[%s11628_s7 + $0x80] sm:$0xff]  ;;  %v11700_v24 = vld [vmem:[%s11628_s7 + $0x70] sm:$0xff]  ;;  %s15189_s22 = scalar_lea.hbm %s15667_s4, %s10626_s10  ;;  %s11366_s17 = scalar_lea.vmem %s15191_s28, 6144 }
  0x5e   : > { %v11703_v25 = vld [vmem:[%s11628_s7 + $0x90] sm:$0xff]  ;;  %v11706_v26 = vld [vmem:[%s11628_s7 + $0x98] sm:$0xff]  ;;  %v383_v27 = vadd.f32 %v382_v16, %v11679_v15  ;;  %v390_v28 = vadd.f32 %v11697_v23, %v11694_v22  ;;  %v11712_v29 = vld [vmem:[%s11628_s7 + $0x88] sm:$0xff]  ;;  %s13771_s13 = scalar_lea.vmem %s15668_s5, %s10625_s15  ;;  %p11367_p6 = scmp.ne.s32.totalorder %s15191_s28, %s11366_s17 }
  0x5f   : > { %380 = vadd.xlane.f32.xlu1 %v379_v20  ;;  %v11715_v30 = vld [vmem:[%s11628_s7 + $0xa8] sm:$0xff]  ;;  %v11718_v31 = vld [vmem:[%s11628_s7 + $0xb0] sm:$0xff]  ;;  %v387_v32 = vadd.f32 %v386_v21, %v11700_v24  ;;  %v394_v33 = vadd.f32 %v11706_v26, %v11703_v25  ;;  %v11724_v34 = vld [vmem:[%s11628_s7 + $0xa0] sm:$0xff]  ;;  %s11446_s12 = smov [#allocation7]  }
  0x60   : > { %v11727_v35 = vld [vmem:[%s11628_s7 + $0xc0] sm:$0xff]  ;;  %v11730_v36 = vld [vmem:[%s11628_s7 + $0xc8] sm:$0xff]  ;;  %v391_v37 = vadd.f32 %v390_v28, %v11712_v29  ;;  %v398_v38 = vadd.f32 %v11718_v31, %v11715_v30  ;;  %v11736_v39 = vld [vmem:[%s11628_s7 + $0xb8] sm:$0xff]  ;;  %p11368_p8 = pnand %p11367_p6, %p11573_p12 }
  0x61   : > { %376 = vadd.xlane.f32.xlu0 %v375_v19  ;;  %v11739_v40 = vld [vmem:[%s11628_s7 + $0xd8] sm:$0xff]  ;;  %v11742_v41 = vld [vmem:[%s11628_s7 + $0xe0] sm:$0xff]  ;;  %v395_v42 = vadd.f32 %v394_v33, %v11724_v34  ;;  %v402_v43 = vadd.f32 %v11730_v36, %v11727_v35  ;;  %v11748_v44 = vld [vmem:[%s11628_s7 + $0xd0] sm:$0xff] }
  0x62   : > { %v11751_v45 = vld [vmem:[%s11628_s7 + $0xf0] sm:$0xff]  ;;  %v11754_v46 = vld [vmem:[%s11628_s7 + $0xf8] sm:$0xff]  ;;  %v399_v47 = vadd.f32 %v398_v38, %v11736_v39  ;;  %v406_v48 = vadd.f32 %v11742_v41, %v11739_v40  ;;  %v11760_v49 = vld [vmem:[%s11628_s7 + $0xe8] sm:$0xff]  ;;  %p11369_p10 = pneg %p11368_p8 }
  0x63   : > { %384 = vadd.xlane.f32.xlu1 %v383_v27  ;;  %v11763_v50 = vld [vmem:[%s11628_s7 + $0x108] sm:$0xff]  ;;  %v11766_v51 = vld [vmem:[%s11628_s7 + $0x110] sm:$0xff]  ;;  %v403_v52 = vadd.f32 %v402_v43, %v11748_v44  ;;  %v410_v53 = vadd.f32 %v11754_v46, %v11751_v45  ;;  %v11772_v54 = vld [vmem:[%s11628_s7 + $0x100] sm:$0xff] }
  0x64   : > { %v11775_v55 = vld [vmem:[%s11628_s7 + $0x120] sm:$0xff]  ;;  %v11778_v56 = vld [vmem:[%s11628_s7 + $0x128] sm:$0xff]  ;;  %v407_v57 = vadd.f32 %v406_v48, %v11760_v49  ;;  %v414_v58 = vadd.f32 %v11766_v51, %v11763_v50  ;;  %v11784_v59 = vld [vmem:[%s11628_s7 + $0x118] sm:$0xff] }
  0x65   : > { %388 = vadd.xlane.f32.xlu0 %v387_v32  ;;  %v11787_v60 = vld [vmem:[%s11628_s7 + $0x138] sm:$0xff]  ;;  %v11790_v61 = vld [vmem:[%s11628_s7 + $0x140] sm:$0xff]  ;;  %v411_v62 = vadd.f32 %v410_v53, %v11772_v54  ;;  %v11794_v63 = vld [vmem:[%s11628_s7 + $0x130] sm:$0xff]  ;;  %v418_v3 = vadd.f32 %v11778_v56, %v11775_v55 }
  0x66   : > { %v11799_v7 = vld [vmem:[%s11628_s7 + $0x150] sm:$0xff]  ;;  %v11802_v11 = vld [vmem:[%s11628_s7 + $0x158] sm:$0xff]  ;;  %v11805_v12 = vld [vmem:[%s11628_s7 + $0x148] sm:$0xff]  ;;  %v415_v20 = vadd.f32 %v414_v58, %v11784_v59  ;;  %v422_v21 = vadd.f32 %v11790_v61, %v11787_v60 }
  0x67   : > { %392 = vadd.xlane.f32.xlu1 %v391_v37  ;;  %v11808_v16 = vld [vmem:[%s11628_s7 + $0x168] sm:$0xff]  ;;  %v11811_v19 = vld [vmem:[%s11628_s7 + $0x170] sm:$0xff]  ;;  %v11817_v27 = vld [vmem:[%s11628_s7 + $0x160] sm:$0xff]  ;;  %v419_v33 = vadd.f32 %v418_v3, %v11794_v63  ;;  %v426_v37 = vadd.f32 %v11802_v11, %v11799_v7 }
  0x68   : > { %15973 = vst [vmem:[#allocation11_spill] sm:$0xff] %v11808_v16  ;;  %15974 = vst [vmem:[#allocation12_spill] sm:$0xff] %v11811_v19  ;;  %v11820_v28 = vld [vmem:[%s11628_s7 + $0x180] sm:$0xff]  ;;  %v11823_v32 = vld [vmem:[%s11628_s7 + $0x188] sm:$0xff]  ;;  %v430_v48 = vadd.f32 %v11811_v19, %v11808_v16 }
  0x69   : > { %396 = vadd.xlane.f32.xlu0 %v395_v42  ;;  %15975 = vst [vmem:[#allocation13_spill] sm:$0xff] %v11817_v27  ;;  %15976 = vst [vmem:[#allocation14_spill] sm:$0xff] %v11820_v28  ;;  %v11829_v38 = vld [vmem:[%s11628_s7 + $0x178] sm:$0xff]  ;;  %v11835_v43 = vld [vmem:[%s11628_s7 + $0x1a0] sm:$0xff]  ;;  %v427_v53 = vadd.f32 %v426_v37, %v11817_v27 }
  0x6a   : > { %15977 = vst [vmem:[#allocation15_spill] sm:$0xff] %v11823_v32  ;;  %v11832_v42 = vld [vmem:[%s11628_s7 + $0x198] sm:$0xff]  ;;  %15979 = vst [vmem:[#allocation17_spill] sm:$0xff] %v11835_v43  ;;  %v11847_v58 = vld [vmem:[%s11628_s7 + $0x1b0] sm:$0xff] }
  0x6b   : > { %400 = vadd.xlane.f32.xlu1 %v399_v47  ;;  %15978 = vst [vmem:[#allocation16_spill] sm:$0xff] %v11832_v42  ;;  %v423_v47 = vadd.f32 %v422_v21, %v11805_v12  ;;  %15981 = vst [vmem:[#allocation19_spill] sm:$0xff] %v11847_v58  ;;  %v11853_v3 = vld [vmem:[%s11628_s7 + $0x1a8] sm:$0xff]  ;;  %v11859_v21 = vld [vmem:[%s11628_s7 + $0x1d0] sm:$0xff]  ;;  %v438_v37 = vadd.f32 %v11835_v43, %v11832_v42 }
  0x6c   : > { %15984 = vst [vmem:[#allocation22_spill] sm:$0xff] %v11859_v21  ;;  %v11865_v27 = vld [vmem:[%s11628_s7 + $0x1c0] sm:$0xff]  ;;  %v11874_v16 = vld [vmem:[%s11628_s7 + $0x1e8] sm:$0xff] }
  0x6d   : > { %404 = vadd.xlane.f32.xlu0 %v403_v52  ;;  %v11841_v52 = vld [vmem:[%s11628_s7 + $0x190] sm:$0xff]  ;;  %15985 = vst [vmem:[#allocation23_spill] sm:$0xff] %v11865_v27  ;;  %v11871_v19 = vld [vmem:[%s11628_s7 + $0x1e0] sm:$0xff]  ;;  %15987 = vst [vmem:[#allocation25_spill] sm:$0xff] %v11874_v16  ;;  %v439_v43 = vadd.f32 %v438_v37, %v11853_v3 }
  0x6e   : > { %15980 = vst [vmem:[#allocation18_spill] sm:$0xff] %v11841_v52  ;;  %15986 = vst [vmem:[#allocation24_spill] sm:$0xff] %v11871_v19 }
  0x6f   : > { %408 = vadd.xlane.f32.xlu1 %v407_v57  ;;  %v434_v57 = vadd.f32 %v11823_v32, %v11820_v28 }
  0x71   : > { %412 = vadd.xlane.f32.xlu0 %v411_v62  ;;  %v11850_v62 = vld [vmem:[%s11628_s7 + $0x1b8] sm:$0xff]  ;;  %v435_v32 = vadd.f32 %v434_v57, %v11841_v52  ;;  %v450_v52 = vadd.f32 %v11874_v16, %v11871_v19  ;;  %v11033_v16 = vld [vmem:[#allocation5 + $0x30] ss:$24 sps:$4 sm:$0xff]   ;;  %v11058_v19 = vld [vmem:[#allocation5 + $0x334] ss:$24 sps:$4 sm:$0xff]  }
  0x72   : > { %15982 = vst [vmem:[#allocation20_spill] sm:$0xff] %v11850_v62  ;;  %v442_v28 = vadd.f32 %v11850_v62, %v11847_v58  ;;  %v11890_v62 = vld [vmem:[%s11628_s7 + $0x1f0] sm:$0xff]  ;;  %v11895_v58 = vld [vmem:[%s11628_s7 + $0x208] sm:$0xff] }
  0x73   : > { %416 = vadd.xlane.f32.xlu1 %v415_v20  ;;  %v11856_v20 = vld [vmem:[%s11628_s7 + $0x1c8] sm:$0xff]  ;;  %15989 = vst [vmem:[#allocation27_spill] sm:$0xff] %v11895_v58 }
  0x74   : > { %15983 = vst [vmem:[#allocation21_spill] sm:$0xff] %v11856_v20  ;;  %v446_v42 = vadd.f32 %v11859_v21, %v11856_v20  ;;  %v443_v57 = vadd.f32 %v442_v28, %v11865_v27  ;;  %v451_v21 = vadd.f32 %v450_v52, %v11890_v62  ;;  %v11028_v28 = vld [vmem:[#allocation5 + $0x4] ss:$24 sps:$4 sm:$0xff]   ;;  %v11030_v27 = vld [vmem:[#allocation5] ss:$24 sps:$4 sm:$0xff]  }
  0x75   : > { %420 = vadd.xlane.f32.xlu0 %v419_v33  ;;  %v431_v33 = vadd.f32 %v430_v48, %v11829_v38  ;;  %v11880_v48 = vld [vmem:[%s11628_s7 + $0x1f8] sm:$0xff]  ;;  %v11031_v20 = vld [vmem:[#allocation5 + $0x34] ss:$24 sps:$4 sm:$0xff]   ;;  %2179 = vmatprep.subr.bf16.mxu1 %v11028_v28 }
  0x76   : > { %2180 = vmatpush1.bf16.msra.mxu1 %v11030_v27  ;;  %v11037_v52 = vld [vmem:[#allocation5 + $0x94] ss:$24 sps:$4 sm:$0xff]  }
  0x77   : > { %424 = vadd.xlane.f32.xlu1 %v423_v47  ;;  %v11877_v47 = vld [vmem:[%s11628_s7 + $0x1d8] sm:$0xff]  ;;  %2181 = vmatprep.subr.bf16.mxu1 %v11031_v20  ;;  %v11043_v27 = vld [vmem:[#allocation5 + $0xf4] ss:$24 sps:$4 sm:$0xff]   ;;  %v11045_v20 = vld [vmem:[#allocation5 + $0xf0] ss:$24 sps:$4 sm:$0xff]  }
  0x78   : > { %15988 = vst [vmem:[#allocation26_spill] sm:$0xff] %v11877_v47  ;;  %v11049_v28 = vld [vmem:[#allocation5 + $0x154] ss:$24 sps:$4 sm:$0xff]  }
  0x79   : > { %428 = vadd.xlane.f32.xlu0 %v427_v53  ;;  %v11886_v53 = vld [vmem:[%s11628_s7 + $0x200] sm:$0xff] }
  0x7a   : > { %v454_v37 = vadd.f32 %v11886_v53, %v11880_v48  ;;  %2182 = vmatpush1.bf16.msra.mxu1 %v11033_v16  ;;  %v11048_v16 = vld [vmem:[#allocation5 + $0x120] ss:$24 sps:$4 sm:$0xff]  }
  0x7b   : > { %432 = vadd.xlane.f32.xlu1 %v431_v33  ;;  %v447_v33 = vadd.f32 %v446_v42, %v11877_v47  ;;  %v11052_v42 = vld [vmem:[#allocation5 + $0x304] ss:$24 sps:$4 sm:$0xff]   ;;  %v11056_v47 = vld [vmem:[#allocation5 + $0x300] ss:$24 sps:$4 sm:$0xff]  }
  0x7c   : > { %2372 = vmatprep.subr.bf16.mxu0 %v11052_v42 }
  0x7d   : > { %436 = vadd.xlane.f32.xlu0 %v435_v32  ;;  %v455_v32 = vadd.f32 %v454_v37, %v11895_v58  ;;  %2373 = vmatpush1.bf16.msra.mxu0 %v11056_v47  ;;  %v11042_v37 = vld [vmem:[#allocation5 + $0xc0] ss:$24 sps:$4 sm:$0xff]   ;;  %v11051_v47 = vld [vmem:[#allocation5 + $0x150] ss:$24 sps:$4 sm:$0xff]  }
  0x7e   : > { %2374 = vmatprep.subr.bf16.mxu0 %v11058_v19  ;;  %v11054_v19 = vld [vmem:[#allocation5 + $0x184] ss:$24 sps:$4 sm:$0xff]   ;;  %v11947_v58 = vld [vmem:[%s11628_s7 + $0x228] sm:$0xff] }
  0x7f   : > { %440 = vadd.xlane.f32.xlu1 %v439_v43  ;;  %v11034_v43 = vld [vmem:[#allocation5 + $0x64] ss:$24 sps:$4 sm:$0xff]   ;;  %16002 = vst [vmem:[#allocation40_spill] sm:$0xff] %v11947_v58 }
  0x80   : > { %2183 = vmatprep.subr.bf16.mxu1 %v11034_v43  ;;  %v11057_v43 = vld [vmem:[#allocation5 + $0x180] ss:$24 sps:$4 sm:$0xff]  }
  0x81   : > { %444 = vadd.xlane.f32.xlu0 %v443_v57  ;;  %v11036_v57 = vld [vmem:[#allocation5 + $0x60] ss:$24 sps:$4 sm:$0xff]  }
  0x82   : > { %2184 = vmatpush1.bf16.msra.mxu1 %v11036_v57 }
  0x83   : > { %448 = vadd.xlane.f32.xlu1 %v447_v33  ;;  %2185 = vmatprep.subr.bf16.mxu1 %v11037_v52  ;;  %v11040_v33 = vld [vmem:[#allocation5 + $0xc4] ss:$24 sps:$4 sm:$0xff]  }
  0x85   : > { %452 = vadd.xlane.f32.xlu0 %v451_v21  ;;  %v11039_v21 = vld [vmem:[#allocation5 + $0x90] ss:$24 sps:$4 sm:$0xff]  }
  0x86   : > { %2186 = vmatpush1.bf16.msra.mxu1 %v11039_v21 }
  0x87   : > { %456 = vadd.xlane.f32.xlu1 %v455_v32  ;;  %2187 = vmatprep.subr.bf16.mxu1 %v11040_v33  ;;  %v11046_v32 = vld [vmem:[#allocation5 + $0x124] ss:$24 sps:$4 sm:$0xff]  }
  0x8a   : > { %2188 = vmatpush1.bf16.msra.mxu1 %v11042_v37 }
  0x8b   : > { %2189 = vmatprep.subr.bf16.mxu1 %v11043_v27 }
  0x8e   : > { %2190 = vmatpush1.bf16.msra.mxu1 %v11045_v20 }
  0x8f   : > { %2191 = vmatprep.subr.bf16.mxu1 %v11046_v32  ;;  %v11912_v32 = vld [vmem:[%s11628_s7 + $0x210] sm:$0xff] }
  0x90   : > { %15993 = vst [vmem:[#allocation31_spill] sm:$0xff] %v11912_v32 }
  0x92   : > { %2192 = vmatpush1.bf16.msra.mxu1 %v11048_v16  ;;  %v11915_v16 = vld [vmem:[%s11628_s7 + $0x218] sm:$0xff] }
  0x93   : > { %2193 = vmatprep.subr.bf16.mxu1 %v11049_v28  ;;  %15994 = vst [vmem:[#allocation32_spill] sm:$0xff] %v11915_v16 }
  0x96   : > { %2194 = vmatpush1.bf16.msra.mxu1 %v11051_v47 }
  0x97   : > { %2195 = vmatprep.subr.bf16.mxu1 %v11054_v19 }
  0x9a   : > { %2196 = vmatpush1.bf16.msra.mxu1 %v11057_v43 }
  0xea   : > { %v373_v42 = vpop.xlane.xlu0 %372 }
  0xeb   : > { %v499_v57 = vmul.f32 0.0026041667, %v373_v42 }
  0xec   : > { %v381_v52 = vpop.xlane.xlu1 %380 }
  0xed   : > { %v11903_v21 = vsub.f32 %v11639_v0, %v499_v57  ;;  %v11906_v33 = vsub.f32 %v11642_v1, %v499_v57  ;;  %v501_v37 = vmul.f32 0.0026041667, %v381_v52  ;;  %v11909_v20 = vsub.f32 %v11645_v2, %v499_v57 }
  0xee   : > { %v377_v27 = vpop.xlane.xlu0 %376 }
  0xef   : > { %15990 = vst [vmem:[#allocation28_spill] sm:$0xff] %v11903_v21  ;;  %15991 = vst [vmem:[#allocation29_spill] sm:$0xff] %v11906_v33  ;;  %v500_v28 = vmul.f32 0.0026041667, %v377_v27  ;;  %v11918_v47 = vsub.f32 %v11661_v8, %v501_v37  ;;  %v11921_v0 = vsub.f32 %v11664_v9, %v501_v37  ;;  %v627_v19 = vmul.f32 %v11903_v21, %v11903_v21  ;;  %v11941_v21 = vld [vmem:[%s11628_s7 + $0x220] sm:$0xff] }
  0xf0   : > { %15992 = vst [vmem:[#allocation30_spill] sm:$0xff] %v11909_v20  ;;  %v385_v1 = vpop.xlane.xlu1 %384  ;;  %v628_v2 = vmul.f32 %v11906_v33, %v11906_v33  ;;  %v458_v8 = vadd.f32 %v11915_v16, %v11912_v32  ;;  %v11936_v9 = vsub.f32 %v11667_v10, %v501_v37  ;;  %v629_v52 = vmul.f32 %v11909_v20, %v11909_v20  ;;  %v11999_v32 = vld [vmem:[%s11628_s7 + $0x260] sm:$0xff] }
  0xf1   : > { %15995 = vst [vmem:[#allocation33_spill] sm:$0xff] %v11918_v47  ;;  %15996 = vst [vmem:[#allocation34_spill] sm:$0xff] %v11921_v0  ;;  %v11928_v43 = vsub.f32 %v11650_v4, %v500_v28  ;;  %v11931_v42 = vsub.f32 %v11653_v5, %v500_v28  ;;  %v502_v57 = vmul.f32 0.0026041667, %v385_v1  ;;  %v11944_v33 = vsub.f32 %v11656_v6, %v500_v28  ;;  %v11950_v5 = vld [vmem:[%s11628_s7 + $0x230] sm:$0xff] }
  0xf2   : > { %15999 = vst [vmem:[#allocation37_spill] sm:$0xff] %v11936_v9  ;;  %v723_v27 = vadd.f32 %v628_v2, %v627_v19  ;;  %16000 = vst [vmem:[#allocation38_spill] sm:$0xff] %v11941_v21  ;;  %v389_v4 = vpop.xlane.xlu0 %388  ;;  %v633_v37 = vmul.f32 %v11918_v47, %v11918_v47  ;;  %v634_v6 = vmul.f32 %v11921_v0, %v11921_v0 }
  0xf3   : > { %15997 = vst [vmem:[#allocation35_spill] sm:$0xff] %v11928_v43  ;;  %15998 = vst [vmem:[#allocation36_spill] sm:$0xff] %v11931_v42  ;;  %v11953_v1 = vsub.f32 %v11673_v13, %v502_v57  ;;  %v630_v10 = vmul.f32 %v11928_v43, %v11928_v43  ;;  %v11962_v28 = vsub.f32 %v11676_v14, %v502_v57  ;;  %v503_v2 = vmul.f32 0.0026041667, %v389_v4  ;;  %v11984_v4 = vld [vmem:[%s11628_s7 + $0x248] sm:$0xff] }
  0xf4   : > { %16001 = vst [vmem:[#allocation39_spill] sm:$0xff] %v11944_v33  ;;  %16003 = vst [vmem:[#allocation41_spill] sm:$0xff] %v11950_v5  ;;  %v724_v19 = vadd.f32 %v723_v27, %v629_v52  ;;  %v631_v13 = vmul.f32 %v11931_v42, %v11931_v42  ;;  %v393_v20 = vpop.xlane.xlu1 %392  ;;  %v459_v43 = vadd.f32 %v458_v8, %v11941_v21  ;;  %v11978_v27 = vld [vmem:[%s11628_s7 + $0x238] sm:$0xff]  ;;  %v11981_v8 = vld [vmem:[%s11628_s7 + $0x240] sm:$0xff] }
  0xf5   : > { %16004 = vst [vmem:[#allocation42_spill] sm:$0xff] %v11953_v1  ;;  %16005 = vst [vmem:[#allocation43_spill] sm:$0xff] %v11962_v28  ;;  %v462_v16 = vadd.f32 %v11950_v5, %v11947_v58  ;;  %v632_v47 = vmul.f32 %v11944_v33, %v11944_v33  ;;  %v11972_v14 = vsub.f32 %v11684_v17, %v503_v2 }
  0xf6   : > { %725 = vadd.xlane.f32.xlu0 %v724_v19  ;;  %v727_v0 = vadd.f32 %v631_v13, %v630_v10  ;;  %v11975_v52 = vsub.f32 %v11687_v18, %v503_v2  ;;  %16008 = vst [vmem:[#allocation46_spill] sm:$0xff] %v11984_v4  ;;  %v397_v19 = vpop.xlane.xlu0 %396  ;;  %v11987_v42 = vsub.f32 %v11679_v15, %v502_v57  ;;  %v504_v10 = vmul.f32 0.0026041667, %v393_v20  ;;  %v11992_v13 = vld [vmem:[%s11628_s7 + $0x258] sm:$0xff]  ;;  %v12002_v15 = vld [vmem:[%s11628_s7 + $0x270] sm:$0xff] }
  0xf7   : > { %16006 = vst [vmem:[#allocation44_spill] sm:$0xff] %v11972_v14  ;;  %v635_v17 = vmul.f32 %v11936_v9, %v11936_v9  ;;  %16010 = vst [vmem:[#allocation48_spill] sm:$0xff] %v11992_v13  ;;  %v731_v18 = vadd.f32 %v634_v6, %v633_v37  ;;  %v636_v5 = vmul.f32 %v11953_v1, %v11953_v1  ;;  %v12005_v20 = vld [vmem:[%s11628_s7 + $0x278] sm:$0xff] }
  0xf8   : > { %16007 = vst [vmem:[#allocation45_spill] sm:$0xff] %v11975_v52  ;;  %16009 = vst [vmem:[#allocation47_spill] sm:$0xff] %v11987_v42  ;;  %v728_v33 = vadd.f32 %v727_v0, %v632_v47  ;;  %v637_v58 = vmul.f32 %v11962_v28, %v11962_v28  ;;  %v401_v21 = vpop.xlane.xlu1 %400  ;;  %v463_v57 = vadd.f32 %v462_v16, %v11978_v27  ;;  %v505_v0 = vmul.f32 0.0026041667, %v397_v19  ;;  %v12018_v28 = vld [vmem:[%s11628_s7 + $0x250] sm:$0xff] }
  0xf9   : > { %16011 = vst [vmem:[#allocation49_spill] sm:$0xff] %v11999_v32  ;;  %16012 = vst [vmem:[#allocation50_spill] sm:$0xff] %v12002_v15  ;;  %v466_v47 = vadd.f32 %v11984_v4, %v11981_v8  ;;  %v12011_v37 = vsub.f32 %v11700_v24, %v503_v2  ;;  %v639_v6 = vmul.f32 %v11972_v14, %v11972_v14 }
  0xfa   : > { %16013 = vst [vmem:[#allocation51_spill] sm:$0xff] %v12005_v20  ;;  %460 = vadd.xlane.f32.xlu0 %v459_v43  ;;  %729 = vadd.xlane.f32.xlu1 %v728_v33  ;;  %v640_v1 = vmul.f32 %v11975_v52, %v11975_v52  ;;  %v405_v9 = vpop.xlane.xlu0 %404  ;;  %16015 = vst [vmem:[#allocation53_spill] sm:$0xff] %v12018_v28  ;;  %v638_v16 = vmul.f32 %v11987_v42, %v11987_v42  ;;  %v12033_v52 = vld [vmem:[%s11628_s7 + $0x268] sm:$0xff]  ;;  %v12036_v42 = vld [vmem:[%s11628_s7 + $0x280] sm:$0xff] }
  0xfb   : > { %16014 = vst [vmem:[#allocation52_spill] sm:$0xff] %v12011_v37  ;;  %v470_v19 = vadd.f32 %v11999_v32, %v11992_v13  ;;  %v474_v33 = vadd.f32 %v12005_v20, %v12002_v15  ;;  %v12027_v24 = vsub.f32 %v11694_v22, %v504_v10  ;;  %v12030_v43 = vsub.f32 %v11697_v23, %v504_v10  ;;  %v12051_v15 = vld [vmem:[%s11628_s7 + $0x290] sm:$0xff] }
  0xfc   : > { %v732_v2 = vadd.f32 %v731_v18, %v635_v17  ;;  %v735_v14 = vadd.f32 %v637_v58, %v636_v5  ;;  %16018 = vst [vmem:[#allocation56_spill] sm:$0xff] %v12033_v52  ;;  %16019 = vst [vmem:[#allocation57_spill] sm:$0xff] %v12036_v42  ;;  %v409_v32 = vpop.xlane.xlu1 %408  ;;  %v12039_v20 = vsub.f32 %v11703_v25, %v505_v0  ;;  %v506_v58 = vmul.f32 0.0026041667, %v401_v21  ;;  %v12048_v18 = vld [vmem:[%s11628_s7 + $0x288] sm:$0xff]  ;;  %v12064_v21 = vld [vmem:[%s11628_s7 + $0x2b8] sm:$0xff] }
  0xfd   : > { %16016 = vst [vmem:[#allocation54_spill] sm:$0xff] %v12027_v24  ;;  %16017 = vst [vmem:[#allocation55_spill] sm:$0xff] %v12030_v43  ;;  %v12042_v22 = vsub.f32 %v11706_v26, %v505_v0  ;;  %v467_v23 = vadd.f32 %v466_v47, %v12018_v28  ;;  %v641_v5 = vmul.f32 %v12011_v37, %v12011_v37  ;;  %v12061_v47 = vld [vmem:[%s11628_s7 + $0x2a8] sm:$0xff]  ;;  %v507_v28 = vmul.f32 0.0026041667, %v405_v9 }
  0xfe   : > { %16020 = vst [vmem:[#allocation58_spill] sm:$0xff] %v12039_v20  ;;  %733 = vadd.xlane.f32.xlu0 %v732_v2  ;;  %464 = vadd.xlane.f32.xlu1 %v463_v57  ;;  %v739_v17 = vadd.f32 %v640_v1, %v639_v6  ;;  %16022 = vst [vmem:[#allocation60_spill] sm:$0xff] %v12051_v15  ;;  %v413_v25 = vpop.xlane.xlu0 %412  ;;  %v471_v26 = vadd.f32 %v470_v19, %v12033_v52  ;;  %v12058_v57 = vld [vmem:[%s11628_s7 + $0x2a0] sm:$0xff]  ;;  %v12080_v52 = vld [vmem:[%s11628_s7 + $0x2d8] sm:$0xff] }
  0xff   : > { %16021 = vst [vmem:[#allocation59_spill] sm:$0xff] %v12042_v22  ;;  %v12055_v2 = vadd.f32 %v474_v33, %v12036_v42  ;;  %16023 = vst [vmem:[#allocation61_spill] sm:$0xff] %v12061_v47  ;;  %v12067_v37 = vsub.f32 %v11712_v29, %v504_v10  ;;  %v736_v1 = vadd.f32 %v735_v14, %v638_v16  ;;  %v12074_v19 = vld [vmem:[%s11628_s7 + $0x2c0] sm:$0xff]  ;;  %v12077_v42 = vld [vmem:[%s11628_s7 + $0x2d0] sm:$0xff] }
 0x100   : > { %16024 = vst [vmem:[#allocation62_spill] sm:$0xff] %v12064_v21  ;;  %v642_v6 = vmul.f32 %v12027_v24, %v12027_v24  ;;  %v643_v13 = vmul.f32 %v12030_v43, %v12030_v43  ;;  %16026 = vst [vmem:[#allocation64_spill] sm:$0xff] %v12074_v19  ;;  %v417_v33 = vpop.xlane.xlu1 %416  ;;  %v12083_v4 = vsub.f32 %v11724_v34, %v505_v0  ;;  %v11060_v34 = vld [vmem:[#allocation5 + $0x1b4] ss:$24 sps:$4 sm:$0xff]   ;;  %v11062_v0 = vld [vmem:[#allocation5 + $0x330] ss:$24 sps:$4 sm:$0xff]  }
 0x101   : > { %16025 = vst [vmem:[#allocation63_spill] sm:$0xff] %v12067_v37  ;;  %16027 = vst [vmem:[#allocation65_spill] sm:$0xff] %v12077_v42  ;;  %v645_v29 = vmul.f32 %v12039_v20, %v12039_v20  ;;  %v646_v14 = vmul.f32 %v12042_v22, %v12042_v22  ;;  %v12090_v10 = vsub.f32 %v11715_v30, %v506_v58  ;;  %v508_v43 = vmul.f32 0.0026041667, %v409_v32 }
 0x102   : > { %16028 = vst [vmem:[#allocation66_spill] sm:$0xff] %v12080_v52  ;;  %16029 = vst [vmem:[#allocation67_spill] sm:$0xff] %v12083_v4  ;;  %468 = vadd.xlane.f32.xlu0 %v467_v23  ;;  %737 = vadd.xlane.f32.xlu1 %v736_v1  ;;  %v12093_v16 = vsub.f32 %v11718_v31, %v506_v58  ;;  %v740_v9 = vadd.f32 %v739_v17, %v641_v5  ;;  %v12101_v1 = vpop.xlane.xlu0 %420  ;;  %v11063_v31 = vld [vmem:[#allocation5 + $0x1b0] ss:$24 sps:$4 sm:$0xff]  }
 0x103   : > { %16030 = vst [vmem:[#allocation68_spill] sm:$0xff] %v12090_v10  ;;  %v478_v20 = vadd.f32 %v12051_v15, %v12048_v18  ;;  %v482_v22 = vadd.f32 %v12061_v47, %v12058_v57  ;;  %v486_v23 = vadd.f32 %v12074_v19, %v12064_v21  ;;  %v490_v30 = vadd.f32 %v12080_v52, %v12077_v42  ;;  %v12111_v15 = vld [vmem:[%s11628_s7 + $0x298] sm:$0xff]  ;;  %v12114_v47 = vld [vmem:[%s11628_s7 + $0x2b0] sm:$0xff]  ;;  %v12117_v19 = vld [vmem:[%s11628_s7 + $0x2c8] sm:$0xff] }
 0x104   : > { %v12106_v24 = vsub.f32 %v11736_v39, %v506_v58  ;;  %v644_v5 = vmul.f32 %v12067_v37, %v12067_v37  ;;  %v743_v17 = vadd.f32 %v643_v13, %v642_v6  ;;  %v425_v21 = vpop.xlane.xlu1 %424  ;;  %2197 = vmatprep.subr.bf16.mxu1 %v11060_v34  ;;  %v12120_v52 = vsub.f32 %v11727_v35, %v507_v28  ;;  %v11064_v13 = vld [vmem:[#allocation5 + $0x364] ss:$24 sps:$4 sm:$0xff]   ;;  %v11068_v42 = vld [vmem:[#allocation5 + $0x360] ss:$24 sps:$4 sm:$0xff]  }
 0x105   : > { %v647_v39 = vmul.f32 %v12083_v4, %v12083_v4  ;;  %v747_v58 = vadd.f32 %v646_v14, %v645_v29  ;;  %2375 = vmatpush1.bf16.msra.mxu0 %v11062_v0  ;;  %2198 = vmatpush1.bf16.msra.mxu1 %v11063_v31  ;;  %v12125_v32 = vsub.f32 %v11730_v36, %v507_v28  ;;  %v12132_v35 = vld [vmem:[%s11628_s7 + $0x2e0] sm:$0xff]  ;;  %v510_v4 = vmul.f32 0.0026041667, %v417_v33 }
 0x106   : > { %16031 = vst [vmem:[#allocation69_spill] sm:$0xff] %v12120_v52  ;;  %472 = vadd.xlane.f32.xlu1 %v471_v26  ;;  %741 = vadd.xlane.f32.xlu0 %v740_v9  ;;  %v648_v6 = vmul.f32 %v12090_v10, %v12090_v10  ;;  %v649_v34 = vmul.f32 %v12093_v16, %v12093_v16  ;;  %v11066_v37 = vld [vmem:[#allocation5 + $0x1e4] ss:$24 sps:$4 sm:$0xff]   ;;  %v509_v26 = vmul.f32 0.0026041667, %v413_v25 }
 0x107   : > { %v479_v29 = vadd.f32 %v478_v20, %v12111_v15  ;;  %v12136_v14 = vadd.f32 %v482_v22, %v12114_v47  ;;  %v12139_v36 = vadd.f32 %v486_v23, %v12117_v19  ;;  %2376 = vmatprep.subr.bf16.mxu0 %v11064_v13  ;;  %v11069_v9 = vld [vmem:[#allocation5 + $0x1e0] ss:$24 sps:$4 sm:$0xff]   ;;  %v744_v0 = vadd.f32 %v743_v17, %v644_v5  ;;  %v429_v5 = vpop.xlane.xlu0 %428  ;;  %v12156_v17 = vld [vmem:[%s11628_s7 + $0x2e8] sm:$0xff] }
 0x108   : > { %v12142_v31 = vsub.f32 %v11739_v40, %v508_v43  ;;  %v12145_v10 = vsub.f32 %v11742_v41, %v508_v43  ;;  %2199 = vmatprep.subr.bf16.mxu1 %v11066_v37  ;;  %v748_v20 = vadd.f32 %v747_v58, %v647_v39  ;;  %v650_v22 = vmul.f32 %v12106_v24, %v12106_v24  ;;  %v11070_v40 = vld [vmem:[#allocation5 + $0x394] ss:$24 sps:$4 sm:$0xff]   ;;  %v11074_v39 = vld [vmem:[#allocation5 + $0x390] ss:$24 sps:$4 sm:$0xff]  }
 0x109   : > { %v12150_v25 = vsub.f32 %v11748_v44, %v507_v28  ;;  %v12153_v23 = vadd.f32 %v490_v30, %v12132_v35  ;;  %2377 = vmatpush1.bf16.msra.mxu0 %v11068_v42  ;;  %v751_v41 = vadd.f32 %v649_v34, %v648_v6  ;;  %v651_v37 = vmul.f32 %v12120_v52, %v12120_v52  ;;  %v12164_v44 = vld [vmem:[%s11628_s7 + $0x2f0] sm:$0xff]  ;;  %v433_v28 = vpop.xlane.xlu1 %432  ;;  %v11078_v52 = vld [vmem:[#allocation5 + $0x244] ss:$24 sps:$4 sm:$0xff]  }
 0x10a   : > { %16032 = vst [vmem:[#allocation70_spill] sm:$0xff] %v12142_v31  ;;  %16033 = vst [vmem:[#allocation71_spill] sm:$0xff] %v12145_v10  ;;  %745 = vadd.xlane.f32.xlu1 %v744_v0  ;;  %476 = vadd.xlane.f32.xlu0 %v12055_v2  ;;  %v652_v33 = vmul.f32 %v12125_v32, %v12125_v32  ;;  %v11072_v30 = vld [vmem:[#allocation5 + $0x214] ss:$24 sps:$4 sm:$0xff]   ;;  %v12167_v58 = vsub.f32 %v11760_v49, %v508_v43  ;;  %v11075_v13 = vld [vmem:[#allocation5 + $0x210] ss:$24 sps:$4 sm:$0xff]  }
 0x10b   : > { %16034 = vst [vmem:[#allocation72_spill] sm:$0xff] %v12150_v25  ;;  %v12170_v42 = vsub.f32 %v11751_v45, %v509_v26  ;;  %v12173_v2 = vsub.f32 %v11754_v46, %v509_v26  ;;  %2200 = vmatpush1.bf16.msra.mxu1 %v11069_v9  ;;  %2378 = vmatprep.subr.bf16.mxu0 %v11070_v40  ;;  %v511_v49 = vmul.f32 0.0026041667, %v12101_v1  ;;  %v512_v43 = vmul.f32 0.0026041667, %v425_v21 }
 0x10c   : > { %v12176_v6 = vsub.f32 %v11763_v50, %v510_v4  ;;  %v12179_v34 = vsub.f32 %v11766_v51, %v510_v4  ;;  %v654_v0 = vmul.f32 %v12142_v31, %v12142_v31  ;;  %v655_v45 = vmul.f32 %v12145_v10, %v12145_v10  ;;  %2201 = vmatprep.subr.bf16.mxu1 %v11072_v30  ;;  %v11076_v51 = vld [vmem:[#allocation5 + $0x3c4] ss:$24 sps:$4 sm:$0xff]   ;;  %v11080_v30 = vld [vmem:[#allocation5 + $0x3c0] ss:$24 sps:$4 sm:$0xff]  }
 0x10d   : > { %v653_v46 = vmul.f32 %v12150_v25, %v12150_v25  ;;  %v494_v50 = vadd.f32 %v12164_v44, %v12156_v17  ;;  %2379 = vmatpush1.bf16.msra.mxu0 %v11074_v39  ;;  %v752_v9 = vadd.f32 %v751_v41, %v650_v22  ;;  %v755_v40 = vadd.f32 %v652_v33, %v651_v37  ;;  %v12194_v10 = vld [vmem:[%s11628_s7 + $0x2f8] sm:$0xff] }
 0x10e   : > { %16035 = vst [vmem:[#allocation73_spill] sm:$0xff] %v12176_v6  ;;  %480 = vadd.xlane.f32.xlu1 %v479_v29  ;;  %749 = vadd.xlane.f32.xlu0 %v748_v20  ;;  %v12191_v31 = vsub.f32 %v11784_v59, %v510_v4  ;;  %v12197_v25 = vsub.f32 %v11772_v54, %v509_v26  ;;  %v437_v29 = vpop.xlane.xlu0 %436  ;;  %v11081_v20 = vld [vmem:[#allocation5 + $0x240] ss:$24 sps:$4 sm:$0xff]   ;;  %v441_v26 = vpop.xlane.xlu1 %440 }
 0x10f   : > { %v657_v21 = vmul.f32 %v12170_v42, %v12170_v42  ;;  %v658_v1 = vmul.f32 %v12173_v2, %v12173_v2  ;;  %2202 = vmatpush1.bf16.msra.mxu1 %v11075_v13  ;;  %2380 = vmatprep.subr.bf16.mxu0 %v11076_v51  ;;  %v656_v59 = vmul.f32 %v12167_v58, %v12167_v58 }
 0x110   : > { %v759_v4 = vadd.f32 %v655_v45, %v654_v0  ;;  %v660_v22 = vmul.f32 %v12176_v6, %v12176_v6  ;;  %v661_v54 = vmul.f32 %v12179_v34, %v12179_v34  ;;  %2203 = vmatprep.subr.bf16.mxu1 %v11078_v52  ;;  %v12210_v41 = vsub.f32 %v11775_v55, %v511_v49  ;;  %v11082_v45 = vld [vmem:[#allocation5 + $0x3f4] ss:$24 sps:$4 sm:$0xff]  }
 0x111   : > { %v12213_v37 = vsub.f32 %v11778_v56, %v511_v49  ;;  %v12216_v33 = vsub.f32 %v11787_v60, %v512_v43  ;;  %v12219_v39 = vsub.f32 %v11790_v61, %v512_v43  ;;  %2381 = vmatpush1.bf16.msra.mxu0 %v11080_v30  ;;  %v756_v13 = vadd.f32 %v755_v40, %v653_v46  ;;  %v11084_v30 = vld [vmem:[#allocation5 + $0x274] ss:$24 sps:$4 sm:$0xff]  }
 0x112   : > { %16036 = vst [vmem:[#allocation74_spill] sm:$0xff] %v12210_v41  ;;  %753 = vadd.xlane.f32.xlu1 %v752_v9  ;;  %484 = vadd.xlane.f32.xlu0 %v12136_v14  ;;  %v513_v0 = vmul.f32 0.0026041667, %v429_v5  ;;  %v12223_v52 = vadd.f32 %v494_v50, %v12194_v10  ;;  %v514_v55 = vmul.f32 0.0026041667, %v433_v28  ;;  %v12226_v56 = vsub.f32 %v11805_v12, %v512_v43  ;;  %v445_v50 = vpop.xlane.xlu0 %444 }
 0x113   : > { %16037 = vst [vmem:[#allocation75_spill] sm:$0xff] %v12216_v33  ;;  %v659_v60 = vmul.f32 %v12197_v25, %v12197_v25  ;;  %v763_v51 = vadd.f32 %v658_v1, %v657_v21  ;;  %v515_v61 = vmul.f32 0.0026041667, %v437_v29  ;;  %2204 = vmatpush1.bf16.msra.mxu1 %v11081_v20  ;;  %v11086_v9 = vld [vmem:[#allocation5 + $0x3f0] ss:$24 sps:$4 sm:$0xff]   ;;  %v760_v6 = vadd.f32 %v759_v4, %v656_v59  ;;  %v16042_v1 = vld [vmem:[#allocation11_spill] sm:$0xff]  ;;  %v449_v59 = vpop.xlane.xlu1 %448 }
 0x114   : > { %16038 = vst [vmem:[#allocation76_spill] sm:$0xff] %v12226_v56  ;;  %v662_v14 = vmul.f32 %v12191_v31, %v12191_v31  ;;  %v767_v5 = vadd.f32 %v661_v54, %v660_v22  ;;  %v12233_v46 = vsub.f32 %v11794_v63, %v511_v49  ;;  %2382 = vmatprep.subr.bf16.mxu0 %v11082_v45  ;;  %v11087_v28 = vld [vmem:[#allocation5 + $0x270] ss:$24 sps:$4 sm:$0xff]   ;;  %v516_v20 = vmul.f32 0.0026041667, %v441_v26 }
 0x115   : > { %v663_v12 = vmul.f32 %v12210_v41, %v12210_v41  ;;  %v664_v43 = vmul.f32 %v12213_v37, %v12213_v37  ;;  %v666_v40 = vmul.f32 %v12216_v33, %v12216_v33  ;;  %v667_v21 = vmul.f32 %v12219_v39, %v12219_v39  ;;  %2205 = vmatprep.subr.bf16.mxu1 %v11084_v30  ;;  %v11088_v4 = vld [vmem:[#allocation5 + $0x424] ss:$24 sps:$4 sm:$0xff]   ;;  %v16044_v54 = vld [vmem:[#allocation12_spill] sm:$0xff] }
 0x116   : > { %16039 = vst [vmem:[#allocation77_spill] sm:$0xff] %v12233_v46  ;;  %488 = vadd.xlane.f32.xlu1 %v12139_v36  ;;  %757 = vadd.xlane.f32.xlu0 %v756_v13  ;;  %v12245_v63 = vsub.f32 %v11799_v7, %v513_v0  ;;  %v12248_v49 = vsub.f32 %v11802_v11, %v513_v0  ;;  %v16046_v36 = vld [vmem:[#allocation14_spill] sm:$0xff]  ;;  %v16048_v11 = vld [vmem:[#allocation15_spill] sm:$0xff]  ;;  %v517_v41 = vmul.f32 0.0026041667, %v445_v50  ;;  %v16052_v50 = vld [vmem:[#allocation17_spill] sm:$0xff] }
 0x117   : > { %v12251_v29 = vsub.f32 %v16042_v1, %v514_v55  ;;  %v764_v22 = vadd.f32 %v763_v51, %v659_v60  ;;  %v12254_v45 = vsub.f32 %v16044_v54, %v514_v55  ;;  %v12257_v30 = vsub.f32 %v11829_v38, %v514_v55  ;;  %2383 = vmatpush1.bf16.msra.mxu0 %v11086_v9  ;;  %v11090_v7 = vld [vmem:[#allocation5 + $0x2a4] ss:$24 sps:$4 sm:$0xff]   ;;  %v11092_v60 = vld [vmem:[#allocation5 + $0x420] ss:$24 sps:$4 sm:$0xff]   ;;  %v16050_v54 = vld [vmem:[#allocation13_spill] sm:$0xff] }
 0x118   : > { %16040 = vst [vmem:[#allocation78_spill] sm:$0xff] %v12245_v63  ;;  %16041 = vst [vmem:[#allocation79_spill] sm:$0xff] %v12248_v49  ;;  %v12260_v13 = vsub.f32 %v16046_v36, %v515_v61  ;;  %v12263_v33 = vsub.f32 %v16048_v11, %v515_v61  ;;  %v768_v1 = vadd.f32 %v767_v5, %v662_v14  ;;  %2206 = vmatpush1.bf16.msra.mxu1 %v11087_v28  ;;  %v11093_v9 = vld [vmem:[#allocation5 + $0x2a0] ss:$24 sps:$4 sm:$0xff]   ;;  %v16051_v14 = vld [vmem:[#allocation16_spill] sm:$0xff] }
 0x119   : > { %16043 = vst [vmem:[#allocation11_spill] sm:$0xff] %v12251_v29  ;;  %16045 = vst [vmem:[#allocation12_spill] sm:$0xff] %v12254_v45  ;;  %v665_v26 = vmul.f32 %v12233_v46, %v12233_v46  ;;  %v771_v51 = vadd.f32 %v664_v43, %v663_v12  ;;  %v668_v38 = vmul.f32 %v12226_v56, %v12226_v56  ;;  %2384 = vmatprep.subr.bf16.mxu0 %v11088_v4  ;;  %v11094_v4 = vld [vmem:[#allocation5 + $0x454] ss:$24 sps:$4 sm:$0xff]  }
 0x11a   : > { %16047 = vst [vmem:[#allocation14_spill] sm:$0xff] %v12260_v13  ;;  %16049 = vst [vmem:[#allocation15_spill] sm:$0xff] %v12263_v33  ;;  %v775_v55 = vadd.f32 %v667_v21, %v666_v40  ;;  %v12270_v36 = vsub.f32 %v16050_v54, %v513_v0  ;;  %761 = vadd.xlane.f32.xlu1 %v760_v6  ;;  %492 = vadd.xlane.f32.xlu0 %v12153_v23  ;;  %v518_v43 = vmul.f32 0.0026041667, %v449_v59  ;;  %v453_v21 = vpop.xlane.xlu0 %452  ;;  %v11096_v11 = vld [vmem:[#allocation5 + $0x2d4] ss:$24 sps:$4 sm:$0xff]  }
 0x11b   : > { %v12274_v5 = vsub.f32 %v16051_v14, %v516_v20  ;;  %v669_v28 = vmul.f32 %v12245_v63, %v12245_v63  ;;  %v670_v12 = vmul.f32 %v12248_v49, %v12248_v49  ;;  %v12281_v40 = vsub.f32 %v16052_v50, %v516_v20  ;;  %2207 = vmatprep.subr.bf16.mxu1 %v11090_v7  ;;  %v16053_v54 = vld [vmem:[#allocation19_spill] sm:$0xff]  ;;  %v16055_v59 = vld [vmem:[#allocation18_spill] sm:$0xff]  ;;  %v457_v50 = vpop.xlane.xlu1 %456 }
 0x11c   : > { %v12284_v0 = vsub.f32 %v11853_v3, %v516_v20  ;;  %v672_v23 = vmul.f32 %v12251_v29, %v12251_v29  ;;  %v673_v6 = vmul.f32 %v12254_v45, %v12254_v45  ;;  %v12291_v14 = vsub.f32 %v16053_v54, %v517_v41  ;;  %2385 = vmatpush1.bf16.msra.mxu0 %v11092_v60  ;;  %v11098_v29 = vld [vmem:[#allocation5 + $0x450] ss:$24 sps:$4 sm:$0xff]  }
 0x11d   : > { %v12294_v63 = vsub.f32 %v16055_v59, %v515_v61  ;;  %v675_v3 = vmul.f32 %v12260_v13, %v12260_v13  ;;  %v676_v20 = vmul.f32 %v12263_v33, %v12263_v33  ;;  %v772_v49 = vadd.f32 %v771_v51, %v665_v26  ;;  %v16056_v45 = vld [vmem:[#allocation20_spill] sm:$0xff]  ;;  %2208 = vmatpush1.bf16.msra.mxu1 %v11093_v9  ;;  %v16057_v13 = vld [vmem:[#allocation21_spill] sm:$0xff] }
 0x11e   : > { %16054 = vst [vmem:[#allocation13_spill] sm:$0xff] %v12291_v14  ;;  %v12301_v7 = vsub.f32 %v16056_v45, %v517_v41  ;;  %v776_v56 = vadd.f32 %v775_v55, %v668_v38  ;;  %v671_v54 = vmul.f32 %v12270_v36, %v12270_v36  ;;  %v11099_v61 = vld [vmem:[#allocation5 + $0x2d0] ss:$24 sps:$4 sm:$0xff]   ;;  %496 = vadd.xlane.f32.xlu1 %v12223_v52  ;;  %v519_v33 = vmul.f32 0.0026041667, %v453_v21  ;;  %v16059_v55 = vld [vmem:[#allocation22_spill] sm:$0xff] }
 0x11f   : > { %765 = vadd.xlane.f32.xlu0 %v764_v22  ;;  %v779_v59 = vadd.f32 %v670_v12, %v669_v28  ;;  %v12307_v46 = vsub.f32 %v16057_v13, %v518_v43  ;;  %v674_v26 = vmul.f32 %v12257_v30, %v12257_v30  ;;  %v783_v60 = vadd.f32 %v673_v6, %v672_v23  ;;  %v16060_v28 = vld [vmem:[#allocation23_spill] sm:$0xff] }
 0x120   : > { %v520_v45 = vmul.f32 0.0026041667, %v457_v50  ;;  %v678_v51 = vmul.f32 %v12274_v5, %v12274_v5  ;;  %2386 = vmatprep.subr.bf16.mxu0 %v11094_v4  ;;  %2209 = vmatprep.subr.bf16.mxu1 %v11096_v11  ;;  %v677_v38 = vmul.f32 %v12294_v63, %v12294_v63  ;;  %v787_v52 = vadd.f32 %v676_v20, %v675_v3  ;;  %v16064_v11 = vld [vmem:[#allocation25_spill] sm:$0xff]  ;;  %v16066_v20 = vld [vmem:[#allocation26_spill] sm:$0xff] }
 0x121   : > { %16058 = vst [vmem:[#allocation16_spill] sm:$0xff] %v12307_v46  ;;  %v679_v22 = vmul.f32 %v12281_v40, %v12281_v40  ;;  %2387 = vmatpush1.bf16.msra.mxu0 %v11098_v29  ;;  %v15746_v13 = vmov 0   ;;  %v12319_v9 = vsub.f32 %v16059_v55, %v518_v43  ;;  %v12322_v12 = vsub.f32 %v16060_v28, %v517_v41  ;;  %v16062_v29 = vld [vmem:[#allocation24_spill] sm:$0xff] }
 0x122   : > { %2404 = vmatprep.mubr.bf16.mxu0 %v15746_v13  ;;  %v681_v21 = vmul.f32 %v12291_v14, %v12291_v14  ;;  %v682_v23 = vmul.f32 %v12301_v7, %v12301_v7  ;;  %2210 = vmatpush1.bf16.msra.mxu1 %v11099_v61  ;;  %v780_v6 = vadd.f32 %v779_v59, %v671_v54  ;;  %v16099_v14 = vld [vmem:[#allocation28_spill] sm:$0xff] }
 0x123   : > { %16061 = vst [vmem:[#allocation17_spill] sm:$0xff] %v12322_v12  ;;  %769 = vadd.xlane.f32.xlu1 %v768_v1  ;;  %773 = vadd.xlane.f32.xlu0 %v772_v49  ;;  %v12329_v4 = vsub.f32 %v16062_v29, %v519_v33  ;;  %v12332_v3 = vsub.f32 %v16064_v11, %v519_v33 }
 0x124   : > { %v12335_v50 = vsub.f32 %v16066_v20, %v518_v43  ;;  %v12338_v41 = vsub.f32 %v11880_v48, %v520_v45  ;;  %v12341_v55 = vsub.f32 %v11886_v53, %v520_v45  ;;  %v784_v28 = vadd.f32 %v783_v60, %v674_v26 }
 0x125   : > { %16063 = vst [vmem:[#allocation19_spill] sm:$0xff] %v12329_v4  ;;  %16065 = vst [vmem:[#allocation18_spill] sm:$0xff] %v12332_v3  ;;  %v788_v61 = vadd.f32 %v787_v52, %v677_v38  ;;  %v680_v49 = vmul.f32 %v12284_v0, %v12284_v0  ;;  %v791_v1 = vadd.f32 %v679_v22, %v678_v51  ;;  %v16070_v51 = vld [vmem:[#allocation27_spill] sm:$0xff] }
 0x126   : > { %16067 = vst [vmem:[#allocation20_spill] sm:$0xff] %v12338_v41  ;;  %16068 = vst [vmem:[#allocation21_spill] sm:$0xff] %v12341_v55  ;;  %v683_v54 = vmul.f32 %v12322_v12, %v12322_v12  ;;  %v795_v59 = vadd.f32 %v682_v23, %v681_v21  ;;  %v684_v43 = vmul.f32 %v12307_v46, %v12307_v46 }
 0x127   : > { %v685_v48 = vmul.f32 %v12319_v9, %v12319_v9  ;;  %777 = vadd.xlane.f32.xlu1 %v776_v56  ;;  %781 = vadd.xlane.f32.xlu0 %v780_v6  ;;  %v12352_v53 = vsub.f32 %v11890_v62, %v519_v33  ;;  %v687_v26 = vmul.f32 %v12329_v4, %v12329_v4 }
 0x128   : > { %v688_v60 = vmul.f32 %v12332_v3, %v12332_v3  ;;  %v12359_v38 = vsub.f32 %v16070_v51, %v520_v45  ;;  %v792_v52 = vadd.f32 %v791_v1, %v680_v49  ;;  %v796_v22 = vadd.f32 %v795_v59, %v683_v54  ;;  %v16098_v3 = vld [vmem:[#allocation39_spill] sm:$0xff] }
 0x129   : > { %16069 = vst [vmem:[#allocation22_spill] sm:$0xff] %v12352_v53  ;;  %v686_v21 = vmul.f32 %v12335_v50, %v12335_v50  ;;  %v799_v23 = vadd.f32 %v685_v48, %v684_v43  ;;  %v690_v56 = vmul.f32 %v12338_v41, %v12338_v41  ;;  %v689_v62 = vmul.f32 %v12352_v53, %v12352_v53 }
 0x12a   : > { %16071 = vst [vmem:[#allocation23_spill] sm:$0xff] %v12359_v38  ;;  %v803_v33 = vadd.f32 %v688_v60, %v687_v26  ;;  %v691_v6 = vmul.f32 %v12341_v55, %v12341_v55  ;;  %v692_v11 = vmul.f32 %v12359_v38, %v12359_v38  ;;  %v1044_v1 = vlaneseq }
 0x12b   : > { %785 = vadd.xlane.f32.xlu1 %v784_v28  ;;  %789 = vadd.xlane.f32.xlu0 %v788_v61  ;;  %v800_v45 = vadd.f32 %v799_v23, %v686_v21  ;;  %v11102_v28 = vld [vmem:[#allocation5 + $0x14] ss:$24 sps:$4 sm:$0xff]   ;;  %v16073_v23 = vld [vmem:[#allocation31_spill] sm:$0xff] }
 0x12c   : > { %v804_v29 = vadd.f32 %v803_v33, %v689_v62  ;;  %v807_v20 = vadd.f32 %v691_v6, %v690_v56  ;;  %v11105_v61 = vld [vmem:[#allocation5 + $0xc] ss:$24 sps:$4 sm:$0xff]   ;;  %2951 = vmatprep.subr.bf16.mxu0 %v11102_v28  ;;  %v12371_v43 = vshrl.u32 %v1044_v1, 7  ;;  %v16077_v6 = vld [vmem:[#allocation38_spill] sm:$0xff] }
 0x12d   : > { %2565 = vmatprep.subr.bf16.mxu1 %v11105_v61  ;;  %v16075_v62 = vld [vmem:[#allocation32_spill] sm:$0xff] }
 0x12e   : > { %v808_v49 = vadd.f32 %v807_v20, %v692_v11  ;;  %16072 = vst [vmem:[#allocation24_spill] sm:$0xff] %v12371_v43  ;;  %v368_v20 = vld [vmem:[%s15664_s1] sm:$0x7] }
 0x12f   : > { %793 = vadd.xlane.f32.xlu1 %v792_v52  ;;  %797 = vadd.xlane.f32.xlu0 %v796_v22  ;;  %v1050_v22 = vsub.s32 1, %v12371_v43 }
 0x133   : > { %801 = vadd.xlane.f32.xlu1 %v800_v45  ;;  %805 = vadd.xlane.f32.xlu0 %v804_v29 }
 0x137   : > { %809 = vadd.xlane.f32.xlu1 %v808_v49  ;;  %v1054_v49 = vsub.s32 2, %v12371_v43 }
 0x183   : > { %v726_v54 = vpop.xlane.xlu0 %725 }
 0x184   : > { %v851_v59 = vmul.f32 0.0026041667, %v726_v54  ;;  %v369_v54 = vld [vmem:[%s15665_s2] sm:$0x7] }
 0x185   : > { %v12416_v41 = vrot.slane %v369_v54, %v1054_v49 }
 0x186   : > { %v883_v48 = vadd.f32 1e-05, %v851_v59 }
 0x187   : > { %v730_v26 = vpop.xlane.xlu1 %729  ;;  %v461_v60 = vpop.xlane.xlu0 %460 }
 0x188   : > { %11244 = vrsqrt.f32 %v883_v48  ;;  %v852_v51 = vmul.f32 0.0026041667, %v730_v26  ;;  %v521_v52 = vmul.f32 0.0026041667, %v461_v60  ;;  %v1046_v26 = vsub.s32 0, %v12371_v43  ;;  %v16079_v60 = vld [vmem:[#allocation40_spill] sm:$0xff] }
 0x189   : > { %v12412_v43 = vrot.slane %v368_v20, %v1054_v49 }
 0x18a   : > { %v884_v21 = vadd.f32 1e-05, %v852_v51  ;;  %v12375_v56 = vsub.f32 %v16073_v23, %v521_v52  ;;  %v12378_v33 = vsub.f32 %v16075_v62, %v521_v52  ;;  %v12381_v45 = vsub.f32 %v16077_v6, %v521_v52  ;;  %v16081_v52 = vld [vmem:[#allocation41_spill] sm:$0xff] }
 0x18b   : > { %v465_v29 = vpop.xlane.xlu1 %464  ;;  %v734_v11 = vpop.xlane.xlu0 %733  ;;  %v12403_v23 = vrot.slane %v368_v20, %v1050_v22 }
 0x18c   : > { %16074 = vst [vmem:[#allocation25_spill] sm:$0xff] %v12375_v56  ;;  %16076 = vst [vmem:[#allocation26_spill] sm:$0xff] %v12378_v33  ;;  %11246 = vrsqrt.f32 %v884_v21  ;;  %v522_v28 = vmul.f32 0.0026041667, %v465_v29  ;;  %v853_v61 = vmul.f32 0.0026041667, %v734_v11  ;;  %v693_v1 = vmul.f32 %v12375_v56, %v12375_v56 }
 0x18d   : > { %16078 = vst [vmem:[#allocation27_spill] sm:$0xff] %v12381_v45  ;;  %v694_v59 = vmul.f32 %v12378_v33, %v12378_v33  ;;  %v695_v48 = vmul.f32 %v12381_v45, %v12381_v45  ;;  %v12408_v56 = vrot.slane %v369_v54, %v1050_v22  ;;  %v16085_v22 = vld [vmem:[#allocation46_spill] sm:$0xff] }
 0x18e   : > { %v12398_v51 = vsub.f32 %v16079_v60, %v522_v28  ;;  %v12401_v21 = vsub.f32 %v16081_v52, %v522_v28  ;;  %v12406_v62 = vsub.f32 %v11978_v27, %v522_v28  ;;  %v885_v6 = vadd.f32 1e-05, %v853_v61 }
 0x18f   : > { %v738_v29 = vpop.xlane.xlu1 %737  ;;  %v469_v11 = vpop.xlane.xlu0 %468  ;;  %v811_v13 = vadd.f32 %v694_v59, %v693_v1  ;;  %v12418_v27 = vrot.slane %v368_v20, %v1046_v26  ;;  %v16087_v59 = vld [vmem:[#allocation53_spill] sm:$0xff] }
 0x190   : > { %16080 = vst [vmem:[#allocation31_spill] sm:$0xff] %v12398_v51  ;;  %16082 = vst [vmem:[#allocation32_spill] sm:$0xff] %v12401_v21  ;;  %v854_v45 = vmul.f32 0.0026041667, %v738_v29  ;;  %v523_v33 = vmul.f32 0.0026041667, %v469_v11  ;;  %v696_v60 = vmul.f32 %v12398_v51, %v12398_v51  ;;  %v697_v4 = vmul.f32 %v12401_v21, %v12401_v21 }
 0x191   : > { %16083 = vst [vmem:[#allocation38_spill] sm:$0xff] %v12406_v62  ;;  %v812_v52 = vadd.f32 %v811_v13, %v695_v48  ;;  %v12429_v11 = vrot.slane %v369_v54, %v1046_v26  ;;  %11248 = vrsqrt.f32 %v885_v6  ;;  %v698_v20 = vmul.f32 %v12406_v62, %v12406_v62  ;;  %v16089_v51 = vld [vmem:[#allocation29_spill] sm:$0xff]  ;;  %v16097_v62 = vld [vmem:[#allocation36_spill] sm:$0xff] }
 0x192   : > { %v11245_v28 = vpop.eup %11244  ;;  %v12421_v61 = vsub.f32 %v11981_v8, %v523_v33  ;;  %v12424_v1 = vsub.f32 %v16085_v22, %v523_v33  ;;  %v12427_v29 = vsub.f32 %v16087_v59, %v523_v33  ;;  %v815_v49 = vadd.f32 %v697_v4, %v696_v60  ;;  %v16090_v59 = vld [vmem:[#allocation48_spill] sm:$0xff] }
 0x193   : > { %813 = vadd.xlane.f32.xlu0 %v812_v52  ;;  %v473_v13 = vpop.xlane.xlu1 %472  ;;  %v742_v48 = vpop.xlane.xlu0 %741  ;;  %v948_v21 = vmul.f32 %v11245_v28, %v16089_v51  ;;  %v886_v8 = vadd.f32 1e-05, %v854_v45  ;;  %v16092_v51 = vld [vmem:[#allocation49_spill] sm:$0xff]  ;;  %v16094_v60 = vld [vmem:[#allocation56_spill] sm:$0xff]  ;;  %v947_v55 = vmul.f32 %v11245_v28, %v16099_v14 }
 0x194   : > { %16084 = vst [vmem:[#allocation40_spill] sm:$0xff] %v12421_v61  ;;  %16086 = vst [vmem:[#allocation41_spill] sm:$0xff] %v12424_v1  ;;  %v524_v53 = vmul.f32 0.0026041667, %v473_v13  ;;  %v855_v38 = vmul.f32 0.0026041667, %v742_v48  ;;  %v699_v22 = vmul.f32 %v12421_v61, %v12421_v61  ;;  %v816_v33 = vadd.f32 %v815_v49, %v698_v20 }
 0x195   : > { %16088 = vst [vmem:[#allocation46_spill] sm:$0xff] %v12427_v29  ;;  %v700_v54 = vmul.f32 %v12424_v1, %v12424_v1  ;;  %v701_v26 = vmul.f32 %v12427_v29, %v12427_v29  ;;  %v1060_v6 = vmul.f32 %v12403_v23, %v948_v21  ;;  %v16096_v48 = vld [vmem:[#allocation30_spill] sm:$0xff]  ;;  %11250 = vrsqrt.f32 %v886_v8 }
 0x196   : > { %v11247_v52 = vpop.eup %11246  ;;  %v12442_v4 = vsub.f32 %v16090_v59, %v524_v53  ;;  %v12445_v45 = vsub.f32 %v16092_v51, %v524_v53  ;;  %v12448_v13 = vsub.f32 %v16094_v60, %v524_v53  ;;  %v949_v20 = vmul.f32 %v11245_v28, %v16096_v48  ;;  %817 = vadd.xlane.f32.xlu1 %v816_v33 }
 0x197   : > { %v746_v49 = vpop.xlane.xlu1 %745  ;;  %v477_v61 = vpop.xlane.xlu0 %476  ;;  %v819_v1 = vadd.f32 %v700_v54, %v699_v22  ;;  %v951_v29 = vmul.f32 %v11247_v52, %v16097_v62  ;;  %v952_v21 = vmul.f32 %v11247_v52, %v16098_v3  ;;  %v887_v59 = vadd.f32 1e-05, %v855_v38  ;;  %v16100_v62 = vld [vmem:[#allocation50_spill] sm:$0xff]  ;;  %v16102_v3 = vld [vmem:[#allocation51_spill] sm:$0xff] }
 0x198   : > { %16091 = vst [vmem:[#allocation53_spill] sm:$0xff] %v12442_v4  ;;  %16093 = vst [vmem:[#allocation29_spill] sm:$0xff] %v12445_v45  ;;  %v525_v46 = vmul.f32 0.0026041667, %v477_v61  ;;  %v702_v51 = vmul.f32 %v12442_v4, %v12442_v4  ;;  %v703_v60 = vmul.f32 %v12445_v45, %v12445_v45  ;;  %v1172_v22 = vadd.f32 %v12408_v56, %v1060_v6  ;;  %v16104_v6 = vld [vmem:[#allocation57_spill] sm:$0xff] }
 0x199   : > { %16095 = vst [vmem:[#allocation48_spill] sm:$0xff] %v12448_v13  ;;  %v820_v53 = vadd.f32 %v819_v1, %v701_v26  ;;  %v1063_v33 = vmul.f32 %v12403_v23, %v951_v29  ;;  %v856_v54 = vmul.f32 0.0026041667, %v746_v49  ;;  %v704_v38 = vmul.f32 %v12448_v13, %v12448_v13 }
 0x19a   : > { %v12461_v48 = vsub.f32 %v16100_v62, %v525_v46  ;;  %v12464_v14 = vsub.f32 %v16102_v3, %v525_v46  ;;  %v823_v1 = vadd.f32 %v703_v60, %v702_v51  ;;  %v1061_v29 = vmul.f32 %v12412_v43, %v949_v20  ;;  %v16106_v3 = vld [vmem:[#allocation35_spill] sm:$0xff] }
 0x19b   : > { %821 = vadd.xlane.f32.xlu0 %v820_v53  ;;  %v481_v28 = vpop.xlane.xlu1 %480  ;;  %v750_v61 = vpop.xlane.xlu0 %749  ;;  %v1175_v8 = vadd.f32 %v12408_v56, %v1063_v33  ;;  %v1064_v26 = vmul.f32 %v12412_v43, %v952_v21  ;;  %v12472_v49 = vsub.f32 %v16104_v6, %v525_v46  ;;  %v950_v45 = vmul.f32 %v11247_v52, %v16106_v3  ;;  %v16109_v21 = vld [vmem:[#allocation60_spill] sm:$0xff] }
 0x19c   : > { %16101 = vst [vmem:[#allocation49_spill] sm:$0xff] %v12461_v48  ;;  %16103 = vst [vmem:[#allocation56_spill] sm:$0xff] %v12464_v14  ;;  %v526_v62 = vmul.f32 0.0026041667, %v481_v28  ;;  %v857_v4 = vmul.f32 0.0026041667, %v750_v61  ;;  %v12475_v12 = vpop.eup %11248  ;;  %v824_v13 = vadd.f32 %v823_v1, %v704_v38  ;;  %v1173_v51 = vadd.f32 %v12416_v41, %v1061_v29 }
 0x19d   : > { %16105 = vst [vmem:[#allocation30_spill] sm:$0xff] %v12472_v49  ;;  %v12477_v53 = vpack.c.bf16 %v1175_v8, %v1172_v22  ;;  %v1176_v60 = vadd.f32 %v12416_v41, %v1064_v26  ;;  %v888_v33 = vadd.f32 1e-05, %v856_v54  ;;  %v1059_v28 = vmul.f32 %v12418_v27, %v947_v55  ;;  %v11100_v61 = vld [vmem:[#allocation5 + $0x10] ss:$24 sps:$4 sm:$0xff]  }
 0x19e   : > { %v12482_v20 = vsub.f32 %v12048_v18, %v526_v62  ;;  %v12485_v46 = vsub.f32 %v16109_v21, %v526_v62  ;;  %825 = vadd.xlane.f32.xlu1 %v824_v13  ;;  %v1062_v1 = vmul.f32 %v12418_v27, %v950_v45  ;;  %v705_v54 = vmul.f32 %v12461_v48, %v12461_v48  ;;  %v11108_v18 = vld [vmem:[#allocation5 + $0x44] ss:$24 sps:$4 sm:$0xff]   ;;  %v11103_v6 = vld [vmem:[#allocation5 + $0x8] ss:$24 sps:$4 sm:$0xff]   ;;  %v11109_v48 = vld [vmem:[#allocation5 + $0x38] ss:$24 sps:$4 sm:$0xff]  }
 0x19f   : > { %16107 = vst [vmem:[#allocation36_spill] sm:$0xff] %v12477_v53  ;;  %v754_v52 = vpop.xlane.xlu1 %753  ;;  %2211 = vmatprep.mubr.bf16.mxu1 %v12477_v53  ;;  %v12489_v22 = vpack.c.bf16 %v1176_v60, %v1173_v51  ;;  %v485_v38 = vpop.xlane.xlu0 %484  ;;  %11252 = vrsqrt.f32 %v887_v59  ;;  %v889_v8 = vadd.f32 1e-05, %v857_v4  ;;  %v1171_v29 = vadd.f32 %v12429_v11, %v1059_v28  ;;  %v11106_v60 = vld [vmem:[#allocation5 + $0x40] ss:$24 sps:$4 sm:$0xff]  }
 0x1a0   : > { %16108 = vst [vmem:[#allocation39_spill] sm:$0xff] %v12482_v20  ;;  %16110 = vst [vmem:[#allocation28_spill] sm:$0xff] %v12485_v46  ;;  %v1174_v55 = vadd.f32 %v12429_v11, %v1062_v1  ;;  %v706_v13 = vmul.f32 %v12464_v14, %v12464_v14  ;;  %v707_v26 = vmul.f32 %v12472_v49, %v12472_v49  ;;  %v12504_v3 = vpop.eup %11250  ;;  %11254 = vrsqrt.f32 %v888_v33  ;;  %v16120_v49 = vld [vmem:[#allocation61_spill] sm:$0xff] }
 0x1a1   : > { %16111 = vst [vmem:[#allocation50_spill] sm:$0xff] %v12489_v22  ;;  %2405 = vmatmul.mubr.bf16.vlgmr.msra.gmra.mrb[0].mxu0 %v12489_v22  ;;  %v12502_v45 = vsub.f32 %v12111_v15, %v526_v62  ;;  %v858_v4 = vmul.f32 0.0026041667, %v754_v52  ;;  %v527_v59 = vmul.f32 0.0026041667, %v485_v38  ;;  %v16113_v51 = vmov 0  }
 0x1a2   : > { %2414 = vmatprep.mubr.bf16.mxu0 %v16113_v51  ;;  %2952 = vmatpush1.bf16.msra.mxu0 %v11100_v61  ;;  %v12507_v21 = vpack.c.bf16 %v1174_v55, %v1171_v29  ;;  %v827_v28 = vadd.f32 %v706_v13, %v705_v54  ;;  %v708_v53 = vmul.f32 %v12482_v20, %v12482_v20  ;;  %11256 = vrsqrt.f32 %v889_v8  ;;  %v11111_v52 = vld [vmem:[#allocation5 + $0x3c] ss:$24 sps:$4 sm:$0xff]   ;;  %v16116_v13 = vld [vmem:[#allocation43_spill] sm:$0xff] }
 0x1a3   : > { %16112 = vst [vmem:[#allocation51_spill] sm:$0xff] %v12502_v45  ;;  %v489_v1 = vpop.xlane.xlu1 %488  ;;  %v758_v22 = vpop.xlane.xlu0 %757  ;;  %v709_v15 = vmul.f32 %v12485_v46, %v12485_v46  ;;  %2953 = vmatprep.subr.bf16.mxu0 %v11108_v18  ;;  %v710_v33 = vmul.f32 %v12502_v45, %v12502_v45  ;;  %v11114_v61 = vld [vmem:[#allocation5 + $0x74] ss:$24 sps:$4 sm:$0xff]   ;;  %v16115_v29 = vld [vmem:[#allocation34_spill] sm:$0xff]  ;;  %v957_v20 = vmul.f32 %v12504_v3, %v16116_v13  ;;  %v890_v46 = vadd.f32 1e-05, %v858_v4 }
 0x1a4   : > { %16114 = vst [vmem:[#allocation57_spill] sm:$0xff] %v12507_v21  ;;  %v859_v62 = vmul.f32 0.0026041667, %v758_v22  ;;  %2212 = vmatmul.mubr.bf16.vlgmr.msra.gmra.mrb[0].mxu1 %v12507_v21  ;;  %v828_v38 = vadd.f32 %v827_v28, %v707_v26  ;;  %v954_v55 = vmul.f32 %v12475_v12, %v16115_v29  ;;  %v12521_v18 = vsub.f32 %v12058_v57, %v527_v59  ;;  %v16118_v8 = vld [vmem:[#allocation37_spill] sm:$0xff]  ;;  %v16119_v29 = vld [vmem:[#allocation47_spill] sm:$0xff] }
 0x1a5   : > { %v831_v54 = vadd.f32 %v709_v15, %v708_v53  ;;  %v528_v22 = vmul.f32 0.0026041667, %v489_v1  ;;  %v955_v45 = vmul.f32 %v12475_v12, %v16118_v8  ;;  %2566 = vmatpush1.bf16.msra.mxu1 %v11103_v6  ;;  %v11112_v21 = vld [vmem:[#allocation5 + $0x70] ss:$24 sps:$4 sm:$0xff]   ;;  %v1069_v15 = vmul.f32 %v12403_v23, %v957_v20  ;;  %v11117_v57 = vld [vmem:[#allocation5 + $0x6c] ss:$24 sps:$4 sm:$0xff]  }
 0x1a6   : > { %16117 = vst [vmem:[#allocation35_spill] sm:$0xff] %v12521_v18  ;;  %2954 = vmatpush1.bf16.msra.mxu0 %v11106_v60  ;;  %829 = vadd.xlane.f32.xlu0 %v828_v38  ;;  %v1066_v28 = vmul.f32 %v12403_v23, %v954_v55  ;;  %v958_v4 = vmul.f32 %v12504_v3, %v16119_v29  ;;  %v891_v6 = vadd.f32 1e-05, %v859_v62  ;;  %v16122_v55 = vld [vmem:[#allocation33_spill] sm:$0xff]  ;;  %v11115_v29 = vld [vmem:[#allocation5 + $0x68] ss:$24 sps:$4 sm:$0xff]   ;;  %11258 = vrsqrt.f32 %v890_v46 }
 0x1a7   : > { %v832_v53 = vadd.f32 %v831_v54, %v710_v33  ;;  %v762_v26 = vpop.xlane.xlu1 %761  ;;  %v493_v13 = vpop.xlane.xlu0 %492  ;;  %v12530_v1 = vsub.f32 %v16120_v49, %v527_v59  ;;  %v12533_v8 = vsub.f32 %v12114_v47, %v527_v59  ;;  %v1067_v60 = vmul.f32 %v12412_v43, %v955_v45  ;;  %2567 = vmatprep.subr.bf16.mxu1 %v11111_v52  ;;  %v11120_v33 = vld [vmem:[#allocation5 + $0xa4] ss:$24 sps:$4 sm:$0xff]   ;;  %v11118_v52 = vld [vmem:[#allocation5 + $0xa0] ss:$24 sps:$4 sm:$0xff]  }
 0x1a8   : > { %2955 = vmatprep.subr.bf16.mxu0 %v11114_v61  ;;  %v1178_v20 = vadd.f32 %v12408_v56, %v1066_v28  ;;  %v1181_v38 = vadd.f32 %v12408_v56, %v1069_v15  ;;  %v1070_v54 = vmul.f32 %v12412_v43, %v958_v4  ;;  %v953_v49 = vmul.f32 %v12475_v12, %v16122_v55  ;;  %v16123_v47 = vld [vmem:[#allocation62_spill] sm:$0xff] }
 0x1a9   : > { %16121 = vst [vmem:[#allocation60_spill] sm:$0xff] %v12533_v8  ;;  %833 = vadd.xlane.f32.xlu1 %v832_v53  ;;  %v12541_v14 = vpop.eup %11252  ;;  %v12544_v59 = vsub.f32 %v16123_v47, %v528_v22  ;;  %v860_v45 = vmul.f32 0.0026041667, %v762_v26  ;;  %v529_v62 = vmul.f32 0.0026041667, %v493_v13  ;;  %2568 = vmatpush1.bf16.msra.mxu1 %v11109_v48  ;;  %v1179_v53 = vadd.f32 %v12416_v41, %v1067_v60  ;;  %v16126_v15 = vld [vmem:[#allocation42_spill] sm:$0xff] }
 0x1aa   : > { %2956 = vmatpush1.bf16.msra.mxu0 %v11112_v21  ;;  %v12546_v61 = vpack.c.bf16 %v1181_v38, %v1178_v20  ;;  %v1182_v28 = vadd.f32 %v12416_v41, %v1070_v54  ;;  %v956_v12 = vmul.f32 %v12504_v3, %v16126_v15  ;;  %2569 = vmatprep.subr.bf16.mxu1 %v11117_v57  ;;  %v12552_v46 = vpop.eup %11254  ;;  %v16127_v47 = vld [vmem:[#allocation64_spill] sm:$0xff]  ;;  %v11123_v60 = vld [vmem:[#allocation5 + $0x9c] ss:$24 sps:$4 sm:$0xff]   ;;  %11260 = vrsqrt.f32 %v891_v6  ;;  %v11121_v6 = vld [vmem:[#allocation5 + $0x98] ss:$24 sps:$4 sm:$0xff]  }
 0x1ab   : > { %16124 = vst [vmem:[#allocation34_spill] sm:$0xff] %v12544_v59  ;;  %v497_v4 = vpop.xlane.xlu1 %496  ;;  %v12555_v26 = vsub.f32 %v16127_v47, %v528_v22  ;;  %v1065_v48 = vmul.f32 %v12418_v27, %v953_v49  ;;  %v711_v21 = vmul.f32 %v12521_v18, %v12521_v18  ;;  %v712_v13 = vmul.f32 %v12530_v1, %v12530_v1  ;;  %v11126_v38 = vld [vmem:[#allocation5 + $0xd4] ss:$24 sps:$4 sm:$0xff]  }
 0x1ac   : > { %16125 = vst [vmem:[#allocation43_spill] sm:$0xff] %v12546_v61  ;;  %v766_v55 = vpop.xlane.xlu0 %765  ;;  %2957 = vmatprep.subr.bf16.mxu0 %v11120_v33  ;;  %2221 = vmatprep.mubr.bf16.mxu1 %v12546_v61  ;;  %v12563_v3 = vpack.c.bf16 %v1182_v28, %v1179_v53  ;;  %v1068_v57 = vmul.f32 %v12418_v27, %v956_v12  ;;  %v12568_v54 = vpop.eup %11256  ;;  %v892_v49 = vadd.f32 1e-05, %v860_v45  ;;  %v16130_v15 = vld [vmem:[#allocation65_spill] sm:$0xff]  ;;  %v16132_v53 = vld [vmem:[#allocation66_spill] sm:$0xff] }
 0x1ad   : > { %16128 = vst [vmem:[#allocation37_spill] sm:$0xff] %v12555_v26  ;;  %v713_v20 = vmul.f32 %v12533_v8, %v12533_v8  ;;  %v12571_v47 = vsub.f32 %v16130_v15, %v529_v62  ;;  %v835_v18 = vadd.f32 %v712_v13, %v711_v21  ;;  %v12574_v33 = vsub.f32 %v12117_v19, %v528_v22  ;;  %v11124_v21 = vld [vmem:[#allocation5 + $0xd0] ss:$24 sps:$4 sm:$0xff]  }
 0x1ae   : > { %16129 = vst [vmem:[#allocation47_spill] sm:$0xff] %v12563_v3  ;;  %2570 = vmatpush1.bf16.msra.mxu1 %v11115_v29  ;;  %2958 = vmatpush1.bf16.msra.mxu0 %v11118_v52  ;;  %v12578_v28 = vsub.f32 %v16132_v53, %v529_v62  ;;  %v1177_v12 = vadd.f32 %v12429_v11, %v1065_v48  ;;  %v12587_v29 = vmul.f32 0.0026041667, %v497_v4  ;;  %v11129_v48 = vld [vmem:[#allocation5 + $0xcc] ss:$24 sps:$4 sm:$0xff]   ;;  %v16134_v53 = vld [vmem:[#allocation45_spill] sm:$0xff]  ;;  %11262 = vrsqrt.f32 %v892_v49 }
 0x1af   : > { %16131 = vst [vmem:[#allocation61_spill] sm:$0xff] %v12574_v33  ;;  %2415 = vmatmul.mubr.bf16.gmra.mrb[4].mxu0 %v12563_v3  ;;  %v1180_v61 = vadd.f32 %v12429_v11, %v1068_v57  ;;  %v714_v45 = vmul.f32 %v12544_v59, %v12544_v59  ;;  %v12585_v19 = vsub.f32 %v12132_v35, %v529_v62  ;;  %v16135_v35 = vld [vmem:[#allocation55_spill] sm:$0xff]  ;;  %v16136_v59 = vld [vmem:[#allocation52_spill] sm:$0xff] }
 0x1b0   : > { %v770_v15 = vpop.xlane.xlu1 %769  ;;  %v836_v22 = vadd.f32 %v835_v18, %v713_v20  ;;  %v715_v52 = vmul.f32 %v12555_v26, %v12555_v26  ;;  %2424 = vmatprep.mubr.bf16.mxu0 %v16113_v51  ;;  %2571 = vmatprep.subr.bf16.mxu1 %v11123_v60  ;;  %v716_v57 = vmul.f32 %v12574_v33, %v12574_v33  ;;  %v774_v62 = vpop.xlane.xlu0 %773  ;;  %v11132_v4 = vld [vmem:[#allocation5 + $0x104] ss:$24 sps:$4 sm:$0xff]   ;;  %v11127_v33 = vld [vmem:[#allocation5 + $0xc8] ss:$24 sps:$4 sm:$0xff]  }
 0x1b1   : > { %v12592_v13 = vpack.c.bf16 %v1180_v61, %v1177_v12  ;;  %v960_v3 = vmul.f32 %v12541_v14, %v16134_v53  ;;  %v963_v18 = vmul.f32 %v12552_v46, %v16135_v35  ;;  %2959 = vmatprep.subr.bf16.mxu0 %v11126_v38  ;;  %v961_v60 = vmul.f32 %v12541_v14, %v16136_v59  ;;  %v16137_v61 = vld [vmem:[#allocation63_spill] sm:$0xff] }
 0x1b2   : > { %837 = vadd.xlane.f32.xlu0 %v836_v22  ;;  %v839_v20 = vadd.f32 %v715_v52, %v714_v45  ;;  %v964_v12 = vmul.f32 %v12552_v46, %v16137_v61  ;;  %2572 = vmatpush1.bf16.msra.mxu1 %v11121_v6  ;;  %v861_v53 = vmul.f32 0.0026041667, %v766_v55  ;;  %v862_v26 = vmul.f32 0.0026041667, %v770_v15  ;;  %v11130_v49 = vld [vmem:[#allocation5 + $0x100] ss:$24 sps:$4 sm:$0xff]   ;;  %v12607_v22 = vpop.eup %11258 }
 0x1b3   : > { %16133 = vst [vmem:[#allocation33_spill] sm:$0xff] %v12592_v13  ;;  %2222 = vmatmul.mubr.bf16.gmra.mrb[4].mxu1 %v12592_v13  ;;  %v1072_v35 = vmul.f32 %v12403_v23, %v960_v3  ;;  %v1075_v38 = vmul.f32 %v12403_v23, %v963_v18  ;;  %2960 = vmatpush1.bf16.msra.mxu0 %v11124_v21  ;;  %v16138_v61 = vld [vmem:[#allocation44_spill] sm:$0xff]  ;;  %v11135_v55 = vld [vmem:[#allocation5 + $0xfc] ss:$24 sps:$4 sm:$0xff]  }
 0x1b4   : > { %v840_v45 = vadd.f32 %v839_v20, %v716_v57  ;;  %v1073_v59 = vmul.f32 %v12412_v43, %v961_v60  ;;  %v1076_v52 = vmul.f32 %v12412_v43, %v964_v12  ;;  %v959_v6 = vmul.f32 %v12541_v14, %v16138_v61  ;;  %v778_v8 = vpop.xlane.xlu1 %777  ;;  %2573 = vmatprep.subr.bf16.mxu1 %v11129_v48  ;;  %v11138_v18 = vld [vmem:[#allocation5 + $0x134] ss:$24 sps:$4 sm:$0xff]   ;;  %v16139_v20 = vld [vmem:[#allocation54_spill] sm:$0xff]  ;;  %v12628_v12 = vpop.eup %11260 }
 0x1b5   : > { %v12615_v3 = vsub.f32 %v12156_v17, %v12587_v29  ;;  %v12619_v15 = vsub.f32 %v12164_v44, %v12587_v29  ;;  %v1184_v21 = vadd.f32 %v12408_v56, %v1072_v35  ;;  %v1187_v57 = vadd.f32 %v12408_v56, %v1075_v38  ;;  %2961 = vmatprep.subr.bf16.mxu0 %v11132_v4  ;;  %v782_v38 = vpop.xlane.xlu0 %781  ;;  %v16144_v13 = vld [vmem:[#allocation58_spill] sm:$0xff] }
 0x1b6   : > { %841 = vadd.xlane.f32.xlu1 %v840_v45  ;;  %v1185_v14 = vadd.f32 %v12416_v41, %v1073_v59  ;;  %v1188_v48 = vadd.f32 %v12416_v41, %v1076_v52  ;;  %v962_v60 = vmul.f32 %v12552_v46, %v16139_v20  ;;  %v1071_v17 = vmul.f32 %v12418_v27, %v959_v6  ;;  %v11133_v45 = vld [vmem:[#allocation5 + $0xf8] ss:$24 sps:$4 sm:$0xff]  }
 0x1b7   : > { %v893_v44 = vadd.f32 1e-05, %v861_v53  ;;  %v12630_v61 = vpack.c.bf16 %v1187_v57, %v1184_v21  ;;  %v717_v35 = vmul.f32 %v12571_v47, %v12571_v47  ;;  %v718_v4 = vmul.f32 %v12578_v28, %v12578_v28  ;;  %2574 = vmatpush1.bf16.msra.mxu1 %v11127_v33  ;;  %2962 = vmatpush1.bf16.msra.mxu0 %v11130_v49  ;;  %v11136_v6 = vld [vmem:[#allocation5 + $0x130] ss:$24 sps:$4 sm:$0xff]   ;;  %v11141_v21 = vld [vmem:[#allocation5 + $0x12c] ss:$24 sps:$4 sm:$0xff]  }
 0x1b8   : > { %v894_v59 = vadd.f32 1e-05, %v862_v26  ;;  %v12636_v52 = vpack.c.bf16 %v1188_v48, %v1185_v14  ;;  %v1074_v46 = vmul.f32 %v12418_v27, %v962_v60  ;;  %v719_v53 = vmul.f32 %v12585_v19, %v12585_v19  ;;  %2575 = vmatprep.subr.bf16.mxu1 %v11135_v55  ;;  %2963 = vmatprep.subr.bf16.mxu0 %v11138_v18  ;;  %v11144_v26 = vld [vmem:[#allocation5 + $0x164] ss:$24 sps:$4 sm:$0xff]   ;;  %v12656_v18 = vpop.eup %11262 }
 0x1b9   : > { %16140 = vst [vmem:[#allocation62_spill] sm:$0xff] %v12630_v61  ;;  %2231 = vmatprep.mubr.bf16.mxu1 %v12630_v61  ;;  %v863_v57 = vmul.f32 0.0026041667, %v774_v62  ;;  %v843_v20 = vadd.f32 %v718_v4, %v717_v35  ;;  %v12644_v33 = vsub.f32 %v12194_v10, %v12587_v29  ;;  %v1183_v49 = vadd.f32 %v12429_v11, %v1071_v17  ;;  %v786_v62 = vpop.xlane.xlu1 %785  ;;  %v11139_v29 = vld [vmem:[#allocation5 + $0x128] ss:$24 sps:$4 sm:$0xff]  }
 0x1ba   : > { %16141 = vst [vmem:[#allocation42_spill] sm:$0xff] %v12636_v52  ;;  %2425 = vmatmul.mubr.bf16.gmra.mrb[8].mxu0 %v12636_v52  ;;  %v1186_v14 = vadd.f32 %v12429_v11, %v1074_v46  ;;  %v720_v55 = vmul.f32 %v12615_v3, %v12615_v3  ;;  %v721_v48 = vmul.f32 %v12619_v15, %v12619_v15  ;;  %11264 = vrsqrt.f32 %v893_v44  ;;  %v16142_v46 = vld [vmem:[#allocation59_spill] sm:$0xff] }
 0x1bb   : > { %v844_v60 = vadd.f32 %v843_v20, %v719_v53  ;;  %v864_v35 = vmul.f32 0.0026041667, %v778_v8  ;;  %v722_v10 = vmul.f32 %v12644_v33, %v12644_v33  ;;  %2434 = vmatprep.mubr.bf16.mxu0 %v16113_v51  ;;  %2576 = vmatpush1.bf16.msra.mxu1 %v11133_v45  ;;  %11266 = vrsqrt.f32 %v894_v59  ;;  %v11142_v44 = vld [vmem:[#allocation5 + $0x160] ss:$24 sps:$4 sm:$0xff]  }
 0x1bc   : > { %v12658_v17 = vpack.c.bf16 %v1186_v14, %v1183_v49  ;;  %v847_v4 = vadd.f32 %v721_v48, %v720_v55  ;;  %v966_v52 = vmul.f32 %v12568_v54, %v16142_v46  ;;  %2964 = vmatpush1.bf16.msra.mxu0 %v11136_v6  ;;  %2577 = vmatprep.subr.bf16.mxu1 %v11141_v21  ;;  %v895_v8 = vadd.f32 1e-05, %v863_v57  ;;  %v16143_v20 = vld [vmem:[#allocation67_spill] sm:$0xff]  ;;  %v790_v49 = vpop.xlane.xlu0 %789  ;;  %v11147_v14 = vld [vmem:[#allocation5 + $0x15c] ss:$24 sps:$4 sm:$0xff]  }
 0x1bd   : > { %845 = vadd.xlane.f32.xlu0 %v844_v60  ;;  %v969_v53 = vmul.f32 %v12607_v22, %v12093_v16  ;;  %v967_v45 = vmul.f32 %v12568_v54, %v16143_v20  ;;  %v970_v59 = vmul.f32 %v12607_v22, %v12106_v24  ;;  %2965 = vmatprep.subr.bf16.mxu0 %v11144_v26  ;;  %v11150_v55 = vld [vmem:[#allocation5 + $0x194] ss:$24 sps:$4 sm:$0xff]   ;;  %v865_v6 = vmul.f32 0.0026041667, %v782_v38  ;;  %v11145_v24 = vld [vmem:[#allocation5 + $0x158] ss:$24 sps:$4 sm:$0xff]  }
 0x1be   : > { %2232 = vmatmul.mubr.bf16.gmra.mrb[8].mxu1 %v12658_v17  ;;  %v848_v21 = vadd.f32 %v847_v4, %v722_v10  ;;  %v866_v48 = vmul.f32 0.0026041667, %v786_v62  ;;  %v1078_v57 = vmul.f32 %v12403_v23, %v966_v52  ;;  %v896_v60 = vadd.f32 1e-05, %v864_v35  ;;  %v16145_v10 = vld [vmem:[#allocation68_spill] sm:$0xff]  ;;  %v794_v52 = vpop.xlane.xlu1 %793 }
 0x1bf   : > { %v1081_v16 = vmul.f32 %v12403_v23, %v969_v53  ;;  %v1079_v46 = vmul.f32 %v12412_v43, %v967_v45  ;;  %v1082_v20 = vmul.f32 %v12412_v43, %v970_v59  ;;  %2578 = vmatpush1.bf16.msra.mxu1 %v11139_v29  ;;  %v867_v61 = vmul.f32 0.0026041667, %v790_v49  ;;  %v11148_v35 = vld [vmem:[#allocation5 + $0x190] ss:$24 sps:$4 sm:$0xff]   ;;  %v11153_v4 = vld [vmem:[#allocation5 + $0x18c] ss:$24 sps:$4 sm:$0xff]  }
 0x1c0   : > { %849 = vadd.xlane.f32.xlu1 %v848_v21  ;;  %v1190_v26 = vadd.f32 %v12408_v56, %v1078_v57  ;;  %v965_v38 = vmul.f32 %v12568_v54, %v16144_v13  ;;  %v968_v62 = vmul.f32 %v12607_v22, %v16145_v10  ;;  %2966 = vmatpush1.bf16.msra.mxu0 %v11142_v44  ;;  %11268 = vrsqrt.f32 %v895_v8  ;;  %v11156_v22 = vld [vmem:[#allocation5 + $0x1c4] ss:$24 sps:$4 sm:$0xff]   ;;  %v11151_v57 = vld [vmem:[#allocation5 + $0x188] ss:$24 sps:$4 sm:$0xff]  }
 0x1c1   : > { %v1193_v53 = vadd.f32 %v12408_v56, %v1081_v16  ;;  %v1191_v29 = vadd.f32 %v12416_v41, %v1079_v46  ;;  %v1194_v45 = vadd.f32 %v12416_v41, %v1082_v20  ;;  %2579 = vmatprep.subr.bf16.mxu1 %v11147_v14  ;;  %2967 = vmatprep.subr.bf16.mxu0 %v11150_v55  ;;  %v897_v59 = vadd.f32 1e-05, %v865_v6  ;;  %v16147_v20 = vld [vmem:[#allocation72_spill] sm:$0xff] }
 0x1c2   : > { %v898_v49 = vadd.f32 1e-05, %v866_v48  ;;  %v1077_v54 = vmul.f32 %v12418_v27, %v965_v38  ;;  %v1080_v13 = vmul.f32 %v12418_v27, %v968_v62  ;;  %11270 = vrsqrt.f32 %v896_v60  ;;  %v16146_v48 = vld [vmem:[#allocation71_spill] sm:$0xff] }
 0x1c3   : > { %v12683_v44 = vpack.c.bf16 %v1193_v53, %v1190_v26  ;;  %v12685_v21 = vpack.c.bf16 %v1194_v45, %v1191_v29  ;;  %v868_v8 = vmul.f32 0.0026041667, %v794_v52  ;;  %2580 = vmatpush1.bf16.msra.mxu1 %v11145_v24  ;;  %v899_v16 = vadd.f32 1e-05, %v867_v61  ;;  %v11154_v24 = vld [vmem:[#allocation5 + $0x1c0] ss:$24 sps:$4 sm:$0xff]  }
 0x1c4   : > { %v1189_v46 = vadd.f32 %v12429_v11, %v1077_v54  ;;  %v1192_v14 = vadd.f32 %v12429_v11, %v1080_v13  ;;  %v972_v55 = vmul.f32 %v12628_v12, %v12125_v32  ;;  %2968 = vmatpush1.bf16.msra.mxu0 %v11148_v35  ;;  %2581 = vmatprep.subr.bf16.mxu1 %v11153_v4  ;;  %v12691_v6 = vpop.eup %11264  ;;  %v11159_v26 = vld [vmem:[#allocation5 + $0x1bc] ss:$24 sps:$4 sm:$0xff]   ;;  %11272 = vrsqrt.f32 %v897_v59  ;;  %v802_v32 = vpop.xlane.xlu1 %801  ;;  %v11157_v45 = vld [vmem:[#allocation5 + $0x1b8] ss:$24 sps:$4 sm:$0xff]  }
 0x1c5   : > { %2241 = vmatprep.mubr.bf16.mxu1 %v12683_v44  ;;  %2435 = vmatmul.mubr.bf16.gmra.mrb[12].mxu0 %v12685_v21  ;;  %v975_v60 = vmul.f32 %v12656_v18, %v16146_v48  ;;  %v973_v61 = vmul.f32 %v12628_v12, %v16147_v20  ;;  %v11267_v38 = vpop.eup %11266  ;;  %v976_v52 = vmul.f32 %v12656_v18, %v12167_v58  ;;  %v11162_v35 = vld [vmem:[#allocation5 + $0x1f4] ss:$24 sps:$4 sm:$0xff]   ;;  %11274 = vrsqrt.f32 %v898_v49  ;;  %v798_v59 = vpop.xlane.xlu0 %797  ;;  %v16149_v58 = vld [vmem:[#allocation70_spill] sm:$0xff] }
 0x1c6   : > { %v12699_v10 = vpack.c.bf16 %v1192_v14, %v1189_v46  ;;  %2444 = vmatprep.mubr.bf16.mxu0 %v16113_v51  ;;  %v1084_v62 = vmul.f32 %v12403_v23, %v972_v55  ;;  %2969 = vmatprep.subr.bf16.mxu0 %v11156_v22  ;;  %v900_v4 = vadd.f32 1e-05, %v868_v8  ;;  %11276 = vrsqrt.f32 %v899_v16  ;;  %v16148_v13 = vld [vmem:[#allocation69_spill] sm:$0xff]  ;;  %v11165_v49 = vld [vmem:[#allocation5 + $0x1ec] ss:$24 sps:$4 sm:$0xff]  }
 0x1c7   : > { %v1087_v53 = vmul.f32 %v12403_v23, %v975_v60  ;;  %v1085_v29 = vmul.f32 %v12412_v43, %v973_v61  ;;  %2582 = vmatpush1.bf16.msra.mxu1 %v11151_v57  ;;  %v1088_v54 = vmul.f32 %v12412_v43, %v976_v52  ;;  %v971_v46 = vmul.f32 %v12628_v12, %v16148_v13  ;;  %v11160_v16 = vld [vmem:[#allocation5 + $0x1f0] ss:$24 sps:$4 sm:$0xff]  }
 0x1c8   : > { %2242 = vmatmul.mubr.bf16.gmra.mrb[12].mxu1 %v12699_v10  ;;  %v974_v22 = vmul.f32 %v12656_v18, %v16149_v58  ;;  %v870_v8 = vmul.f32 0.0026041667, %v802_v32  ;;  %v1196_v14 = vadd.f32 %v12408_v56, %v1084_v62  ;;  %2970 = vmatpush1.bf16.msra.mxu0 %v11154_v24  ;;  %v978_v18 = vmul.f32 %v12691_v6, %v12173_v2 }
 0x1c9   : > { %v1199_v55 = vadd.f32 %v12408_v56, %v1087_v53  ;;  %v1197_v57 = vadd.f32 %v12416_v41, %v1085_v29  ;;  %2583 = vmatprep.subr.bf16.mxu1 %v11159_v26  ;;  %v1200_v48 = vadd.f32 %v12416_v41, %v1088_v54  ;;  %v1083_v60 = vmul.f32 %v12418_v27, %v971_v46  ;;  %v16150_v46 = vld [vmem:[#allocation73_spill] sm:$0xff] }
 0x1ca   : > { %v1086_v12 = vmul.f32 %v12418_v27, %v974_v22  ;;  %2971 = vmatprep.subr.bf16.mxu0 %v11162_v35  ;;  %v11269_v20 = vpop.eup %11268  ;;  %11278 = vrsqrt.f32 %v900_v4  ;;  %v869_v61 = vmul.f32 0.0026041667, %v798_v59  ;;  %v981_v62 = vmul.f32 %v11267_v38, %v12179_v34  ;;  %v11168_v22 = vld [vmem:[#allocation5 + $0x224] ss:$24 sps:$4 sm:$0xff]  }
 0x1cb   : > { %v12721_v32 = vpack.c.bf16 %v1199_v55, %v1196_v14  ;;  %2584 = vmatpush1.bf16.msra.mxu1 %v11157_v45  ;;  %v12724_v24 = vpack.c.bf16 %v1200_v48, %v1197_v57  ;;  %v1195_v26 = vadd.f32 %v12429_v11, %v1083_v60  ;;  %v1090_v53 = vmul.f32 %v12403_v23, %v978_v18  ;;  %v11163_v45 = vld [vmem:[#allocation5 + $0x1e8] ss:$24 sps:$4 sm:$0xff]  }
 0x1cc   : > { %v1198_v52 = vadd.f32 %v12429_v11, %v1086_v12  ;;  %2585 = vmatprep.subr.bf16.mxu1 %v11165_v49  ;;  %v11271_v29 = vpop.eup %11270  ;;  %v902_v2 = vadd.f32 1e-05, %v870_v8  ;;  %v1093_v35 = vmul.f32 %v12403_v23, %v981_v62  ;;  %v979_v4 = vmul.f32 %v12691_v6, %v12197_v25  ;;  %2972 = vmatpush1.bf16.msra.mxu0 %v11160_v16  ;;  %v11166_v16 = vld [vmem:[#allocation5 + $0x220] ss:$24 sps:$4 sm:$0xff]   ;;  %v11171_v62 = vld [vmem:[#allocation5 + $0x21c] ss:$24 sps:$4 sm:$0xff]  }
 0x1cd   : > { %2251 = vmatprep.mubr.bf16.mxu1 %v12721_v32  ;;  %v982_v34 = vmul.f32 %v11267_v38, %v12191_v31  ;;  %2445 = vmatmul.mubr.bf16.gmra.mrb[16].mxu0 %v12724_v24  ;;  %v1202_v54 = vadd.f32 %v12408_v56, %v1090_v53  ;;  %v977_v13 = vmul.f32 %v12691_v6, %v12170_v42 }
 0x1ce   : > { %v12735_v59 = vpack.c.bf16 %v1198_v52, %v1195_v26  ;;  %v980_v58 = vmul.f32 %v11267_v38, %v16150_v46  ;;  %2454 = vmatprep.mubr.bf16.mxu0 %v16113_v51  ;;  %v1205_v25 = vadd.f32 %v12408_v56, %v1093_v35  ;;  %v1091_v31 = vmul.f32 %v12412_v43, %v979_v4  ;;  %v12746_v14 = vpop.eup %11272  ;;  %v16151_v38 = vld [vmem:[#allocation77_spill] sm:$0xff]  ;;  %v810_v52 = vpop.xlane.xlu1 %809  ;;  %v16152_v4 = vld [vmem:[#allocation76_spill] sm:$0xff]  ;;  %v16153_v46 = vld [vmem:[#allocation74_spill] sm:$0xff] }
 0x1cf   : > { %v1094_v49 = vmul.f32 %v12412_v43, %v982_v34  ;;  %v984_v8 = vmul.f32 %v11269_v20, %v12213_v37  ;;  %v1089_v55 = vmul.f32 %v12418_v27, %v977_v13  ;;  %v987_v6 = vmul.f32 %v11271_v29, %v12219_v39  ;;  %v11275_v48 = vpop.eup %11274  ;;  %2586 = vmatpush1.bf16.msra.mxu1 %v11163_v45 }
 0x1d0   : > { %2252 = vmatmul.mubr.bf16.gmra.mrb[16].mxu1 %v12735_v59  ;;  %v1092_v42 = vmul.f32 %v12418_v27, %v980_v58  ;;  %v985_v57 = vmul.f32 %v11269_v20, %v16151_v38  ;;  %v12753_v60 = vpack.c.bf16 %v1205_v25, %v1202_v54  ;;  %v1203_v12 = vadd.f32 %v12416_v41, %v1091_v31  ;;  %v12758_v26 = vpop.eup %11276  ;;  %v806_v25 = vpop.xlane.xlu0 %805 }
 0x1d1   : > { %v1206_v37 = vadd.f32 %v12416_v41, %v1094_v49  ;;  %v1096_v18 = vmul.f32 %v12403_v23, %v984_v8  ;;  %v1201_v53 = vadd.f32 %v12429_v11, %v1089_v55  ;;  %v1099_v35 = vmul.f32 %v12403_v23, %v987_v6  ;;  %2973 = vmatprep.subr.bf16.mxu0 %v11168_v22  ;;  %v16154_v55 = vld [vmem:[#allocation75_spill] sm:$0xff] }
 0x1d2   : > { %v1204_v39 = vadd.f32 %v12429_v11, %v1092_v42  ;;  %v988_v34 = vmul.f32 %v11271_v29, %v16152_v4  ;;  %v901_v54 = vadd.f32 1e-05, %v869_v61  ;;  %2261 = vmatprep.mubr.bf16.mxu1 %v12753_v60  ;;  %v983_v58 = vmul.f32 %v11269_v20, %v16153_v46  ;;  %2974 = vmatpush1.bf16.msra.mxu0 %v11166_v16  ;;  %v16155_v6 = vld [vmem:[#allocation79_spill] sm:$0xff]  ;;  %v11172_v4 = vld [vmem:[#allocation5 + $0x250] ss:$24 sps:$4 sm:$0xff]  }
 0x1d3   : > { %v12765_v13 = vpack.c.bf16 %v1206_v37, %v1203_v12  ;;  %v1208_v45 = vadd.f32 %v12408_v56, %v1096_v18  ;;  %v1211_v49 = vadd.f32 %v12408_v56, %v1099_v35  ;;  %v986_v42 = vmul.f32 %v11271_v29, %v16154_v55  ;;  %v16156_v12 = vld [vmem:[#allocation12_spill] sm:$0xff]  ;;  %2587 = vmatprep.subr.bf16.mxu1 %v11171_v62  ;;  %v11169_v29 = vld [vmem:[#allocation5 + $0x218] ss:$24 sps:$4 sm:$0xff]  }
 0x1d4   : > { %v12769_v31 = vpack.c.bf16 %v1204_v39, %v1201_v53  ;;  %v1100_v8 = vmul.f32 %v12412_v43, %v988_v34  ;;  %v12774_v22 = vpop.eup %11278  ;;  %v872_v61 = vmul.f32 0.0026041667, %v810_v52  ;;  %v990_v38 = vmul.f32 %v12746_v14, %v16155_v6  ;;  %v11174_v39 = vld [vmem:[#allocation5 + $0x254] ss:$24 sps:$4 sm:$0xff]   ;;  %2588 = vmatpush1.bf16.msra.mxu1 %v11169_v29  ;;  %v11175_v29 = vld [vmem:[#allocation5 + $0x248] ss:$24 sps:$4 sm:$0xff]  }
 0x1d5   : > { %v993_v37 = vmul.f32 %v11275_v48, %v16156_v12  ;;  %11280 = vrsqrt.f32 %v902_v2  ;;  %2455 = vmatmul.mubr.bf16.gmra.mrb[20].mxu0 %v12765_v13  ;;  %v12780_v20 = vpack.c.bf16 %v1211_v49, %v1208_v45  ;;  %v1097_v18 = vmul.f32 %v12412_v43, %v985_v57  ;;  %v11177_v45 = vld [vmem:[#allocation5 + $0x24c] ss:$24 sps:$4 sm:$0xff]   ;;  %2975 = vmatprep.subr.bf16.mxu0 %v11174_v39 }
 0x1d6   : > { %v1098_v53 = vmul.f32 %v12418_v27, %v986_v42  ;;  %v871_v16 = vmul.f32 0.0026041667, %v806_v25  ;;  %2464 = vmatprep.mubr.bf16.mxu0 %v16113_v51  ;;  %11282 = vrsqrt.f32 %v901_v54  ;;  %v1212_v2 = vadd.f32 %v12416_v41, %v1100_v8  ;;  %v16157_v49 = vld [vmem:[#allocation11_spill] sm:$0xff]  ;;  %2976 = vmatpush1.bf16.msra.mxu0 %v11172_v4 }
 0x1d7   : > { %v1105_v52 = vmul.f32 %v12403_v23, %v993_v37  ;;  %v1095_v62 = vmul.f32 %v12418_v27, %v983_v58  ;;  %v994_v35 = vmul.f32 %v11275_v48, %v12257_v30  ;;  %v904_v57 = vadd.f32 1e-05, %v872_v61  ;;  %2589 = vmatprep.subr.bf16.mxu1 %v11177_v45  ;;  %v11178_v4 = vld [vmem:[#allocation5 + $0x280] ss:$24 sps:$4 sm:$0xff]   ;;  %v11183_v45 = vld [vmem:[#allocation5 + $0x27c] ss:$24 sps:$4 sm:$0xff]  }
 0x1d8   : > { %2262 = vmatmul.mubr.bf16.gmra.mrb[20].mxu1 %v12769_v31  ;;  %v1102_v34 = vmul.f32 %v12403_v23, %v990_v38  ;;  %v1209_v46 = vadd.f32 %v12416_v41, %v1097_v18  ;;  %v1210_v25 = vadd.f32 %v12429_v11, %v1098_v53  ;;  %v991_v54 = vmul.f32 %v12746_v14, %v12270_v36  ;;  %v16158_v38 = vld [vmem:[#allocation78_spill] sm:$0xff] }
 0x1d9   : > { %2271 = vmatprep.mubr.bf16.mxu1 %v12780_v20  ;;  %v992_v8 = vmul.f32 %v11275_v48, %v16157_v49  ;;  %v903_v58 = vadd.f32 1e-05, %v871_v16  ;;  %v1217_v30 = vadd.f32 %v12408_v56, %v1105_v52  ;;  %v999_v55 = vmul.f32 %v12774_v22, %v12281_v40  ;;  %v16159_v48 = vld [vmem:[#allocation15_spill] sm:$0xff]  ;;  %2590 = vmatpush1.bf16.msra.mxu1 %v11175_v29 }
 0x1da   : > { %v12800_v42 = vpack.c.bf16 %v1212_v2, %v1209_v46  ;;  %v1207_v61 = vadd.f32 %v12429_v11, %v1095_v62  ;;  %v1106_v6 = vmul.f32 %v12412_v43, %v994_v35  ;;  %v989_v12 = vmul.f32 %v12746_v14, %v16158_v38  ;;  %v11180_v52 = vld [vmem:[#allocation5 + $0x284] ss:$24 sps:$4 sm:$0xff]   ;;  %2591 = vmatprep.subr.bf16.mxu1 %v11183_v45  ;;  %v16162_v45 = vld [vmem:[#allocation16_spill] sm:$0xff] }
 0x1db   : > { %v1214_v36 = vadd.f32 %v12408_v56, %v1102_v34  ;;  %v996_v37 = vmul.f32 %v12758_v26, %v16159_v48  ;;  %11284 = vrsqrt.f32 %v904_v57  ;;  %v1103_v18 = vmul.f32 %v12412_v43, %v991_v54  ;;  %2977 = vmatprep.subr.bf16.mxu0 %v11180_v52  ;;  %v11192_v52 = vld [vmem:[#allocation5 + $0x2e4] ss:$24 sps:$4 sm:$0xff]  }
 0x1dc   : > { %v12810_v40 = vpack.c.bf16 %v1210_v25, %v1207_v61  ;;  %v1104_v53 = vmul.f32 %v12418_v27, %v992_v8  ;;  %v1111_v14 = vmul.f32 %v12403_v23, %v999_v55  ;;  %11286 = vrsqrt.f32 %v903_v58  ;;  %v16160_v55 = vld [vmem:[#allocation14_spill] sm:$0xff]  ;;  %2978 = vmatpush1.bf16.msra.mxu0 %v11178_v4 }
 0x1dd   : > { %2465 = vmatmul.mubr.bf16.gmra.mrb[24].mxu0 %v12800_v42  ;;  %v12814_v16 = vpack.c.bf16 %v1217_v30, %v1214_v36  ;;  %v1218_v2 = vadd.f32 %v12416_v41, %v1106_v6  ;;  %v1101_v62 = vmul.f32 %v12418_v27, %v989_v12  ;;  %v1000_v35 = vmul.f32 %v12774_v22, %v12284_v0  ;;  %v11181_v12 = vld [vmem:[#allocation5 + $0x278] ss:$24 sps:$4 sm:$0xff]   ;;  %v11186_v36 = vld [vmem:[#allocation5 + $0x2b4] ss:$24 sps:$4 sm:$0xff]  }
 0x1de   : > { %2474 = vmatprep.mubr.bf16.mxu0 %v16113_v51  ;;  %v1108_v57 = vmul.f32 %v12403_v23, %v996_v37  ;;  %v997_v34 = vmul.f32 %v12758_v26, %v12294_v63  ;;  %v1215_v25 = vadd.f32 %v12416_v41, %v1103_v18  ;;  %v1216_v54 = vadd.f32 %v12429_v11, %v1104_v53  ;;  %v11184_v37 = vld [vmem:[#allocation5 + $0x2b0] ss:$24 sps:$4 sm:$0xff]   ;;  %v11189_v18 = vld [vmem:[#allocation5 + $0x2ac] ss:$24 sps:$4 sm:$0xff]  }
 0x1df   : > { %v11281_v39 = vpop.eup %11280  ;;  %v998_v49 = vmul.f32 %v12774_v22, %v12274_v5  ;;  %v1223_v0 = vadd.f32 %v12408_v56, %v1111_v14  ;;  %v1213_v30 = vadd.f32 %v12429_v11, %v1101_v62  ;;  %v1112_v63 = vmul.f32 %v12412_v43, %v1000_v35  ;;  %2592 = vmatpush1.bf16.msra.mxu1 %v11181_v12  ;;  %v11198_v12 = vld [vmem:[#allocation5 + $0x314] ss:$24 sps:$4 sm:$0xff]  }
 0x1e0   : > { %2272 = vmatmul.mubr.bf16.gmra.mrb[24].mxu1 %v12810_v40  ;;  %v11283_v46 = vpop.eup %11282  ;;  %v1005_v8 = vmul.f32 %v11281_v39, %v12319_v9  ;;  %v12833_v58 = vpack.c.bf16 %v1218_v2, %v1215_v25  ;;  %v995_v61 = vmul.f32 %v12758_v26, %v16160_v55  ;;  %v1220_v6 = vadd.f32 %v12408_v56, %v1108_v57  ;;  %v16161_v57 = vld [vmem:[#allocation17_spill] sm:$0xff] }
 0x1e1   : > { %2281 = vmatprep.mubr.bf16.mxu1 %v12814_v16  ;;  %v1109_v5 = vmul.f32 %v12412_v43, %v997_v34  ;;  %v1002_v22 = vmul.f32 %v11283_v46, %v12301_v7  ;;  %v12843_v9 = vpack.c.bf16 %v1216_v54, %v1213_v30  ;;  %v1110_v38 = vmul.f32 %v12418_v27, %v998_v49  ;;  %v11187_v54 = vld [vmem:[#allocation5 + $0x2a8] ss:$24 sps:$4 sm:$0xff]  }
 0x1e2   : > { %v12846_v48 = vpack.c.bf16 %v1223_v0, %v1220_v6  ;;  %v1117_v26 = vmul.f32 %v12403_v23, %v1005_v8  ;;  %v1224_v7 = vadd.f32 %v12416_v41, %v1112_v63  ;;  %v1107_v29 = vmul.f32 %v12418_v27, %v995_v61  ;;  %2979 = vmatprep.subr.bf16.mxu0 %v11186_v36  ;;  %v11190_v8 = vld [vmem:[#allocation5 + $0x2e0] ss:$24 sps:$4 sm:$0xff]   ;;  %v16164_v61 = vld [vmem:[#allocation13_spill] sm:$0xff] }
 0x1e3   : > { %v1006_v14 = vmul.f32 %v11281_v39, %v12335_v50  ;;  %v1221_v2 = vadd.f32 %v12416_v41, %v1109_v5  ;;  %v1114_v62 = vmul.f32 %v12403_v23, %v1002_v22  ;;  %v1222_v4 = vadd.f32 %v12429_v11, %v1110_v38  ;;  %v16163_v50 = vld [vmem:[#allocation21_spill] sm:$0xff]  ;;  %2980 = vmatpush1.bf16.msra.mxu0 %v11184_v37  ;;  %v16165_v22 = vld [vmem:[#allocation18_spill] sm:$0xff] }
 0x1e4   : > { %v1003_v34 = vmul.f32 %v11283_v46, %v16161_v57  ;;  %v1004_v25 = vmul.f32 %v11281_v39, %v16162_v45  ;;  %v1229_v49 = vadd.f32 %v12408_v56, %v1117_v26  ;;  %2593 = vmatprep.subr.bf16.mxu1 %v11189_v18  ;;  %v1219_v63 = vadd.f32 %v12429_v11, %v1107_v29  ;;  %v11195_v39 = vld [vmem:[#allocation5 + $0x2dc] ss:$24 sps:$4 sm:$0xff]   ;;  %v11193_v18 = vld [vmem:[#allocation5 + $0x2d8] ss:$24 sps:$4 sm:$0xff]   ;;  %v11201_v29 = vld [vmem:[#allocation5 + $0x30c] ss:$24 sps:$4 sm:$0xff]  }
 0x1e5   : > { %2475 = vmatmul.mubr.bf16.gmra.mrb[28].mxu0 %v12833_v58  ;;  %v11285_v53 = vpop.eup %11284  ;;  %v12862_v30 = vpack.c.bf16 %v1224_v7, %v1221_v2  ;;  %v1118_v55 = vmul.f32 %v12412_v43, %v1006_v14  ;;  %v1001_v6 = vmul.f32 %v11283_v46, %v16164_v61  ;;  %2981 = vmatprep.subr.bf16.mxu0 %v11192_v52  ;;  %v16166_v2 = vld [vmem:[#allocation23_spill] sm:$0xff]  ;;  %v16167_v45 = vld [vmem:[#allocation22_spill] sm:$0xff] }
 0x1e6   : > { %2484 = vmatprep.mubr.bf16.mxu0 %v16113_v51  ;;  %v11287_v35 = vpop.eup %11286  ;;  %v1011_v0 = vmul.f32 %v11285_v53, %v16163_v50  ;;  %v1226_v5 = vadd.f32 %v12408_v56, %v1114_v62  ;;  %v12870_v36 = vpack.c.bf16 %v1222_v4, %v1219_v63  ;;  %v1115_v26 = vmul.f32 %v12412_v43, %v1003_v34 }
 0x1e7   : > { %v1008_v38 = vmul.f32 %v11287_v35, %v16165_v22  ;;  %v1116_v37 = vmul.f32 %v12418_v27, %v1004_v25  ;;  %2594 = vmatpush1.bf16.msra.mxu1 %v11187_v54  ;;  %2982 = vmatpush1.bf16.msra.mxu0 %v11190_v8  ;;  %v1230_v14 = vadd.f32 %v12416_v41, %v1118_v55  ;;  %v16168_v54 = vld [vmem:[#allocation20_spill] sm:$0xff]  ;;  %v16169_v55 = vld [vmem:[#allocation19_spill] sm:$0xff] }
 0x1e8   : > { %2282 = vmatmul.mubr.bf16.gmra.mrb[28].mxu1 %v12843_v9  ;;  %v12874_v7 = vpack.c.bf16 %v1229_v49, %v1226_v5  ;;  %v1123_v46 = vmul.f32 %v12403_v23, %v1011_v0  ;;  %v1113_v52 = vmul.f32 %v12418_v27, %v1001_v6  ;;  %v1012_v62 = vmul.f32 %v11285_v53, %v16166_v2 }
 0x1e9   : > { %2291 = vmatprep.mubr.bf16.mxu1 %v12846_v48  ;;  %2595 = vmatprep.subr.bf16.mxu1 %v11195_v39  ;;  %v1120_v4 = vmul.f32 %v12403_v23, %v1008_v38  ;;  %v1227_v57 = vadd.f32 %v12416_v41, %v1115_v26  ;;  %v1228_v34 = vadd.f32 %v12429_v11, %v1116_v37 }
 0x1ea   : > { %3144 = vmatprep.subr.bf16.mxu0 %v11198_v12  ;;  %v1009_v25 = vmul.f32 %v11287_v35, %v16167_v45  ;;  %v1010_v49 = vmul.f32 %v11285_v53, %v16168_v54  ;;  %v1235_v50 = vadd.f32 %v12408_v56, %v1123_v46  ;;  %v1225_v8 = vadd.f32 %v12429_v11, %v1113_v52 }
 0x1eb   : > { %2596 = vmatpush1.bf16.msra.mxu1 %v11193_v18  ;;  %v12889_v0 = vpack.c.bf16 %v1230_v14, %v1227_v57  ;;  %v1124_v63 = vmul.f32 %v12412_v43, %v1012_v62  ;;  %v1007_v61 = vmul.f32 %v11287_v35, %v16169_v55  ;;  %v1232_v6 = vadd.f32 %v12408_v56, %v1120_v4  ;;  %v16171_v55 = vld [vmem:[#allocation27_spill] sm:$0xff] }
 0x1ec   : > { %2758 = vmatprep.subr.bf16.mxu1 %v11201_v29  ;;  %v12896_v39 = vpack.c.bf16 %v1228_v34, %v1225_v8  ;;  %v1121_v53 = vmul.f32 %v12412_v43, %v1009_v25  ;;  %v1122_v5 = vmul.f32 %v12418_v27, %v1010_v49  ;;  %v16170_v8 = vld [vmem:[#allocation26_spill] sm:$0xff] }
 0x1ed   : > { %2485 = vmatmul.mubr.bf16.gmra.mrb[32].mxu0 %v12862_v30  ;;  %v12900_v22 = vpack.c.bf16 %v1235_v50, %v1232_v6  ;;  %v1236_v38 = vadd.f32 %v12416_v41, %v1124_v63  ;;  %v1119_v35 = vmul.f32 %v12418_v27, %v1007_v61  ;;  %v16172_v6 = vld [vmem:[#allocation25_spill] sm:$0xff] }
 0x1ee   : > { %2494 = vmatprep.mubr.bf16.mxu0 %v16113_v51  ;;  %v1233_v12 = vadd.f32 %v12416_v41, %v1121_v53  ;;  %v1234_v26 = vadd.f32 %v12429_v11, %v1122_v5 }
 0x1ef   : > { %v1231_v18 = vadd.f32 %v12429_v11, %v1119_v35 }
 0x1f0   : > { %2292 = vmatmul.mubr.bf16.gmra.mrb[32].mxu1 %v12870_v36  ;;  %v12909_v37 = vpack.c.bf16 %v1236_v38, %v1233_v12 }
 0x1f1   : > { %2301 = vmatprep.mubr.bf16.mxu1 %v12874_v7  ;;  %v12913_v46 = vpack.c.bf16 %v1234_v26, %v1231_v18  ;;  %v16173_v18 = vld [vmem:[#allocation32_spill] sm:$0xff] }
 0x1f5   : > { %2495 = vmatmul.mubr.bf16.gmra.mrb[36].mxu0 %v12889_v0 }
 0x1f6   : > { %2504 = vmatprep.mubr.bf16.mxu0 %v16113_v51 }
 0x1f8   : > { %2302 = vmatmul.mubr.bf16.gmra.mrb[36].mxu1 %v12896_v39 }
 0x1f9   : > { %2311 = vmatprep.mubr.bf16.mxu1 %v12900_v22 }
 0x1fd   : > { %2505 = vmatmul.mubr.bf16.gmra.mrb[40].mxu0 %v12909_v37 }
 0x1fe   : > { %2514 = vmatprep.mubr.bf16.mxu0 %v16113_v51 }
 0x200   : > { %2312 = vmatmul.mubr.bf16.gmra.mrb[40].mxu1 %v12913_v46 }
 0x220   : > { %v814_v29 = vpop.xlane.xlu0 %813 }
 0x221   : > { %v873_v14 = vmul.f32 0.0026041667, %v814_v29 }
 0x223   : > { %v905_v52 = vadd.f32 1e-05, %v873_v14  ;;  %v818_v2 = vpop.xlane.xlu1 %817  ;;  %v16174_v14 = vld [vmem:[#allocation38_spill] sm:$0xff] }
 0x224   : > { %v874_v62 = vmul.f32 0.0026041667, %v818_v2 }
 0x225   : > { %11288 = vrsqrt.f32 %v905_v52 }
 0x226   : > { %v906_v4 = vadd.f32 1e-05, %v874_v62  ;;  %v16175_v62 = vld [vmem:[#allocation31_spill] sm:$0xff] }
 0x228   : > { %v822_v57 = vpop.xlane.xlu0 %821  ;;  %11290 = vrsqrt.f32 %v906_v4 }
 0x229   : > { %v875_v34 = vmul.f32 0.0026041667, %v822_v57 }
 0x22b   : > { %v907_v45 = vadd.f32 1e-05, %v875_v34  ;;  %v826_v25 = vpop.xlane.xlu1 %825 }
 0x22c   : > { %v876_v54 = vmul.f32 0.0026041667, %v826_v25 }
 0x22d   : > { %11292 = vrsqrt.f32 %v907_v45 }
 0x22e   : > { %v908_v50 = vadd.f32 1e-05, %v876_v54 }
 0x22f   : > { %v11289_v49 = vpop.eup %11288 }
 0x230   : > { %v1014_v63 = vmul.f32 %v11289_v49, %v16170_v8  ;;  %v1015_v61 = vmul.f32 %v11289_v49, %v16171_v55  ;;  %v1013_v53 = vmul.f32 %v11289_v49, %v16172_v6  ;;  %11294 = vrsqrt.f32 %v908_v50 }
 0x232   : > { %v1126_v5 = vmul.f32 %v12403_v23, %v1014_v63  ;;  %v1127_v38 = vmul.f32 %v12412_v43, %v1015_v61  ;;  %v11291_v35 = vpop.eup %11290  ;;  %v1125_v12 = vmul.f32 %v12418_v27, %v1013_v53  ;;  %v16176_v53 = vld [vmem:[#allocation41_spill] sm:$0xff] }
 0x233   : > { %v830_v26 = vpop.xlane.xlu0 %829  ;;  %v1017_v29 = vmul.f32 %v11291_v35, %v16173_v18  ;;  %v1018_v52 = vmul.f32 %v11291_v35, %v16174_v14  ;;  %v1016_v4 = vmul.f32 %v11291_v35, %v16175_v62 }
 0x234   : > { %v877_v2 = vmul.f32 0.0026041667, %v830_v26  ;;  %v1238_v45 = vadd.f32 %v12408_v56, %v1126_v5  ;;  %v1239_v54 = vadd.f32 %v12416_v41, %v1127_v38  ;;  %v1237_v55 = vadd.f32 %v12429_v11, %v1125_v12  ;;  %v16177_v26 = vld [vmem:[#allocation46_spill] sm:$0xff]  ;;  %v16178_v38 = vld [vmem:[#allocation40_spill] sm:$0xff] }
 0x235   : > { %v1129_v34 = vmul.f32 %v12403_v23, %v1017_v29  ;;  %v1130_v25 = vmul.f32 %v12412_v43, %v1018_v52  ;;  %v1128_v63 = vmul.f32 %v12418_v27, %v1016_v4 }
 0x236   : > { %v834_v57 = vpop.xlane.xlu1 %833  ;;  %v909_v50 = vadd.f32 1e-05, %v877_v2 }
 0x237   : > { %v11293_v49 = vpop.eup %11292  ;;  %v878_v8 = vmul.f32 0.0026041667, %v834_v57  ;;  %v1241_v61 = vadd.f32 %v12408_v56, %v1129_v34  ;;  %v1242_v6 = vadd.f32 %v12416_v41, %v1130_v25  ;;  %v1240_v29 = vadd.f32 %v12429_v11, %v1128_v63  ;;  %v16179_v57 = vld [vmem:[#allocation29_spill] sm:$0xff]  ;;  %v16180_v25 = vld [vmem:[#allocation48_spill] sm:$0xff] }
 0x238   : > { %v1020_v35 = vmul.f32 %v11293_v49, %v16176_v53  ;;  %v1021_v18 = vmul.f32 %v11293_v49, %v16177_v26  ;;  %11296 = vrsqrt.f32 %v909_v50  ;;  %v1019_v14 = vmul.f32 %v11293_v49, %v16178_v38 }
 0x239   : > { %v910_v5 = vadd.f32 1e-05, %v878_v8  ;;  %v12938_v52 = vpack.c.bf16 %v1241_v61, %v1238_v45  ;;  %v12940_v2 = vpack.c.bf16 %v1242_v6, %v1239_v54  ;;  %v12942_v12 = vpack.c.bf16 %v1240_v29, %v1237_v55  ;;  %v16181_v45 = vld [vmem:[#allocation53_spill] sm:$0xff] }
 0x23a   : > { %v11295_v62 = vpop.eup %11294  ;;  %v1132_v4 = vmul.f32 %v12403_v23, %v1020_v35  ;;  %v1133_v49 = vmul.f32 %v12412_v43, %v1021_v18  ;;  %v1131_v8 = vmul.f32 %v12418_v27, %v1019_v14 }
 0x23b   : > { %11298 = vrsqrt.f32 %v910_v5  ;;  %2321 = vmatprep.mubr.bf16.mxu1 %v12938_v52  ;;  %2515 = vmatmul.mubr.bf16.gmra.mrb[44].mxu0 %v12940_v2  ;;  %v1023_v34 = vmul.f32 %v11295_v62, %v16179_v57  ;;  %v1024_v50 = vmul.f32 %v11295_v62, %v16180_v25  ;;  %v1022_v54 = vmul.f32 %v11295_v62, %v16181_v45 }
 0x23c   : > { %2322 = vmatmul.mubr.bf16.gmra.mrb[44].mxu1 %v12942_v12  ;;  %2524 = vmatprep.mubr.bf16.mxu0 %v16113_v51  ;;  %v1244_v6 = vadd.f32 %v12408_v56, %v1132_v4  ;;  %v1245_v18 = vadd.f32 %v12416_v41, %v1133_v49  ;;  %v1243_v29 = vadd.f32 %v12429_v11, %v1131_v8  ;;  %v16183_v49 = vld [vmem:[#allocation56_spill] sm:$0xff] }
 0x23d   : > { %v1135_v63 = vmul.f32 %v12403_v23, %v1023_v34  ;;  %v1136_v55 = vmul.f32 %v12412_v43, %v1024_v50  ;;  %v1134_v53 = vmul.f32 %v12418_v27, %v1022_v54  ;;  %v16184_v54 = vld [vmem:[#allocation30_spill] sm:$0xff] }
 0x23f   : > { %v838_v61 = vpop.xlane.xlu0 %837  ;;  %v1247_v26 = vadd.f32 %v12408_v56, %v1135_v63  ;;  %v1248_v5 = vadd.f32 %v12416_v41, %v1136_v55  ;;  %v1246_v38 = vadd.f32 %v12429_v11, %v1134_v53  ;;  %v16185_v55 = vld [vmem:[#allocation49_spill] sm:$0xff]  ;;  %v16186_v53 = vld [vmem:[#allocation28_spill] sm:$0xff] }
 0x240   : > { %v879_v35 = vmul.f32 0.0026041667, %v838_v61 }
 0x241   : > { %v12963_v62 = vpack.c.bf16 %v1247_v26, %v1244_v6  ;;  %v12965_v57 = vpack.c.bf16 %v1248_v5, %v1245_v18  ;;  %v12967_v25 = vpack.c.bf16 %v1246_v38, %v1243_v29  ;;  %v16187_v18 = vld [vmem:[#allocation51_spill] sm:$0xff] }
 0x242   : > { %v911_v14 = vadd.f32 1e-05, %v879_v35  ;;  %v11297_v34 = vpop.eup %11296  ;;  %v16188_v38 = vld [vmem:[#allocation39_spill] sm:$0xff] }
 0x243   : > { %16182 = vst [vmem:[#allocation64_spill] sm:$0xff] %v12965_v57  ;;  %v842_v4 = vpop.xlane.xlu1 %841  ;;  %2331 = vmatprep.mubr.bf16.mxu1 %v12963_v62  ;;  %2525 = vmatmul.mubr.bf16.gmra.mrb[48].mxu0 %v12965_v57  ;;  %v1026_v45 = vmul.f32 %v11297_v34, %v16183_v49  ;;  %v1027_v8 = vmul.f32 %v11297_v34, %v16184_v54 }
 0x244   : > { %11300 = vrsqrt.f32 %v911_v14  ;;  %v880_v50 = vmul.f32 0.0026041667, %v842_v4  ;;  %2332 = vmatmul.mubr.bf16.gmra.mrb[48].mxu1 %v12967_v25  ;;  %2534 = vmatprep.mubr.bf16.mxu0 %v16113_v51  ;;  %v1025_v61 = vmul.f32 %v11297_v34, %v16185_v55 }
 0x245   : > { %v11299_v63 = vpop.eup %11298  ;;  %v1138_v26 = vmul.f32 %v12403_v23, %v1026_v45  ;;  %v1139_v29 = vmul.f32 %v12412_v43, %v1027_v8 }
 0x246   : > { %v912_v6 = vadd.f32 1e-05, %v880_v50  ;;  %v1029_v35 = vmul.f32 %v11299_v63, %v16186_v53  ;;  %v1030_v5 = vmul.f32 %v11299_v63, %v16187_v18  ;;  %v1028_v14 = vmul.f32 %v11299_v63, %v16188_v38 }
 0x247   : > { %v1137_v4 = vmul.f32 %v12418_v27, %v1025_v61  ;;  %v1250_v55 = vadd.f32 %v12408_v56, %v1138_v26  ;;  %v1251_v53 = vadd.f32 %v12416_v41, %v1139_v29 }
 0x248   : > { %11302 = vrsqrt.f32 %v912_v6  ;;  %v1141_v49 = vmul.f32 %v12403_v23, %v1029_v35  ;;  %v1142_v54 = vmul.f32 %v12412_v43, %v1030_v5  ;;  %v1140_v34 = vmul.f32 %v12418_v27, %v1028_v14 }
 0x249   : > { %v1249_v63 = vadd.f32 %v12429_v11, %v1137_v4  ;;  %v16190_v4 = vld [vmem:[#allocation60_spill] sm:$0xff] }
 0x24a   : > { %v846_v50 = vpop.xlane.xlu0 %845  ;;  %v1253_v45 = vadd.f32 %v12408_v56, %v1141_v49  ;;  %v1254_v8 = vadd.f32 %v12416_v41, %v1142_v54  ;;  %v1252_v61 = vadd.f32 %v12429_v11, %v1140_v34  ;;  %v16191_v34 = vld [vmem:[#allocation35_spill] sm:$0xff] }
 0x24b   : > { %v881_v18 = vmul.f32 0.0026041667, %v846_v50 }
 0x24c   : > { %v12991_v6 = vpack.c.bf16 %v1253_v45, %v1250_v55  ;;  %v12993_v35 = vpack.c.bf16 %v1254_v8, %v1251_v53  ;;  %v12995_v14 = vpack.c.bf16 %v1252_v61, %v1249_v63  ;;  %v16192_v45 = vld [vmem:[#allocation37_spill] sm:$0xff] }
 0x24d   : > { %v913_v5 = vadd.f32 1e-05, %v881_v18  ;;  %v850_v38 = vpop.xlane.xlu1 %849  ;;  %v16193_v18 = vld [vmem:[#allocation61_spill] sm:$0xff] }
 0x24e   : > { %16189 = vst [vmem:[#allocation65_spill] sm:$0xff] %v12993_v35  ;;  %v11301_v26 = vpop.eup %11300  ;;  %v882_v57 = vmul.f32 0.0026041667, %v850_v38  ;;  %2341 = vmatprep.mubr.bf16.mxu1 %v12991_v6  ;;  %2535 = vmatmul.mubr.bf16.gmra.mrb[52].mxu0 %v12993_v35 }
 0x24f   : > { %11304 = vrsqrt.f32 %v913_v5  ;;  %2342 = vmatmul.mubr.bf16.gmra.mrb[52].mxu1 %v12995_v14  ;;  %2544 = vmatprep.mubr.bf16.mxu0 %v16113_v51  ;;  %v1032_v29 = vmul.f32 %v11301_v26, %v12530_v1  ;;  %v1033_v49 = vmul.f32 %v11301_v26, %v16190_v4  ;;  %v1031_v50 = vmul.f32 %v11301_v26, %v16191_v34  ;;  %v16194_v5 = vld [vmem:[#allocation34_spill] sm:$0xff] }
 0x250   : > { %v914_v54 = vadd.f32 1e-05, %v882_v57 }
 0x251   : > { %v1144_v8 = vmul.f32 %v12403_v23, %v1032_v29  ;;  %v1145_v61 = vmul.f32 %v12412_v43, %v1033_v49  ;;  %v1143_v35 = vmul.f32 %v12418_v27, %v1031_v50 }
 0x252   : > { %v11303_v55 = vpop.eup %11302  ;;  %11306 = vrsqrt.f32 %v914_v54 }
 0x253   : > { %v1035_v53 = vmul.f32 %v11303_v55, %v16192_v45  ;;  %v1036_v63 = vmul.f32 %v11303_v55, %v16193_v18  ;;  %v1034_v38 = vmul.f32 %v11303_v55, %v16194_v5  ;;  %v1256_v4 = vadd.f32 %v12408_v56, %v1144_v8 }
 0x254   : > { %v1257_v29 = vadd.f32 %v12416_v41, %v1145_v61  ;;  %v1255_v49 = vadd.f32 %v12429_v11, %v1143_v35 }
 0x255   : > { %v1147_v1 = vmul.f32 %v12403_v23, %v1035_v53  ;;  %v1148_v57 = vmul.f32 %v12412_v43, %v1036_v63  ;;  %v1146_v26 = vmul.f32 %v12418_v27, %v1034_v38 }
 0x257   : > { %v1259_v54 = vadd.f32 %v12408_v56, %v1147_v1  ;;  %v1260_v34 = vadd.f32 %v12416_v41, %v1148_v57  ;;  %v1258_v55 = vadd.f32 %v12429_v11, %v1146_v26 }
 0x259   : > { %v11305_v45 = vpop.eup %11304  ;;  %v13019_v50 = vpack.c.bf16 %v1259_v54, %v1256_v4  ;;  %v13021_v53 = vpack.c.bf16 %v1260_v34, %v1257_v29  ;;  %v13023_v18 = vpack.c.bf16 %v1258_v55, %v1255_v49 }
 0x25a   : > { %v1038_v63 = vmul.f32 %v11305_v45, %v12578_v28  ;;  %v1039_v8 = vmul.f32 %v11305_v45, %v12585_v19  ;;  %v1037_v5 = vmul.f32 %v11305_v45, %v12571_v47  ;;  %v11207_v45 = vld [vmem:[#allocation5 + $0x33c] ss:$24 sps:$4 sm:$0xff]  }
 0x25b   : > { %2351 = vmatprep.mubr.bf16.mxu1 %v13019_v50  ;;  %2545 = vmatmul.mubr.bf16.gmra.mrb[56].mxu0 %v13021_v53 }
 0x25c   : > { %v11307_v35 = vpop.eup %11306  ;;  %2352 = vmatmul.mubr.bf16.gmra.mrb[56].mxu1 %v13023_v18  ;;  %2554 = vmatprep.mubr.bf16.mxu0 %v16113_v51  ;;  %v1150_v61 = vmul.f32 %v12403_v23, %v1038_v63  ;;  %v1151_v38 = vmul.f32 %v12412_v43, %v1039_v8  ;;  %v1149_v47 = vmul.f32 %v12418_v27, %v1037_v5  ;;  %v11202_v63 = vld [vmem:[#allocation5 + $0x340] ss:$24 sps:$4 sm:$0xff]   ;;  %v11210_v5 = vld [vmem:[#allocation5 + $0x374] ss:$24 sps:$4 sm:$0xff]  }
 0x25d   : > { %v1041_v1 = vmul.f32 %v11307_v35, %v12619_v15  ;;  %v1042_v28 = vmul.f32 %v11307_v35, %v12644_v33  ;;  %v1040_v19 = vmul.f32 %v11307_v35, %v12615_v3  ;;  %v16197_v8 = vld [vmem:[#allocation43_spill] sm:$0xff]  ;;  %v11205_v35 = vld [vmem:[#allocation5 + $0x338] ss:$24 sps:$4 sm:$0xff]  }
 0x25e   : > { %v1262_v54 = vadd.f32 %v12408_v56, %v1150_v61  ;;  %v1263_v29 = vadd.f32 %v12416_v41, %v1151_v38  ;;  %v1261_v33 = vadd.f32 %v12429_v11, %v1149_v47  ;;  %v11213_v61 = vld [vmem:[#allocation5 + $0x36c] ss:$24 sps:$4 sm:$0xff]   ;;  %v11208_v38 = vld [vmem:[#allocation5 + $0x370] ss:$24 sps:$4 sm:$0xff]  }
 0x25f   : > { %v1153_v57 = vmul.f32 %v12403_v23, %v1041_v1  ;;  %v1154_v26 = vmul.f32 %v12412_v43, %v1042_v28  ;;  %v1152_v4 = vmul.f32 %v12418_v27, %v1040_v19  ;;  %v16195_v43 = vld [vmem:[#allocation36_spill] sm:$0xff]  ;;  %v11204_v27 = vld [vmem:[#allocation5 + $0x344] ss:$24 sps:$4 sm:$0xff]   ;;  %v16198_v47 = vld [vmem:[#allocation33_spill] sm:$0xff] }
 0x260   : > { %v11211_v28 = vld [vmem:[#allocation5 + $0x368] ss:$24 sps:$4 sm:$0xff]   ;;  %v11216_v19 = vld [vmem:[#allocation5 + $0x3a4] ss:$24 sps:$4 sm:$0xff]  }
 0x261   : > { %v1265_v34 = vadd.f32 %v12408_v56, %v1153_v57  ;;  %v1266_v15 = vadd.f32 %v12416_v41, %v1154_v26  ;;  %v1264_v3 = vadd.f32 %v12429_v11, %v1152_v4  ;;  %v11196_v41 = vld [vmem:[#allocation5 + $0x310] ss:$24 sps:$4 sm:$0xff]   ;;  %v11219_v26 = vld [vmem:[#allocation5 + $0x39c] ss:$24 sps:$4 sm:$0xff]  }
 0x262   : > { %v11199_v56 = vld [vmem:[#allocation5 + $0x308] ss:$24 sps:$4 sm:$0xff]   ;;  %v16196_v11 = vld [vmem:[#allocation57_spill] sm:$0xff]  ;;  %v16199_v4 = vld [vmem:[#allocation62_spill] sm:$0xff] }
 0x263   : > { %v13047_v49 = vpack.c.bf16 %v1265_v34, %v1262_v54  ;;  %v13049_v55 = vpack.c.bf16 %v1266_v15, %v1263_v29  ;;  %v13051_v23 = vpack.c.bf16 %v1264_v3, %v1261_v33  ;;  %v11214_v34 = vld [vmem:[#allocation5 + $0x3a0] ss:$24 sps:$4 sm:$0xff]   ;;  %v11222_v3 = vld [vmem:[#allocation5 + $0x3d4] ss:$24 sps:$4 sm:$0xff]  }
 0x264   : > { %v11217_v33 = vld [vmem:[#allocation5 + $0x398] ss:$24 sps:$4 sm:$0xff]  }
 0x265   : > { %2361 = vmatprep.mubr.bf16.mxu1 %v13047_v49  ;;  %2555 = vmatmul.mubr.bf16.gmra.mrb[60].mxu0 %v13049_v55 }
 0x266   : > { %2362 = vmatmul.mubr.bf16.gmra.mrb[60].mxu1 %v13051_v23  ;;  %2983 = vmatprep.mubr.bf16.mxu0 %v16195_v43 }
 0x267   : > { %2597 = vmatprep.mubr.bf16.mxu1 %v16195_v43 }
 0x26d   : > { %2984 = vmatmul.mubr.bf16.vlgmr.msra.gmra.mrb[64].mxu0 %v16196_v11 }
 0x26e   : > { %3145 = vmatpush1.bf16.msra.mxu0 %v11196_v41  ;;  %2598 = vmatmul.mubr.bf16.vlgmr.msra.gmra.mrb[64].mxu1 %v16196_v11 }
 0x26f   : > { %2993 = vmatprep.mubr.bf16.mxu0 %v16197_v8  ;;  %2607 = vmatprep.mubr.bf16.mxu1 %v16197_v8 }
 0x270   : > { %2759 = vmatpush1.bf16.msra.mxu1 %v11199_v56  ;;  %3146 = vmatprep.subr.bf16.mxu0 %v11204_v27  ;;  %v11225_v56 = vld [vmem:[#allocation5 + $0x3cc] ss:$24 sps:$4 sm:$0xff]  }
 0x271   : > { %2760 = vmatprep.subr.bf16.mxu1 %v11207_v45 }
 0x272   : > { %3147 = vmatpush1.bf16.msra.mxu0 %v11202_v63 }
 0x273   : > { %3148 = vmatprep.subr.bf16.mxu0 %v11210_v5 }
 0x274   : > { %v2406_v1 = vpop.f32.mrb[0].mxu0  ;;  %2761 = vmatpush1.bf16.msra.mxu1 %v11205_v35  ;;  %v11220_v35 = vld [vmem:[#allocation5 + $0x3d0] ss:$24 sps:$4 sm:$0xff]  }
 0x275   : > { %2994 = vmatmul.mubr.bf16.gmra.mrb[68].mxu0 %v16198_v47  ;;  %v2408_v57 = vpop.f32.mrb[1].mxu0  ;;  %2762 = vmatprep.subr.bf16.mxu1 %v11213_v61  ;;  %v11223_v61 = vld [vmem:[#allocation5 + $0x3c8] ss:$24 sps:$4 sm:$0xff]  }
 0x276   : > { %2608 = vmatmul.mubr.bf16.gmra.mrb[68].mxu1 %v16198_v47  ;;  %3003 = vmatprep.mubr.bf16.mxu0 %v16199_v4  ;;  %v2410_v54 = vpop.f32.mrb[2].mxu0  ;;  %v11229_v47 = vld [vmem:[#allocation5 + $0x3f8] ss:$24 sps:$4 sm:$0xff]  }
 0x277   : > { %2617 = vmatprep.mubr.bf16.mxu1 %v16199_v4  ;;  %v2412_v29 = vpop.f32.mrb[3].mxu0  ;;  %3149 = vmatpush1.bf16.msra.mxu0 %v11208_v38  ;;  %v2213_v15 = vpop.f32.mrb[0].mxu1  ;;  %v11228_v38 = vld [vmem:[#allocation5 + $0x404] ss:$24 sps:$4 sm:$0xff]  }
 0x278   : > { %2763 = vmatpush1.bf16.msra.mxu1 %v11211_v28  ;;  %3150 = vmatprep.subr.bf16.mxu0 %v11216_v19  ;;  %v2407_v43 = vadd.f32 %v2406_v1, %v2213_v15  ;;  %v2215_v41 = vpop.f32.mrb[1].mxu1  ;;  %v11231_v28 = vld [vmem:[#allocation5 + $0x3fc] ss:$24 sps:$4 sm:$0xff]   ;;  %v11226_v19 = vld [vmem:[#allocation5 + $0x400] ss:$24 sps:$4 sm:$0xff]  }
 0x279   : > { %2764 = vmatprep.subr.bf16.mxu1 %v11219_v26  ;;  %v2409_v27 = vadd.f32 %v2408_v57, %v2215_v41  ;;  %v2217_v11 = vpop.f32.mrb[2].mxu1  ;;  %v11234_v57 = vld [vmem:[#allocation5 + $0x434] ss:$24 sps:$4 sm:$0xff]   ;;  %v11240_v15 = vld [vmem:[#allocation5 + $0x464] ss:$24 sps:$4 sm:$0xff]  }
 0x27a   : > { %v2411_v45 = vadd.f32 %v2410_v54, %v2217_v11  ;;  %v2219_v63 = vpop.f32.mrb[3].mxu1  ;;  %v11237_v54 = vld [vmem:[#allocation5 + $0x42c] ss:$24 sps:$4 sm:$0xff]   ;;  %v11238_v11 = vld [vmem:[#allocation5 + $0x460] ss:$24 sps:$4 sm:$0xff]  }
 0x27b   : > { %3151 = vmatpush1.bf16.msra.mxu0 %v11214_v34  ;;  %v2413_v8 = vadd.f32 %v2412_v29, %v2219_v63  ;;  %v10692_v5 = vpack.i.bf16 %v2409_v27, %v2407_v43  ;;  %v11235_v34 = vld [vmem:[#allocation5 + $0x428] ss:$24 sps:$4 sm:$0xff]  }
 0x27c   : > { %2765 = vmatpush1.bf16.msra.mxu1 %v11217_v33  ;;  %3152 = vmatprep.subr.bf16.mxu0 %v11222_v3  ;;  %v11243_v33 = vld [vmem:[#allocation5 + $0x45c] ss:$24 sps:$4 sm:$0xff]  }
 0x27d   : > { %3004 = vmatmul.mubr.bf16.gmra.mrb[72].mxu0 %v12658_v17  ;;  %2766 = vmatprep.subr.bf16.mxu1 %v11225_v56  ;;  %v10694_v1 = vpack.i.bf16 %v2413_v8, %v2411_v45  ;;  %v11241_v8 = vld [vmem:[#allocation5 + $0x458] ss:$24 sps:$4 sm:$0xff]  }
 0x27e   : > { %2618 = vmatmul.mubr.bf16.gmra.mrb[72].mxu1 %v12658_v17  ;;  %3013 = vmatprep.mubr.bf16.mxu0 %v12683_v44  ;;  %v11232_v17 = vld [vmem:[#allocation5 + $0x430] ss:$24 sps:$4 sm:$0xff]  }
 0x27f   : > { %2627 = vmatprep.mubr.bf16.mxu1 %v12683_v44  ;;  %10693 = vxpose.xlu0.b32.start [1/16] %v10692_v5, 128 }
 0x280   : > { %3153 = vmatpush1.bf16.msra.mxu0 %v11220_v35  ;;  %2767 = vmatpush1.bf16.msra.mxu1 %v11223_v61 }
 0x281   : > { %3154 = vmatprep.subr.bf16.mxu0 %v11228_v38  ;;  %2768 = vmatprep.subr.bf16.mxu1 %v11231_v28 }
 0x282   : > { %v2416_v26 = vpop.f32.mrb[4].mxu0 }
 0x283   : > { %v2418_v4 = vpop.f32.mrb[5].mxu0  ;;  %10695 = vxpose.xlu0.b32.cont [2/16] %v10694_v1, 128 }
 0x284   : > { %v2420_v29 = vpop.f32.mrb[6].mxu0  ;;  %3155 = vmatpush1.bf16.msra.mxu0 %v11226_v19  ;;  %2769 = vmatpush1.bf16.msra.mxu1 %v11229_v47 }
 0x285   : > { %3014 = vmatmul.mubr.bf16.gmra.mrb[76].mxu0 %v12699_v10  ;;  %v2422_v44 = vpop.f32.mrb[7].mxu0  ;;  %3156 = vmatprep.subr.bf16.mxu0 %v11234_v57 }
 0x286   : > { %v2223_v3 = vpop.f32.mrb[4].mxu1  ;;  %2628 = vmatmul.mubr.bf16.gmra.mrb[76].mxu1 %v12699_v10  ;;  %3023 = vmatprep.mubr.bf16.mxu0 %v12721_v32 }
 0x287   : > { %v2417_v43 = vadd.f32 %v2416_v26, %v2223_v3  ;;  %v2225_v41 = vpop.f32.mrb[5].mxu1  ;;  %2637 = vmatprep.mubr.bf16.mxu1 %v12721_v32  ;;  %2770 = vmatprep.subr.bf16.mxu1 %v11237_v54 }
 0x288   : > { %v2419_v56 = vadd.f32 %v2418_v4, %v2225_v41  ;;  %v2227_v27 = vpop.f32.mrb[6].mxu1  ;;  %3157 = vmatpush1.bf16.msra.mxu0 %v11232_v17  ;;  %2771 = vmatpush1.bf16.msra.mxu1 %v11235_v34 }
 0x289   : > { %v2421_v45 = vadd.f32 %v2420_v29, %v2227_v27  ;;  %v2229_v63 = vpop.f32.mrb[7].mxu1  ;;  %3158 = vmatprep.subr.bf16.mxu0 %v11240_v15  ;;  %2772 = vmatprep.subr.bf16.mxu1 %v11243_v33 }
 0x28a   : > { %v10696_v5 = vpack.i.bf16 %v2419_v56, %v2417_v43  ;;  %v2423_v35 = vadd.f32 %v2422_v44, %v2229_v63 }
 0x28c   : > { %v10698_v10 = vpack.i.bf16 %v2423_v35, %v2421_v45  ;;  %10697 = vxpose.xlu0.b32.cont [3/16] %v10696_v5, 128  ;;  %3159 = vmatpush1.bf16.msra.mxu0 %v11238_v11 }
 0x28d   : > { %v2426_v61 = vpop.f32.mrb[8].mxu0  ;;  %3024 = vmatmul.mubr.bf16.gmra.mrb[80].mxu0 %v12735_v59  ;;  %2773 = vmatpush1.bf16.msra.mxu1 %v11241_v8 }
 0x28e   : > { %v2428_v32 = vpop.f32.mrb[9].mxu0  ;;  %2638 = vmatmul.mubr.bf16.gmra.mrb[80].mxu1 %v12735_v59  ;;  %3033 = vmatprep.mubr.bf16.mxu0 %v12753_v60 }
 0x28f   : > { %v2430_v38 = vpop.f32.mrb[10].mxu0  ;;  %2647 = vmatprep.mubr.bf16.mxu1 %v12753_v60 }
 0x290   : > { %v2432_v28 = vpop.f32.mrb[11].mxu0  ;;  %10699 = vxpose.xlu0.b32.cont [4/16] %v10698_v10, 128 }
 0x291   : > { %v2233_v1 = vpop.f32.mrb[8].mxu1 }
 0x292   : > { %v2427_v19 = vadd.f32 %v2426_v61, %v2233_v1  ;;  %v2235_v47 = vpop.f32.mrb[9].mxu1 }
 0x293   : > { %v2429_v57 = vadd.f32 %v2428_v32, %v2235_v47  ;;  %v2237_v26 = vpop.f32.mrb[10].mxu1 }
 0x294   : > { %v2431_v4 = vadd.f32 %v2430_v38, %v2237_v26  ;;  %v2239_v54 = vpop.f32.mrb[11].mxu1 }
 0x295   : > { %v10700_v29 = vpack.i.bf16 %v2429_v57, %v2427_v19  ;;  %v2433_v17 = vadd.f32 %v2432_v28, %v2239_v54  ;;  %3034 = vmatmul.mubr.bf16.gmra.mrb[84].mxu0 %v12769_v31 }
 0x296   : > { %2648 = vmatmul.mubr.bf16.gmra.mrb[84].mxu1 %v12769_v31  ;;  %3043 = vmatprep.mubr.bf16.mxu0 %v12780_v20 }
 0x297   : > { %v10702_v59 = vpack.i.bf16 %v2433_v17, %v2431_v4  ;;  %10701 = vxpose.xlu0.b32.cont [5/16] %v10700_v29, 128  ;;  %2657 = vmatprep.mubr.bf16.mxu1 %v12780_v20 }
 0x298   : > { %v2436_v60 = vpop.f32.mrb[12].mxu0 }
 0x299   : > { %v2438_v34 = vpop.f32.mrb[13].mxu0 }
 0x29a   : > { %v2440_v44 = vpop.f32.mrb[14].mxu0 }
 0x29b   : > { %v2243_v15 = vpop.f32.mrb[12].mxu1  ;;  %v2442_v33 = vpop.f32.mrb[15].mxu0  ;;  %10703 = vxpose.xlu0.b32.cont [6/16] %v10702_v59, 128 }
 0x29c   : > { %v2437_v3 = vadd.f32 %v2436_v60, %v2243_v15  ;;  %v2245_v43 = vpop.f32.mrb[13].mxu1 }
 0x29d   : > { %v2439_v41 = vadd.f32 %v2438_v34, %v2245_v43  ;;  %v2247_v56 = vpop.f32.mrb[14].mxu1  ;;  %3044 = vmatmul.mubr.bf16.gmra.mrb[88].mxu0 %v12810_v40 }
 0x29e   : > { %v2441_v27 = vadd.f32 %v2440_v44, %v2247_v56  ;;  %v2249_v31 = vpop.f32.mrb[15].mxu1  ;;  %2658 = vmatmul.mubr.bf16.gmra.mrb[88].mxu1 %v12810_v40  ;;  %3053 = vmatprep.mubr.bf16.mxu0 %v12814_v16 }
 0x29f   : > { %v10704_v11 = vpack.i.bf16 %v2439_v41, %v2437_v3  ;;  %v2443_v20 = vadd.f32 %v2442_v33, %v2249_v31  ;;  %2667 = vmatprep.mubr.bf16.mxu1 %v12814_v16 }
 0x2a0   : > { %v2446_v63 = vpop.f32.mrb[16].mxu0 }
 0x2a1   : > { %v10706_v45 = vpack.i.bf16 %v2443_v20, %v2441_v27  ;;  %10705 = vxpose.xlu0.b32.cont [7/16] %v10704_v11, 128  ;;  %v2448_v8 = vpop.f32.mrb[17].mxu0 }
 0x2a2   : > { %v2450_v35 = vpop.f32.mrb[18].mxu0 }
 0x2a3   : > { %v2253_v5 = vpop.f32.mrb[16].mxu1  ;;  %v2452_v32 = vpop.f32.mrb[19].mxu0 }
 0x2a4   : > { %v2447_v10 = vadd.f32 %v2446_v63, %v2253_v5  ;;  %v2255_v61 = vpop.f32.mrb[17].mxu1 }
 0x2a5   : > { %v2449_v38 = vadd.f32 %v2448_v8, %v2255_v61  ;;  %v2257_v28 = vpop.f32.mrb[18].mxu1  ;;  %10707 = vxpose.xlu0.b32.cont [8/16] %v10706_v45, 128  ;;  %3054 = vmatmul.mubr.bf16.gmra.mrb[92].mxu0 %v12843_v9 }
 0x2a6   : > { %v2451_v40 = vadd.f32 %v2450_v35, %v2257_v28  ;;  %v2259_v1 = vpop.f32.mrb[19].mxu1  ;;  %2668 = vmatmul.mubr.bf16.gmra.mrb[92].mxu1 %v12843_v9  ;;  %3063 = vmatprep.mubr.bf16.mxu0 %v12846_v48 }
 0x2a7   : > { %v10708_v16 = vpack.i.bf16 %v2449_v38, %v2447_v10  ;;  %v2453_v19 = vadd.f32 %v2452_v32, %v2259_v1  ;;  %2677 = vmatprep.mubr.bf16.mxu1 %v12846_v48 }
 0x2a8   : > { %v2456_v57 = vpop.f32.mrb[20].mxu0 }
 0x2a9   : > { %v10710_v47 = vpack.i.bf16 %v2453_v19, %v2451_v40  ;;  %10709 = vxpose.xlu0.b32.cont [9/16] %v10708_v16, 128  ;;  %v2458_v26 = vpop.f32.mrb[21].mxu0 }
 0x2aa   : > { %v2460_v54 = vpop.f32.mrb[22].mxu0 }
 0x2ab   : > { %v2263_v4 = vpop.f32.mrb[20].mxu1  ;;  %v2462_v59 = vpop.f32.mrb[23].mxu0 }
 0x2ac   : > { %v2457_v29 = vadd.f32 %v2456_v57, %v2263_v4  ;;  %v2265_v17 = vpop.f32.mrb[21].mxu1 }
 0x2ad   : > { %v2459_v60 = vadd.f32 %v2458_v26, %v2265_v17  ;;  %10711 = vxpose.xlu0.b32.cont [10/16] %v10710_v47, 128  ;;  %v2267_v34 = vpop.f32.mrb[22].mxu1  ;;  %3064 = vmatmul.mubr.bf16.gmra.mrb[96].mxu0 %v12870_v36 }
 0x2ae   : > { %v2461_v9 = vadd.f32 %v2460_v54, %v2267_v34  ;;  %v2269_v44 = vpop.f32.mrb[23].mxu1  ;;  %2678 = vmatmul.mubr.bf16.gmra.mrb[96].mxu1 %v12870_v36  ;;  %3073 = vmatprep.mubr.bf16.mxu0 %v12874_v7 }
 0x2af   : > { %v10712_v48 = vpack.i.bf16 %v2459_v60, %v2457_v29  ;;  %v2463_v15 = vadd.f32 %v2462_v59, %v2269_v44  ;;  %2687 = vmatprep.mubr.bf16.mxu1 %v12874_v7 }
 0x2b0   : > { %v2466_v3 = vpop.f32.mrb[24].mxu0 }
 0x2b1   : > { %v10714_v33 = vpack.i.bf16 %v2463_v15, %v2461_v9  ;;  %10713 = vxpose.xlu0.b32.cont [11/16] %v10712_v48, 128  ;;  %v2468_v43 = vpop.f32.mrb[25].mxu0 }
 0x2b2   : > { %v2470_v56 = vpop.f32.mrb[26].mxu0 }
 0x2b3   : > { %v2273_v41 = vpop.f32.mrb[24].mxu1  ;;  %v2472_v11 = vpop.f32.mrb[27].mxu0 }
 0x2b4   : > { %v2467_v27 = vadd.f32 %v2466_v3, %v2273_v41  ;;  %v2275_v31 = vpop.f32.mrb[25].mxu1 }
 0x2b5   : > { %v2469_v20 = vadd.f32 %v2468_v43, %v2275_v31  ;;  %10715 = vxpose.xlu0.b32.cont [12/16] %v10714_v33, 128  ;;  %v2277_v45 = vpop.f32.mrb[26].mxu1  ;;  %3074 = vmatmul.mubr.bf16.gmra.mrb[100].mxu0 %v12896_v39 }
 0x2b6   : > { %v2471_v36 = vadd.f32 %v2470_v56, %v2277_v45  ;;  %v2279_v63 = vpop.f32.mrb[27].mxu1  ;;  %2688 = vmatmul.mubr.bf16.gmra.mrb[100].mxu1 %v12896_v39  ;;  %3083 = vmatprep.mubr.bf16.mxu0 %v12900_v22 }
 0x2b7   : > { %v10716_v7 = vpack.i.bf16 %v2469_v20, %v2467_v27  ;;  %v2473_v8 = vadd.f32 %v2472_v11, %v2279_v63  ;;  %2697 = vmatprep.mubr.bf16.mxu1 %v12900_v22 }
 0x2b8   : > { %v2476_v35 = vpop.f32.mrb[28].mxu0 }
 0x2b9   : > { %v10718_v5 = vpack.i.bf16 %v2473_v8, %v2471_v36  ;;  %10717 = vxpose.xlu0.b32.cont [13/16] %v10716_v7, 128  ;;  %v2478_v10 = vpop.f32.mrb[29].mxu0 }
 0x2ba   : > { %v2480_v32 = vpop.f32.mrb[30].mxu0 }
 0x2bb   : > { %v2283_v61 = vpop.f32.mrb[28].mxu1  ;;  %v2482_v40 = vpop.f32.mrb[31].mxu0 }
 0x2bc   : > { %v2477_v38 = vadd.f32 %v2476_v35, %v2283_v61  ;;  %v2285_v28 = vpop.f32.mrb[29].mxu1 }
 0x2bd   : > { %v2479_v1 = vadd.f32 %v2478_v10, %v2285_v28  ;;  %10719 = vxpose.xlu0.b32.cont [14/16] %v10718_v5, 128  ;;  %v2287_v16 = vpop.f32.mrb[30].mxu1  ;;  %3084 = vmatmul.mubr.bf16.gmra.mrb[104].mxu0 %v12913_v46 }
 0x2be   : > { %v2481_v39 = vadd.f32 %v2480_v32, %v2287_v16  ;;  %v2289_v19 = vpop.f32.mrb[31].mxu1  ;;  %2698 = vmatmul.mubr.bf16.gmra.mrb[104].mxu1 %v12913_v46  ;;  %3093 = vmatprep.mubr.bf16.mxu0 %v12938_v52 }
 0x2bf   : > { %v10720_v22 = vpack.i.bf16 %v2479_v1, %v2477_v38  ;;  %v2483_v47 = vadd.f32 %v2482_v40, %v2289_v19  ;;  %2707 = vmatprep.mubr.bf16.mxu1 %v12938_v52 }
 0x2c0   : > { %v2486_v26 = vpop.f32.mrb[32].mxu0 }
 0x2c1   : > { %v10722_v57 = vpack.i.bf16 %v2483_v47, %v2481_v39  ;;  %10721 = vxpose.xlu0.b32.cont [15/16] %v10720_v22, 128  ;;  %v2488_v4 = vpop.f32.mrb[33].mxu0 }
 0x2c2   : > { %v2490_v29 = vpop.f32.mrb[34].mxu0 }
 0x2c3   : > { %v2293_v54 = vpop.f32.mrb[32].mxu1  ;;  %v2492_v60 = vpop.f32.mrb[35].mxu0 }
 0x2c4   : > { %v13102_v17 = vadd.f32 %v2486_v26, %v2293_v54  ;;  %v2295_v59 = vpop.f32.mrb[33].mxu1 }
 0x2c5   : > { %v13104_v34 = vadd.f32 %v2488_v4, %v2295_v59  ;;  %10723 = vxpose.xlu0.b32.end [16/16] %v10722_v57, 128  ;;  %v2297_v46 = vpop.f32.mrb[34].mxu1  ;;  %3094 = vmatmul.mubr.bf16.gmra.mrb[108].mxu0 %v12942_v12 }
 0x2c6   : > { %v13107_v9 = vadd.f32 %v2490_v29, %v2297_v46  ;;  %v2299_v44 = vpop.f32.mrb[35].mxu1  ;;  %2708 = vmatmul.mubr.bf16.gmra.mrb[108].mxu1 %v12942_v12  ;;  %3103 = vmatprep.mubr.bf16.mxu0 %v12963_v62 }
 0x2c7   : > { %16200 = vst [vmem:[#allocation66_spill] sm:$0xff] %v13104_v34  ;;  %v13111_v52 = vadd.f32 %v2492_v60, %v2299_v44  ;;  %2717 = vmatprep.mubr.bf16.mxu1 %v12963_v62 }
 0x2c8   : > { %v2496_v48 = vpop.f32.mrb[36].mxu0 }
 0x2c9   : > { %16201 = vst [vmem:[#allocation45_spill] sm:$0xff] %v13111_v52  ;;  %v2498_v15 = vpop.f32.mrb[37].mxu0 }
 0x2ca   : > { %v2500_v3 = vpop.f32.mrb[38].mxu0 }
 0x2cb   : > { %v2303_v33 = vpop.f32.mrb[36].mxu1  ;;  %v2502_v56 = vpop.f32.mrb[39].mxu0 }
 0x2cc   : > { %v13114_v43 = vadd.f32 %v2496_v48, %v2303_v33  ;;  %v2305_v41 = vpop.f32.mrb[37].mxu1 }
 0x2cd   : > { %v13116_v27 = vadd.f32 %v2498_v15, %v2305_v41  ;;  %v2307_v31 = vpop.f32.mrb[38].mxu1  ;;  %3104 = vmatmul.mubr.bf16.gmra.mrb[112].mxu0 %v12967_v25 }
 0x2ce   : > { %16202 = vst [vmem:[#allocation55_spill] sm:$0xff] %v13114_v43  ;;  %v13119_v12 = vadd.f32 %v2500_v3, %v2307_v31  ;;  %v2309_v11 = vpop.f32.mrb[39].mxu1  ;;  %2718 = vmatmul.mubr.bf16.gmra.mrb[112].mxu1 %v12967_v25  ;;  %3113 = vmatprep.mubr.bf16.mxu0 %v12991_v6 }
 0x2cf   : > { %16203 = vst [vmem:[#allocation52_spill] sm:$0xff] %v13116_v27  ;;  %v13123_v62 = vadd.f32 %v2502_v56, %v2309_v11  ;;  %2727 = vmatprep.mubr.bf16.mxu1 %v12991_v6 }
 0x2d0   : > { %16204 = vst [vmem:[#allocation63_spill] sm:$0xff] %v13119_v12  ;;  %v2506_v20 = vpop.f32.mrb[40].mxu0 }
 0x2d1   : > { %16205 = vst [vmem:[#allocation44_spill] sm:$0xff] %v13123_v62  ;;  %v2508_v45 = vpop.f32.mrb[41].mxu0 }
 0x2d2   : > { %v2510_v63 = vpop.f32.mrb[42].mxu0 }
 0x2d3   : > { %v2313_v36 = vpop.f32.mrb[40].mxu1  ;;  %v2512_v5 = vpop.f32.mrb[43].mxu0 }
 0x2d4   : > { %v13126_v7 = vadd.f32 %v2506_v20, %v2313_v36  ;;  %v2315_v8 = vpop.f32.mrb[41].mxu1 }
 0x2d5   : > { %v13128_v35 = vadd.f32 %v2508_v45, %v2315_v8  ;;  %v2317_v10 = vpop.f32.mrb[42].mxu1  ;;  %3114 = vmatmul.mubr.bf16.gmra.mrb[116].mxu0 %v12995_v14 }
 0x2d6   : > { %16206 = vst [vmem:[#allocation54_spill] sm:$0xff] %v13126_v7  ;;  %v13131_v25 = vadd.f32 %v2510_v63, %v2317_v10  ;;  %v2319_v61 = vpop.f32.mrb[43].mxu1  ;;  %2728 = vmatmul.mubr.bf16.gmra.mrb[116].mxu1 %v12995_v14  ;;  %3123 = vmatprep.mubr.bf16.mxu0 %v13019_v50  ;;  %v16210_v14 = vld [vmem:[#allocation50_spill] sm:$0xff] }
 0x2d7   : > { %16207 = vst [vmem:[#allocation59_spill] sm:$0xff] %v13128_v35  ;;  %v13135_v6 = vadd.f32 %v2512_v5, %v2319_v61  ;;  %2737 = vmatprep.mubr.bf16.mxu1 %v13019_v50  ;;  %v16211_v50 = vld [vmem:[#allocation47_spill] sm:$0xff] }
 0x2d8   : > { %16208 = vst [vmem:[#allocation67_spill] sm:$0xff] %v13131_v25 }
 0x2d9   : > { %16209 = vst [vmem:[#allocation58_spill] sm:$0xff] %v13135_v6 }
 0x2dd   : > { %3124 = vmatmul.mubr.bf16.gmra.mrb[120].mxu0 %v13023_v18 }
 0x2de   : > { %2738 = vmatmul.mubr.bf16.gmra.mrb[120].mxu1 %v13023_v18  ;;  %3133 = vmatprep.mubr.bf16.mxu0 %v13047_v49  ;;  %v16212_v18 = vld [vmem:[#allocation42_spill] sm:$0xff] }
 0x2df   : > { %2747 = vmatprep.mubr.bf16.mxu1 %v13047_v49 }
 0x2e5   : > { %3134 = vmatmul.mubr.bf16.gmra.mrb[124].mxu0 %v13051_v23 }
 0x2e6   : > { %2748 = vmatmul.mubr.bf16.gmra.mrb[124].mxu1 %v13051_v23  ;;  %3176 = vmatprep.mubr.bf16.mxu0 %v16113_v51 }
 0x2e7   : > { %2790 = vmatprep.mubr.bf16.mxu1 %v16113_v51 }
 0x2ed   : > { %3177 = vmatmul.mubr.bf16.vlgmr.msra.gmra.mrb[64].mxu0 %v16210_v14 }
 0x2ee   : > { %2791 = vmatmul.mubr.bf16.vlgmr.msra.gmra.mrb[64].mxu1 %v16210_v14  ;;  %3186 = vmatprep.mubr.bf16.mxu0 %v16113_v51 }
 0x2ef   : > { %2800 = vmatprep.mubr.bf16.mxu1 %v16113_v51 }
 0x2f5   : > { %3187 = vmatmul.mubr.bf16.gmra.mrb[68].mxu0 %v16211_v50 }
 0x2f6   : > { %2801 = vmatmul.mubr.bf16.gmra.mrb[68].mxu1 %v16211_v50  ;;  %3196 = vmatprep.mubr.bf16.mxu0 %v16113_v51 }
 0x2f7   : > { %2810 = vmatprep.mubr.bf16.mxu1 %v16113_v51 }
 0x2fd   : > { %3197 = vmatmul.mubr.bf16.gmra.mrb[72].mxu0 %v16212_v18 }
 0x2fe   : > { %2811 = vmatmul.mubr.bf16.gmra.mrb[72].mxu1 %v16212_v18  ;;  %3206 = vmatprep.mubr.bf16.mxu0 %v16113_v51 }
 0x2ff   : > { %2820 = vmatprep.mubr.bf16.mxu1 %v16113_v51 }
 0x305   : > { %3207 = vmatmul.mubr.bf16.gmra.mrb[76].mxu0 %v12685_v21 }
 0x306   : > { %2821 = vmatmul.mubr.bf16.gmra.mrb[76].mxu1 %v12685_v21  ;;  %3216 = vmatprep.mubr.bf16.mxu0 %v16113_v51 }
 0x307   : > { %2830 = vmatprep.mubr.bf16.mxu1 %v16113_v51 }
 0x30d   : > { %3217 = vmatmul.mubr.bf16.gmra.mrb[80].mxu0 %v12724_v24 }
 0x30e   : > { %2831 = vmatmul.mubr.bf16.gmra.mrb[80].mxu1 %v12724_v24  ;;  %3226 = vmatprep.mubr.bf16.mxu0 %v16113_v51  ;;  %v2516_v49 = vpop.f32.mrb[44].mxu0 }
 0x30f   : > { %2840 = vmatprep.mubr.bf16.mxu1 %v16113_v51  ;;  %v2323_v23 = vpop.f32.mrb[44].mxu1  ;;  %v2518_v32 = vpop.f32.mrb[45].mxu0 }
 0x310   : > { %v13166_v38 = vadd.f32 %v2516_v49, %v2323_v23  ;;  %v2325_v28 = vpop.f32.mrb[45].mxu1  ;;  %v2520_v40 = vpop.f32.mrb[46].mxu0 }
 0x311   : > { %v13168_v21 = vadd.f32 %v2518_v32, %v2325_v28  ;;  %v2327_v1 = vpop.f32.mrb[46].mxu1  ;;  %v2522_v16 = vpop.f32.mrb[47].mxu0 }
 0x312   : > { %16213 = vst [vmem:[#allocation68_spill] sm:$0xff] %v13166_v38  ;;  %v13170_v39 = vadd.f32 %v2520_v40, %v2327_v1  ;;  %v2329_v19 = vpop.f32.mrb[47].mxu1 }
 0x313   : > { %16214 = vst [vmem:[#allocation71_spill] sm:$0xff] %v13168_v21  ;;  %v13172_v22 = vadd.f32 %v2522_v16, %v2329_v19 }
 0x314   : > { %16215 = vst [vmem:[#allocation72_spill] sm:$0xff] %v13170_v39 }
 0x315   : > { %16216 = vst [vmem:[#allocation69_spill] sm:$0xff] %v13172_v22  ;;  %3227 = vmatmul.mubr.bf16.gmra.mrb[84].mxu0 %v12765_v13 }
 0x316   : > { %2841 = vmatmul.mubr.bf16.gmra.mrb[84].mxu1 %v12765_v13  ;;  %3236 = vmatprep.mubr.bf16.mxu0 %v16113_v51  ;;  %v2526_v24 = vpop.f32.mrb[48].mxu0 }
 0x317   : > { %2850 = vmatprep.mubr.bf16.mxu1 %v16113_v51  ;;  %v2333_v47 = vpop.f32.mrb[48].mxu1  ;;  %v2528_v57 = vpop.f32.mrb[49].mxu0 }
 0x318   : > { %v13178_v26 = vadd.f32 %v2526_v24, %v2333_v47  ;;  %v2335_v4 = vpop.f32.mrb[49].mxu1  ;;  %v2530_v54 = vpop.f32.mrb[50].mxu0 }
 0x319   : > { %v13180_v29 = vadd.f32 %v2528_v57, %v2335_v4  ;;  %v2337_v59 = vpop.f32.mrb[50].mxu1  ;;  %v2532_v60 = vpop.f32.mrb[51].mxu0 }
 0x31a   : > { %16217 = vst [vmem:[#allocation70_spill] sm:$0xff] %v13178_v26  ;;  %v13182_v46 = vadd.f32 %v2530_v54, %v2337_v59  ;;  %v2339_v44 = vpop.f32.mrb[51].mxu1 }
 0x31b   : > { %16218 = vst [vmem:[#allocation73_spill] sm:$0xff] %v13180_v29  ;;  %v13184_v48 = vadd.f32 %v2532_v60, %v2339_v44 }
 0x31c   : > { %16219 = vst [vmem:[#allocation77_spill] sm:$0xff] %v13182_v46 }
 0x31d   : > { %3237 = vmatmul.mubr.bf16.gmra.mrb[88].mxu0 %v12800_v42 }
 0x31e   : > { %2851 = vmatmul.mubr.bf16.gmra.mrb[88].mxu1 %v12800_v42  ;;  %3246 = vmatprep.mubr.bf16.mxu0 %v16113_v51 }
 0x31f   : > { %2860 = vmatprep.mubr.bf16.mxu1 %v16113_v51 }
 0x321   : > { %v2536_v13 = vpop.f32.mrb[52].mxu0 }
 0x322   : > { %v2343_v15 = vpop.f32.mrb[52].mxu1  ;;  %v2538_v33 = vpop.f32.mrb[53].mxu0 }
 0x323   : > { %v13190_v3 = vadd.f32 %v2536_v13, %v2343_v15  ;;  %v2345_v41 = vpop.f32.mrb[53].mxu1  ;;  %v2540_v56 = vpop.f32.mrb[54].mxu0 }
 0x324   : > { %v13192_v31 = vadd.f32 %v2538_v33, %v2345_v41  ;;  %v2347_v11 = vpop.f32.mrb[54].mxu1  ;;  %v2542_v20 = vpop.f32.mrb[55].mxu0 }
 0x325   : > { %16220 = vst [vmem:[#allocation76_spill] sm:$0xff] %v13190_v3  ;;  %3247 = vmatmul.mubr.bf16.gmra.mrb[92].mxu0 %v12833_v58  ;;  %v13195_v45 = vadd.f32 %v2540_v56, %v2347_v11  ;;  %v2349_v42 = vpop.f32.mrb[55].mxu1 }
 0x326   : > { %2861 = vmatmul.mubr.bf16.gmra.mrb[92].mxu1 %v12833_v58  ;;  %v13198_v36 = vadd.f32 %v2542_v20, %v2349_v42  ;;  %3256 = vmatprep.mubr.bf16.mxu0 %v16113_v51 }
 0x327   : > { %16221 = vst [vmem:[#allocation74_spill] sm:$0xff] %v13195_v45  ;;  %2870 = vmatprep.mubr.bf16.mxu1 %v16113_v51 }
 0x32d   : > { %3257 = vmatmul.mubr.bf16.gmra.mrb[96].mxu0 %v12862_v30 }
 0x32e   : > { %2871 = vmatmul.mubr.bf16.gmra.mrb[96].mxu1 %v12862_v30  ;;  %v2546_v63 = vpop.f32.mrb[56].mxu0  ;;  %3266 = vmatprep.mubr.bf16.mxu0 %v16113_v51 }
 0x32f   : > { %v2353_v8 = vpop.f32.mrb[56].mxu1  ;;  %v2548_v5 = vpop.f32.mrb[57].mxu0  ;;  %2880 = vmatprep.mubr.bf16.mxu1 %v16113_v51 }
 0x330   : > { %v13206_v10 = vadd.f32 %v2546_v63, %v2353_v8  ;;  %v2355_v58 = vpop.f32.mrb[57].mxu1  ;;  %v2550_v61 = vpop.f32.mrb[58].mxu0 }
 0x331   : > { %v13208_v14 = vadd.f32 %v2548_v5, %v2355_v58  ;;  %v2357_v50 = vpop.f32.mrb[58].mxu1  ;;  %v2552_v18 = vpop.f32.mrb[59].mxu0 }
 0x332   : > { %16222 = vst [vmem:[#allocation75_spill] sm:$0xff] %v13206_v10  ;;  %v13210_v49 = vadd.f32 %v2550_v61, %v2357_v50  ;;  %v2359_v23 = vpop.f32.mrb[59].mxu1 }
 0x333   : > { %16223 = vst [vmem:[#allocation79_spill] sm:$0xff] %v13208_v14  ;;  %v13212_v32 = vadd.f32 %v2552_v18, %v2359_v23 }
 0x334   : > { %16224 = vst [vmem:[#allocation12_spill] sm:$0xff] %v13210_v49 }
 0x335   : > { %16225 = vst [vmem:[#allocation11_spill] sm:$0xff] %v13212_v32  ;;  %3267 = vmatmul.mubr.bf16.gmra.mrb[100].mxu0 %v12889_v0 }
 0x336   : > { %2881 = vmatmul.mubr.bf16.gmra.mrb[100].mxu1 %v12889_v0  ;;  %3276 = vmatprep.mubr.bf16.mxu0 %v16113_v51  ;;  %v16230_v0 = vld [vmem:[#allocation64_spill] sm:$0xff] }
 0x337   : > { %2890 = vmatprep.mubr.bf16.mxu1 %v16113_v51 }
 0x338   : > { %v2556_v30 = vpop.f32.mrb[60].mxu0 }
 0x339   : > { %v2363_v28 = vpop.f32.mrb[60].mxu1  ;;  %v2558_v40 = vpop.f32.mrb[61].mxu0 }
 0x33a   : > { %v13218_v1 = vadd.f32 %v2556_v30, %v2363_v28  ;;  %v2365_v16 = vpop.f32.mrb[61].mxu1  ;;  %v2560_v19 = vpop.f32.mrb[62].mxu0 }
 0x33b   : > { %v13220_v24 = vadd.f32 %v2558_v40, %v2365_v16  ;;  %v2367_v47 = vpop.f32.mrb[62].mxu1  ;;  %v2562_v57 = vpop.f32.mrb[63].mxu0 }
 0x33c   : > { %16226 = vst [vmem:[#allocation78_spill] sm:$0xff] %v13218_v1  ;;  %v13222_v4 = vadd.f32 %v2560_v19, %v2367_v47  ;;  %v2369_v54 = vpop.f32.mrb[63].mxu1 }
 0x33d   : > { %16227 = vst [vmem:[#allocation15_spill] sm:$0xff] %v13220_v24  ;;  %v13224_v59 = vadd.f32 %v2562_v57, %v2369_v54  ;;  %3277 = vmatmul.mubr.bf16.gmra.mrb[104].mxu0 %v12909_v37 }
 0x33e   : > { %16228 = vst [vmem:[#allocation14_spill] sm:$0xff] %v13222_v4  ;;  %2891 = vmatmul.mubr.bf16.gmra.mrb[104].mxu1 %v12909_v37  ;;  %3286 = vmatprep.mubr.bf16.mxu0 %v16113_v51  ;;  %v16231_v37 = vld [vmem:[#allocation65_spill] sm:$0xff] }
 0x33f   : > { %16229 = vst [vmem:[#allocation17_spill] sm:$0xff] %v13224_v59  ;;  %2900 = vmatprep.mubr.bf16.mxu1 %v16113_v51 }
 0x345   : > { %3287 = vmatmul.mubr.bf16.gmra.mrb[108].mxu0 %v12940_v2 }
 0x346   : > { %2901 = vmatmul.mubr.bf16.gmra.mrb[108].mxu1 %v12940_v2  ;;  %3296 = vmatprep.mubr.bf16.mxu0 %v16113_v51  ;;  %v13248_v2 = vpop.trf.xlu0 }
 0x347   : > { %2910 = vmatprep.mubr.bf16.mxu1 %v16113_v51  ;;  %16232 = vst [vmem:[#allocation16_spill] sm:$0xff] %v13248_v2  ;;  %v16319_v2 = vld [vmem:[#allocation63_spill] sm:$0xff] }
 0x34a   : > { %v13250_v60 = vpop.trf.xlu0 }
 0x34b   : > { %16233 = vst [vmem:[#allocation21_spill] sm:$0xff] %v13250_v60 }
 0x34d   : > { %3297 = vmatmul.mubr.bf16.gmra.mrb[112].mxu0 %v16230_v0 }
 0x34e   : > { %2911 = vmatmul.mubr.bf16.gmra.mrb[112].mxu1 %v16230_v0  ;;  %3306 = vmatprep.mubr.bf16.mxu0 %v16113_v51  ;;  %v13252_v44 = vpop.trf.xlu0 }
 0x34f   : > { %2920 = vmatprep.mubr.bf16.mxu1 %v16113_v51  ;;  %16234 = vst [vmem:[#allocation13_spill] sm:$0xff] %v13252_v44  ;;  %v16313_v44 = vld [vmem:[#allocation11_spill] sm:$0xff] }
 0x352   : > { %v13254_v13 = vpop.trf.xlu0 }
 0x353   : > { %16235 = vst [vmem:[#allocation18_spill] sm:$0xff] %v13254_v13 }
 0x355   : > { %3307 = vmatmul.mubr.bf16.gmra.mrb[116].mxu0 %v16231_v37 }
 0x356   : > { %2921 = vmatmul.mubr.bf16.gmra.mrb[116].mxu1 %v16231_v37  ;;  %3316 = vmatprep.mubr.bf16.mxu0 %v16113_v51  ;;  %v13256_v15 = vpop.trf.xlu0 }
 0x357   : > { %2930 = vmatprep.mubr.bf16.mxu1 %v16113_v51  ;;  %16236 = vst [vmem:[#allocation23_spill] sm:$0xff] %v13256_v15 }
 0x35a   : > { %v13258_v33 = vpop.trf.xlu0 }
 0x35b   : > { %16237 = vst [vmem:[#allocation22_spill] sm:$0xff] %v13258_v33 }
 0x35d   : > { %3317 = vmatmul.mubr.bf16.gmra.mrb[120].mxu0 %v13021_v53 }
 0x35e   : > { %2931 = vmatmul.mubr.bf16.gmra.mrb[120].mxu1 %v13021_v53  ;;  %3326 = vmatprep.mubr.bf16.mxu0 %v16113_v51  ;;  %v13260_v53 = vpop.trf.xlu0 }
 0x35f   : > { %2940 = vmatprep.mubr.bf16.mxu1 %v16113_v51  ;;  %16238 = vst [vmem:[#allocation20_spill] sm:$0xff] %v13260_v53 }
 0x362   : > { %v13262_v41 = vpop.trf.xlu0 }
 0x363   : > { %16239 = vst [vmem:[#allocation19_spill] sm:$0xff] %v13262_v41 }
 0x365   : > { %3327 = vmatmul.mubr.bf16.gmra.mrb[124].mxu0 %v13049_v55 }
 0x366   : > { %2941 = vmatmul.mubr.bf16.gmra.mrb[124].mxu1 %v13049_v55  ;;  %v13264_v56 = vpop.trf.xlu0 }
 0x367   : > { %16240 = vst [vmem:[#allocation26_spill] sm:$0xff] %v13264_v56 }
 0x36a   : > { %v13266_v11 = vpop.trf.xlu0 }
 0x36b   : > { %16241 = vst [vmem:[#allocation27_spill] sm:$0xff] %v13266_v11 }
 0x36e   : > { %v13268_v55 = vpop.trf.xlu0 }
 0x36f   : > { %16242 = vst [vmem:[#allocation25_spill] sm:$0xff] %v13268_v55 }
 0x372   : > { %v13270_v20 = vpop.trf.xlu0 }
 0x373   : > { %16243 = vst [vmem:[#allocation32_spill] sm:$0xff] %v13270_v20 }
 0x376   : > { %v13272_v42 = vpop.trf.xlu0 }
 0x377   : > { %16244 = vst [vmem:[#allocation38_spill] sm:$0xff] %v13272_v42  ;;  %v16307_v42 = vld [vmem:[#allocation79_spill] sm:$0xff] }
 0x37a   : > { %v13274_v63 = vpop.trf.xlu0 }
 0x37b   : > { %16245 = vst [vmem:[#allocation31_spill] sm:$0xff] %v13274_v63 }
 0x37e   : > { %v13276_v8 = vpop.trf.xlu0 }
 0x37f   : > { %16246 = vst [vmem:[#allocation41_spill] sm:$0xff] %v13276_v8 }
 0x382   : > { %v13278_v5 = vpop.trf.xlu0 }
 0x383   : > { %16247 = vst [vmem:[#allocation46_spill] sm:$0xff] %v13278_v5 }
 0x3c0   : > { %v3178_v58 = vpop.f32.mrb[64].mxu0 }
 0x3c1   : > { %v13280_v61 = vpop.f32.mrb[64].mxu1  ;;  %v3180_v50 = vpop.f32.mrb[65].mxu0 }
 0x3c2   : > { %v2794_v23 = vpop.f32.mrb[65].mxu1  ;;  %v3182_v30 = vpop.f32.mrb[66].mxu0 }
 0x3c3   : > { %v13284_v28 = vpack.c.bf16 %v3182_v30, %v3178_v58  ;;  %v13286_v40 = vpop.f32.mrb[66].mxu1  ;;  %v3184_v16 = vpop.f32.mrb[67].mxu0 }
 0x3c4   : > { %v13290_v47 = vpack.c.bf16 %v3184_v16, %v3180_v50  ;;  %v2798_v57 = vpop.f32.mrb[67].mxu1  ;;  %v16302_v53 = vpack.i.bf16 %v13107_v9, %v13286_v40 }
 0x3c5   : > { %v13292_v54 = vpack.c.bf16 %v2798_v57, %v2794_v23  ;;  %3977 = vrot.lane.b32.xlu1 %v13284_v28, %s11443_s6 }
 0x3c6   : > { %4025 = vrot.lane.b32.xlu0 %v13290_v47, %s11443_s6 }
 0x3c8   : > { %v3188_v0 = vpop.f32.mrb[68].mxu0 }
 0x3c9   : > { %v3190_v37 = vpop.f32.mrb[69].mxu0  ;;  %3929 = vrot.lane.b32.xlu1 %v13292_v54, %s11443_s6  ;;  %v13300_v58 = vpop.f32.mrb[68].mxu1 }
 0x3ca   : > { %16248 = vst [vmem:[#allocation40_spill] sm:$0xff] %v13300_v58  ;;  %v2804_v30 = vpop.f32.mrb[69].mxu1  ;;  %v3192_v23 = vpop.f32.mrb[70].mxu0 }
 0x3cb   : > { %v13304_v16 = vpack.c.bf16 %v3192_v23, %v3188_v0  ;;  %v13306_v57 = vpop.f32.mrb[70].mxu1  ;;  %v3194_v19 = vpop.f32.mrb[71].mxu0 }
 0x3cc   : > { %16249 = vst [vmem:[#allocation29_spill] sm:$0xff] %v13306_v57  ;;  %v13310_v59 = vpack.c.bf16 %v3194_v19, %v3190_v37  ;;  %v2808_v24 = vpop.f32.mrb[71].mxu1 }
 0x3cd   : > { %v13312_v32 = vpack.c.bf16 %v2808_v24, %v2804_v30  ;;  %3979 = vrot.lane.b32.xlu1 %v13304_v16, %s11443_s6 }
 0x3d0   : > { %v3198_v14 = vpop.f32.mrb[72].mxu0 }
 0x3d1   : > { %v3200_v50 = vpop.f32.mrb[73].mxu0  ;;  %4027 = vrot.lane.b32.xlu1 %v13310_v59, %s11443_s6  ;;  %v13318_v0 = vpop.f32.mrb[72].mxu1  ;;  %v16309_v55 = vld [vmem:[#allocation40_spill] sm:$0xff] }
 0x3d2   : > { %16250 = vst [vmem:[#allocation48_spill] sm:$0xff] %v13318_v0  ;;  %v2814_v58 = vpop.f32.mrb[73].mxu1  ;;  %v3202_v18 = vpop.f32.mrb[74].mxu0 }
 0x3d3   : > { %v13322_v19 = vpack.c.bf16 %v3202_v18, %v3198_v14  ;;  %v13324_v37 = vpop.f32.mrb[74].mxu1  ;;  %v3204_v24 = vpop.f32.mrb[75].mxu0 }
 0x3d4   : > { %16252 = vst [vmem:[#allocation56_spill] sm:$0xff] %v13324_v37  ;;  %v13328_v57 = vpack.c.bf16 %v3204_v24, %v3200_v50  ;;  %v2818_v12 = vpop.f32.mrb[75].mxu1 }
 0x3d5   : > { %16251 = vst [vmem:[#allocation53_spill] sm:$0xff] %v13322_v19  ;;  %v13330_v43 = vpack.c.bf16 %v2818_v12, %v2814_v58  ;;  %3931 = vrot.lane.b32.xlu1 %v13312_v32, %s11443_s6 }
 0x3d6   : > { %16253 = vst [vmem:[#allocation30_spill] sm:$0xff] %v13328_v57  ;;  %4029 = vrot.lane.b32.xlu0 %v13328_v57, %s11443_s6 }
 0x3d8   : > { %v3208_v23 = vpop.f32.mrb[76].mxu0 }
 0x3d9   : > { %v3210_v14 = vpop.f32.mrb[77].mxu0  ;;  %3981 = vrot.lane.b32.xlu1 %v13322_v19, %s11443_s6  ;;  %v13338_v18 = vpop.f32.mrb[76].mxu1 }
 0x3da   : > { %16254 = vst [vmem:[#allocation49_spill] sm:$0xff] %v13338_v18  ;;  %v2824_v24 = vpop.f32.mrb[77].mxu1  ;;  %v3212_v30 = vpop.f32.mrb[78].mxu0 }
 0x3db   : > { %v13342_v12 = vpack.c.bf16 %v3212_v30, %v3208_v23  ;;  %v13344_v58 = vpop.f32.mrb[78].mxu1  ;;  %v3214_v37 = vpop.f32.mrb[79].mxu0 }
 0x3dc   : > { %16255 = vst [vmem:[#allocation28_spill] sm:$0xff] %v13344_v58  ;;  %v13348_v0 = vpack.c.bf16 %v3214_v37, %v3210_v14  ;;  %v2828_v7 = vpop.f32.mrb[79].mxu1 }
 0x3dd   : > { %v13350_v57 = vpack.c.bf16 %v2828_v7, %v2824_v24  ;;  %3933 = vrot.lane.b32.xlu1 %v13330_v43, %s11443_s6 }
 0x3e0   : > { %v3218_v19 = vpop.f32.mrb[80].mxu0 }
 0x3e1   : > { %v3220_v50 = vpop.f32.mrb[81].mxu0  ;;  %3983 = vrot.lane.b32.xlu1 %v13342_v12, %s11443_s6  ;;  %v13356_v23 = vpop.f32.mrb[80].mxu1 }
 0x3e2   : > { %16256 = vst [vmem:[#allocation51_spill] sm:$0xff] %v13356_v23  ;;  %v2834_v18 = vpop.f32.mrb[81].mxu1  ;;  %v3222_v25 = vpop.f32.mrb[82].mxu0 }
 0x3e3   : > { %v13360_v37 = vpack.c.bf16 %v3222_v25, %v3218_v19  ;;  %v13362_v14 = vpop.f32.mrb[82].mxu1  ;;  %v3224_v7 = vpop.f32.mrb[83].mxu0 }
 0x3e4   : > { %16258 = vst [vmem:[#allocation60_spill] sm:$0xff] %v13362_v14  ;;  %v13366_v58 = vpack.c.bf16 %v3224_v7, %v3220_v50  ;;  %v2838_v39 = vpop.f32.mrb[83].mxu1 }
 0x3e5   : > { %16257 = vst [vmem:[#allocation39_spill] sm:$0xff] %v13360_v37  ;;  %v13368_v38 = vpack.c.bf16 %v2838_v39, %v2834_v18  ;;  %3985 = vrot.lane.b32.xlu0 %v13360_v37, %s11443_s6  ;;  %4031 = vrot.lane.b32.xlu1 %v13348_v0, %s11443_s6 }
 0x3e6   : > { %16259 = vst [vmem:[#allocation35_spill] sm:$0xff] %v13366_v58 }
 0x3e7   : > { %16260 = vst [vmem:[#allocation37_spill] sm:$0xff] %v13368_v38 }
 0x3e8   : > { %v3228_v30 = vpop.f32.mrb[84].mxu0 }
 0x3e9   : > { %4033 = vrot.lane.b32.xlu0 %v13366_v58, %s11443_s6  ;;  %v3230_v25 = vpop.f32.mrb[85].mxu0  ;;  %3935 = vrot.lane.b32.xlu1 %v13350_v57, %s11443_s6  ;;  %v13378_v19 = vpop.f32.mrb[84].mxu1 }
 0x3ea   : > { %16261 = vst [vmem:[#allocation61_spill] sm:$0xff] %v13378_v19  ;;  %v2844_v18 = vpop.f32.mrb[85].mxu1  ;;  %v3232_v50 = vpop.f32.mrb[86].mxu0 }
 0x3eb   : > { %v13382_v7 = vpack.c.bf16 %v3232_v50, %v3228_v30  ;;  %v13384_v24 = vpop.f32.mrb[86].mxu1  ;;  %v3234_v14 = vpop.f32.mrb[87].mxu0 }
 0x3ec   : > { %16263 = vst [vmem:[#allocation36_spill] sm:$0xff] %v13384_v24  ;;  %v13388_v23 = vpack.c.bf16 %v3234_v14, %v3230_v25  ;;  %v2848_v26 = vpop.f32.mrb[87].mxu1  ;;  %v16305_v5 = vld [vmem:[#allocation39_spill] sm:$0xff] }
 0x3ed   : > { %16262 = vst [vmem:[#allocation34_spill] sm:$0xff] %v13382_v7  ;;  %v13390_v58 = vpack.c.bf16 %v2848_v26, %v2844_v18  ;;  %3937 = vrot.lane.b32.xlu1 %v13368_v38, %s11443_s6  ;;  %v16306_v63 = vld [vmem:[#allocation35_spill] sm:$0xff] }
 0x3ee   : > { %16264 = vst [vmem:[#allocation57_spill] sm:$0xff] %v13388_v23 }
 0x3ef   : > { %16265 = vst [vmem:[#allocation43_spill] sm:$0xff] %v13390_v58 }
 0x3f0   : > { %v3238_v37 = vpop.f32.mrb[88].mxu0 }
 0x3f1   : > { %v3240_v39 = vpop.f32.mrb[89].mxu0  ;;  %3987 = vrot.lane.b32.xlu1 %v13382_v7, %s11443_s6  ;;  %v13396_v30 = vpop.f32.mrb[88].mxu1 }
 0x3f2   : > { %16266 = vst [vmem:[#allocation33_spill] sm:$0xff] %v13396_v30  ;;  %v2854_v19 = vpop.f32.mrb[89].mxu1  ;;  %v3242_v46 = vpop.f32.mrb[90].mxu0 }
 0x3f3   : > { %v13400_v14 = vpack.c.bf16 %v3242_v46, %v3238_v37  ;;  %v13402_v25 = vpop.f32.mrb[90].mxu1  ;;  %v3244_v26 = vpop.f32.mrb[91].mxu0 }
 0x3f4   : > { %16268 = vst [vmem:[#allocation50_spill] sm:$0xff] %v13402_v25  ;;  %v13406_v24 = vpack.c.bf16 %v3244_v26, %v3240_v39  ;;  %v2858_v45 = vpop.f32.mrb[91].mxu1 }
 0x3f5   : > { %16267 = vst [vmem:[#allocation62_spill] sm:$0xff] %v13400_v14  ;;  %v13408_v3 = vpack.c.bf16 %v2858_v45, %v2854_v19  ;;  %3989 = vrot.lane.b32.xlu0 %v13400_v14, %s11443_s6  ;;  %4035 = vrot.lane.b32.xlu1 %v13388_v23, %s11443_s6  ;;  %v16330_v23 = vld [vmem:[#allocation54_spill] sm:$0xff] }
 0x3f6   : > { %16269 = vst [vmem:[#allocation47_spill] sm:$0xff] %v13406_v24 }
 0x3f7   : > { %16270 = vst [vmem:[#allocation42_spill] sm:$0xff] %v13408_v3 }
 0x3f8   : > { %v3248_v50 = vpop.f32.mrb[92].mxu0 }
 0x3f9   : > { %4037 = vrot.lane.b32.xlu0 %v13406_v24, %s11443_s6  ;;  %v3250_v46 = vpop.f32.mrb[93].mxu0  ;;  %3939 = vrot.lane.b32.xlu1 %v13390_v58, %s11443_s6  ;;  %v13418_v37 = vpop.f32.mrb[92].mxu1 }
 0x3fa   : > { %16271 = vst [vmem:[#allocation64_spill] sm:$0xff] %v13418_v37  ;;  %v2864_v19 = vpop.f32.mrb[93].mxu1  ;;  %v3252_v39 = vpop.f32.mrb[94].mxu0 }
 0x3fb   : > { %v13422_v26 = vpack.c.bf16 %v3252_v39, %v3248_v50  ;;  %v13424_v18 = vpop.f32.mrb[94].mxu1  ;;  %v3254_v25 = vpop.f32.mrb[95].mxu0 }
 0x3fc   : > { %16273 = vst [vmem:[#allocation80_spill] sm:$0xff] %v13424_v18  ;;  %v13428_v30 = vpack.c.bf16 %v3254_v25, %v3250_v46  ;;  %v2868_v10 = vpop.f32.mrb[95].mxu1 }
 0x3fd   : > { %16272 = vst [vmem:[#allocation65_spill] sm:$0xff] %v13422_v26  ;;  %v13430_v24 = vpack.c.bf16 %v2868_v10, %v2864_v19  ;;  %3941 = vrot.lane.b32.xlu1 %v13408_v3, %s11443_s6 }
 0x3ff   : > { %16274 = vst [vmem:[#allocation81_spill] sm:$0xff] %v13430_v24 }
 0x400   : > { %v3258_v14 = vpop.f32.mrb[96].mxu0 }
 0x401   : > { %v3260_v45 = vpop.f32.mrb[97].mxu0  ;;  %3991 = vrot.lane.b32.xlu1 %v13422_v26, %s11443_s6  ;;  %v13436_v50 = vpop.f32.mrb[96].mxu1 }
 0x402   : > { %16275 = vst [vmem:[#allocation82_spill] sm:$0xff] %v13436_v50  ;;  %v2874_v37 = vpop.f32.mrb[97].mxu1  ;;  %v3262_v49 = vpop.f32.mrb[98].mxu0 }
 0x403   : > { %v13440_v25 = vpack.c.bf16 %v3262_v49, %v3258_v14  ;;  %v13442_v46 = vpop.f32.mrb[98].mxu1  ;;  %v3264_v10 = vpop.f32.mrb[99].mxu0 }
 0x404   : > { %16277 = vst [vmem:[#allocation84_spill] sm:$0xff] %v13442_v46  ;;  %v13446_v18 = vpack.c.bf16 %v3264_v10, %v3260_v45  ;;  %v2878_v4 = vpop.f32.mrb[99].mxu1 }
 0x405   : > { %16276 = vst [vmem:[#allocation83_spill] sm:$0xff] %v13440_v25  ;;  %v13448_v1 = vpack.c.bf16 %v2878_v4, %v2874_v37  ;;  %3993 = vrot.lane.b32.xlu0 %v13440_v25, %s11443_s6 }
 0x406   : > { %16278 = vst [vmem:[#allocation85_spill] sm:$0xff] %v13446_v18  ;;  %v16317_v13 = vld [vmem:[#allocation81_spill] sm:$0xff] }
 0x407   : > { %16279 = vst [vmem:[#allocation86_spill] sm:$0xff] %v13448_v1 }
 0x408   : > { %v3268_v24 = vpop.f32.mrb[100].mxu0 }
 0x409   : > { %4041 = vrot.lane.b32.xlu0 %v13446_v18, %s11443_s6  ;;  %v13454_v49 = vpop.f32.mrb[100].mxu1  ;;  %v3270_v14 = vpop.f32.mrb[101].mxu0 }
 0x40a   : > { %16280 = vst [vmem:[#allocation87_spill] sm:$0xff] %v13454_v49  ;;  %v2884_v34 = vpop.f32.mrb[101].mxu1  ;;  %v3272_v19 = vpop.f32.mrb[102].mxu0 }
 0x40b   : > { %v13458_v45 = vpack.c.bf16 %v3272_v19, %v3268_v24  ;;  %v13460_v10 = vpop.f32.mrb[102].mxu1  ;;  %v3274_v4 = vpop.f32.mrb[103].mxu0 }
 0x40c   : > { %16282 = vst [vmem:[#allocation89_spill] sm:$0xff] %v13460_v10  ;;  %v13464_v52 = vpack.c.bf16 %v3274_v4, %v3270_v14  ;;  %v2888_v46 = vpop.f32.mrb[103].mxu1 }
 0x40d   : > { %16281 = vst [vmem:[#allocation88_spill] sm:$0xff] %v13458_v45  ;;  %v13466_v50 = vpack.c.bf16 %v2888_v46, %v2884_v34  ;;  %3945 = vrot.lane.b32.xlu0 %v13448_v1, %s11443_s6 }
 0x40e   : > { %16283 = vst [vmem:[#allocation90_spill] sm:$0xff] %v13464_v52 }
 0x40f   : > { %16284 = vst [vmem:[#allocation91_spill] sm:$0xff] %v13466_v50 }
 0x410   : > { %v3278_v18 = vpop.f32.mrb[104].mxu0 }
 0x411   : > { %v13470_v39 = vpop.f32.mrb[104].mxu1  ;;  %v3280_v27 = vpop.f32.mrb[105].mxu0 }
 0x412   : > { %16285 = vst [vmem:[#allocation92_spill] sm:$0xff] %v13470_v39  ;;  %v2894_v19 = vpop.f32.mrb[105].mxu1  ;;  %v3282_v49 = vpop.f32.mrb[106].mxu0  ;;  %v11444_v39 = vmov 1983009808  }
 0x413   : > { %v13474_v45 = vpack.c.bf16 %v3282_v49, %v3278_v18  ;;  %v13476_v37 = vpop.f32.mrb[106].mxu1  ;;  %v3284_v14 = vpop.f32.mrb[107].mxu0 }
 0x414   : > { %16287 = vst [vmem:[#allocation94_spill] sm:$0xff] %v13476_v37  ;;  %v13480_v46 = vpack.c.bf16 %v3284_v14, %v3280_v27  ;;  %v2898_v4 = vpop.f32.mrb[107].mxu1 }
 0x415   : > { %16286 = vst [vmem:[#allocation93_spill] sm:$0xff] %v13474_v45  ;;  %v13482_v62 = vpack.c.bf16 %v2898_v4, %v2894_v19  ;;  %3997 = vrot.lane.b32.xlu0 %v13474_v45, %s11443_s6 }
 0x416   : > { %16288 = vst [vmem:[#allocation95_spill] sm:$0xff] %v13480_v46 }
 0x417   : > { %16289 = vst [vmem:[#allocation96_spill] sm:$0xff] %v13482_v62  ;;  %v4450_v62 = vunpack.c.l.s4 %v11444_v39 }
 0x418   : > { %v3288_v10 = vpop.f32.mrb[108].mxu0 }
 0x419   : > { %v3290_v24 = vpop.f32.mrb[109].mxu0  ;;  %4045 = vrot.lane.b32.xlu0 %v13480_v46, %s11443_s6  ;;  %v13488_v18 = vpop.f32.mrb[108].mxu1  ;;  %v11445_v46 = vmov 1934713408   ;;  %v4451_v21 = vunpack.c.0.s8 %v4450_v62 }
 0x41a   : > { %16290 = vst [vmem:[#allocation97_spill] sm:$0xff] %v13488_v18  ;;  %v2904_v35 = vpop.f32.mrb[109].mxu1  ;;  %v3292_v34 = vpop.f32.mrb[110].mxu0  ;;  %v4481_v45 = vunpack.c.l.s4 %v11445_v46 }
 0x41b   : > { %v13492_v27 = vpack.c.bf16 %v3292_v34, %v3288_v10  ;;  %v13494_v14 = vpop.f32.mrb[110].mxu1  ;;  %v3294_v19 = vpop.f32.mrb[111].mxu0 }
 0x41c   : > { %v13498_v6 = vpack.c.bf16 %v3294_v19, %v3290_v24  ;;  %v2908_v37 = vpop.f32.mrb[111].mxu1  ;;  %v4482_v18 = vunpack.c.0.s8 %v4481_v45  ;;  %v16296_v45 = vld [vmem:[#allocation24_spill] sm:$0xff] }
 0x41d   : > { %16291 = vst [vmem:[#allocation98_spill] sm:$0xff] %v13492_v27  ;;  %v13500_v50 = vpack.c.bf16 %v2908_v37, %v2904_v35  ;;  %v13515_v46 = vsub.s32 %v4451_v21, %v16296_v45  ;;  %v16298_v21 = vpack.i.bf16 %v13102_v17, %v13280_v61 }
 0x41e   : > { %16292 = vst [vmem:[#allocation99_spill] sm:$0xff] %v13498_v6  ;;  %v13518_v22 = vsub.s32 %v4482_v18, %v16296_v45 }
 0x41f   : > { %16293 = vst [vmem:[#allocation100_spill] sm:$0xff] %v13500_v50 }
 0x420   : > { %v3298_v49 = vpop.f32.mrb[112].mxu0 }
 0x421   : > { %v13502_v10 = vpop.f32.mrb[112].mxu1  ;;  %v3300_v34 = vpop.f32.mrb[113].mxu0 }
 0x422   : > { %v2914_v52 = vpop.f32.mrb[113].mxu1  ;;  %v3302_v4 = vpop.f32.mrb[114].mxu0 }
 0x423   : > { %v13506_v24 = vpack.c.bf16 %v3302_v4, %v3298_v49  ;;  %v13508_v19 = vpop.f32.mrb[114].mxu1  ;;  %v3304_v39 = vpop.f32.mrb[115].mxu0 }
 0x424   : > { %v13512_v37 = vpack.c.bf16 %v3304_v39, %v3300_v34  ;;  %v2918_v62 = vpop.f32.mrb[115].mxu1  ;;  %v16303_v34 = vld [vmem:[#allocation53_spill] sm:$0xff] }
 0x425   : > { %16294 = vst [vmem:[#allocation101_spill] sm:$0xff] %v13506_v24  ;;  %v13521_v29 = vpack.c.bf16 %v2918_v62, %v2914_v52  ;;  %4001 = vrot.lane.b32.xlu0 %v13506_v24, %s11443_s6  ;;  %v16304_v62 = vld [vmem:[#allocation30_spill] sm:$0xff] }
 0x426   : > { %16295 = vst [vmem:[#allocation102_spill] sm:$0xff] %v13512_v37 }
 0x427   : > { %16297 = vst [vmem:[#allocation24_spill] sm:$0xff] %v13521_v29 }
 0x428   : > { %v3308_v35 = vpop.f32.mrb[116].mxu0 }
 0x429   : > { %v3310_v45 = vpop.f32.mrb[117].mxu0  ;;  %4049 = vrot.lane.b32.xlu0 %v13512_v37, %s11443_s6  ;;  %v13543_v52 = vpop.f32.mrb[116].mxu1 }
 0x42a   : > { %v3312_v39 = vpop.f32.mrb[118].mxu0  ;;  %10805 = vxpose.xlu1.b32.start [1/16] %v16298_v21, 128  ;;  %v2924_v18 = vpop.f32.mrb[117].mxu1 }
 0x42b   : > { %v13556_v27 = vpack.c.bf16 %v3312_v39, %v3308_v35  ;;  %v13558_v49 = vpop.f32.mrb[118].mxu1  ;;  %v3314_v4 = vpop.f32.mrb[119].mxu0 }
 0x42c   : > { %v13564_v61 = vpack.c.bf16 %v3314_v4, %v3310_v45  ;;  %v2928_v21 = vpop.f32.mrb[119].mxu1  ;;  %v13579_v45 = vpack.i.b16 %v16113_v51, %v16113_v51  ;;  %v16308_v51 = vld [vmem:[#allocation55_spill] sm:$0xff] }
 0x42d   : > { %16299 = vst [vmem:[#allocation103_spill] sm:$0xff] %v13556_v27  ;;  %v13567_v41 = vpack.c.bf16 %v2928_v21, %v2924_v18  ;;  %v4069_v18 = vshrl.u32 %v13284_v28, 16  ;;  %v16310_v17 = vpack.i.bf16 %v16308_v51, %v16309_v55 }
 0x42e   : > { %16300 = vst [vmem:[#allocation104_spill] sm:$0xff] %v13564_v61  ;;  %10807 = vxpose.xlu1.b32.cont [2/16] %v16302_v53, 128 }
 0x42f   : > { %16301 = vst [vmem:[#allocation105_spill] sm:$0xff] %v13567_v41 }
 0x430   : > { %v3318_v11 = vpop.f32.mrb[120].mxu0 }
 0x431   : > { %v13593_v35 = vpop.f32.mrb[120].mxu1  ;;  %v3320_v39 = vpop.f32.mrb[121].mxu0 }
 0x432   : > { %v3322_v20 = vpop.f32.mrb[122].mxu0  ;;  %10809 = vxpose.xlu1.b32.cont [3/16] %v16310_v17, 128  ;;  %v2934_v8 = vpop.f32.mrb[121].mxu1 }
 0x433   : > { %v13606_v9 = vpack.c.bf16 %v3322_v20, %v3318_v11  ;;  %v13608_v53 = vpop.f32.mrb[122].mxu1  ;;  %v3324_v40 = vpop.f32.mrb[123].mxu0  ;;  %v16322_v11 = vld [vmem:[#allocation88_spill] sm:$0xff] }
 0x434   : > { %v13614_v17 = vpack.c.bf16 %v3324_v40, %v3320_v39  ;;  %v2938_v51 = vpop.f32.mrb[123].mxu1 }
 0x435   : > { %16311 = vst [vmem:[#allocation53_spill] sm:$0xff] %v13606_v9  ;;  %v13619_v20 = vpack.c.bf16 %v2938_v51, %v2934_v8  ;;  %4005 = vrot.lane.b32.xlu0 %v13606_v9, %s11443_s6 }
 0x436   : > { %16314 = vst [vmem:[#allocation30_spill] sm:$0xff] %v13614_v17  ;;  %v16320_v17 = vld [vmem:[#allocation29_spill] sm:$0xff] }
 0x437   : > { %16316 = vst [vmem:[#allocation39_spill] sm:$0xff] %v13619_v20  ;;  %v16321_v60 = vpack.i.bf16 %v16319_v2, %v16320_v17  ;;  %v3978_v21 = vpop.permute.xlu1 %3977 }
 0x438   : > { %v4067_v55 = vpack.i.b16 %v3978_v21, %v13284_v28  ;;  %v4070_v40 = vshrl.u32 %v3978_v21, 16  ;;  %v3328_v39 = vpop.f32.mrb[124].mxu0  ;;  %v4026_v25 = vpop.permute.xlu0 %4025  ;;  %v16329_v28 = vld [vmem:[#allocation15_spill] sm:$0xff] }
 0x439   : > { %10811 = vxpose.xlu1.b32.cont [4/16] %v16321_v60, 128  ;;  %v13641_v1 = vpop.f32.mrb[124].mxu1  ;;  %v3330_v20 = vpop.f32.mrb[125].mxu0  ;;  %v16331_v60 = vld [vmem:[#allocation48_spill] sm:$0xff]  ;;  %v4078_v50 = vshrl.u32 %v4026_v25, 16 }
 0x43a   : > { %v4071_v33 = vpack.i.b16 %v4070_v40, %v4069_v18  ;;  %v3332_v15 = vpop.f32.mrb[126].mxu0  ;;  %v16332_v2 = vpack.i.bf16 %v16330_v23, %v16331_v60  ;;  %v2944_v56 = vpop.f32.mrb[125].mxu1  ;;  %v4463_v4 = vcombine.high %v4067_v55, %v13579_v45  ;;  %v4470_v18 = vrot.slane %v4067_v55, %v13515_v46 }
 0x43b   : > { %v13652_v6 = vpack.c.bf16 %v3332_v15, %v3328_v39  ;;  %v3334_v58 = vpop.f32.mrb[127].mxu0  ;;  %v3930_v24 = vpop.permute.xlu1 %3929 }
 0x43c   : > { %v13657_v21 = vpack.c.bf16 %v3334_v58, %v3330_v20  ;;  %v13659_v23 = vpop.f32.mrb[126].mxu1  ;;  %v4059_v60 = vpack.i.b16 %v3930_v24, %v13292_v54  ;;  %v4062_v26 = vshrl.u32 %v3930_v24, 16  ;;  %v4530_v40 = vcombine.high %v4071_v33, %v13579_v45  ;;  %v16338_v58 = vld [vmem:[#allocation67_spill] sm:$0xff]  ;;  %v16339_v20 = vld [vmem:[#allocation56_spill] sm:$0xff] }
 0x43d   : > { %10813 = vxpose.xlu1.b32.cont [5/16] %v16332_v2, 128  ;;  %16333 = vst [vmem:[#allocation35_spill] sm:$0xff] %v13652_v6  ;;  %16335 = vst [vmem:[#allocation55_spill] sm:$0xff] %v13659_v23  ;;  %v4075_v2 = vpack.i.b16 %v4026_v25, %v13290_v47  ;;  %v2948_v39 = vpop.f32.mrb[127].mxu1  ;;  %v16341_v25 = vshrl.u32 %v13290_v47, 16  ;;  %v16342_v24 = vshrl.u32 %v13292_v54, 16  ;;  %v4477_v37 = vrot.slane %v4463_v4, %v13515_v46 }
 0x43e   : > { %16334 = vst [vmem:[#allocation79_spill] sm:$0xff] %v13657_v21  ;;  %v13668_v6 = vpack.c.bf16 %v2948_v39, %v2944_v56  ;;  %v16340_v21 = vpack.i.bf16 %v16338_v58, %v16339_v20  ;;  %v4537_v55 = vrot.slane %v4071_v33, %v13515_v46  ;;  %v16343_v54 = vshrl.u32 %v13304_v16, 16  ;;  %v16344_v33 = vld [vmem:[#allocation68_spill] sm:$0xff] }
 0x43f   : > { %v4079_v41 = vpack.i.b16 %v4078_v50, %v16341_v25  ;;  %v4063_v61 = vpack.i.b16 %v4062_v26, %v16342_v24  ;;  %v4447_v15 = vcombine.low %v4059_v60, %v4075_v2  ;;  %v4448_v27 = vcombine.high %v4059_v60, %v4075_v2  ;;  %v3980_v29 = vpop.permute.xlu1 %3979  ;;  %v16345_v60 = vld [vmem:[#allocation49_spill] sm:$0xff] }
 0x440   : > { %16337 = vst [vmem:[#allocation40_spill] sm:$0xff] %v13668_v6  ;;  %v4097_v56 = vpack.i.b16 %v3980_v29, %v13304_v16  ;;  %v4100_v39 = vshrl.u32 %v3980_v29, 16  ;;  %v4544_v50 = vrot.slane %v4530_v40, %v13515_v46  ;;  %v16346_v29 = vpack.i.bf16 %v16344_v33, %v16345_v60 }
 0x441   : > { %10815 = vxpose.xlu1.b32.cont [6/16] %v16340_v21, 128  ;;  %v4455_v9 = vrot.slane %v4447_v15, %v13515_v46  ;;  %v4462_v21 = vrot.slane %v4448_v27, %v13515_v46  ;;  %v4514_v58 = vcombine.low %v4063_v61, %v4079_v41  ;;  %v4515_v47 = vcombine.high %v4063_v61, %v4079_v41 }
 0x442   : > { %v13685_v26 = vpack.i.b16 %v4100_v39, %v16343_v54  ;;  %v4597_v2 = vcombine.high %v4097_v56, %v13579_v45  ;;  %v13689_v4 = vrot.slane %v4097_v56, %v13515_v46  ;;  %v16347_v54 = vld [vmem:[#allocation72_spill] sm:$0xff] }
 0x443   : > { %v4478_v15 = vcombine.low %v4455_v9, %v4470_v18  ;;  %v4479_v20 = vcombine.high %v4455_v9, %v4470_v18  ;;  %v4494_v27 = vcombine.low %v4462_v21, %v4477_v37  ;;  %v4495_v25 = vcombine.high %v4462_v21, %v4477_v37 }
 0x444   : > { %v4522_v41 = vrot.slane %v4514_v58, %v13515_v46  ;;  %v4529_v61 = vrot.slane %v4515_v47, %v13515_v46  ;;  %v13697_v16 = vrot.slane %v4597_v2, %v13515_v46  ;;  %v4664_v40 = vcombine.high %v13685_v26, %v13579_v45  ;;  %v13705_v47 = vpop.permute.xlu1 %4027  ;;  %v16348_v2 = vld [vmem:[#allocation28_spill] sm:$0xff] }
 0x445   : > { %10817 = vxpose.xlu1.b32.cont [7/16] %v16346_v29, 128  ;;  %v4486_v24 = vrot.slane %v4478_v15, %v13518_v22  ;;  %v4493_v56 = vrot.slane %v4479_v20, %v13518_v22  ;;  %v4502_v39 = vrot.slane %v4494_v27, %v13518_v22  ;;  %v4509_v9 = vrot.slane %v4495_v25, %v13518_v22 }
 0x446   : > { %v4545_v37 = vcombine.low %v4522_v41, %v4537_v55  ;;  %v4546_v18 = vcombine.high %v4522_v41, %v4537_v55  ;;  %v4561_v21 = vcombine.low %v4529_v61, %v4544_v50  ;;  %v4562_v58 = vcombine.high %v4529_v61, %v4544_v50 }
 0x447   : > { %v16349_v33 = vpack.i.bf16 %v16347_v54, %v16348_v2  ;;  %v6591_v60 = vcombine.low %v4486_v24, %v4493_v56  ;;  %v10122_v29 = vcombine.high %v4486_v24, %v4493_v56  ;;  %v6607_v15 = vcombine.low %v4502_v39, %v4509_v9  ;;  %v16351_v54 = vld [vmem:[#allocation51_spill] sm:$0xff] }
 0x448   : > { %v10123_v6 = vcombine.high %v4502_v39, %v4509_v9  ;;  %v4553_v20 = vrot.slane %v4545_v37, %v13518_v22  ;;  %v4560_v27 = vrot.slane %v4546_v18, %v13518_v22  ;;  %v4569_v25 = vrot.slane %v4561_v21, %v13518_v22  ;;  %v16350_v18 = vld [vmem:[#allocation70_spill] sm:$0xff]  ;;  %v3932_v3 = vpop.permute.xlu1 %3931 }
 0x449   : > { %10819 = vxpose.xlu1.b32.cont [8/16] %v16349_v33, 128  ;;  %v4576_v55 = vrot.slane %v4562_v58, %v13518_v22  ;;  %v6598_v50 = vrot.slane %v6591_v60, %v13515_v46  ;;  %v6606_v41 = vrot.slane %v10122_v29, %v13515_v46  ;;  %v6614_v61 = vrot.slane %v6607_v15, %v13515_v46 }
 0x44a   : > { %v6622_v24 = vrot.slane %v10123_v6, %v13515_v46  ;;  %v6658_v56 = vcombine.low %v4553_v20, %v4560_v27  ;;  %v10124_v39 = vcombine.high %v4553_v20, %v4560_v27  ;;  %v16352_v21 = vpack.i.bf16 %v16350_v18, %v16351_v54 }
 0x44b   : > { %v6674_v9 = vcombine.low %v4569_v25, %v4576_v55  ;;  %v10125_v37 = vcombine.high %v4569_v25, %v4576_v55  ;;  %v6623_v58 = vcombine.low %v6598_v50, %v6606_v41  ;;  %v6624_v2 = vcombine.high %v6598_v50, %v6606_v41 }
 0x44c   : > { %v6639_v33 = vcombine.low %v6614_v61, %v6622_v24  ;;  %v6640_v60 = vcombine.high %v6614_v61, %v6622_v24  ;;  %v6665_v29 = vrot.slane %v6658_v56, %v13515_v46  ;;  %v6673_v15 = vrot.slane %v10124_v39, %v13515_v46  ;;  %v16353_v56 = vld [vmem:[#allocation77_spill] sm:$0xff]  ;;  %v16354_v39 = vld [vmem:[#allocation60_spill] sm:$0xff] }
 0x44d   : > { %10821 = vxpose.xlu1.b32.cont [9/16] %v16352_v21, 128  ;;  %v6681_v17 = vrot.slane %v6674_v9, %v13515_v46  ;;  %v6689_v6 = vrot.slane %v10125_v37, %v13515_v46  ;;  %v6631_v20 = vrot.slane %v6623_v58, %v13518_v22  ;;  %v6638_v27 = vrot.slane %v6624_v2, %v13518_v22 }
 0x44e   : > { %v6647_v25 = vrot.slane %v6639_v33, %v13518_v22  ;;  %v6654_v55 = vrot.slane %v6640_v60, %v13518_v22  ;;  %v6690_v50 = vcombine.low %v6665_v29, %v6673_v15  ;;  %v6691_v41 = vcombine.high %v6665_v29, %v6673_v15 }
 0x44f   : > { %v6706_v61 = vcombine.low %v6681_v17, %v6689_v6  ;;  %v6707_v24 = vcombine.high %v6681_v17, %v6689_v6  ;;  %v16355_v9 = vpack.i.bf16 %v16353_v56, %v16354_v39  ;;  %v13740_v21 = vrot.slane %v13685_v26, %v13515_v46  ;;  %v13746_v17 = vpop.permute.xlu0 %4029 }
 0x450   : > { %v6655_v37 = vcombine.low %v6631_v20, %v6647_v25  ;;  %v6656_v18 = vcombine.high %v6631_v20, %v6647_v25  ;;  %v6657_v54 = vcombine.low %v6638_v27, %v6654_v55  ;;  %v6698_v58 = vrot.slane %v6690_v50, %v13518_v22  ;;  %v13754_v50 = vpop.permute.xlu1 %3981 }
 0x451   : > { %10823 = vxpose.xlu1.b32.cont [10/16] %v16355_v9, 128  ;;  %v6705_v2 = vrot.slane %v6691_v41, %v13518_v22  ;;  %v6714_v33 = vrot.slane %v6706_v61, %v13518_v22  ;;  %v6721_v60 = vrot.slane %v6707_v24, %v13518_v22  ;;  %v13750_v20 = vrot.slane %v4664_v40, %v13515_v46  ;;  %v16356_v41 = vld [vmem:[#allocation76_spill] sm:$0xff]  ;;  %v16357_v61 = vld [vmem:[#allocation61_spill] sm:$0xff] }
 0x452   : > { %v8738_v29 = vshrl.u32 %v6655_v37, 16  ;;  %v8744_v15 = vshrl.u32 %v6656_v18, 16  ;;  %v8750_v6 = vshrl.u32 %v6657_v54, 16  ;;  %v4105_v55 = vpack.i.b16 %v13705_v47, %v13310_v59 }
 0x453   : > { %v6722_v27 = vcombine.low %v6698_v58, %v6714_v33  ;;  %v6723_v26 = vcombine.high %v6698_v58, %v6714_v33  ;;  %v6724_v25 = vcombine.low %v6705_v2, %v6721_v60  ;;  %v16358_v24 = vpack.i.bf16 %v16356_v41, %v16357_v61  ;;  %v16359_v58 = vld [vmem:[#allocation82_spill] sm:$0xff] }
 0x454   : > { %v4108_v56 = vshrl.u32 %v13705_v47, 16  ;;  %v4089_v39 = vpack.i.b16 %v3932_v3, %v13312_v32  ;;  %v4092_v9 = vshrl.u32 %v3932_v3, 16  ;;  %v13763_v40 = vpack.i.b16 %v13746_v17, %v16304_v62  ;;  %v16360_v2 = vld [vmem:[#allocation66_spill] sm:$0xff] }
 0x455   : > { %10825 = vxpose.xlu1.b32.cont [11/16] %v16358_v24, 128  ;;  %v16361_v33 = vpack.i.bf16 %v16359_v58, %v16360_v2  ;;  %v8737_v60 = vpack.i.b16 %v6722_v27, %v6655_v37  ;;  %v8739_v7 = vshrl.u32 %v6722_v27, 16  ;;  %v8743_v51 = vpack.i.b16 %v6723_v26, %v6656_v18  ;;  %v16365_v2 = vld [vmem:[#allocation36_spill] sm:$0xff] }
 0x456   : > { %v8745_v8 = vshrl.u32 %v6723_v26, 16  ;;  %v8749_v47 = vpack.i.b16 %v6724_v25, %v6657_v54  ;;  %v8751_v41 = vshrl.u32 %v6724_v25, 16  ;;  %v16362_v3 = vshrl.u32 %v13310_v59, 16  ;;  %v16364_v26 = vld [vmem:[#allocation74_spill] sm:$0xff] }
 0x457   : > { %10917 = vxpose.xlu0.b32.start [1/16] %v16361_v33, 128  ;;  %v16363_v24 = vshrl.u32 %v13312_v32, 16  ;;  %v8740_v58 = vpack.i.b16 %v8739_v7, %v8738_v29  ;;  %v10186_v27 = vcombine.low %v8737_v60, %v8737_v60  ;;  %v10187_v18 = vcombine.high %v8737_v60, %v8737_v60  ;;  %v16368_v32 = vld [vmem:[#allocation45_spill] sm:$0xff] }
 0x458   : > { %v4109_v61 = vpack.i.b16 %v4108_v56, %v16362_v3  ;;  %v8746_v37 = vpack.i.b16 %v8745_v8, %v8744_v15  ;;  %v16366_v33 = vpack.i.bf16 %v16364_v26, %v16365_v2  ;;  %v8752_v38 = vpack.i.b16 %v8751_v41, %v8750_v6  ;;  %v16367_v56 = vld [vmem:[#allocation84_spill] sm:$0xff]  ;;  %v13787_v6 = vpop.permute.xlu1 %3933 }
 0x459   : > { %v4093_v23 = vpack.i.b16 %v4092_v9, %v16363_v24  ;;  %v10250_v54 = vcombine.low %v8743_v51, %v8743_v51  ;;  %v10251_v59 = vcombine.high %v8743_v51, %v8743_v51  ;;  %v10314_v25 = vcombine.low %v8749_v47, %v8749_v47  ;;  %9600 = vst.msk [vmem:[%s13771_s13] sm:$0xf] %vm9599_vm0, %v10186_v27  ;;  %v16371_v27 = vld [vmem:[#allocation33_spill] sm:$0xff] }
 0x45a   : > { %10827 = vxpose.xlu1.b32.cont [12/16] %v16366_v33, 128  ;;  %v16369_v3 = vpack.i.bf16 %v16367_v56, %v16368_v32  ;;  %v10218_v7 = vcombine.low %v8740_v58, %v8740_v58  ;;  %v10219_v8 = vcombine.high %v8740_v58, %v8740_v58  ;;  %v10282_v29 = vcombine.low %v8746_v37, %v8746_v37 }
 0x45b   : > { %v10283_v15 = vcombine.high %v8746_v37, %v8746_v37  ;;  %9601 = vst.msk [vmem:[%s13771_s13 + $0x4] sm:$0xf] %vm9599_vm0, %v10187_v18  ;;  %v10315_v51 = vcombine.high %v8749_v47, %v8749_v47  ;;  %v10346_v9 = vcombine.low %v8752_v38, %v8752_v38  ;;  %v10347_v60 = vcombine.high %v8752_v38, %v8752_v38  ;;  %v16370_v37 = vld [vmem:[#allocation75_spill] sm:$0xff] }
 0x45c   : > { %10919 = vxpose.xlu0.b32.cont [2/16] %v16369_v3, 128  ;;  %9664 = vst.msk [vmem:[%s13771_s13 + $0x100] sm:$0xf] %vm9599_vm0, %v10250_v54  ;;  %9665 = vst.msk [vmem:[%s13771_s13 + $0x104] sm:$0xf] %vm9599_vm0, %v10251_v59  ;;  %v4581_v41 = vcombine.low %v4089_v39, %v4105_v55  ;;  %v4582_v47 = vcombine.high %v4089_v39, %v4105_v55  ;;  %v4648_v24 = vcombine.low %v4093_v23, %v4109_v61  ;;  %v16373_v55 = vld [vmem:[#allocation87_spill] sm:$0xff]  ;;  %v16374_v39 = vld [vmem:[#allocation52_spill] sm:$0xff] }
 0x45d   : > { %9728 = vst.msk [vmem:[%s13771_s13 + $0x200] sm:$0xf] %vm9599_vm0, %v10314_v25  ;;  %9632 = vst.msk [vmem:[%s13771_s13 + $0x80] sm:$0xf] %vm9599_vm0, %v10218_v7  ;;  %v4649_v58 = vcombine.high %v4093_v23, %v4109_v61  ;;  %v4132_v38 = vshrl.u32 %v13746_v17, 16  ;;  %v16372_v18 = vpack.i.bf16 %v16370_v37, %v16371_v27  ;;  %v13816_v2 = vpack.i.b16 %v13754_v50, %v16303_v34 }
 0x45e   : > { %9633 = vst.msk [vmem:[%s13771_s13 + $0x84] sm:$0xf] %vm9599_vm0, %v10219_v8  ;;  %9696 = vst.msk [vmem:[%s13771_s13 + $0x180] sm:$0xf] %vm9599_vm0, %v10282_v29  ;;  %v4589_v26 = vrot.slane %v4581_v41, %v13515_v46  ;;  %v4124_v23 = vshrl.u32 %v13754_v50, 16  ;;  %v13821_v17 = vpack.i.b16 %v13787_v6, %v13330_v43  ;;  %v16375_v61 = vpack.i.bf16 %v16373_v55, %v16374_v39 }
 0x45f   : > { %9697 = vst.msk [vmem:[%s13771_s13 + $0x184] sm:$0xf] %vm9599_vm0, %v10283_v15  ;;  %10829 = vxpose.xlu1.b32.cont [13/16] %v16372_v18, 128  ;;  %9729 = vst.msk [vmem:[%s13771_s13 + $0x204] sm:$0xf] %vm9599_vm0, %v10315_v51  ;;  %v4596_v33 = vrot.slane %v4582_v47, %v13515_v46  ;;  %v4656_v54 = vrot.slane %v4648_v24, %v13515_v46  ;;  %v4663_v59 = vrot.slane %v4649_v58, %v13515_v46  ;;  %v16381_v58 = vld [vmem:[#allocation89_spill] sm:$0xff] }
 0x460   : > { %9760 = vst.msk [vmem:[%s13771_s13 + $0x280] sm:$0xf] %vm9599_vm0, %v10346_v9  ;;  %9761 = vst.msk [vmem:[%s13771_s13 + $0x284] sm:$0xf] %vm9599_vm0, %v10347_v60  ;;  %10921 = vxpose.xlu0.b32.cont [3/16] %v16375_v61, 128  ;;  %v16376_v25 = vshrl.u32 %v16304_v62, 16  ;;  %v4612_v50 = vcombine.low %v4589_v26, %v13689_v4  ;;  %v4613_v32 = vcombine.high %v4589_v26, %v13689_v4  ;;  %v16377_v3 = vshrl.u32 %v16303_v34, 16 }
 0x461   : > { %v4731_v8 = vcombine.high %v13816_v2, %v13579_v45  ;;  %v4628_v29 = vcombine.low %v4596_v33, %v13697_v16  ;;  %v4629_v15 = vcombine.high %v4596_v33, %v13697_v16  ;;  %v4679_v51 = vcombine.low %v4656_v54, %v13740_v21  ;;  %v16378_v9 = vld [vmem:[#allocation12_spill] sm:$0xff]  ;;  %v16379_v60 = vld [vmem:[#allocation50_spill] sm:$0xff] }
 0x462   : > { %v13831_v56 = vpack.i.b16 %v4132_v38, %v16376_v25  ;;  %v13837_v7 = vpack.i.b16 %v4124_v23, %v16377_v3  ;;  %v4680_v62 = vcombine.high %v4656_v54, %v13740_v21  ;;  %v16380_v41 = vpack.i.bf16 %v16378_v9, %v16379_v60  ;;  %v16382_v38 = vld [vmem:[#allocation44_spill] sm:$0xff] }
 0x463   : > { %v4620_v4 = vrot.slane %v4612_v50, %v13518_v22  ;;  %v4627_v34 = vrot.slane %v4613_v32, %v13518_v22  ;;  %v4695_v47 = vcombine.low %v4663_v59, %v13750_v20  ;;  %v4696_v24 = vcombine.high %v4663_v59, %v13750_v20  ;;  %v16384_v59 = vld [vmem:[#allocation78_spill] sm:$0xff]  ;;  %v16385_v25 = vld [vmem:[#allocation64_spill] sm:$0xff] }
 0x464   : > { %10831 = vxpose.xlu1.b32.cont [14/16] %v16380_v41, 128  ;;  %v16383_v37 = vpack.i.bf16 %v16381_v58, %v16382_v38  ;;  %v4636_v16 = vrot.slane %v4628_v29, %v13518_v22  ;;  %v4643_v21 = vrot.slane %v4629_v15, %v13518_v22  ;;  %v4687_v27 = vrot.slane %v4679_v51, %v13518_v22  ;;  %v16387_v51 = vld [vmem:[#allocation92_spill] sm:$0xff] }
 0x465   : > { %v4694_v18 = vrot.slane %v4680_v62, %v13518_v22  ;;  %v4703_v26 = vrot.slane %v4695_v47, %v13518_v22  ;;  %v4710_v23 = vrot.slane %v4696_v24, %v13518_v22  ;;  %v6725_v55 = vcombine.low %v4620_v4, %v4627_v34  ;;  %v16388_v62 = vld [vmem:[#allocation59_spill] sm:$0xff] }
 0x466   : > { %10923 = vxpose.xlu0.b32.cont [4/16] %v16383_v37, 128  ;;  %v10126_v39 = vcombine.high %v4620_v4, %v4627_v34  ;;  %v6741_v61 = vcombine.low %v4636_v16, %v4643_v21  ;;  %v10127_v20 = vcombine.high %v4636_v16, %v4643_v21  ;;  %v16386_v50 = vpack.i.bf16 %v16384_v59, %v16385_v25 }
 0x467   : > { %v6792_v33 = vcombine.low %v4687_v27, %v4694_v18  ;;  %v10128_v54 = vcombine.high %v4687_v27, %v4694_v18  ;;  %v6732_v32 = vrot.slane %v6725_v55, %v13515_v46  ;;  %v6808_v29 = vcombine.low %v4703_v26, %v4710_v23  ;;  %v16390_v18 = vld [vmem:[#allocation14_spill] sm:$0xff] }
 0x468   : > { %10833 = vxpose.xlu1.b32.cont [15/16] %v16386_v50, 128  ;;  %v6740_v3 = vrot.slane %v10126_v39, %v13515_v46  ;;  %v10129_v15 = vcombine.high %v4703_v26, %v4710_v23  ;;  %v16389_v9 = vpack.i.bf16 %v16387_v51, %v16388_v62  ;;  %v6748_v60 = vrot.slane %v6741_v61, %v13515_v46  ;;  %v16391_v26 = vld [vmem:[#allocation80_spill] sm:$0xff] }
 0x469   : > { %v6756_v41 = vrot.slane %v10127_v20, %v13515_v46  ;;  %v6799_v4 = vrot.slane %v6792_v33, %v13515_v46  ;;  %v6807_v34 = vrot.slane %v10128_v54, %v13515_v46  ;;  %v6815_v58 = vrot.slane %v6808_v29, %v13515_v46  ;;  %v16393_v33 = vld [vmem:[#allocation94_spill] sm:$0xff] }
 0x46a   : > { %10925 = vxpose.xlu0.b32.cont [5/16] %v16389_v9, 128  ;;  %v6757_v47 = vcombine.low %v6732_v32, %v6740_v3  ;;  %v6758_v24 = vcombine.high %v6732_v32, %v6740_v3  ;;  %v6823_v38 = vrot.slane %v10129_v15, %v13515_v46  ;;  %v16392_v23 = vpack.i.bf16 %v16390_v18, %v16391_v26  ;;  %v16394_v54 = vld [vmem:[#allocation58_spill] sm:$0xff] }
 0x46b   : > { %v6773_v37 = vcombine.low %v6748_v60, %v6756_v41  ;;  %v6774_v16 = vcombine.high %v6748_v60, %v6756_v41  ;;  %v6824_v21 = vcombine.low %v6799_v4, %v6807_v34  ;;  %v6825_v27 = vcombine.high %v6799_v4, %v6807_v34 }
 0x46c   : > { %10835 = vxpose.xlu1.b32.end [16/16] %v16392_v23, 128  ;;  %v6765_v55 = vrot.slane %v6757_v47, %v13518_v22  ;;  %v6772_v39 = vrot.slane %v6758_v24, %v13518_v22  ;;  %v6840_v61 = vcombine.low %v6815_v58, %v6823_v38  ;;  %v6841_v20 = vcombine.high %v6815_v58, %v6823_v38  ;;  %v3984_v38 = vpop.permute.xlu1 %3983 }
 0x46d   : > { %v16395_v59 = vpack.i.bf16 %v16393_v33, %v16394_v54  ;;  %v6781_v25 = vrot.slane %v6773_v37, %v13518_v22  ;;  %v6788_v50 = vrot.slane %v6774_v16, %v13518_v22  ;;  %v6832_v32 = vrot.slane %v6824_v21, %v13518_v22  ;;  %v16396_v37 = vld [vmem:[#allocation97_spill] sm:$0xff] }
 0x46e   : > { %v6839_v3 = vrot.slane %v6825_v27, %v13518_v22  ;;  %v6848_v29 = vrot.slane %v6840_v61, %v13518_v22  ;;  %v6855_v15 = vrot.slane %v6841_v20, %v13518_v22  ;;  %v13891_v51 = vrot.slane %v13816_v2, %v13515_v46  ;;  %v16397_v2 = vld [vmem:[#allocation71_spill] sm:$0xff] }
 0x46f   : > { %10927 = vxpose.xlu0.b32.cont [6/16] %v16395_v59, 128  ;;  %v13894_v62 = vrot.slane %v4731_v8, %v13515_v46  ;;  %v6789_v9 = vcombine.low %v6765_v55, %v6781_v25  ;;  %v6790_v60 = vcombine.high %v6765_v55, %v6781_v25  ;;  %v6791_v41 = vcombine.low %v6772_v39, %v6788_v50 }
 0x470   : > { %v4798_v4 = vcombine.high %v13837_v7, %v13579_v45  ;;  %v6856_v34 = vcombine.low %v6832_v32, %v6848_v29  ;;  %v6857_v47 = vcombine.high %v6832_v32, %v6848_v29  ;;  %v6858_v24 = vcombine.low %v6839_v3, %v6855_v15  ;;  %v16399_v32 = vld [vmem:[#allocation69_spill] sm:$0xff] }
 0x471   : > { %v13900_v58 = vrot.slane %v13837_v7, %v13515_v46  ;;  %v16398_v16 = vpack.i.bf16 %v16396_v37, %v16397_v2  ;;  %v8756_v8 = vshrl.u32 %v6789_v9, 16  ;;  %v8762_v21 = vshrl.u32 %v6790_v60, 16 }
 0x472   : > { %v8768_v27 = vshrl.u32 %v6791_v41, 16  ;;  %v13906_v18 = vrot.slane %v4798_v4, %v13515_v46  ;;  %v8755_v26 = vpack.i.b16 %v6856_v34, %v6789_v9  ;;  %v8757_v23 = vshrl.u32 %v6856_v34, 16 }
 0x473   : > { %10929 = vxpose.xlu0.b32.cont [7/16] %v16398_v16, 128  ;;  %v8761_v55 = vpack.i.b16 %v6857_v47, %v6790_v60  ;;  %v8763_v39 = vshrl.u32 %v6857_v47, 16  ;;  %v8767_v61 = vpack.i.b16 %v6858_v24, %v6791_v41  ;;  %v8769_v20 = vshrl.u32 %v6858_v24, 16 }
 0x474   : > { %v4116_v7 = vshrl.u32 %v13787_v6, 16  ;;  %v4715_v33 = vcombine.low %v13821_v17, %v13763_v40  ;;  %v8758_v54 = vpack.i.b16 %v8757_v23, %v8756_v8  ;;  %v10188_v25 = vcombine.low %v8755_v26, %v8755_v26 }
 0x475   : > { %v8764_v59 = vpack.i.b16 %v8763_v39, %v8762_v21  ;;  %v10189_v50 = vcombine.high %v8755_v26, %v8755_v26  ;;  %v16400_v3 = vpack.i.bf16 %v13494_v14, %v16399_v32  ;;  %v8770_v29 = vpack.i.b16 %v8769_v20, %v8768_v27  ;;  %v13918_v14 = vpop.permute.xlu1 %4031 }
 0x476   : > { %v10252_v15 = vcombine.low %v8761_v55, %v8761_v55  ;;  %v10253_v9 = vcombine.high %v8761_v55, %v8761_v55  ;;  %v10316_v6 = vcombine.low %v8767_v61, %v8767_v61  ;;  %v10220_v60 = vcombine.low %v8758_v54, %v8758_v54  ;;  %9602 = vst.msk [vmem:[%s13771_s13 + $0x8] sm:$0xf] %vm9599_vm0, %v10188_v25 }
 0x477   : > { %10931 = vxpose.xlu0.b32.cont [8/16] %v16400_v3, 128  ;;  %v10221_v41 = vcombine.high %v8758_v54, %v8758_v54  ;;  %v10284_v4 = vcombine.low %v8764_v59, %v8764_v59  ;;  %v10285_v34 = vcombine.high %v8764_v59, %v8764_v59  ;;  %9603 = vst.msk [vmem:[%s13771_s13 + $0xc] sm:$0xf] %vm9599_vm0, %v10189_v50  ;;  %v16401_v2 = vshrl.u32 %v13330_v43, 16  ;;  %v16402_v43 = vld [vmem:[#allocation73_spill] sm:$0xff] }
 0x478   : > { %v10317_v47 = vcombine.high %v8767_v61, %v8767_v61  ;;  %v10348_v24 = vcombine.low %v8770_v29, %v8770_v29  ;;  %v10349_v37 = vcombine.high %v8770_v29, %v8770_v29  ;;  %9666 = vst.msk [vmem:[%s13771_s13 + $0x108] sm:$0xf] %vm9599_vm0, %v10252_v15  ;;  %9667 = vst.msk [vmem:[%s13771_s13 + $0x10c] sm:$0xf] %vm9599_vm0, %v10253_v9  ;;  %v4148_v26 = vshrl.u32 %v3984_v38, 16 }
 0x479   : > { %9730 = vst.msk [vmem:[%s13771_s13 + $0x208] sm:$0xf] %vm9599_vm0, %v10316_v6  ;;  %v4117_v16 = vpack.i.b16 %v4116_v7, %v16401_v2  ;;  %9634 = vst.msk [vmem:[%s13771_s13 + $0x88] sm:$0xf] %vm9599_vm0, %v10220_v60  ;;  %v4716_v8 = vcombine.high %v13821_v17, %v13763_v40  ;;  %v4723_v21 = vrot.slane %v4715_v33, %v13515_v46  ;;  %v16404_v20 = vshrl.u32 %v13342_v12, 16 }
 0x47a   : > { %9635 = vst.msk [vmem:[%s13771_s13 + $0x8c] sm:$0xf] %vm9599_vm0, %v10221_v41  ;;  %9698 = vst.msk [vmem:[%s13771_s13 + $0x188] sm:$0xf] %vm9599_vm0, %v10284_v4  ;;  %v13940_v27 = vpack.i.b16 %v3984_v38, %v13342_v12  ;;  %v16403_v23 = vpack.i.bf16 %v13502_v10, %v16402_v43  ;;  %v13955_v17 = vpack.i.b16 %v13918_v14, %v13348_v0  ;;  %v4156_v38 = vshrl.u32 %v13918_v14, 16 }
 0x47b   : > { %9699 = vst.msk [vmem:[%s13771_s13 + $0x18c] sm:$0xf] %vm9599_vm0, %v10285_v34  ;;  %9731 = vst.msk [vmem:[%s13771_s13 + $0x20c] sm:$0xf] %vm9599_vm0, %v10317_v47  ;;  %v4782_v55 = vcombine.low %v4117_v16, %v13831_v56  ;;  %v4783_v40 = vcombine.high %v4117_v16, %v13831_v56  ;;  %v4730_v39 = vrot.slane %v4716_v8, %v13515_v46 }
 0x47c   : > { %10933 = vxpose.xlu0.b32.cont [9/16] %v16403_v23, 128  ;;  %9762 = vst.msk [vmem:[%s13771_s13 + $0x288] sm:$0xf] %vm9599_vm0, %v10348_v24  ;;  %9763 = vst.msk [vmem:[%s13771_s13 + $0x28c] sm:$0xf] %vm9599_vm0, %v10349_v37  ;;  %v4746_v10 = vcombine.low %v4723_v21, %v13891_v51  ;;  %v4747_v61 = vcombine.high %v4723_v21, %v13891_v51  ;;  %v13963_v7 = vpack.i.b16 %v4148_v26, %v16404_v20 }
 0x47d   : > { %v4790_v33 = vrot.slane %v4782_v55, %v13515_v46  ;;  %v4797_v56 = vrot.slane %v4783_v40, %v13515_v46  ;;  %v4865_v54 = vcombine.high %v13940_v27, %v13579_v45  ;;  %v13971_v59 = vrot.slane %v13940_v27, %v13515_v46 }
 0x47e   : > { %v4754_v25 = vrot.slane %v4746_v10, %v13518_v22  ;;  %v4761_v50 = vrot.slane %v4747_v61, %v13518_v22  ;;  %v4762_v51 = vcombine.low %v4730_v39, %v13894_v62  ;;  %v4763_v12 = vcombine.high %v4730_v39, %v13894_v62 }
 0x47f   : > { %v16405_v32 = vpack.i.bf16 %v13508_v19, %v13184_v48  ;;  %v4813_v3 = vcombine.low %v4790_v33, %v13900_v58  ;;  %v4814_v29 = vcombine.high %v4790_v33, %v13900_v58  ;;  %v4829_v15 = vcombine.low %v4797_v56, %v13906_v18 }
 0x480   : > { %v4830_v9 = vcombine.high %v4797_v56, %v13906_v18  ;;  %v4770_v6 = vrot.slane %v4762_v51, %v13518_v22  ;;  %v4777_v60 = vrot.slane %v4763_v12, %v13518_v22  ;;  %v6859_v41 = vcombine.low %v4754_v25, %v4761_v50 }
 0x481   : > { %10935 = vxpose.xlu0.b32.cont [10/16] %v16405_v32, 128  ;;  %v10130_v4 = vcombine.high %v4754_v25, %v4761_v50  ;;  %v4821_v62 = vrot.slane %v4813_v3, %v13518_v22  ;;  %v4828_v34 = vrot.slane %v4814_v29, %v13518_v22  ;;  %v4837_v48 = vrot.slane %v4829_v15, %v13518_v22 }
 0x482   : > { %v4844_v19 = vrot.slane %v4830_v9, %v13518_v22  ;;  %v6866_v58 = vrot.slane %v6859_v41, %v13515_v46  ;;  %v6875_v24 = vcombine.low %v4770_v6, %v4777_v60  ;;  %v10131_v18 = vcombine.high %v4770_v6, %v4777_v60  ;;  %v14017_v6 = vpop.permute.xlu1 %3935 }
 0x483   : > { %v6874_v47 = vrot.slane %v10130_v4, %v13515_v46  ;;  %v16406_v37 = vpack.i.bf16 %v13543_v52, %v13192_v31  ;;  %v6926_v2 = vcombine.low %v4821_v62, %v4828_v34  ;;  %v10132_v16 = vcombine.high %v4821_v62, %v4828_v34 }
 0x484   : > { %v6942_v8 = vcombine.low %v4837_v48, %v4844_v19  ;;  %v10133_v21 = vcombine.high %v4837_v48, %v4844_v19  ;;  %v6882_v27 = vrot.slane %v6875_v24, %v13515_v46  ;;  %v6890_v26 = vrot.slane %v10131_v18, %v13515_v46 }
 0x485   : > { %10937 = vxpose.xlu0.b32.cont [11/16] %v16406_v37, 128  ;;  %v6891_v43 = vcombine.low %v6866_v58, %v6874_v47  ;;  %v6892_v23 = vcombine.high %v6866_v58, %v6874_v47  ;;  %v6933_v55 = vrot.slane %v6926_v2, %v13515_v46  ;;  %v6941_v40 = vrot.slane %v10132_v16, %v13515_v46  ;;  %v3986_v47 = vpop.permute.xlu0 %3985 }
 0x486   : > { %v6949_v39 = vrot.slane %v6942_v8, %v13515_v46  ;;  %v6957_v10 = vrot.slane %v10133_v21, %v13515_v46  ;;  %v6907_v61 = vcombine.low %v6882_v27, %v6890_v26  ;;  %v6908_v20 = vcombine.high %v6882_v27, %v6890_v26 }
 0x487   : > { %v6899_v31 = vrot.slane %v6891_v43, %v13518_v22  ;;  %v6906_v52 = vrot.slane %v6892_v23, %v13518_v22  ;;  %v16407_v33 = vpack.i.bf16 %v13558_v49, %v13198_v36  ;;  %v6958_v56 = vcombine.low %v6933_v55, %v6941_v40 }
 0x488   : > { %v6959_v25 = vcombine.high %v6933_v55, %v6941_v40  ;;  %v6974_v50 = vcombine.low %v6949_v39, %v6957_v10  ;;  %v6975_v51 = vcombine.high %v6949_v39, %v6957_v10  ;;  %v6915_v12 = vrot.slane %v6907_v61, %v13518_v22  ;;  %v3938_v40 = vpop.permute.xlu1 %3937 }
 0x489   : > { %10939 = vxpose.xlu0.b32.cont [12/16] %v16407_v33, 128  ;;  %v6922_v32 = vrot.slane %v6908_v20, %v13518_v22  ;;  %v14009_v3 = vrot.slane %v4865_v54, %v13515_v46  ;;  %v4932_v29 = vcombine.high %v13963_v7, %v13579_v45  ;;  %v6966_v15 = vrot.slane %v6958_v56, %v13518_v22  ;;  %v4034_v33 = vpop.permute.xlu0 %4033 }
 0x48a   : > { %v6973_v9 = vrot.slane %v6959_v25, %v13518_v22  ;;  %v6982_v36 = vrot.slane %v6974_v50, %v13518_v22  ;;  %v6989_v49 = vrot.slane %v6975_v51, %v13518_v22  ;;  %v6923_v60 = vcombine.low %v6899_v31, %v6915_v12  ;;  %4039 = vrot.lane.b32.xlu1 %v13428_v30, %s11443_s6 }
 0x48b   : > { %v6924_v41 = vcombine.high %v6899_v31, %v6915_v12  ;;  %v6925_v4 = vcombine.low %v6906_v52, %v6922_v32  ;;  %v14021_v54 = vrot.slane %v13963_v7, %v13515_v46  ;;  %v16408_v62 = vpack.i.bf16 %v13593_v35, %v16307_v42 }
 0x48c   : > { %v6990_v34 = vcombine.low %v6966_v15, %v6982_v36  ;;  %v6991_v48 = vcombine.high %v6966_v15, %v6982_v36  ;;  %v6992_v19 = vcombine.low %v6973_v9, %v6989_v49  ;;  %v14027_v58 = vrot.slane %v4932_v29, %v13515_v46 }
 0x48d   : > { %10941 = vxpose.xlu0.b32.cont [13/16] %v16408_v62, 128  ;;  %v8774_v24 = vshrl.u32 %v6923_v60, 16  ;;  %v8780_v18 = vshrl.u32 %v6924_v41, 16  ;;  %v8786_v37 = vshrl.u32 %v6925_v4, 16  ;;  %v16409_v7 = vshrl.u32 %v13348_v0, 16 }
 0x48e   : > { %v8773_v42 = vpack.i.b16 %v6990_v34, %v6923_v60  ;;  %v8775_v35 = vshrl.u32 %v6990_v34, 16  ;;  %v8779_v16 = vpack.i.b16 %v6991_v48, %v6924_v41  ;;  %v8781_v8 = vshrl.u32 %v6991_v48, 16  ;;  %3943 = vrot.lane.b32.xlu1 %v16317_v13, %s11443_s6  ;;  %v14093_v34 = vpop.permute.xlu1 %3987 }
 0x48f   : > { %v14035_v2 = vpack.i.b16 %v4156_v38, %v16409_v7  ;;  %v8785_v21 = vpack.i.b16 %v6992_v19, %v6925_v4  ;;  %v8787_v27 = vshrl.u32 %v6992_v19, 16  ;;  %v4169_v26 = vpack.i.b16 %v3986_v47, %v16305_v5  ;;  %v16416_v7 = vld [vmem:[#allocation55_spill] sm:$0xff] }
 0x490   : > { %v4172_v43 = vshrl.u32 %v3986_v47, 16  ;;  %v16410_v23 = vpack.i.bf16 %v13608_v53, %v16313_v44  ;;  %v8776_v0 = vpack.i.b16 %v8775_v35, %v8774_v24  ;;  %v8782_v55 = vpack.i.b16 %v8781_v8, %v8780_v18  ;;  %v16415_v24 = vld [vmem:[#allocation37_spill] sm:$0xff] }
 0x491   : > { %v10190_v14 = vcombine.low %v8773_v42, %v8773_v42  ;;  %v10191_v38 = vcombine.high %v8773_v42, %v8773_v42  ;;  %v8788_v39 = vpack.i.b16 %v8787_v27, %v8786_v37  ;;  %v10254_v10 = vcombine.low %v8779_v16, %v8779_v16  ;;  %v16417_v42 = vld [vmem:[#allocation17_spill] sm:$0xff] }
 0x492   : > { %10943 = vxpose.xlu0.b32.cont [14/16] %v16410_v23, 128  ;;  %v10255_v31 = vcombine.high %v8779_v16, %v8779_v16  ;;  %v10318_v52 = vcombine.low %v8785_v21, %v8785_v21  ;;  %v10222_v44 = vcombine.low %v8776_v0, %v8776_v0  ;;  %v10223_v53 = vcombine.high %v8776_v0, %v8776_v0  ;;  %v16421_v23 = vld [vmem:[#allocation34_spill] sm:$0xff] }
 0x493   : > { %v10286_v61 = vcombine.low %v8782_v55, %v8782_v55  ;;  %v10287_v20 = vcombine.high %v8782_v55, %v8782_v55  ;;  %9604 = vst.msk [vmem:[%s13771_s13 + $0x10] sm:$0xf] %vm9599_vm0, %v10190_v14  ;;  %9605 = vst.msk [vmem:[%s13771_s13 + $0x14] sm:$0xf] %vm9599_vm0, %v10191_v38  ;;  %v10319_v56 = vcombine.high %v8785_v21, %v8785_v21  ;;  %v16411_v51 = vshrl.u32 %v16305_v5, 16  ;;  %v16419_v21 = vld [vmem:[#allocation90_spill] sm:$0xff] }
 0x494   : > { %v10350_v25 = vcombine.low %v8788_v39, %v8788_v39  ;;  %v10351_v50 = vcombine.high %v8788_v39, %v8788_v39  ;;  %9668 = vst.msk [vmem:[%s13771_s13 + $0x110] sm:$0xf] %vm9599_vm0, %v10254_v10  ;;  %9669 = vst.msk [vmem:[%s13771_s13 + $0x114] sm:$0xf] %vm9599_vm0, %v10255_v31  ;;  %v16412_v32 = vpack.i.bf16 %v13641_v1, %v16329_v28  ;;  %v4140_v9 = vshrl.u32 %v14017_v6, 16 }
 0x495   : > { %9732 = vst.msk [vmem:[%s13771_s13 + $0x210] sm:$0xf] %vm9599_vm0, %v10318_v52  ;;  %v4173_v12 = vpack.i.b16 %v4172_v43, %v16411_v51  ;;  %9636 = vst.msk [vmem:[%s13771_s13 + $0x90] sm:$0xf] %vm9599_vm0, %v10222_v44  ;;  %v4999_v29 = vcombine.high %v4169_v26, %v13579_v45  ;;  %v14068_v15 = vrot.slane %v4169_v26, %v13515_v46  ;;  %3995 = vrot.lane.b32.xlu1 %v16322_v11, %s11443_s6 }
 0x496   : > { %10945 = vxpose.xlu0.b32.cont [15/16] %v16412_v32, 128  ;;  %9637 = vst.msk [vmem:[%s13771_s13 + $0x94] sm:$0xf] %vm9599_vm0, %v10223_v53  ;;  %9700 = vst.msk [vmem:[%s13771_s13 + $0x190] sm:$0xf] %vm9599_vm0, %v10286_v61  ;;  %v4137_v5 = vpack.i.b16 %v14017_v6, %v13350_v57  ;;  %v4177_v36 = vpack.i.b16 %v4034_v33, %v16306_v63  ;;  %v4180_v49 = vshrl.u32 %v4034_v33, 16  ;;  %v16413_v6 = vshrl.u32 %v13350_v57, 16 }
 0x497   : > { %9701 = vst.msk [vmem:[%s13771_s13 + $0x194] sm:$0xf] %vm9599_vm0, %v10287_v20  ;;  %9733 = vst.msk [vmem:[%s13771_s13 + $0x214] sm:$0xf] %vm9599_vm0, %v10319_v56  ;;  %v5066_v1 = vcombine.high %v4173_v12, %v13579_v45  ;;  %v14083_v28 = vrot.slane %v4173_v12, %v13515_v46  ;;  %v14087_v60 = vrot.slane %v4999_v29, %v13515_v46  ;;  %v16414_v19 = vshrl.u32 %v16306_v63, 16 }
 0x498   : > { %9764 = vst.msk [vmem:[%s13771_s13 + $0x290] sm:$0xf] %vm9599_vm0, %v10350_v25  ;;  %9765 = vst.msk [vmem:[%s13771_s13 + $0x294] sm:$0xf] %vm9599_vm0, %v10351_v50  ;;  %v4141_v41 = vpack.i.b16 %v4140_v9, %v16413_v6  ;;  %v4849_v4 = vcombine.low %v4137_v5, %v13955_v17  ;;  %v4850_v62 = vcombine.high %v4137_v5, %v13955_v17  ;;  %v4164_v37 = vshrl.u32 %v3938_v40, 16 }
 0x499   : > { %v14096_v48 = vrot.slane %v5066_v1, %v13515_v46  ;;  %v14100_v47 = vpack.i.b16 %v4180_v49, %v16414_v19  ;;  %v4161_v18 = vpack.i.b16 %v3938_v40, %v16415_v24  ;;  %v16418_v57 = vpack.i.bf16 %v16416_v7, %v16417_v42  ;;  %4043 = vrot.lane.b32.xlu1 %v16419_v21, %s11443_s6  ;;  %v16423_v49 = vld [vmem:[#allocation96_spill] sm:$0xff] }
 0x49a   : > { %v4857_v35 = vrot.slane %v4849_v4, %v13515_v46  ;;  %v4864_v17 = vrot.slane %v4850_v62, %v13515_v46  ;;  %v4916_v16 = vcombine.low %v4141_v41, %v14035_v2  ;;  %v4917_v8 = vcombine.high %v4141_v41, %v14035_v2 }
 0x49b   : > { %10947 = vxpose.xlu0.b32.end [16/16] %v16418_v57, 128  ;;  %v16420_v63 = vshrl.u32 %v16415_v24, 16  ;;  %v4983_v26 = vcombine.low %v4161_v18, %v4177_v36  ;;  %v4984_v43 = vcombine.high %v4161_v18, %v4177_v36  ;;  %v14118_v0 = vpack.i.b16 %v14093_v34, %v16421_v23 }
 0x49c   : > { %v4880_v55 = vcombine.low %v4857_v35, %v13971_v59  ;;  %v4881_v14 = vcombine.high %v4857_v35, %v13971_v59  ;;  %v4896_v38 = vcombine.low %v4864_v17, %v14009_v3  ;;  %v4897_v2 = vcombine.high %v4864_v17, %v14009_v3  ;;  %v16422_v3 = vld [vmem:[#allocation91_spill] sm:$0xff] }
 0x49d   : > { %v14114_v27 = vpack.i.b16 %v4164_v37, %v16420_v63  ;;  %v4924_v40 = vrot.slane %v4916_v16, %v13515_v46  ;;  %v4931_v39 = vrot.slane %v4917_v8, %v13515_v46  ;;  %v14127_v10 = vrot.slane %v4983_v26, %v13515_v46  ;;  %3947 = vrot.lane.b32.xlu1 %v16422_v3, %s11443_s6  ;;  %v16424_v26 = vld [vmem:[#allocation98_spill] sm:$0xff] }
 0x49e   : > { %v14130_v31 = vrot.slane %v4984_v43, %v13515_v46  ;;  %v4888_v52 = vrot.slane %v4880_v55, %v13518_v22  ;;  %v4895_v44 = vrot.slane %v4881_v14, %v13518_v22  ;;  %v4904_v59 = vrot.slane %v4896_v38, %v13518_v22 }
 0x49f   : > { %v4911_v53 = vrot.slane %v4897_v2, %v13518_v22  ;;  %v4947_v61 = vcombine.low %v4924_v40, %v14021_v54  ;;  %v4948_v20 = vcombine.high %v4924_v40, %v14021_v54  ;;  %v4963_v33 = vcombine.low %v4931_v39, %v14027_v58 }
 0x4a0   : > { %v4964_v56 = vcombine.high %v4931_v39, %v14027_v58  ;;  %v6993_v25 = vcombine.low %v4888_v52, %v4895_v44  ;;  %v10134_v50 = vcombine.high %v4888_v52, %v4895_v44  ;;  %v5014_v52 = vcombine.low %v14127_v10, %v14068_v15 }
 0x4a1   : > { %v7009_v51 = vcombine.low %v4904_v59, %v4911_v53  ;;  %v10135_v12 = vcombine.high %v4904_v59, %v4911_v53  ;;  %v4955_v32 = vrot.slane %v4947_v61, %v13518_v22  ;;  %v4962_v29 = vrot.slane %v4948_v20, %v13518_v22  ;;  %3949 = vrot.lane.b32.xlu1 %v16423_v49, %s11443_s6 }
 0x4a2   : > { %v4971_v5 = vrot.slane %v4963_v33, %v13518_v22  ;;  %v4978_v9 = vrot.slane %v4964_v56, %v13518_v22  ;;  %v7000_v1 = vrot.slane %v6993_v25, %v13515_v46  ;;  %v7008_v54 = vrot.slane %v10134_v50, %v13515_v46  ;;  %v16425_v50 = vld [vmem:[#allocation99_spill] sm:$0xff] }
 0x4a3   : > { %v7016_v36 = vrot.slane %v7009_v51, %v13515_v46  ;;  %v7024_v58 = vrot.slane %v10135_v12, %v13515_v46  ;;  %v7060_v6 = vcombine.low %v4955_v32, %v4962_v29  ;;  %v10136_v41 = vcombine.high %v4955_v32, %v4962_v29 }
 0x4a4   : > { %v7076_v4 = vcombine.low %v4971_v5, %v4978_v9  ;;  %v10137_v62 = vcombine.high %v4971_v5, %v4978_v9  ;;  %v7025_v19 = vcombine.low %v7000_v1, %v7008_v54  ;;  %v7026_v24 = vcombine.high %v7000_v1, %v7008_v54 }
 0x4a5   : > { %v7041_v18 = vcombine.low %v7016_v36, %v7024_v58  ;;  %v7042_v37 = vcombine.high %v7016_v36, %v7024_v58  ;;  %v7067_v7 = vrot.slane %v7060_v6, %v13515_v46  ;;  %v7075_v42 = vrot.slane %v10136_v41, %v13515_v46  ;;  %3999 = vrot.lane.b32.xlu1 %v16424_v26, %s11443_s6 }
 0x4a6   : > { %v7083_v57 = vrot.slane %v7076_v4, %v13515_v46  ;;  %v7091_v35 = vrot.slane %v10137_v62, %v13515_v46  ;;  %v7033_v17 = vrot.slane %v7025_v19, %v13518_v22  ;;  %v7040_v16 = vrot.slane %v7026_v24, %v13518_v22  ;;  %v16426_v19 = vld [vmem:[#allocation100_spill] sm:$0xff] }
 0x4a7   : > { %v7049_v8 = vrot.slane %v7041_v18, %v13518_v22  ;;  %v7056_v63 = vrot.slane %v7042_v37, %v13518_v22  ;;  %v7092_v43 = vcombine.low %v7067_v7, %v7075_v42  ;;  %v7093_v55 = vcombine.high %v7067_v7, %v7075_v42 }
 0x4a8   : > { %v7108_v14 = vcombine.low %v7083_v57, %v7091_v35  ;;  %v7109_v38 = vcombine.high %v7083_v57, %v7091_v35  ;;  %v5015_v25 = vcombine.high %v14127_v10, %v14068_v15  ;;  %v5022_v29 = vrot.slane %v5014_v52, %v13518_v22 }
 0x4a9   : > { %v7057_v2 = vcombine.low %v7033_v17, %v7049_v8  ;;  %v7058_v40 = vcombine.high %v7033_v17, %v7049_v8  ;;  %v7059_v39 = vcombine.low %v7040_v16, %v7056_v63  ;;  %v7100_v44 = vrot.slane %v7092_v43, %v13518_v22  ;;  %4047 = vrot.lane.b32.xlu1 %v16425_v50, %s11443_s6 }
 0x4aa   : > { %v7107_v59 = vrot.slane %v7093_v55, %v13518_v22  ;;  %v7116_v53 = vrot.slane %v7108_v14, %v13518_v22  ;;  %v7123_v61 = vrot.slane %v7109_v38, %v13518_v22  ;;  %v5029_v5 = vrot.slane %v5015_v25, %v13518_v22  ;;  %v16427_v38 = vld [vmem:[#allocation24_spill] sm:$0xff] }
 0x4ab   : > { %v8792_v20 = vshrl.u32 %v7057_v2, 16  ;;  %v8798_v33 = vshrl.u32 %v7058_v40, 16  ;;  %v8804_v56 = vshrl.u32 %v7059_v39, 16  ;;  %v5030_v9 = vcombine.low %v14130_v31, %v14087_v60 }
 0x4ac   : > { %v7124_v51 = vcombine.low %v7100_v44, %v7116_v53  ;;  %v7125_v12 = vcombine.high %v7100_v44, %v7116_v53  ;;  %v7126_v32 = vcombine.low %v7107_v59, %v7123_v61  ;;  %v5031_v1 = vcombine.high %v14130_v31, %v14087_v60 }
 0x4ad   : > { %v5050_v54 = vcombine.low %v14114_v27, %v14100_v47  ;;  %v5038_v4 = vrot.slane %v5030_v9, %v13518_v22  ;;  %3951 = vrot.lane.b32.xlu1 %v16426_v19, %s11443_s6  ;;  %v5051_v14 = vcombine.high %v14114_v27, %v14100_v47  ;;  %v4196_v44 = vshrl.u32 %v14093_v34, 16  ;;  %v16428_v34 = vld [vmem:[#allocation103_spill] sm:$0xff] }
 0x4ae   : > { %v8791_v15 = vpack.i.b16 %v7124_v51, %v7057_v2  ;;  %v8793_v10 = vshrl.u32 %v7124_v51, 16  ;;  %v8797_v36 = vpack.i.b16 %v7125_v12, %v7058_v40  ;;  %v8799_v58 = vshrl.u32 %v7125_v12, 16 }
 0x4af   : > { %v8803_v6 = vpack.i.b16 %v7126_v32, %v7059_v39  ;;  %v8805_v41 = vshrl.u32 %v7126_v32, 16  ;;  %v5045_v62 = vrot.slane %v5031_v1, %v13518_v22  ;;  %v5058_v2 = vrot.slane %v5050_v54, %v13515_v46 }
 0x4b0   : > { %v8794_v24 = vpack.i.b16 %v8793_v10, %v8792_v20  ;;  %v8800_v60 = vpack.i.b16 %v8799_v58, %v8798_v33  ;;  %v10192_v31 = vcombine.low %v8791_v15, %v8791_v15  ;;  %v10193_v18 = vcombine.high %v8791_v15, %v8791_v15 }
 0x4b1   : > { %v8806_v37 = vpack.i.b16 %v8805_v41, %v8804_v56  ;;  %v10256_v7 = vcombine.low %v8797_v36, %v8797_v36  ;;  %v10257_v42 = vcombine.high %v8797_v36, %v8797_v36  ;;  %v10320_v57 = vcombine.low %v8803_v6, %v8803_v6  ;;  %3953 = vrot.lane.b32.xlu1 %v16427_v38, %s11443_s6  ;;  %v3990_v41 = vpop.permute.xlu0 %3989 }
 0x4b2   : > { %v10224_v35 = vcombine.low %v8794_v24, %v8794_v24  ;;  %v10225_v17 = vcombine.high %v8794_v24, %v8794_v24  ;;  %v10288_v16 = vcombine.low %v8800_v60, %v8800_v60  ;;  %v10289_v8 = vcombine.high %v8800_v60, %v8800_v60  ;;  %9606 = vst.msk [vmem:[%s13771_s13 + $0x18] sm:$0xf] %vm9599_vm0, %v10192_v31  ;;  %v16429_v31 = vld [vmem:[#allocation104_spill] sm:$0xff] }
 0x4b3   : > { %9607 = vst.msk [vmem:[%s13771_s13 + $0x1c] sm:$0xf] %vm9599_vm0, %v10193_v18  ;;  %v10321_v63 = vcombine.high %v8803_v6, %v8803_v6  ;;  %v10352_v43 = vcombine.low %v8806_v37, %v8806_v37  ;;  %v10353_v55 = vcombine.high %v8806_v37, %v8806_v37  ;;  %9670 = vst.msk [vmem:[%s13771_s13 + $0x118] sm:$0xf] %vm9599_vm0, %v10256_v7  ;;  %v4036_v6 = vpop.permute.xlu1 %4035  ;;  %v16430_v7 = vshrl.u32 %v16421_v23, 16 }
 0x4b4   : > { %9671 = vst.msk [vmem:[%s13771_s13 + $0x11c] sm:$0xf] %vm9599_vm0, %v10257_v42  ;;  %9734 = vst.msk [vmem:[%s13771_s13 + $0x218] sm:$0xf] %vm9599_vm0, %v10320_v57  ;;  %v7127_v40 = vcombine.low %v5022_v29, %v5029_v5  ;;  %v10138_v39 = vcombine.high %v5022_v29, %v5029_v5  ;;  %v7143_v52 = vcombine.low %v5038_v4, %v5045_v62 }
 0x4b5   : > { %9638 = vst.msk [vmem:[%s13771_s13 + $0x98] sm:$0xf] %vm9599_vm0, %v10224_v35  ;;  %9639 = vst.msk [vmem:[%s13771_s13 + $0x9c] sm:$0xf] %vm9599_vm0, %v10225_v17  ;;  %v5065_v47 = vrot.slane %v5051_v14, %v13515_v46  ;;  %v10139_v27 = vcombine.high %v5038_v4, %v5045_v62  ;;  %v5133_v59 = vcombine.high %v14118_v0, %v13579_v45  ;;  %4003 = vrot.lane.b32.xlu1 %v16428_v34, %s11443_s6 }
 0x4b6   : > { %9702 = vst.msk [vmem:[%s13771_s13 + $0x198] sm:$0xf] %vm9599_vm0, %v10288_v16  ;;  %9703 = vst.msk [vmem:[%s13771_s13 + $0x19c] sm:$0xf] %vm9599_vm0, %v10289_v8  ;;  %v5081_v53 = vcombine.low %v5058_v2, %v14083_v28  ;;  %v5082_v61 = vcombine.high %v5058_v2, %v14083_v28  ;;  %v7134_v20 = vrot.slane %v7127_v40, %v13515_v46 }
 0x4b7   : > { %9735 = vst.msk [vmem:[%s13771_s13 + $0x21c] sm:$0xf] %vm9599_vm0, %v10321_v63  ;;  %9766 = vst.msk [vmem:[%s13771_s13 + $0x298] sm:$0xf] %vm9599_vm0, %v10352_v43  ;;  %v7142_v33 = vrot.slane %v10138_v39, %v13515_v46  ;;  %v5097_v56 = vcombine.low %v5065_v47, %v14096_v48  ;;  %v5098_v25 = vcombine.high %v5065_v47, %v14096_v48 }
 0x4b8   : > { %9767 = vst.msk [vmem:[%s13771_s13 + $0x29c] sm:$0xf] %vm9599_vm0, %v10353_v55  ;;  %v7150_v51 = vrot.slane %v7143_v52, %v13515_v46  ;;  %v7158_v12 = vrot.slane %v10139_v27, %v13515_v46  ;;  %v5089_v32 = vrot.slane %v5081_v53, %v13518_v22  ;;  %v5096_v29 = vrot.slane %v5082_v61, %v13518_v22  ;;  %v3940_v53 = vpop.permute.xlu1 %3939  ;;  %v14255_v61 = vpop.permute.xlu0 %4037 }
 0x4b9   : > { %v7159_v28 = vcombine.low %v7134_v20, %v7142_v33  ;;  %v7160_v5 = vcombine.high %v7134_v20, %v7142_v33  ;;  %v5105_v9 = vrot.slane %v5097_v56, %v13518_v22  ;;  %v5112_v1 = vrot.slane %v5098_v25, %v13518_v22  ;;  %4051 = vrot.lane.b32.xlu1 %v16429_v31, %s11443_s6  ;;  %v16432_v33 = vld [vmem:[#allocation57_spill] sm:$0xff] }
 0x4ba   : > { %v7175_v54 = vcombine.low %v7150_v51, %v7158_v12  ;;  %v7176_v15 = vcombine.high %v7150_v51, %v7158_v12  ;;  %v7194_v36 = vcombine.low %v5089_v32, %v5096_v29  ;;  %v10140_v58 = vcombine.high %v5089_v32, %v5096_v29  ;;  %v16433_v32 = vld [vmem:[#allocation62_spill] sm:$0xff] }
 0x4bb   : > { %v7167_v48 = vrot.slane %v7159_v28, %v13518_v22  ;;  %v7174_v10 = vrot.slane %v7160_v5, %v13518_v22  ;;  %v7210_v24 = vcombine.low %v5105_v9, %v5112_v1  ;;  %v10141_v60 = vcombine.high %v5105_v9, %v5112_v1  ;;  %v16435_v1 = vld [vmem:[#allocation43_spill] sm:$0xff] }
 0x4bc   : > { %v7183_v4 = vrot.slane %v7175_v54, %v13518_v22  ;;  %v7190_v62 = vrot.slane %v7176_v15, %v13518_v22  ;;  %v7201_v18 = vrot.slane %v7194_v36, %v13515_v46  ;;  %v7209_v37 = vrot.slane %v10140_v58, %v13515_v46  ;;  %v16437_v36 = vld [vmem:[#allocation39_spill] sm:$0xff]  ;;  %v16438_v58 = vld [vmem:[#allocation30_spill] sm:$0xff] }
 0x4bd   : > { %v4197_v42 = vpack.i.b16 %v4196_v44, %v16430_v7  ;;  %v14243_v57 = vrot.slane %v14118_v0, %v13515_v46  ;;  %v7217_v8 = vrot.slane %v7210_v24, %v13515_v46  ;;  %v7225_v63 = vrot.slane %v10141_v60, %v13515_v46  ;;  %v16431_v0 = vld [vmem:[#allocation105_spill] sm:$0xff] }
 0x4be   : > { %v7191_v35 = vcombine.low %v7167_v48, %v7183_v4  ;;  %v7192_v17 = vcombine.high %v7167_v48, %v7183_v4  ;;  %v7193_v16 = vcombine.low %v7174_v10, %v7190_v62  ;;  %v7226_v43 = vcombine.low %v7201_v18, %v7209_v37  ;;  %3955 = vrot.lane.b32.xlu1 %v16431_v0, %s11443_s6  ;;  %v16436_v48 = vld [vmem:[#allocation47_spill] sm:$0xff] }
 0x4bf   : > { %v7227_v55 = vcombine.high %v7201_v18, %v7209_v37  ;;  %v14248_v14 = vrot.slane %v5133_v59, %v13515_v46  ;;  %v5200_v39 = vcombine.high %v4197_v42, %v13579_v45  ;;  %v7242_v27 = vcombine.low %v7217_v8, %v7225_v63 }
 0x4c0   : > { %v8810_v2 = vshrl.u32 %v7191_v35, 16  ;;  %v8816_v40 = vshrl.u32 %v7192_v17, 16  ;;  %v8822_v23 = vshrl.u32 %v7193_v16, 16  ;;  %v7234_v52 = vrot.slane %v7226_v43, %v13518_v22 }
 0x4c1   : > { %v7241_v47 = vrot.slane %v7227_v55, %v13518_v22  ;;  %v7243_v44 = vcombine.high %v7217_v8, %v7225_v63  ;;  %v14258_v59 = vrot.slane %v4197_v42, %v13515_v46  ;;  %v14261_v20 = vrot.slane %v5200_v39, %v13515_v46 }
 0x4c2   : > { %v14264_v56 = vpack.i.b16 %v4036_v6, %v16432_v33  ;;  %v4204_v25 = vshrl.u32 %v4036_v6, 16  ;;  %v7250_v51 = vrot.slane %v7242_v27, %v13518_v22  ;;  %v4217_v29 = vpack.i.b16 %v3990_v41, %v16433_v32  ;;  %3957 = vrot.lane.b32.xlu1 %v16437_v36, %s11443_s6 }
 0x4c3   : > { %v7257_v12 = vrot.slane %v7243_v44, %v13518_v22  ;;  %v4220_v28 = vshrl.u32 %v3990_v41, 16  ;;  %v16434_v5 = vshrl.u32 %v16432_v33, 16  ;;  %v4185_v54 = vpack.i.b16 %v3940_v53, %v16435_v1  ;;  %v16441_v44 = vld [vmem:[#allocation35_spill] sm:$0xff] }
 0x4c4   : > { %v4188_v15 = vshrl.u32 %v3940_v53, 16  ;;  %v14276_v10 = vpack.i.b16 %v14255_v61, %v16436_v48  ;;  %4053 = vrot.lane.b32.xlu0 %v16438_v58, %s11443_s6  ;;  %v7258_v6 = vcombine.low %v7234_v52, %v7250_v51  ;;  %v7259_v4 = vcombine.high %v7234_v52, %v7250_v51 }
 0x4c5   : > { %v14271_v9 = vpack.i.b16 %v4204_v25, %v16434_v5  ;;  %v7260_v41 = vcombine.low %v7241_v47, %v7257_v12  ;;  %v16439_v62 = vshrl.u32 %v16433_v32, 16  ;;  %v5267_v60 = vcombine.high %v4217_v29, %v13579_v45 }
 0x4c6   : > { %v14286_v18 = vrot.slane %v4217_v29, %v13515_v46  ;;  %v16440_v37 = vshrl.u32 %v16435_v1, 16  ;;  %v5117_v42 = vcombine.low %v4185_v54, %v14264_v56  ;;  %v8809_v8 = vpack.i.b16 %v7258_v6, %v7191_v35  ;;  %4007 = vrot.lane.b32.xlu1 %v16441_v44, %s11443_s6 }
 0x4c7   : > { %v4221_v24 = vpack.i.b16 %v4220_v28, %v16439_v62  ;;  %v8811_v63 = vshrl.u32 %v7258_v6, 16  ;;  %v8815_v43 = vpack.i.b16 %v7259_v4, %v7192_v17  ;;  %v8817_v55 = vshrl.u32 %v7259_v4, 16  ;;  %v16442_v6 = vld [vmem:[#allocation40_spill] sm:$0xff] }
 0x4c8   : > { %v4189_v7 = vpack.i.b16 %v4188_v15, %v16440_v37  ;;  %v8821_v39 = vpack.i.b16 %v7260_v41, %v7193_v16  ;;  %v8823_v52 = vshrl.u32 %v7260_v41, 16  ;;  %v14292_v47 = vrot.slane %v5267_v60, %v13515_v46 }
 0x4c9   : > { %v5334_v27 = vcombine.high %v4221_v24, %v13579_v45  ;;  %v8812_v53 = vpack.i.b16 %v8811_v63, %v8810_v2  ;;  %v8818_v33 = vpack.i.b16 %v8817_v55, %v8816_v40  ;;  %v10194_v25 = vcombine.low %v8809_v8, %v8809_v8  ;;  %v3942_v2 = vpop.permute.xlu1 %3941 }
 0x4ca   : > { %v10195_v35 = vcombine.high %v8809_v8, %v8809_v8  ;;  %v8824_v17 = vpack.i.b16 %v8823_v52, %v8822_v23  ;;  %v10258_v16 = vcombine.low %v8815_v43, %v8815_v43  ;;  %v10259_v51 = vcombine.high %v8815_v43, %v8815_v43  ;;  %3959 = vrot.lane.b32.xlu1 %v16442_v6, %s11443_s6  ;;  %v16443_v8 = vld [vmem:[#allocation42_spill] sm:$0xff] }
 0x4cb   : > { %v10322_v12 = vcombine.low %v8821_v39, %v8821_v39  ;;  %v10226_v32 = vcombine.low %v8812_v53, %v8812_v53  ;;  %v10227_v29 = vcombine.high %v8812_v53, %v8812_v53  ;;  %v10290_v28 = vcombine.low %v8818_v33, %v8818_v33  ;;  %9608 = vst.msk [vmem:[%s13771_s13 + $0x20] sm:$0xf] %vm9599_vm0, %v10194_v25  ;;  %v16446_v53 = vld [vmem:[#allocation79_spill] sm:$0xff] }
 0x4cc   : > { %v10291_v5 = vcombine.high %v8818_v33, %v8818_v33  ;;  %9609 = vst.msk [vmem:[%s13771_s13 + $0x24] sm:$0xf] %vm9599_vm0, %v10195_v35  ;;  %v10323_v40 = vcombine.high %v8821_v39, %v8821_v39  ;;  %v10354_v23 = vcombine.low %v8824_v17, %v8824_v17  ;;  %v10355_v1 = vcombine.high %v8824_v17, %v8824_v17 }
 0x4cd   : > { %9672 = vst.msk [vmem:[%s13771_s13 + $0x120] sm:$0xf] %vm9599_vm0, %v10258_v16  ;;  %9673 = vst.msk [vmem:[%s13771_s13 + $0x124] sm:$0xf] %vm9599_vm0, %v10259_v51  ;;  %v14308_v15 = vrot.slane %v4221_v24, %v13515_v46  ;;  %v14321_v4 = vrot.slane %v5334_v27, %v13515_v46  ;;  %v5118_v41 = vcombine.high %v4185_v54, %v14264_v56  ;;  %v4228_v37 = vshrl.u32 %v14255_v61, 16 }
 0x4ce   : > { %9736 = vst.msk [vmem:[%s13771_s13 + $0x220] sm:$0xf] %vm9599_vm0, %v10322_v12  ;;  %9640 = vst.msk [vmem:[%s13771_s13 + $0xa0] sm:$0xf] %vm9599_vm0, %v10226_v32  ;;  %v5125_v62 = vrot.slane %v5117_v42, %v13515_v46  ;;  %v5184_v24 = vcombine.low %v4189_v7, %v14271_v9  ;;  %v5185_v60 = vcombine.high %v4189_v7, %v14271_v9  ;;  %v4212_v43 = vshrl.u32 %v3942_v2, 16  ;;  %v14362_v12 = vpop.permute.xlu1 %3991 }
 0x4cf   : > { %9641 = vst.msk [vmem:[%s13771_s13 + $0xa4] sm:$0xf] %vm9599_vm0, %v10227_v29  ;;  %9704 = vst.msk [vmem:[%s13771_s13 + $0x1a0] sm:$0xf] %vm9599_vm0, %v10290_v28  ;;  %v14335_v63 = vpack.i.b16 %v3942_v2, %v16443_v8  ;;  %v5132_v56 = vrot.slane %v5118_v41, %v13515_v46  ;;  %v16444_v52 = vshrl.u32 %v16436_v48, 16  ;;  %v16445_v61 = vshrl.u32 %v16443_v8, 16  ;;  %4055 = vrot.lane.b32.xlu1 %v16446_v53, %s11443_s6  ;;  %v14372_v8 = vpop.permute.xlu0 %3993 }
 0x4d0   : > { %9705 = vst.msk [vmem:[%s13771_s13 + $0x1a4] sm:$0xf] %vm9599_vm0, %v10291_v5  ;;  %9737 = vst.msk [vmem:[%s13771_s13 + $0x224] sm:$0xf] %vm9599_vm0, %v10323_v40  ;;  %v5148_v54 = vcombine.low %v5125_v62, %v14243_v57  ;;  %v5149_v42 = vcombine.high %v5125_v62, %v14243_v57  ;;  %v5192_v55 = vrot.slane %v5184_v24, %v13515_v46  ;;  %s11370_s6 = sshll.u32 %s11446_s12, 4  ;;  %s11371_s6 = int_to_ptr.vmem [resolvable:$false] %s11370_s6 }
 0x4d1   : > { %9768 = vst.msk [vmem:[%s13771_s13 + $0x2a0] sm:$0xf] %vm9599_vm0, %v10354_v23  ;;  %9769 = vst.msk [vmem:[%s13771_s13 + $0x2a4] sm:$0xf] %vm9599_vm0, %v10355_v1  ;;  %v5199_v39 = vrot.slane %v5185_v60, %v13515_v46  ;;  %v14344_v27 = vpack.i.b16 %v4228_v37, %v16444_v52  ;;  %v14348_v9 = vpack.i.b16 %v4212_v43, %v16445_v61  ;;  %s11372_s14 = scalar_lea.vmem %s11371_s6, 12288  ;;  %p11373_p11 = scmp.lt.s32.totalorder %s15191_s28, %s11371_s6 }
 0x4d2   : > { %v5251_v7 = vcombine.low %v14335_v63, %v14276_v10  ;;  %v5156_v57 = vrot.slane %v5148_v54, %v13518_v22  ;;  %v5163_v33 = vrot.slane %v5149_v42, %v13518_v22  ;;  %v5164_v25 = vcombine.low %v5132_v56, %v14248_v14  ;;  %v14374_v43 = vpop.trf.xlu1  ;;  %p11374_p3 = scmp.lt.s32.totalorder %s11372_s14, %s11366_s17 }
 0x4d3   : > { %v5165_v48 = vcombine.high %v5132_v56, %v14248_v14  ;;  %v5215_v35 = vcombine.low %v5192_v55, %v14258_v59  ;;  %v5216_v17 = vcombine.high %v5192_v55, %v14258_v59  ;;  %v5231_v16 = vcombine.low %v5199_v39, %v14261_v20 }
 0x4d4   : > { %v5232_v51 = vcombine.high %v5199_v39, %v14261_v20  ;;  %v5172_v32 = vrot.slane %v5164_v25, %v13518_v22  ;;  %v7261_v28 = vcombine.low %v5156_v57, %v5163_v33  ;;  %v10142_v5 = vcombine.high %v5156_v57, %v5163_v33  ;;  %p11375_p7 = por %p11374_p3, %p11373_p11 }
 0x4d5   : > { %v5179_v29 = vrot.slane %v5165_v48, %v13518_v22  ;;  %v5223_v2 = vrot.slane %v5215_v35, %v13518_v22  ;;  %v5230_v14 = vrot.slane %v5216_v17, %v13518_v22  ;;  %v5239_v40 = vrot.slane %v5231_v16, %v13518_v22 }
 0x4d6   : > { %v5246_v59 = vrot.slane %v5232_v51, %v13518_v22  ;;  %v7268_v23 = vrot.slane %v7261_v28, %v13515_v46  ;;  %v7276_v20 = vrot.slane %v10142_v5, %v13515_v46  ;;  %v5252_v5 = vcombine.high %v14335_v63, %v14276_v10  ;;  %p11376_p9 = pnand %p11375_p7, %p11369_p10 }
 0x4d7   : > { %v7277_v1 = vcombine.low %v5172_v32, %v5179_v29  ;;  %v10143_v41 = vcombine.high %v5172_v32, %v5179_v29  ;;  %v7328_v62 = vcombine.low %v5223_v2, %v5230_v14  ;;  %v10144_v24 = vcombine.high %v5223_v2, %v5230_v14 }
 0x4d8   : > { %v7344_v60 = vcombine.low %v5239_v40, %v5246_v59  ;;  %v10145_v37 = vcombine.high %v5239_v40, %v5246_v59  ;;  %v7293_v42 = vcombine.low %v7268_v23, %v7276_v20  ;;  %v7294_v55 = vcombine.high %v7268_v23, %v7276_v20  ;;  %v14393_v20 = vpop.permute.xlu0 %4041 }
 0x4d9   : > { %v7284_v56 = vrot.slane %v7277_v1, %v13515_v46  ;;  %v7292_v54 = vrot.slane %v10143_v41, %v13515_v46  ;;  %v7335_v39 = vrot.slane %v7328_v62, %v13515_v46  ;;  %v7343_v52 = vrot.slane %v10144_v24, %v13515_v46  ;;  %v14395_v1 = vpop.trf.xlu1 }
 0x4da   : > { %v7351_v61 = vrot.slane %v7344_v60, %v13515_v46  ;;  %v7359_v57 = vrot.slane %v10145_v37, %v13515_v46  ;;  %v7301_v33 = vrot.slane %v7293_v42, %v13518_v22  ;;  %v7308_v25 = vrot.slane %v7294_v55, %v13518_v22 }
 0x4db   : > { %v7309_v48 = vcombine.low %v7284_v56, %v7292_v54  ;;  %v7310_v35 = vcombine.high %v7284_v56, %v7292_v54  ;;  %v7360_v17 = vcombine.low %v7335_v39, %v7343_v52  ;;  %v7361_v16 = vcombine.high %v7335_v39, %v7343_v52 }
 0x4dc   : > { %v7376_v51 = vcombine.low %v7351_v61, %v7359_v57  ;;  %v7377_v32 = vcombine.high %v7351_v61, %v7359_v57  ;;  %v5259_v2 = vrot.slane %v5251_v7, %v13515_v46  ;;  %v5266_v60 = vrot.slane %v5252_v5, %v13515_v46 }
 0x4dd   : > { %v7317_v29 = vrot.slane %v7309_v48, %v13518_v22  ;;  %v7324_v28 = vrot.slane %v7310_v35, %v13518_v22  ;;  %v7368_v14 = vrot.slane %v7360_v17, %v13518_v22  ;;  %v7375_v40 = vrot.slane %v7361_v16, %v13518_v22 }
 0x4de   : > { %v7384_v59 = vrot.slane %v7376_v51, %v13518_v22  ;;  %v7391_v23 = vrot.slane %v7377_v32, %v13518_v22  ;;  %v5282_v37 = vcombine.low %v5259_v2, %v14286_v18  ;;  %v5283_v55 = vcombine.high %v5259_v2, %v14286_v18  ;;  %v14404_v18 = vpop.trf.xlu1 }
 0x4df   : > { %v7325_v41 = vcombine.low %v7301_v33, %v7317_v29  ;;  %v7326_v62 = vcombine.high %v7301_v33, %v7317_v29  ;;  %v7327_v24 = vcombine.low %v7308_v25, %v7324_v28  ;;  %v14402_v29 = vpop.permute.xlu0 %3945 }
 0x4e0   : > { %v7392_v10 = vcombine.low %v7368_v14, %v7384_v59  ;;  %v7393_v63 = vcombine.high %v7368_v14, %v7384_v59  ;;  %v7394_v7 = vcombine.low %v7375_v40, %v7391_v23  ;;  %v5290_v33 = vrot.slane %v5282_v37, %v13518_v22 }
 0x4e1   : > { %v8828_v56 = vshrl.u32 %v7325_v41, 16  ;;  %v8834_v54 = vshrl.u32 %v7326_v62, 16  ;;  %v8840_v42 = vshrl.u32 %v7327_v24, 16  ;;  %v5297_v25 = vrot.slane %v5283_v55, %v13518_v22 }
 0x4e2   : > { %v8827_v39 = vpack.i.b16 %v7392_v10, %v7325_v41  ;;  %v8829_v52 = vshrl.u32 %v7392_v10, 16  ;;  %v8833_v61 = vpack.i.b16 %v7393_v63, %v7326_v62  ;;  %v8835_v57 = vshrl.u32 %v7393_v63, 16 }
 0x4e3   : > { %v8839_v48 = vpack.i.b16 %v7394_v7, %v7327_v24  ;;  %v8841_v35 = vshrl.u32 %v7394_v7, 16  ;;  %v5298_v63 = vcombine.low %v5266_v60, %v14292_v47  ;;  %v5299_v7 = vcombine.high %v5266_v60, %v14292_v47 }
 0x4e4   : > { %v8830_v17 = vpack.i.b16 %v8829_v52, %v8828_v56  ;;  %v8836_v16 = vpack.i.b16 %v8835_v57, %v8834_v54  ;;  %v10196_v51 = vcombine.low %v8827_v39, %v8827_v39  ;;  %v10197_v32 = vcombine.high %v8827_v39, %v8827_v39  ;;  %v16447_v52 = vld [vmem:[#allocation65_spill] sm:$0xff] }
 0x4e5   : > { %v8842_v28 = vpack.i.b16 %v8841_v35, %v8840_v42  ;;  %v10260_v5 = vcombine.low %v8833_v61, %v8833_v61  ;;  %v10261_v2 = vcombine.high %v8833_v61, %v8833_v61  ;;  %v10324_v14 = vcombine.low %v8839_v48, %v8839_v48  ;;  %v14430_v42 = vpop.permute.xlu0 %3997 }
 0x4e6   : > { %v10228_v40 = vcombine.low %v8830_v17, %v8830_v17  ;;  %v10229_v59 = vcombine.high %v8830_v17, %v8830_v17  ;;  %v10292_v23 = vcombine.low %v8836_v16, %v8836_v16  ;;  %v10293_v41 = vcombine.high %v8836_v16, %v8836_v16  ;;  %9610 = vst.msk [vmem:[%s13771_s13 + $0x28] sm:$0xf] %vm9599_vm0, %v10196_v51 }
 0x4e7   : > { %9611 = vst.msk [vmem:[%s13771_s13 + $0x2c] sm:$0xf] %vm9599_vm0, %v10197_v32  ;;  %v10325_v62 = vcombine.high %v8839_v48, %v8839_v48  ;;  %v10356_v24 = vcombine.low %v8842_v28, %v8842_v28  ;;  %v10357_v10 = vcombine.high %v8842_v28, %v8842_v28  ;;  %9674 = vst.msk [vmem:[%s13771_s13 + $0x128] sm:$0xf] %vm9599_vm0, %v10260_v5  ;;  %v4244_v60 = vshrl.u32 %v14362_v12, 16  ;;  %v14446_v48 = vpop.trf.xlu1 }
 0x4e8   : > { %9675 = vst.msk [vmem:[%s13771_s13 + $0x12c] sm:$0xf] %vm9599_vm0, %v10261_v2  ;;  %9738 = vst.msk [vmem:[%s13771_s13 + $0x228] sm:$0xf] %vm9599_vm0, %v10324_v14  ;;  %v5318_v37 = vcombine.low %v14348_v9, %v14344_v27  ;;  %v5319_v56 = vcombine.high %v14348_v9, %v14344_v27  ;;  %v7395_v54 = vcombine.low %v5290_v33, %v5297_v25 }
 0x4e9   : > { %9642 = vst.msk [vmem:[%s13771_s13 + $0xa8] sm:$0xf] %vm9599_vm0, %v10228_v40  ;;  %9643 = vst.msk [vmem:[%s13771_s13 + $0xac] sm:$0xf] %vm9599_vm0, %v10229_v59  ;;  %v5306_v55 = vrot.slane %v5298_v63, %v13518_v22  ;;  %v10146_v39 = vcombine.high %v5290_v33, %v5297_v25  ;;  %v4241_v47 = vpack.i.b16 %v14362_v12, %v16447_v52  ;;  %v16448_v33 = vshrl.u32 %v16447_v52, 16 }
 0x4ea   : > { %9706 = vst.msk [vmem:[%s13771_s13 + $0x1a8] sm:$0xf] %vm9599_vm0, %v10292_v23  ;;  %9707 = vst.msk [vmem:[%s13771_s13 + $0x1ac] sm:$0xf] %vm9599_vm0, %v10293_v41  ;;  %v5313_v61 = vrot.slane %v5299_v7, %v13518_v22  ;;  %v5326_v27 = vrot.slane %v5318_v37, %v13515_v46  ;;  %v5333_v9 = vrot.slane %v5319_v56, %v13515_v46 }
 0x4eb   : > { %9739 = vst.msk [vmem:[%s13771_s13 + $0x22c] sm:$0xf] %vm9599_vm0, %v10325_v62  ;;  %9770 = vst.msk [vmem:[%s13771_s13 + $0x2a8] sm:$0xf] %vm9599_vm0, %v10356_v24  ;;  %v7402_v57 = vrot.slane %v7395_v54, %v13515_v46  ;;  %v7410_v17 = vrot.slane %v10146_v39, %v13515_v46  ;;  %v4245_v25 = vpack.i.b16 %v4244_v60, %v16448_v33  ;;  %v14461_v24 = vpop.permute.xlu0 %4045 }
 0x4ec   : > { %9771 = vst.msk [vmem:[%s13771_s13 + $0x2ac] sm:$0xf] %vm9599_vm0, %v10357_v10  ;;  %v5401_v16 = vcombine.high %v4241_v47, %v13579_v45  ;;  %v5349_v12 = vcombine.low %v5326_v27, %v14308_v15  ;;  %v5350_v51 = vcombine.high %v5326_v27, %v14308_v15  ;;  %v5365_v32 = vcombine.low %v5333_v9, %v14321_v4 }
 0x4ed   : > { %v5366_v28 = vcombine.high %v5333_v9, %v14321_v4  ;;  %v7411_v5 = vcombine.low %v5306_v55, %v5313_v61  ;;  %v10147_v2 = vcombine.high %v5306_v55, %v5313_v61  ;;  %v7427_v14 = vcombine.low %v7402_v57, %v7410_v17  ;;  %v14469_v55 = vpop.trf.xlu1 }
 0x4ee   : > { %v7428_v40 = vcombine.high %v7402_v57, %v7410_v17  ;;  %v5357_v59 = vrot.slane %v5349_v12, %v13518_v22  ;;  %v5364_v23 = vrot.slane %v5350_v51, %v13518_v22  ;;  %v5373_v41 = vrot.slane %v5365_v32, %v13518_v22 }
 0x4ef   : > { %v5380_v62 = vrot.slane %v5366_v28, %v13518_v22  ;;  %v7418_v15 = vrot.slane %v7411_v5, %v13515_v46  ;;  %v7426_v10 = vrot.slane %v10147_v2, %v13515_v46  ;;  %v7435_v4 = vrot.slane %v7427_v14, %v13518_v22  ;;  %v14479_v17 = vpop.permute.xlu0 %4001 }
 0x4f0   : > { %v14467_v63 = vrot.slane %v4241_v47, %v13515_v46  ;;  %v7462_v7 = vcombine.low %v5357_v59, %v5364_v23  ;;  %v10148_v37 = vcombine.high %v5357_v59, %v5364_v23  ;;  %v7442_v39 = vrot.slane %v7428_v40, %v13518_v22  ;;  %v16449_v23 = vld [vmem:[#allocation83_spill] sm:$0xff] }
 0x4f1   : > { %v7478_v56 = vcombine.low %v5373_v41, %v5380_v62  ;;  %v10149_v54 = vcombine.high %v5373_v41, %v5380_v62  ;;  %v7443_v52 = vcombine.low %v7418_v15, %v7426_v10  ;;  %v7444_v60 = vcombine.high %v7418_v15, %v7426_v10 }
 0x4f2   : > { %v14473_v61 = vrot.slane %v5401_v16, %v13515_v46  ;;  %v7469_v27 = vrot.slane %v7462_v7, %v13515_v46  ;;  %v7477_v9 = vrot.slane %v10148_v37, %v13515_v46  ;;  %v5468_v51 = vcombine.high %v4245_v25, %v13579_v45 }
 0x4f3   : > { %v7485_v47 = vrot.slane %v7478_v56, %v13515_v46  ;;  %v7493_v57 = vrot.slane %v10149_v54, %v13515_v46  ;;  %v7451_v33 = vrot.slane %v7443_v52, %v13518_v22  ;;  %v7458_v12 = vrot.slane %v7444_v60, %v13518_v22 }
 0x4f4   : > { %v14485_v32 = vrot.slane %v4245_v25, %v13515_v46  ;;  %v7494_v16 = vcombine.low %v7469_v27, %v7477_v9  ;;  %v7495_v28 = vcombine.high %v7469_v27, %v7477_v9  ;;  %v4265_v41 = vpack.i.b16 %v14372_v8, %v16449_v23  ;;  %v14493_v25 = vpop.trf.xlu1  ;;  %v14499_v9 = vpop.permute.xlu0 %4049 }
 0x4f5   : > { %v7510_v5 = vcombine.low %v7485_v47, %v7493_v57  ;;  %v7511_v2 = vcombine.high %v7485_v47, %v7493_v57  ;;  %v7459_v14 = vcombine.low %v7435_v4, %v7451_v33  ;;  %v7460_v40 = vcombine.high %v7435_v4, %v7451_v33 }
 0x4f6   : > { %v7461_v59 = vcombine.low %v7442_v39, %v7458_v12  ;;  %v7502_v62 = vrot.slane %v7494_v16, %v13518_v22  ;;  %v7509_v15 = vrot.slane %v7495_v28, %v13518_v22  ;;  %v14496_v54 = vrot.slane %v5468_v51, %v13515_v46  ;;  %v16451_v16 = vld [vmem:[#allocation85_spill] sm:$0xff] }
 0x4f7   : > { %v7518_v10 = vrot.slane %v7510_v5, %v13518_v22  ;;  %v7525_v7 = vrot.slane %v7511_v2, %v13518_v22  ;;  %v8846_v37 = vshrl.u32 %v7459_v14, 16  ;;  %v8852_v56 = vshrl.u32 %v7460_v40, 16 }
 0x4f8   : > { %v4268_v4 = vshrl.u32 %v14372_v8, 16  ;;  %v8858_v27 = vshrl.u32 %v7461_v59, 16  ;;  %v16450_v47 = vshrl.u32 %v16449_v23, 16  ;;  %v5535_v33 = vcombine.high %v4265_v41, %v13579_v45  ;;  %v14511_v35 = vpop.permute.xlu0 %4005 }
 0x4f9   : > { %v7526_v39 = vcombine.low %v7502_v62, %v7518_v10  ;;  %v7527_v52 = vcombine.high %v7502_v62, %v7518_v10  ;;  %v7528_v60 = vcombine.low %v7509_v15, %v7525_v7  ;;  %v14505_v12 = vrot.slane %v4265_v41, %v13515_v46 }
 0x4fa   : > { %v4269_v57 = vpack.i.b16 %v4268_v4, %v16450_v47  ;;  %v4273_v51 = vpack.i.b16 %v14393_v20, %v16451_v16  ;;  %v4276_v23 = vshrl.u32 %v14393_v20, 16 }
 0x4fb   : > { %v8845_v28 = vpack.i.b16 %v7526_v39, %v7459_v14  ;;  %v8847_v5 = vshrl.u32 %v7526_v39, 16  ;;  %v8851_v8 = vpack.i.b16 %v7527_v52, %v7460_v40  ;;  %v8853_v2 = vshrl.u32 %v7527_v52, 16  ;;  %v14513_v14 = vpop.trf.xlu1 }
 0x4fc   : > { %v8857_v62 = vpack.i.b16 %v7528_v60, %v7461_v59  ;;  %v8859_v15 = vshrl.u32 %v7528_v60, 16  ;;  %v5602_v10 = vcombine.high %v4269_v57, %v13579_v45 }
 0x4fd   : > { %v8848_v7 = vpack.i.b16 %v8847_v5, %v8846_v37  ;;  %v8854_v4 = vpack.i.b16 %v8853_v2, %v8852_v56  ;;  %v10198_v47 = vcombine.low %v8845_v28, %v8845_v28  ;;  %v10199_v41 = vcombine.high %v8845_v28, %v8845_v28 }
 0x4fe   : > { %v8860_v40 = vpack.i.b16 %v8859_v15, %v8858_v27  ;;  %v10262_v59 = vcombine.low %v8851_v8, %v8851_v8  ;;  %v10263_v39 = vcombine.high %v8851_v8, %v8851_v8  ;;  %v10326_v52 = vcombine.low %v8857_v62, %v8857_v62  ;;  %v16452_v15 = vld [vmem:[#allocation86_spill] sm:$0xff] }
 0x4ff   : > { %v10230_v20 = vcombine.low %v8848_v7, %v8848_v7  ;;  %v10231_v37 = vcombine.high %v8848_v7, %v8848_v7  ;;  %v10294_v56 = vcombine.low %v8854_v4, %v8854_v4  ;;  %v10295_v60 = vcombine.high %v8854_v4, %v8854_v4  ;;  %9612 = vst.msk [vmem:[%s13771_s13 + $0x30] sm:$0xf] %vm9599_vm0, %v10198_v47  ;;  %v14539_v47 = vpop.trf.xlu0 }
 0x500   : > { %9613 = vst.msk [vmem:[%s13771_s13 + $0x34] sm:$0xf] %vm9599_vm0, %v10199_v41  ;;  %v10327_v28 = vcombine.high %v8857_v62, %v8857_v62  ;;  %v10358_v5 = vcombine.low %v8860_v40, %v8860_v40  ;;  %v10359_v27 = vcombine.high %v8860_v40, %v8860_v40  ;;  %9676 = vst.msk [vmem:[%s13771_s13 + $0x130] sm:$0xf] %vm9599_vm0, %v10262_v59  ;;  %v4260_v4 = vshrl.u32 %v14402_v29, 16  ;;  %v16454_v40 = vld [vmem:[#allocation93_spill] sm:$0xff] }
 0x501   : > { %9677 = vst.msk [vmem:[%s13771_s13 + $0x134] sm:$0xf] %vm9599_vm0, %v10263_v39  ;;  %9740 = vst.msk [vmem:[%s13771_s13 + $0x230] sm:$0xf] %vm9599_vm0, %v10326_v52  ;;  %v5549_v8 = vrot.slane %v5535_v33, %v13515_v46  ;;  %v5609_v2 = vrot.slane %v4269_v57, %v13515_v46  ;;  %v5616_v62 = vrot.slane %v5602_v10, %v13515_v46  ;;  %v16453_v33 = vshrl.u32 %v16451_v16, 16 }
 0x502   : > { %9644 = vst.msk [vmem:[%s13771_s13 + $0xb0] sm:$0xf] %vm9599_vm0, %v10230_v20  ;;  %9645 = vst.msk [vmem:[%s13771_s13 + $0xb4] sm:$0xf] %vm9599_vm0, %v10231_v37  ;;  %v4257_v7 = vpack.i.b16 %v14402_v29, %v16452_v15  ;;  %v4313_v57 = vpack.i.b16 %v14430_v42, %v16454_v40  ;;  %v4316_v10 = vshrl.u32 %v14430_v42, 16  ;;  %v4324_v59 = vshrl.u32 %v14461_v24, 16 }
 0x503   : > { %9708 = vst.msk [vmem:[%s13771_s13 + $0x1b0] sm:$0xf] %vm9599_vm0, %v10294_v56  ;;  %9709 = vst.msk [vmem:[%s13771_s13 + $0x1b4] sm:$0xf] %vm9599_vm0, %v10295_v60  ;;  %v4277_v41 = vpack.i.b16 %v4276_v23, %v16453_v33  ;;  %v16455_v29 = vshrl.u32 %v16452_v15, 16  ;;  %v16456_v37 = vld [vmem:[#allocation95_spill] sm:$0xff]  ;;  %v14559_v60 = vpop.trf.xlu1  ;;  %v14587_v53 = vpop.trf.xlu0 }
 0x504   : > { %9741 = vst.msk [vmem:[%s13771_s13 + $0x234] sm:$0xf] %vm9599_vm0, %v10327_v28  ;;  %9772 = vst.msk [vmem:[%s13771_s13 + $0x2b0] sm:$0xf] %vm9599_vm0, %v10358_v5  ;;  %v5519_v52 = vcombine.low %v4257_v7, %v4273_v51  ;;  %v5520_v20 = vcombine.high %v4257_v7, %v4273_v51  ;;  %v14557_v56 = vpack.i.b16 %v14461_v24, %v16456_v37  ;;  %v16457_v16 = vshrl.u32 %v16454_v40, 16  ;;  %v16458_v5 = vld [vmem:[#allocation101_spill] sm:$0xff] }
 0x505   : > { %9773 = vst.msk [vmem:[%s13771_s13 + $0x2b4] sm:$0xf] %vm9599_vm0, %v10359_v27  ;;  %v4261_v39 = vpack.i.b16 %v4260_v4, %v16455_v29  ;;  %v5803_v28 = vcombine.high %v4313_v57, %v13579_v45  ;;  %v14567_v42 = vrot.slane %v4313_v57, %v13515_v46  ;;  %v14571_v27 = vpack.i.b16 %v14479_v17, %v16458_v5 }
 0x506   : > { %v14563_v23 = vpack.i.b16 %v4316_v10, %v16457_v16  ;;  %v5527_v51 = vrot.slane %v5519_v52, %v13515_v46  ;;  %v5534_v24 = vrot.slane %v5520_v20, %v13515_v46  ;;  %v16460_v40 = vshrl.u32 %v16456_v37, 16 }
 0x507   : > { %v5586_v15 = vcombine.low %v4261_v39, %v4277_v41  ;;  %v5587_v7 = vcombine.high %v4261_v39, %v4277_v41  ;;  %v14576_v4 = vrot.slane %v5803_v28, %v13515_v46  ;;  %v4364_v10 = vshrl.u32 %v14479_v17, 16 }
 0x508   : > { %v14582_v57 = vpack.i.b16 %v4324_v59, %v16460_v40  ;;  %v5550_v29 = vcombine.low %v5527_v51, %v14505_v12  ;;  %v5551_v52 = vcombine.high %v5527_v51, %v14505_v12  ;;  %v5566_v16 = vcombine.low %v5534_v24, %v5549_v8 }
 0x509   : > { %16459 = vst [vmem:[#allocation11_spill] sm:$0xff] %v14576_v4  ;;  %v5567_v20 = vcombine.high %v5534_v24, %v5549_v8  ;;  %v5594_v41 = vrot.slane %v5586_v15, %v13515_v46  ;;  %v5601_v39 = vrot.slane %v5587_v7, %v13515_v46  ;;  %v14593_v28 = vrot.slane %v14563_v23, %v13515_v46  ;;  %v14603_v24 = vpop.trf.xlu1 }
 0x50a   : > { %16461 = vst [vmem:[#allocation81_spill] sm:$0xff] %v14582_v57  ;;  %v16463_v59 = vshrl.u32 %v16458_v5, 16  ;;  %v5558_v17 = vrot.slane %v5550_v29, %v13518_v22  ;;  %v5565_v12 = vrot.slane %v5551_v52, %v13518_v22  ;;  %v5574_v8 = vrot.slane %v5566_v16, %v13518_v22 }
 0x50b   : > { %16462 = vst [vmem:[#allocation63_spill] sm:$0xff] %v14593_v28  ;;  %v5581_v51 = vrot.slane %v5567_v20, %v13518_v22  ;;  %v5617_v15 = vcombine.low %v5594_v41, %v5609_v2  ;;  %v5618_v7 = vcombine.high %v5594_v41, %v5609_v2  ;;  %v5633_v40 = vcombine.low %v5601_v39, %v5616_v62  ;;  %v14613_v41 = vpop.trf.xlu0 }
 0x50c   : > { %v14597_v37 = vpack.i.b16 %v4364_v10, %v16463_v59  ;;  %v5634_v33 = vcombine.high %v5601_v39, %v5616_v62  ;;  %v7663_v6 = vcombine.low %v5558_v17, %v5565_v12  ;;  %v10154_v44 = vcombine.high %v5558_v17, %v5565_v12 }
 0x50d   : > { %v7679_v58 = vcombine.low %v5574_v8, %v5581_v51  ;;  %v10155_v5 = vcombine.high %v5574_v8, %v5581_v51  ;;  %v5625_v10 = vrot.slane %v5617_v15, %v13518_v22  ;;  %v5632_v29 = vrot.slane %v5618_v7, %v13518_v22  ;;  %v14615_v36 = vpop.trf.xlu1 }
 0x50e   : > { %v5641_v52 = vrot.slane %v5633_v40, %v13518_v22  ;;  %v5648_v16 = vrot.slane %v5634_v33, %v13518_v22  ;;  %v7670_v20 = vrot.slane %v7663_v6, %v13515_v46  ;;  %v7678_v59 = vrot.slane %v10154_v44, %v13515_v46 }
 0x50f   : > { %v7686_v2 = vrot.slane %v7679_v58, %v13515_v46  ;;  %v7694_v62 = vrot.slane %v10155_v5, %v13515_v46  ;;  %v7730_v39 = vcombine.low %v5625_v10, %v5632_v29  ;;  %v10156_v17 = vcombine.high %v5625_v10, %v5632_v29 }
 0x510   : > { %v7746_v12 = vcombine.low %v5641_v52, %v5648_v16  ;;  %v10157_v8 = vcombine.high %v5641_v52, %v5648_v16  ;;  %v7695_v51 = vcombine.low %v7670_v20, %v7678_v59  ;;  %v7696_v15 = vcombine.high %v7670_v20, %v7678_v59 }
 0x511   : > { %v7711_v7 = vcombine.low %v7686_v2, %v7694_v62  ;;  %v7712_v40 = vcombine.high %v7686_v2, %v7694_v62  ;;  %v7737_v6 = vrot.slane %v7730_v39, %v13515_v46  ;;  %v7745_v44 = vrot.slane %v10156_v17, %v13515_v46 }
 0x512   : > { %v7753_v58 = vrot.slane %v7746_v12, %v13515_v46  ;;  %v7761_v33 = vrot.slane %v10157_v8, %v13515_v46  ;;  %v7703_v5 = vrot.slane %v7695_v51, %v13518_v22  ;;  %v7710_v10 = vrot.slane %v7696_v15, %v13518_v22  ;;  %v14627_v12 = vpop.trf.xlu0 }
 0x513   : > { %v7719_v29 = vrot.slane %v7711_v7, %v13518_v22  ;;  %v7726_v52 = vrot.slane %v7712_v40, %v13518_v22  ;;  %v7762_v16 = vcombine.low %v7737_v6, %v7745_v44  ;;  %v7763_v20 = vcombine.high %v7737_v6, %v7745_v44 }
 0x514   : > { %v7778_v59 = vcombine.low %v7753_v58, %v7761_v33  ;;  %v7779_v2 = vcombine.high %v7753_v58, %v7761_v33  ;;  %v6071_v17 = vcombine.high %v14571_v27, %v13579_v45  ;;  %v16464_v58 = vcombine.high %v14563_v23, %v13579_v45 }
 0x515   : > { %v7727_v62 = vcombine.low %v7703_v5, %v7719_v29  ;;  %v7728_v39 = vcombine.high %v7703_v5, %v7719_v29  ;;  %v7729_v0 = vcombine.low %v7710_v10, %v7726_v52  ;;  %v7770_v8 = vrot.slane %v7762_v16, %v13518_v22  ;;  %v14639_v5 = vpop.trf.xlu1 }
 0x516   : > { %v7777_v51 = vrot.slane %v7763_v20, %v13518_v22  ;;  %v7786_v15 = vrot.slane %v7778_v59, %v13518_v22  ;;  %v7793_v7 = vrot.slane %v7779_v2, %v13518_v22  ;;  %v14637_v33 = vrot.slane %v16464_v58, %v13515_v46  ;;  %v16469_v2 = vld [vmem:[#allocation102_spill] sm:$0xff]  ;;  %v14662_v31 = vpop.trf.xlu0 }
 0x517   : > { %v8882_v40 = vshrl.u32 %v7727_v62, 16  ;;  %v8888_v6 = vshrl.u32 %v7728_v39, 16  ;;  %v8894_v44 = vshrl.u32 %v7729_v0, 16  ;;  %v14643_v16 = vrot.slane %v14571_v27, %v13515_v46 }
 0x518   : > { %16465 = vst [vmem:[#allocation29_spill] sm:$0xff] %v14637_v33  ;;  %v7794_v10 = vcombine.low %v7770_v8, %v7786_v15  ;;  %v7795_v29 = vcombine.high %v7770_v8, %v7786_v15  ;;  %v7796_v52 = vcombine.low %v7777_v51, %v7793_v7  ;;  %v14646_v20 = vrot.slane %v6071_v17, %v13515_v46  ;;  %v16503_v33 = vld [vmem:[#allocation32_spill] sm:$0xff] }
 0x519   : > { %16466 = vst [vmem:[#allocation88_spill] sm:$0xff] %v14643_v16  ;;  %v6138_v59 = vcombine.high %v14597_v37, %v13579_v45  ;;  %v14652_v23 = vrot.slane %v14597_v37, %v13515_v46  ;;  %v14656_v58 = vpack.i.b16 %v14499_v9, %v16469_v2  ;;  %v16504_v28 = vunpack.i.l.bf16 %v16503_v33 }
 0x51a   : > { %16467 = vst [vmem:[#allocation15_spill] sm:$0xff] %v14646_v20  ;;  %v8881_v8 = vpack.i.b16 %v7794_v10, %v7727_v62  ;;  %v8883_v51 = vshrl.u32 %v7794_v10, 16  ;;  %v8887_v15 = vpack.i.b16 %v7795_v29, %v7728_v39  ;;  %v8889_v27 = vshrl.u32 %v7795_v29, 16  ;;  %v14665_v29 = vpop.trf.xlu1 }
 0x51b   : > { %16468 = vst [vmem:[#allocation54_spill] sm:$0xff] %v14652_v23  ;;  %16470 = vst [vmem:[#allocation48_spill] sm:$0xff] %v14656_v58  ;;  %v8893_v7 = vpack.i.b16 %v7796_v52, %v7729_v0  ;;  %v8895_v16 = vshrl.u32 %v7796_v52, 16  ;;  %v14659_v17 = vrot.slane %v6138_v59, %v13515_v46  ;;  %v4372_v20 = vshrl.u32 %v14499_v9, 16 }
 0x51c   : > { %v8884_v37 = vpack.i.b16 %v8883_v51, %v8882_v40  ;;  %v8890_v23 = vpack.i.b16 %v8889_v27, %v8888_v6  ;;  %v10202_v34 = vcombine.low %v8881_v8, %v8881_v8  ;;  %v10203_v58 = vcombine.high %v8881_v8, %v8881_v8  ;;  %v16472_v8 = vld [vmem:[#allocation53_spill] sm:$0xff] }
 0x51d   : > { %16471 = vst [vmem:[#allocation67_spill] sm:$0xff] %v14659_v17  ;;  %v8896_v62 = vpack.i.b16 %v8895_v16, %v8894_v44  ;;  %v10266_v39 = vcombine.low %v8887_v15, %v8887_v15  ;;  %v10267_v0 = vcombine.high %v8887_v15, %v8887_v15  ;;  %v10330_v10 = vcombine.low %v8893_v7, %v8893_v7 }
 0x51e   : > { %v10234_v9 = vcombine.low %v8884_v37, %v8884_v37  ;;  %v10235_v52 = vcombine.high %v8884_v37, %v8884_v37  ;;  %v10298_v40 = vcombine.low %v8890_v23, %v8890_v23  ;;  %v10299_v6 = vcombine.high %v8890_v23, %v8890_v23  ;;  %9616 = vst.msk [vmem:[%s13771_s13 + $0x40] sm:$0xf] %vm9599_vm0, %v10202_v34  ;;  %v14704_v37 = vpop.trf.xlu0 }
 0x51f   : > { %9617 = vst.msk [vmem:[%s13771_s13 + $0x44] sm:$0xf] %vm9599_vm0, %v10203_v58  ;;  %v10331_v44 = vcombine.high %v8893_v7, %v8893_v7  ;;  %v10362_v16 = vcombine.low %v8896_v62, %v8896_v62  ;;  %v10363_v59 = vcombine.high %v8896_v62, %v8896_v62  ;;  %9680 = vst.msk [vmem:[%s13771_s13 + $0x140] sm:$0xf] %vm9599_vm0, %v10266_v39  ;;  %v4412_v34 = vshrl.u32 %v14511_v35, 16 }
 0x520   : > { %9681 = vst.msk [vmem:[%s13771_s13 + $0x144] sm:$0xf] %vm9599_vm0, %v10267_v0  ;;  %9744 = vst.msk [vmem:[%s13771_s13 + $0x240] sm:$0xf] %vm9599_vm0, %v10330_v10  ;;  %v4409_v51 = vpack.i.b16 %v14511_v35, %v16472_v8  ;;  %v10840_v23 = vunpack.i.h.bf16 %v14374_v43  ;;  %v16473_v58 = vshrl.u32 %v16469_v2, 16  ;;  %v10845_v35 = vunpack.i.h.bf16 %v14395_v1  ;;  %v16477_v0 = vld [vmem:[#allocation16_spill] sm:$0xff] }
 0x521   : > { %9648 = vst.msk [vmem:[%s13771_s13 + $0xc0] sm:$0xf] %vm9599_vm0, %v10234_v9  ;;  %9649 = vst.msk [vmem:[%s13771_s13 + $0xc4] sm:$0xf] %vm9599_vm0, %v10235_v52  ;;  %v16476_v62 = vshrl.u32 %v16472_v8, 16  ;;  %v16478_v10 = vunpack.i.l.bf16 %v16477_v0  ;;  %v16480_v2 = vld [vmem:[#allocation21_spill] sm:$0xff]  ;;  %v10842_v8 = vunpack.i.l.bf16 %v14395_v1  ;;  %v10952_v17 = vunpack.i.h.bf16 %v14539_v47 }
 0x522   : > { %9712 = vst.msk [vmem:[%s13771_s13 + $0x1c0] sm:$0xf] %vm9599_vm0, %v10298_v40  ;;  %9713 = vst.msk [vmem:[%s13771_s13 + $0x1c4] sm:$0xf] %vm9599_vm0, %v10299_v6  ;;  %v14697_v15 = vpack.i.b16 %v4372_v20, %v16473_v58  ;;  %v6339_v27 = vcombine.high %v4409_v51, %v13579_v45  ;;  %v14701_v7 = vrot.slane %v4409_v51, %v13515_v46  ;;  %v10837_v20 = vunpack.i.l.bf16 %v14374_v43  ;;  %v16483_v51 = vld [vmem:[#allocation13_spill] sm:$0xff]  ;;  %v16496_v1 = vld [vmem:[#allocation26_spill] sm:$0xff] }
 0x523   : > { %9745 = vst.msk [vmem:[%s13771_s13 + $0x244] sm:$0xf] %vm9599_vm0, %v10331_v44  ;;  %9776 = vst.msk [vmem:[%s13771_s13 + $0x2c0] sm:$0xf] %vm9599_vm0, %v10362_v16  ;;  %v4413_v39 = vpack.i.b16 %v4412_v34, %v16476_v62  ;;  %v10381_v9 = vpack.c.bf16 %v10840_v23, %v16478_v10  ;;  %v16481_v40 = vunpack.i.l.bf16 %v16480_v2  ;;  %v10850_v44 = vunpack.i.h.bf16 %v14404_v18  ;;  %v14717_v16 = vpop.trf.xlu1  ;;  %v16486_v10 = vld [vmem:[#allocation18_spill] sm:$0xff] }
 0x524   : > { %9777 = vst.msk [vmem:[%s13771_s13 + $0x2c4] sm:$0xf] %vm9599_vm0, %v10363_v59  ;;  %16474 = vst [vmem:[#allocation56_spill] sm:$0xff] %v14697_v15  ;;  %v14711_v52 = vrot.slane %v6339_v27, %v13515_v46  ;;  %v16484_v34 = vunpack.i.l.bf16 %v16483_v51  ;;  %v10855_v58 = vunpack.i.h.bf16 %v14446_v48  ;;  %v10860_v62 = vunpack.i.h.bf16 %v14469_v55  ;;  %v16494_v15 = vld [vmem:[#allocation19_spill] sm:$0xff] }
 0x525   : > { %16475 = vst [vmem:[#allocation68_spill] sm:$0xff] %v14701_v7  ;;  %v10382_v6 = vpack.c.bf16 %v10845_v35, %v16481_v40  ;;  %v6406_v59 = vcombine.high %v4413_v39, %v13579_v45  ;;  %3817 = vst [vmem:[%s14722_s23] sm:$0xff] %v10381_v9  ;;  %v14727_v43 = vrot.slane %v4413_v39, %v13515_v46  ;;  %v10847_v35 = vunpack.i.l.bf16 %v14404_v18  ;;  %v14742_v40 = vpop.trf.xlu0 }
 0x526   : > { %16479 = vst [vmem:[#allocation49_spill] sm:$0xff] %v14711_v52  ;;  %v10383_v23 = vpack.c.bf16 %v10850_v44, %v16484_v34  ;;  %v16487_v39 = vunpack.i.l.bf16 %v16486_v10  ;;  %v16492_v52 = vld [vmem:[#allocation20_spill] sm:$0xff]  ;;  %v10880_v18 = vunpack.i.h.bf16 %v14603_v24  ;;  %v16497_v19 = vunpack.i.l.bf16 %v16496_v1 }
 0x527   : > { %16482 = vst [vmem:[#allocation72_spill] sm:$0xff] %v14727_v43  ;;  %3818 = vst [vmem:[%s14722_s23 + $0x8] sm:$0xff] %v10382_v6  ;;  %v14734_v27 = vrot.slane %v6406_v59, %v13515_v46  ;;  %v16488_v6 = vld [vmem:[#allocation23_spill] sm:$0xff]  ;;  %v10865_v59 = vunpack.i.h.bf16 %v14493_v25  ;;  %v10957_v4 = vunpack.i.h.bf16 %v14587_v53 }
 0x528   : > { %3819 = vst [vmem:[%s14722_s23 + $0x10] sm:$0xff] %v10383_v23  ;;  %v10384_v9 = vpack.c.bf16 %v10855_v58, %v16487_v39  ;;  %v16489_v44 = vunpack.i.l.bf16 %v16488_v6  ;;  %v14750_v23 = vpop.trf.xlu1  ;;  %v16490_v58 = vld [vmem:[#allocation22_spill] sm:$0xff] }
 0x529   : > { %16485 = vst [vmem:[#allocation28_spill] sm:$0xff] %v14734_v27  ;;  %v10870_v27 = vunpack.i.h.bf16 %v14513_v14  ;;  %v16491_v39 = vunpack.i.l.bf16 %v16490_v58 }
 0x52a   : > { %v10385_v34 = vpack.c.bf16 %v10860_v62, %v16489_v44  ;;  %3820 = vst [vmem:[%s14722_s23 + $0x18] sm:$0xff] %v10384_v9  ;;  %v10875_v62 = vunpack.i.h.bf16 %v14559_v60  ;;  %v16493_v9 = vunpack.i.l.bf16 %v16492_v52  ;;  %v14769_v44 = vpop.trf.xlu0 }
 0x52b   : > { %v10386_v43 = vpack.c.bf16 %v10865_v59, %v16491_v39  ;;  %v10389_v59 = vpack.c.bf16 %v10880_v18, %v16497_v19  ;;  %v10885_v39 = vunpack.i.h.bf16 %v14615_v36  ;;  %v16500_v18 = vld [vmem:[#allocation25_spill] sm:$0xff] }
 0x52c   : > { %3821 = vst [vmem:[%s14722_s23 + $0x20] sm:$0xff] %v10385_v34  ;;  %v10387_v7 = vpack.c.bf16 %v10870_v27, %v16493_v9  ;;  %v16495_v34 = vunpack.i.l.bf16 %v16494_v15  ;;  %v14779_v19 = vpop.trf.xlu1  ;;  %v16501_v50 = vunpack.i.l.bf16 %v16500_v18  ;;  %v10895_v27 = vunpack.i.h.bf16 %v14665_v29 }
 0x52d   : > { %3822 = vst [vmem:[%s14722_s23 + $0x28] sm:$0xff] %v10386_v43  ;;  %v10890_v43 = vunpack.i.h.bf16 %v14639_v5  ;;  %3825 = vst [vmem:[%s14722_s23 + $0x40] sm:$0xff] %v10389_v59  ;;  %v10887_v59 = vunpack.i.l.bf16 %v14639_v5  ;;  %v10413_v9 = vpack.c.bf16 %v10952_v17, %v10837_v20  ;;  %v10414_v17 = vpack.c.bf16 %v10957_v4, %v10842_v8 }
 0x52e   : > { %v10388_v38 = vpack.c.bf16 %v10875_v62, %v16495_v34  ;;  %3823 = vst [vmem:[%s14722_s23 + $0x30] sm:$0xff] %v10387_v7  ;;  %v16498_v62 = vld [vmem:[#allocation27_spill] sm:$0xff]  ;;  %v10392_v57 = vpack.c.bf16 %v10895_v27, %v16504_v28  ;;  %v16505_v28 = vunpack.i.h.bf16 %v16480_v2  ;;  %v16506_v27 = vld [vmem:[#allocation38_spill] sm:$0xff]  ;;  %v10897_v4 = vunpack.i.l.bf16 %v14717_v16 }
 0x52f   : > { %v16499_v34 = vunpack.i.l.bf16 %v16498_v62  ;;  %v10391_v26 = vpack.c.bf16 %v10890_v43, %v16501_v50  ;;  %3849 = vst [vmem:[%s14722_s23 + $0x100] sm:$0xff] %v10413_v9  ;;  %v10954_v50 = vunpack.i.l.bf16 %v14587_v53  ;;  %v14796_v43 = vpop.trf.xlu0  ;;  %v16507_v9 = vunpack.i.l.bf16 %v16506_v27  ;;  %3850 = vst [vmem:[%s14722_s23 + $0x108] sm:$0xff] %v10414_v17 }
 0x530   : > { %3824 = vst [vmem:[%s14722_s23 + $0x38] sm:$0xff] %v10388_v38  ;;  %v10949_v38 = vunpack.i.l.bf16 %v14539_v47  ;;  %v10900_v47 = vunpack.i.h.bf16 %v14717_v16  ;;  %3828 = vst [vmem:[%s14722_s23 + $0x58] sm:$0xff] %v10392_v57  ;;  %v14806_v53 = vpop.trf.xlu1  ;;  %v10967_v57 = vunpack.i.h.bf16 %v14627_v12  ;;  %v16508_v2 = vunpack.i.h.bf16 %v16483_v51 }
 0x531   : > { %v10390_v7 = vpack.c.bf16 %v10885_v39, %v16499_v34  ;;  %3827 = vst [vmem:[%s14722_s23 + $0x50] sm:$0xff] %v10391_v26  ;;  %v16502_v39 = vunpack.i.h.bf16 %v16477_v0  ;;  %v10892_v26 = vunpack.i.l.bf16 %v14665_v29  ;;  %v10962_v0 = vunpack.i.h.bf16 %v14613_v41 }
 0x532   : > { %v10398_v20 = vpack.c.bf16 %v10954_v50, %v16505_v28  ;;  %v16509_v50 = vld [vmem:[#allocation31_spill] sm:$0xff]  ;;  %v16511_v17 = vunpack.i.l.bf16 %v14446_v48  ;;  %v10910_v28 = vunpack.i.h.bf16 %v14779_v19  ;;  %v16512_v51 = vunpack.i.h.bf16 %v16486_v10  ;;  %v16513_v48 = vld [vmem:[#allocation41_spill] sm:$0xff] }
 0x533   : > { %3826 = vst [vmem:[%s14722_s23 + $0x48] sm:$0xff] %v10390_v7  ;;  %v10397_v34 = vpack.c.bf16 %v10949_v38, %v16502_v39  ;;  %v10393_v7 = vpack.c.bf16 %v10900_v47, %v16507_v9  ;;  %v10415_v38 = vpack.c.bf16 %v10962_v0, %v10847_v35  ;;  %v10959_v39 = vunpack.i.l.bf16 %v14613_v41  ;;  %v10993_v9 = vpop.trf.xlu0 }
 0x534   : > { %3834 = vst [vmem:[%s14722_s23 + $0x88] sm:$0xff] %v10398_v20  ;;  %v16510_v47 = vunpack.i.l.bf16 %v16509_v50  ;;  %v10964_v41 = vunpack.i.l.bf16 %v14627_v12  ;;  %v10416_v0 = vpack.c.bf16 %v10967_v57, %v16511_v17  ;;  %v4040_v20 = vpop.permute.xlu1 %4039  ;;  %v16514_v12 = vunpack.i.l.bf16 %v16513_v48  ;;  %v16517_v17 = vld [vmem:[#allocation46_spill] sm:$0xff] }
 0x535   : > { %3833 = vst [vmem:[%s14722_s23 + $0x80] sm:$0xff] %v10397_v34  ;;  %v10905_v34 = vunpack.i.h.bf16 %v14750_v23  ;;  %3829 = vst [vmem:[%s14722_s23 + $0x60] sm:$0xff] %v10393_v7  ;;  %v10399_v8 = vpack.c.bf16 %v10959_v39, %v16508_v2  ;;  %v10902_v7 = vunpack.i.l.bf16 %v14750_v23  ;;  %v10972_v39 = vunpack.i.h.bf16 %v14662_v31 }
 0x536   : > { %3851 = vst [vmem:[%s14722_s23 + $0x110] sm:$0xff] %v10415_v38  ;;  %v10400_v38 = vpack.c.bf16 %v10964_v41, %v16512_v51  ;;  %3852 = vst [vmem:[%s14722_s23 + $0x118] sm:$0xff] %v10416_v0  ;;  %v10969_v57 = vunpack.i.l.bf16 %v14662_v31  ;;  %v10915_v2 = vunpack.i.h.bf16 %v14806_v53  ;;  %v16516_v10 = vunpack.i.h.bf16 %v16488_v6 }
 0x537   : > { %v10394_v35 = vpack.c.bf16 %v10905_v34, %v16510_v47  ;;  %3835 = vst [vmem:[%s14722_s23 + $0x90] sm:$0xff] %v10399_v8  ;;  %v10395_v34 = vpack.c.bf16 %v10910_v28, %v16514_v12  ;;  %v10907_v8 = vunpack.i.l.bf16 %v14779_v19  ;;  %v16515_v47 = vunpack.i.l.bf16 %v14469_v55 }
 0x538   : > { %3836 = vst [vmem:[%s14722_s23 + $0x98] sm:$0xff] %v10400_v38  ;;  %v10401_v41 = vpack.c.bf16 %v10969_v57, %v16516_v10  ;;  %v16518_v0 = vunpack.i.l.bf16 %v16517_v17  ;;  %v10977_v28 = vunpack.i.h.bf16 %v14704_v37  ;;  %v10974_v31 = vunpack.i.l.bf16 %v14704_v37  ;;  %v10998_v57 = vpop.trf.xlu0 }
 0x539   : > { %3830 = vst [vmem:[%s14722_s23 + $0x68] sm:$0xff] %v10394_v35  ;;  %v10417_v35 = vpack.c.bf16 %v10972_v39, %v16515_v47  ;;  %3831 = vst [vmem:[%s14722_s23 + $0x70] sm:$0xff] %v10395_v34  ;;  %v10982_v38 = vunpack.i.h.bf16 %v14742_v40  ;;  %v16519_v55 = vunpack.i.l.bf16 %v14493_v25  ;;  %v10979_v6 = vunpack.i.l.bf16 %v14742_v40  ;;  %v3944_v34 = vpop.permute.xlu1 %3943 }
 0x53a   : > { %v10396_v51 = vpack.c.bf16 %v10915_v2, %v16518_v0  ;;  %3837 = vst [vmem:[%s14722_s23 + $0xa0] sm:$0xff] %v10401_v41  ;;  %v10987_v12 = vunpack.i.h.bf16 %v14769_v44  ;;  %v16520_v2 = vunpack.i.h.bf16 %v16490_v58  ;;  %v16521_v47 = vunpack.i.l.bf16 %v14513_v14 }
 0x53b   : > { %3853 = vst [vmem:[%s14722_s23 + $0x120] sm:$0xff] %v10417_v35  ;;  %v10418_v39 = vpack.c.bf16 %v10977_v28, %v16519_v55  ;;  %v16522_v10 = vunpack.i.h.bf16 %v16492_v52  ;;  %v16523_v25 = vunpack.i.l.bf16 %v14559_v60  ;;  %v10984_v40 = vunpack.i.l.bf16 %v14769_v44 }
 0x53c   : > { %3832 = vst [vmem:[%s14722_s23 + $0x78] sm:$0xff] %v10396_v51  ;;  %v10402_v37 = vpack.c.bf16 %v10974_v31, %v16520_v2  ;;  %v10419_v35 = vpack.c.bf16 %v10982_v38, %v16521_v47  ;;  %v10992_v51 = vunpack.i.h.bf16 %v14796_v43  ;;  %v10989_v58 = vunpack.i.l.bf16 %v14796_v43 }
 0x53d   : > { %3854 = vst [vmem:[%s14722_s23 + $0x128] sm:$0xff] %v10418_v39  ;;  %v10403_v41 = vpack.c.bf16 %v10979_v6, %v16522_v10  ;;  %v10420_v0 = vpack.c.bf16 %v10987_v12, %v16523_v25  ;;  %v4249_v14 = vpack.i.b16 %v4040_v20, %v13428_v30  ;;  %v16524_v52 = vunpack.i.h.bf16 %v16494_v15  ;;  %v3996_v47 = vpop.permute.xlu1 %3995 }
 0x53e   : > { %3838 = vst [vmem:[%s14722_s23 + $0xa8] sm:$0xff] %v10402_v37  ;;  %3855 = vst [vmem:[%s14722_s23 + $0x130] sm:$0xff] %v10419_v35  ;;  %v16525_v60 = vunpack.i.l.bf16 %v14603_v24  ;;  %v4252_v38 = vshrl.u32 %v4040_v20, 16  ;;  %v10997_v44 = vunpack.i.h.bf16 %v10993_v9  ;;  %v16526_v55 = vunpack.i.h.bf16 %v16496_v1  ;;  %v14884_v35 = vpop.trf.xlu0 }
 0x53f   : > { %3839 = vst [vmem:[%s14722_s23 + $0xb0] sm:$0xff] %v10403_v41  ;;  %3856 = vst [vmem:[%s14722_s23 + $0x138] sm:$0xff] %v10420_v0  ;;  %v10404_v28 = vpack.c.bf16 %v10984_v40, %v16524_v52  ;;  %v10994_v6 = vunpack.i.l.bf16 %v10993_v9  ;;  %v16527_v43 = vshrl.u32 %v13428_v30, 16  ;;  %v16528_v2 = vunpack.i.l.bf16 %v14615_v36 }
 0x540   : > { %v10421_v31 = vpack.c.bf16 %v10992_v51, %v16525_v60  ;;  %v10405_v39 = vpack.c.bf16 %v10989_v58, %v16526_v55  ;;  %v4233_v37 = vpack.i.b16 %v3944_v34, %v16317_v13  ;;  %v4236_v24 = vshrl.u32 %v3944_v34, 16 }
 0x541   : > { %3840 = vst [vmem:[%s14722_s23 + $0xb8] sm:$0xff] %v10404_v28  ;;  %v4253_v12 = vpack.i.b16 %v4252_v38, %v16527_v43  ;;  %v10422_v15 = vpack.c.bf16 %v10997_v44, %v16528_v2  ;;  %v16529_v1 = vunpack.i.h.bf16 %v16498_v62  ;;  %v11002_v9 = vunpack.i.h.bf16 %v10998_v57 }
 0x542   : > { %3857 = vst [vmem:[%s14722_s23 + $0x140] sm:$0xff] %v10421_v31  ;;  %3841 = vst [vmem:[%s14722_s23 + $0xc0] sm:$0xff] %v10405_v39  ;;  %v16530_v10 = vshrl.u32 %v16317_v13, 16  ;;  %v5385_v41 = vcombine.low %v4233_v37, %v4249_v14  ;;  %v5386_v25 = vcombine.high %v4233_v37, %v4249_v14  ;;  %v10999_v36 = vunpack.i.l.bf16 %v10998_v57 }
 0x543   : > { %v10406_v20 = vpack.c.bf16 %v10994_v6, %v16529_v1  ;;  %3858 = vst [vmem:[%s14722_s23 + $0x148] sm:$0xff] %v10422_v15  ;;  %v10423_v34 = vpack.c.bf16 %v11002_v9, %v10887_v59  ;;  %v4289_v0 = vpack.i.b16 %v3996_v47, %v16322_v11  ;;  %v4292_v40 = vshrl.u32 %v3996_v47, 16 }
 0x544   : > { %v4237_v30 = vpack.i.b16 %v4236_v24, %v16530_v10  ;;  %v11007_v51 = vunpack.i.h.bf16 %v14884_v35  ;;  %v5393_v62 = vrot.slane %v5385_v41, %v13515_v46  ;;  %v5400_v58 = vrot.slane %v5386_v25, %v13515_v46 }
 0x545   : > { %3842 = vst [vmem:[%s14722_s23 + $0xc8] sm:$0xff] %v10406_v20  ;;  %3859 = vst [vmem:[%s14722_s23 + $0x150] sm:$0xff] %v10423_v34  ;;  %v16531_v14 = vunpack.i.h.bf16 %v16500_v18  ;;  %v16532_v28 = vshrl.u32 %v16322_v11, 16  ;;  %v5669_v59 = vcombine.high %v4289_v0, %v13579_v45  ;;  %v14908_v60 = vrot.slane %v4289_v0, %v13515_v46 }
 0x546   : > { %v5452_v52 = vcombine.low %v4237_v30, %v4253_v12  ;;  %v5453_v13 = vcombine.high %v4237_v30, %v4253_v12  ;;  %v5416_v31 = vcombine.low %v5393_v62, %v14467_v63  ;;  %v5417_v38 = vcombine.high %v5393_v62, %v14467_v63 }
 0x547   : > { %v10407_v57 = vpack.c.bf16 %v10999_v36, %v16531_v14  ;;  %v14904_v5 = vpack.i.b16 %v4292_v40, %v16532_v28  ;;  %v5432_v44 = vcombine.low %v5400_v58, %v14473_v61  ;;  %v5433_v55 = vcombine.high %v5400_v58, %v14473_v61 }
 0x548   : > { %v5460_v18 = vrot.slane %v5452_v52, %v13515_v46  ;;  %v5467_v39 = vrot.slane %v5453_v13, %v13515_v46  ;;  %v14918_v11 = vrot.slane %v5669_v59, %v13515_v46  ;;  %v5424_v43 = vrot.slane %v5416_v31, %v13518_v22 }
 0x549   : > { %3843 = vst [vmem:[%s14722_s23 + $0xd0] sm:$0xff] %v10407_v57  ;;  %v5736_v6 = vcombine.high %v14904_v5, %v13579_v45  ;;  %v5431_v12 = vrot.slane %v5417_v38, %v13518_v22  ;;  %v5440_v63 = vrot.slane %v5432_v44, %v13518_v22  ;;  %v5447_v2 = vrot.slane %v5433_v55, %v13518_v22 }
 0x54a   : > { %v5483_v61 = vcombine.low %v5460_v18, %v14485_v32  ;;  %v5484_v15 = vcombine.high %v5460_v18, %v14485_v32  ;;  %v5499_v37 = vcombine.low %v5467_v39, %v14496_v54  ;;  %v5500_v24 = vcombine.high %v5467_v39, %v14496_v54 }
 0x54b   : > { %v7529_v47 = vcombine.low %v5424_v43, %v5431_v12  ;;  %v10150_v1 = vcombine.high %v5424_v43, %v5431_v12  ;;  %v7545_v20 = vcombine.low %v5440_v63, %v5447_v2  ;;  %v10151_v9 = vcombine.high %v5440_v63, %v5447_v2 }
 0x54c   : > { %v5491_v10 = vrot.slane %v5483_v61, %v13518_v22  ;;  %v5498_v30 = vrot.slane %v5484_v15, %v13518_v22  ;;  %v5507_v41 = vrot.slane %v5499_v37, %v13518_v22  ;;  %v5514_v25 = vrot.slane %v5500_v24, %v13518_v22 }
 0x54d   : > { %v7536_v36 = vrot.slane %v7529_v47, %v13515_v46  ;;  %v7544_v32 = vrot.slane %v10150_v1, %v13515_v46  ;;  %v7552_v34 = vrot.slane %v7545_v20, %v13515_v46  ;;  %v7560_v54 = vrot.slane %v10151_v9, %v13515_v46  ;;  %v4044_v47 = vpop.permute.xlu1 %4043  ;;  %v14950_v1 = vpop.trf.xlu0 }
 0x54e   : > { %v7596_v0 = vcombine.low %v5491_v10, %v5498_v30  ;;  %v10152_v40 = vcombine.high %v5491_v10, %v5498_v30  ;;  %v7612_v62 = vcombine.low %v5507_v41, %v5514_v25  ;;  %v10153_v58 = vcombine.high %v5507_v41, %v5514_v25 }
 0x54f   : > { %v7561_v52 = vcombine.low %v7536_v36, %v7544_v32  ;;  %v7562_v13 = vcombine.high %v7536_v36, %v7544_v32  ;;  %v7577_v14 = vcombine.low %v7552_v34, %v7560_v54  ;;  %v7578_v57 = vcombine.high %v7552_v34, %v7560_v54 }
 0x550   : > { %v7603_v28 = vrot.slane %v7596_v0, %v13515_v46  ;;  %v7611_v59 = vrot.slane %v10152_v40, %v13515_v46  ;;  %v7619_v31 = vrot.slane %v7612_v62, %v13515_v46  ;;  %v7627_v38 = vrot.slane %v10153_v58, %v13515_v46 }
 0x551   : > { %v7569_v44 = vrot.slane %v7561_v52, %v13518_v22  ;;  %v7576_v55 = vrot.slane %v7562_v13, %v13518_v22  ;;  %v7585_v18 = vrot.slane %v7577_v14, %v13518_v22  ;;  %v7592_v39 = vrot.slane %v7578_v57, %v13518_v22 }
 0x552   : > { %v7628_v43 = vcombine.low %v7603_v28, %v7611_v59  ;;  %v7629_v12 = vcombine.high %v7603_v28, %v7611_v59  ;;  %v7644_v63 = vcombine.low %v7619_v31, %v7627_v38  ;;  %v7645_v2 = vcombine.high %v7619_v31, %v7627_v38  ;;  %v3948_v31 = vpop.permute.xlu1 %3947 }
 0x553   : > { %v7593_v61 = vcombine.low %v7569_v44, %v7585_v18  ;;  %v7594_v15 = vcombine.high %v7569_v44, %v7585_v18  ;;  %v7595_v37 = vcombine.low %v7576_v55, %v7592_v39  ;;  %v14948_v24 = vrot.slane %v14904_v5, %v13515_v46 }
 0x554   : > { %v7636_v20 = vrot.slane %v7628_v43, %v13518_v22  ;;  %v7643_v9 = vrot.slane %v7629_v12, %v13518_v22  ;;  %v7652_v10 = vrot.slane %v7644_v63, %v13518_v22  ;;  %v7659_v30 = vrot.slane %v7645_v2, %v13518_v22 }
 0x555   : > { %v8864_v41 = vshrl.u32 %v7593_v61, 16  ;;  %v8870_v25 = vshrl.u32 %v7594_v15, 16  ;;  %v8876_v36 = vshrl.u32 %v7595_v37, 16  ;;  %v14957_v32 = vrot.slane %v5736_v6, %v13515_v46 }
 0x556   : > { %v7660_v5 = vcombine.low %v7636_v20, %v7652_v10  ;;  %v7661_v34 = vcombine.high %v7636_v20, %v7652_v10  ;;  %v7662_v54 = vcombine.low %v7643_v9, %v7659_v30  ;;  %v10424_v0 = vpack.c.bf16 %v11007_v51, %v10892_v26  ;;  %v11013_v26 = vpop.trf.xlu0 }
 0x557   : > { %v11004_v40 = vunpack.i.l.bf16 %v14884_v35  ;;  %v14965_v62 = vpack.i.b16 %v4044_v47, %v16419_v21  ;;  %v16533_v28 = vunpack.i.h.bf16 %v16503_v33  ;;  %v4300_v29 = vshrl.u32 %v4044_v47, 16 }
 0x558   : > { %v8863_v58 = vpack.i.b16 %v7660_v5, %v7593_v61  ;;  %v8865_v52 = vshrl.u32 %v7660_v5, 16  ;;  %v8869_v13 = vpack.i.b16 %v7661_v34, %v7594_v15  ;;  %v8871_v14 = vshrl.u32 %v7661_v34, 16  ;;  %3860 = vst [vmem:[%s14722_s23 + $0x158] sm:$0xff] %v10424_v0 }
 0x559   : > { %v8875_v6 = vpack.i.b16 %v7662_v54, %v7595_v37  ;;  %v8877_v57 = vshrl.u32 %v7662_v54, 16  ;;  %v10408_v59 = vpack.c.bf16 %v11004_v40, %v16533_v28  ;;  %v16534_v47 = vshrl.u32 %v16419_v21, 16 }
 0x55a   : > { %v8866_v35 = vpack.i.b16 %v8865_v52, %v8864_v41  ;;  %v8872_v51 = vpack.i.b16 %v8871_v14, %v8870_v25  ;;  %v10200_v38 = vcombine.low %v8863_v58, %v8863_v58  ;;  %v10201_v44 = vcombine.high %v8863_v58, %v8863_v58  ;;  %v3950_v25 = vpop.permute.xlu1 %3949 }
 0x55b   : > { %v8878_v55 = vpack.i.b16 %v8877_v57, %v8876_v36  ;;  %v10264_v18 = vcombine.low %v8869_v13, %v8869_v13  ;;  %v10265_v39 = vcombine.high %v8869_v13, %v8869_v13  ;;  %v10328_v43 = vcombine.low %v8875_v6, %v8875_v6  ;;  %3844 = vst [vmem:[%s14722_s23 + $0xd8] sm:$0xff] %v10408_v59  ;;  %v15000_v36 = vpop.trf.xlu0 }
 0x55c   : > { %v10232_v33 = vcombine.low %v8866_v35, %v8866_v35  ;;  %v10233_v12 = vcombine.high %v8866_v35, %v8866_v35  ;;  %v10296_v63 = vcombine.low %v8872_v51, %v8872_v51  ;;  %v10297_v2 = vcombine.high %v8872_v51, %v8872_v51  ;;  %9614 = vst.msk [vmem:[%s13771_s13 + $0x38] sm:$0xf] %vm9599_vm0, %v10200_v38 }
 0x55d   : > { %9615 = vst.msk [vmem:[%s13771_s13 + $0x3c] sm:$0xf] %vm9599_vm0, %v10201_v44  ;;  %v10329_v61 = vcombine.high %v8875_v6, %v8875_v6  ;;  %v10360_v15 = vcombine.low %v8878_v55, %v8878_v55  ;;  %v10361_v37 = vcombine.high %v8878_v55, %v8878_v55  ;;  %9678 = vst.msk [vmem:[%s13771_s13 + $0x138] sm:$0xf] %vm9599_vm0, %v10264_v18  ;;  %v11012_v9 = vunpack.i.h.bf16 %v14950_v1 }
 0x55e   : > { %9679 = vst.msk [vmem:[%s13771_s13 + $0x13c] sm:$0xf] %vm9599_vm0, %v10265_v39  ;;  %9742 = vst.msk [vmem:[%s13771_s13 + $0x238] sm:$0xf] %vm9599_vm0, %v10328_v43  ;;  %v4301_v20 = vpack.i.b16 %v4300_v29, %v16534_v47  ;;  %v11009_v10 = vunpack.i.l.bf16 %v14950_v1  ;;  %v4281_v21 = vpack.i.b16 %v3948_v31, %v16422_v3  ;;  %v4284_v30 = vshrl.u32 %v3948_v31, 16 }
 0x55f   : > { %9646 = vst.msk [vmem:[%s13771_s13 + $0xb8] sm:$0xf] %vm9599_vm0, %v10232_v33  ;;  %9647 = vst.msk [vmem:[%s13771_s13 + $0xbc] sm:$0xf] %vm9599_vm0, %v10233_v12  ;;  %v11017_v41 = vunpack.i.h.bf16 %v11013_v26  ;;  %v10425_v5 = vpack.c.bf16 %v11012_v9, %v10897_v4  ;;  %v16535_v1 = vunpack.i.h.bf16 %v16506_v27  ;;  %v11014_v54 = vunpack.i.l.bf16 %v11013_v26 }
 0x560   : > { %9710 = vst.msk [vmem:[%s13771_s13 + $0x1b8] sm:$0xf] %vm9599_vm0, %v10296_v63  ;;  %9711 = vst.msk [vmem:[%s13771_s13 + $0x1bc] sm:$0xf] %vm9599_vm0, %v10297_v2  ;;  %v16536_v0 = vshrl.u32 %v16422_v3, 16  ;;  %v5653_v58 = vcombine.low %v4281_v21, %v14965_v62  ;;  %v5654_v52 = vcombine.high %v4281_v21, %v14965_v62  ;;  %v16537_v16 = vunpack.i.h.bf16 %v16509_v50 }
 0x561   : > { %9743 = vst.msk [vmem:[%s13771_s13 + $0x23c] sm:$0xf] %vm9599_vm0, %v10329_v61  ;;  %9774 = vst.msk [vmem:[%s13771_s13 + $0x2b8] sm:$0xf] %vm9599_vm0, %v10360_v15  ;;  %v10409_v34 = vpack.c.bf16 %v11009_v10, %v16535_v1  ;;  %v10426_v13 = vpack.c.bf16 %v11017_v41, %v10902_v7  ;;  %v4305_v27 = vpack.i.b16 %v3950_v25, %v16423_v49  ;;  %v4308_v14 = vshrl.u32 %v3950_v25, 16 }
 0x562   : > { %9775 = vst.msk [vmem:[%s13771_s13 + $0x2bc] sm:$0xf] %vm9599_vm0, %v10361_v37  ;;  %v4285_v40 = vpack.i.b16 %v4284_v30, %v16536_v0  ;;  %3861 = vst [vmem:[%s14722_s23 + $0x160] sm:$0xff] %v10425_v5  ;;  %v10410_v4 = vpack.c.bf16 %v11014_v54, %v16537_v16  ;;  %v11022_v6 = vunpack.i.h.bf16 %v15000_v36  ;;  %v5661_v3 = vrot.slane %v5653_v58, %v13515_v46 }
 0x563   : > { %3845 = vst [vmem:[%s14722_s23 + $0xe0] sm:$0xff] %v10409_v34  ;;  %v5668_v57 = vrot.slane %v5654_v52, %v13515_v46  ;;  %3862 = vst [vmem:[%s14722_s23 + $0x168] sm:$0xff] %v10426_v13  ;;  %v16538_v23 = vshrl.u32 %v16423_v49, 16  ;;  %v5787_v50 = vcombine.low %v4305_v27, %v14557_v56  ;;  %v5788_v59 = vcombine.high %v4305_v27, %v14557_v56 }
 0x564   : > { %v5720_v28 = vcombine.low %v4285_v40, %v4301_v20  ;;  %v5721_v62 = vcombine.high %v4285_v40, %v4301_v20  ;;  %3846 = vst [vmem:[%s14722_s23 + $0xe8] sm:$0xff] %v10410_v4  ;;  %v10427_v29 = vpack.c.bf16 %v11022_v6, %v10907_v8  ;;  %v5684_v31 = vcombine.low %v5661_v3, %v14908_v60 }
 0x565   : > { %v15024_v7 = vpack.i.b16 %v4308_v14, %v16538_v23  ;;  %v5685_v26 = vcombine.high %v5661_v3, %v14908_v60  ;;  %v5700_v35 = vcombine.low %v5668_v57, %v14918_v11  ;;  %v5701_v51 = vcombine.high %v5668_v57, %v14918_v11 }
 0x566   : > { %v5728_v38 = vrot.slane %v5720_v28, %v13515_v46  ;;  %v5735_v49 = vrot.slane %v5721_v62, %v13515_v46  ;;  %v5795_v44 = vrot.slane %v5787_v50, %v13515_v46  ;;  %v15038_v55 = vrot.slane %v5788_v59, %v13515_v46  ;;  %3863 = vst [vmem:[%s14722_s23 + $0x170] sm:$0xff] %v10427_v29 }
 0x567   : > { %v5692_v56 = vrot.slane %v5684_v31, %v13518_v22  ;;  %v5699_v19 = vrot.slane %v5685_v26, %v13518_v22  ;;  %v5708_v8 = vrot.slane %v5700_v35, %v13518_v22  ;;  %v5715_v60 = vrot.slane %v5701_v51, %v13518_v22 }
 0x568   : > { %v5751_v11 = vcombine.low %v5728_v38, %v14948_v24  ;;  %v5752_v18 = vcombine.high %v5728_v38, %v14948_v24  ;;  %v5767_v39 = vcombine.low %v5735_v49, %v14957_v32  ;;  %v5768_v43 = vcombine.high %v5735_v49, %v14957_v32 }
 0x569   : > { %v7797_v33 = vcombine.low %v5692_v56, %v5699_v19  ;;  %v10158_v12 = vcombine.high %v5692_v56, %v5699_v19  ;;  %v7813_v63 = vcombine.low %v5708_v8, %v5715_v60  ;;  %v10159_v2 = vcombine.high %v5708_v8, %v5715_v60 }
 0x56a   : > { %v5759_v61 = vrot.slane %v5751_v11, %v13518_v22  ;;  %v5766_v15 = vrot.slane %v5752_v18, %v13518_v22  ;;  %v5775_v37 = vrot.slane %v5767_v39, %v13518_v22  ;;  %v5782_v47 = vrot.slane %v5768_v43, %v13518_v22  ;;  %v16539_v11 = vld [vmem:[#allocation11_spill] sm:$0xff]  ;;  %v16540_v43 = vld [vmem:[#allocation81_spill] sm:$0xff] }
 0x56b   : > { %v7804_v20 = vrot.slane %v7797_v33, %v13515_v46  ;;  %v7812_v24 = vrot.slane %v10158_v12, %v13515_v46  ;;  %v7820_v9 = vrot.slane %v7813_v63, %v13515_v46  ;;  %v7828_v32 = vrot.slane %v10159_v2, %v13515_v46  ;;  %v15079_v12 = vpop.permute.xlu1 %3999 }
 0x56c   : > { %v7864_v10 = vcombine.low %v5759_v61, %v5766_v15  ;;  %v10160_v21 = vcombine.high %v5759_v61, %v5766_v15  ;;  %v7880_v30 = vcombine.low %v5775_v37, %v5782_v47  ;;  %v10161_v41 = vcombine.high %v5775_v37, %v5782_v47 }
 0x56d   : > { %v7829_v25 = vcombine.low %v7804_v20, %v7812_v24  ;;  %v7830_v5 = vcombine.high %v7804_v20, %v7812_v24  ;;  %v7845_v1 = vcombine.low %v7820_v9, %v7828_v32  ;;  %v7846_v34 = vcombine.high %v7820_v9, %v7828_v32 }
 0x56e   : > { %v7871_v54 = vrot.slane %v7864_v10, %v13515_v46  ;;  %v7879_v0 = vrot.slane %v10160_v21, %v13515_v46  ;;  %v7887_v40 = vrot.slane %v7880_v30, %v13515_v46  ;;  %v7895_v58 = vrot.slane %v10161_v41, %v13515_v46 }
 0x56f   : > { %v7837_v52 = vrot.slane %v7829_v25, %v13518_v22  ;;  %v7844_v13 = vrot.slane %v7830_v5, %v13518_v22  ;;  %v7853_v16 = vrot.slane %v7845_v1, %v13518_v22  ;;  %v7860_v4 = vrot.slane %v7846_v34, %v13518_v22 }
 0x570   : > { %v7896_v27 = vcombine.low %v7871_v54, %v7879_v0  ;;  %v7897_v14 = vcombine.high %v7871_v54, %v7879_v0  ;;  %v7912_v6 = vcombine.low %v7887_v40, %v7895_v58  ;;  %v7913_v3 = vcombine.high %v7887_v40, %v7895_v58  ;;  %v15095_v58 = vpop.permute.xlu1 %4047 }
 0x571   : > { %v7861_v57 = vcombine.low %v7837_v52, %v7853_v16  ;;  %v7862_v28 = vcombine.high %v7837_v52, %v7853_v16  ;;  %v7863_v62 = vcombine.low %v7844_v13, %v7860_v4  ;;  %v5818_v23 = vcombine.low %v5795_v44, %v14567_v42 }
 0x572   : > { %v7904_v50 = vrot.slane %v7896_v27, %v13518_v22  ;;  %v7911_v59 = vrot.slane %v7897_v14, %v13518_v22  ;;  %v7920_v29 = vrot.slane %v7912_v6, %v13518_v22  ;;  %v7927_v31 = vrot.slane %v7913_v3, %v13518_v22  ;;  %v16541_v14 = vld [vmem:[#allocation63_spill] sm:$0xff] }
 0x573   : > { %v8900_v26 = vshrl.u32 %v7861_v57, 16  ;;  %v8906_v35 = vshrl.u32 %v7862_v28, 16  ;;  %v8912_v51 = vshrl.u32 %v7863_v62, 16  ;;  %v5819_v38 = vcombine.high %v5795_v44, %v14567_v42 }
 0x574   : > { %v7928_v49 = vcombine.low %v7904_v50, %v7920_v29  ;;  %v7929_v56 = vcombine.high %v7904_v50, %v7920_v29  ;;  %v7930_v19 = vcombine.low %v7911_v59, %v7927_v31  ;;  %v5826_v8 = vrot.slane %v5818_v23, %v13518_v22 }
 0x575   : > { %v5833_v60 = vrot.slane %v5819_v38, %v13518_v22  ;;  %v5834_v18 = vcombine.low %v15038_v55, %v16539_v11  ;;  %v5835_v39 = vcombine.high %v15038_v55, %v16539_v11  ;;  %v5854_v33 = vcombine.low %v15024_v7, %v16540_v43 }
 0x576   : > { %v8899_v63 = vpack.i.b16 %v7928_v49, %v7861_v57  ;;  %v8901_v42 = vshrl.u32 %v7928_v49, 16  ;;  %v8905_v44 = vpack.i.b16 %v7929_v56, %v7862_v28  ;;  %v8907_v2 = vshrl.u32 %v7929_v56, 16 }
 0x577   : > { %v8911_v61 = vpack.i.b16 %v7930_v19, %v7863_v62  ;;  %v8913_v15 = vshrl.u32 %v7930_v19, 16  ;;  %v5842_v37 = vrot.slane %v5834_v18, %v13518_v22  ;;  %v5849_v47 = vrot.slane %v5835_v39, %v13518_v22  ;;  %v16542_v62 = vld [vmem:[#allocation29_spill] sm:$0xff] }
 0x578   : > { %v8902_v20 = vpack.i.b16 %v8901_v42, %v8900_v26  ;;  %v8908_v24 = vpack.i.b16 %v8907_v2, %v8906_v35  ;;  %v10204_v55 = vcombine.low %v8899_v63, %v8899_v63  ;;  %v10205_v9 = vcombine.high %v8899_v63, %v8899_v63 }
 0x579   : > { %v8914_v32 = vpack.i.b16 %v8913_v15, %v8912_v51  ;;  %v10268_v10 = vcombine.low %v8905_v44, %v8905_v44  ;;  %v10269_v21 = vcombine.high %v8905_v44, %v8905_v44  ;;  %v10332_v30 = vcombine.low %v8911_v61, %v8911_v61  ;;  %v16543_v15 = vld [vmem:[#allocation98_spill] sm:$0xff] }
 0x57a   : > { %v10236_v41 = vcombine.low %v8902_v20, %v8902_v20  ;;  %v10237_v25 = vcombine.high %v8902_v20, %v8902_v20  ;;  %v10300_v5 = vcombine.low %v8908_v24, %v8908_v24  ;;  %v10301_v1 = vcombine.high %v8908_v24, %v8908_v24  ;;  %9618 = vst.msk [vmem:[%s13771_s13 + $0x48] sm:$0xf] %vm9599_vm0, %v10204_v55 }
 0x57b   : > { %9619 = vst.msk [vmem:[%s13771_s13 + $0x4c] sm:$0xf] %vm9599_vm0, %v10205_v9  ;;  %v10333_v34 = vcombine.high %v8911_v61, %v8911_v61  ;;  %v10364_v54 = vcombine.low %v8914_v32, %v8914_v32  ;;  %v10365_v0 = vcombine.high %v8914_v32, %v8914_v32  ;;  %9682 = vst.msk [vmem:[%s13771_s13 + $0x148] sm:$0xf] %vm9599_vm0, %v10268_v10  ;;  %v11019_v61 = vunpack.i.l.bf16 %v15000_v36 }
 0x57c   : > { %9683 = vst.msk [vmem:[%s13771_s13 + $0x14c] sm:$0xf] %vm9599_vm0, %v10269_v21  ;;  %9746 = vst.msk [vmem:[%s13771_s13 + $0x248] sm:$0xf] %vm9599_vm0, %v10332_v30  ;;  %v5855_v40 = vcombine.high %v15024_v7, %v16540_v43  ;;  %v5862_v52 = vrot.slane %v5854_v33, %v13515_v46  ;;  %v7931_v13 = vcombine.low %v5826_v8, %v5833_v60  ;;  %v16544_v21 = vunpack.i.h.bf16 %v16513_v48 }
 0x57d   : > { %9650 = vst.msk [vmem:[%s13771_s13 + $0xc8] sm:$0xf] %vm9599_vm0, %v10236_v41  ;;  %9651 = vst.msk [vmem:[%s13771_s13 + $0xcc] sm:$0xf] %vm9599_vm0, %v10237_v25  ;;  %v10162_v16 = vcombine.high %v5826_v8, %v5833_v60  ;;  %v7947_v4 = vcombine.low %v5842_v37, %v5849_v47  ;;  %v10163_v27 = vcombine.high %v5842_v37, %v5849_v47  ;;  %v15125_v8 = vpop.permute.xlu1 %3951  ;;  %v11023_v41 = vpop.trf.xlu0  ;;  %v10912_v25 = vunpack.i.l.bf16 %v14806_v53 }
 0x57e   : > { %9714 = vst.msk [vmem:[%s13771_s13 + $0x1c8] sm:$0xf] %vm9599_vm0, %v10300_v5  ;;  %9715 = vst.msk [vmem:[%s13771_s13 + $0x1cc] sm:$0xf] %vm9599_vm0, %v10301_v1  ;;  %v5869_v7 = vrot.slane %v5855_v40, %v13515_v46  ;;  %v5885_v6 = vcombine.low %v5862_v52, %v16541_v14  ;;  %v5886_v3 = vcombine.high %v5862_v52, %v16541_v14  ;;  %v4340_v1 = vshrl.u32 %v15079_v12, 16 }
 0x57f   : > { %9747 = vst.msk [vmem:[%s13771_s13 + $0x24c] sm:$0xf] %vm9599_vm0, %v10333_v34  ;;  %9778 = vst.msk [vmem:[%s13771_s13 + $0x2c8] sm:$0xf] %vm9599_vm0, %v10364_v54  ;;  %v7938_v57 = vrot.slane %v7931_v13, %v13515_v46  ;;  %v7946_v28 = vrot.slane %v10162_v16, %v13515_v46  ;;  %v7954_v59 = vrot.slane %v7947_v4, %v13515_v46  ;;  %v16545_v48 = vshrl.u32 %v16543_v15, 16 }
 0x580   : > { %9779 = vst.msk [vmem:[%s13771_s13 + $0x2cc] sm:$0xf] %vm9599_vm0, %v10365_v0  ;;  %v5901_v23 = vcombine.low %v5869_v7, %v16542_v62  ;;  %v5902_v50 = vcombine.high %v5869_v7, %v16542_v62  ;;  %v7962_v29 = vrot.slane %v10163_v27, %v13515_v46  ;;  %v5893_v31 = vrot.slane %v5885_v6, %v13518_v22 }
 0x581   : > { %v5900_v26 = vrot.slane %v5886_v3, %v13518_v22  ;;  %v7963_v35 = vcombine.low %v7938_v57, %v7946_v28  ;;  %v7964_v51 = vcombine.high %v7938_v57, %v7946_v28  ;;  %v4337_v37 = vpack.i.b16 %v15079_v12, %v16543_v15  ;;  %v15142_v34 = vpop.permute.xlu1 %3953 }
 0x582   : > { %v5909_v38 = vrot.slane %v5901_v23, %v13518_v22  ;;  %v5916_v49 = vrot.slane %v5902_v50, %v13518_v22  ;;  %v7979_v56 = vcombine.low %v7954_v59, %v7962_v29  ;;  %v7980_v19 = vcombine.high %v7954_v59, %v7962_v29  ;;  %v16546_v29 = vld [vmem:[#allocation99_spill] sm:$0xff] }
 0x583   : > { %v7971_v60 = vrot.slane %v7963_v35, %v13518_v22  ;;  %v7978_v11 = vrot.slane %v7964_v51, %v13518_v22  ;;  %v7998_v18 = vcombine.low %v5893_v31, %v5900_v26  ;;  %v10164_v39 = vcombine.high %v5893_v31, %v5900_v26 }
 0x584   : > { %v7987_v43 = vrot.slane %v7979_v56, %v13518_v22  ;;  %v7994_v33 = vrot.slane %v7980_v19, %v13518_v22  ;;  %v8014_v63 = vcombine.low %v5909_v38, %v5916_v49  ;;  %v10165_v42 = vcombine.high %v5909_v38, %v5916_v49 }
 0x585   : > { %v8005_v44 = vrot.slane %v7998_v18, %v13515_v46  ;;  %v8013_v2 = vrot.slane %v10164_v39, %v13515_v46  ;;  %v10411_v30 = vpack.c.bf16 %v11019_v61, %v16544_v21  ;;  %v4341_v16 = vpack.i.b16 %v4340_v1, %v16545_v48  ;;  %v15171_v35 = vpop.permute.xlu1 %4003  ;;  %v16548_v39 = vld [vmem:[#allocation100_spill] sm:$0xff] }
 0x586   : > { %v7995_v47 = vcombine.low %v7971_v60, %v7987_v43  ;;  %v7996_v20 = vcombine.high %v7971_v60, %v7987_v43  ;;  %v7997_v24 = vcombine.low %v7978_v11, %v7994_v33  ;;  %v8021_v55 = vrot.slane %v8014_v63, %v13515_v46 }
 0x587   : > { %v8029_v9 = vrot.slane %v10165_v42, %v13515_v46  ;;  %v8030_v32 = vcombine.low %v8005_v44, %v8013_v2  ;;  %v8031_v10 = vcombine.high %v8005_v44, %v8013_v2  ;;  %3847 = vst [vmem:[%s14722_s23 + $0xf0] sm:$0xff] %v10411_v30  ;;  %v5937_v53 = vcombine.high %v4337_v37, %v13579_v45 }
 0x588   : > { %v8918_v36 = vshrl.u32 %v7995_v47, 16  ;;  %v8924_v5 = vshrl.u32 %v7996_v20, 16  ;;  %v8930_v13 = vshrl.u32 %v7997_v24, 16  ;;  %v11027_v4 = vunpack.i.h.bf16 %v11023_v41 }
 0x589   : > { %v8038_v54 = vrot.slane %v8030_v32, %v13518_v22  ;;  %v8045_v0 = vrot.slane %v8031_v10, %v13518_v22  ;;  %v8046_v40 = vcombine.low %v8021_v55, %v8029_v9  ;;  %v8047_v52 = vcombine.high %v8021_v55, %v8029_v9  ;;  %v15206_v21 = vpop.permute.xlu1 %4051 }
 0x58a   : > { %v15153_v27 = vrot.slane %v4337_v37, %v13515_v46  ;;  %v15156_v14 = vrot.slane %v5937_v53, %v13515_v46  ;;  %v6004_v6 = vcombine.high %v4341_v16, %v13579_v45  ;;  %v10428_v3 = vpack.c.bf16 %v11027_v4, %v10912_v25 }
 0x58b   : > { %v8054_v7 = vrot.slane %v8046_v40, %v13518_v22  ;;  %v8061_v12 = vrot.slane %v8047_v52, %v13518_v22  ;;  %v11024_v23 = vunpack.i.l.bf16 %v11023_v41  ;;  %v15160_v50 = vrot.slane %v4341_v16, %v13515_v46 }
 0x58c   : > { %v15163_v59 = vrot.slane %v6004_v6, %v13515_v46  ;;  %3864 = vst [vmem:[%s14722_s23 + $0x178] sm:$0xff] %v10428_v3  ;;  %v15168_v31 = vpack.i.b16 %v15095_v58, %v16546_v29  ;;  %v4348_v26 = vshrl.u32 %v15095_v58, 16  ;;  %v16547_v11 = vunpack.i.h.bf16 %v16517_v17 }
 0x58d   : > { %v8062_v57 = vcombine.low %v8038_v54, %v8054_v7  ;;  %v8063_v28 = vcombine.high %v8038_v54, %v8054_v7  ;;  %v8064_v62 = vcombine.low %v8045_v0, %v8061_v12  ;;  %v15179_v43 = vpack.i.b16 %v15125_v8, %v16548_v39 }
 0x58e   : > { %v10412_v18 = vpack.c.bf16 %v11024_v23, %v16547_v11  ;;  %v4332_v10 = vshrl.u32 %v15125_v8, 16 }
 0x58f   : > { %v8917_v51 = vpack.i.b16 %v8062_v57, %v7995_v47  ;;  %v8919_v38 = vshrl.u32 %v8062_v57, 16  ;;  %v8923_v49 = vpack.i.b16 %v8063_v28, %v7996_v20  ;;  %v8925_v56 = vshrl.u32 %v8063_v28, 16 }
 0x590   : > { %v15173_v19 = vpack.i.b16 %v8064_v62, %v7997_v24  ;;  %v8931_v60 = vshrl.u32 %v8064_v62, 16  ;;  %3848 = vst [vmem:[%s14722_s23 + $0xf8] sm:$0xff] %v10412_v18 }
 0x591   : > { %v8920_v33 = vpack.i.b16 %v8919_v38, %v8918_v36  ;;  %v8926_v63 = vpack.i.b16 %v8925_v56, %v8924_v5  ;;  %v10206_v42 = vcombine.low %v8917_v51, %v8917_v51  ;;  %v10207_v44 = vcombine.high %v8917_v51, %v8917_v51 }
 0x592   : > { %v8932_v2 = vpack.i.b16 %v8931_v60, %v8930_v13  ;;  %v10270_v61 = vcombine.low %v8923_v49, %v8923_v49  ;;  %v10271_v15 = vcombine.high %v8923_v49, %v8923_v49  ;;  %v10334_v17 = vcombine.low %v15173_v19, %v15173_v19 }
 0x593   : > { %v10238_v37 = vcombine.low %v8920_v33, %v8920_v33  ;;  %v10239_v47 = vcombine.high %v8920_v33, %v8920_v33  ;;  %v10302_v20 = vcombine.low %v8926_v63, %v8926_v63  ;;  %v10303_v24 = vcombine.high %v8926_v63, %v8926_v63  ;;  %9620 = vst.msk [vmem:[%s13771_s13 + $0x50] sm:$0xf] %vm9599_vm0, %v10206_v42 }
 0x594   : > { %9621 = vst.msk [vmem:[%s13771_s13 + $0x54] sm:$0xf] %vm9599_vm0, %v10207_v44  ;;  %v10335_v55 = vcombine.high %v15173_v19, %v15173_v19  ;;  %v10366_v9 = vcombine.low %v8932_v2, %v8932_v2  ;;  %v10367_v32 = vcombine.high %v8932_v2, %v8932_v2  ;;  %9684 = vst.msk [vmem:[%s13771_s13 + $0x150] sm:$0xf] %vm9599_vm0, %v10270_v61 }
 0x595   : > { %9685 = vst.msk [vmem:[%s13771_s13 + $0x154] sm:$0xf] %vm9599_vm0, %v10271_v15  ;;  %9748 = vst.msk [vmem:[%s13771_s13 + $0x250] sm:$0xf] %vm9599_vm0, %v10334_v17 }
 0x596   : > { %11379 = shalt.err (!%p11376_p9)
}
 0x597   : > { %s11380_s15 = scalar_lea.hbm %s15189_s22, 6144  ;;  %s11384_s16 = scalar_lea.hbm %s15667_s4, 12288 }
 0x598   : > { %p11381_p1 = scmp.ne.s32.totalorder %s15189_s22, %s11380_s15  ;;  %p11385_p13 = scmp.lt.u32.totalorder %s15189_s22, %s15667_s4 }
 0x599   : > { %p11386_p2 = scmp.lt.u32.totalorder %s11384_s16, %s11380_s15  ;;  %p11388_p6 = scmp.lt.u32.totalorder %s11380_s15, %s15189_s22 }
 0x59a   : > { %p11382_p0 = pnand %p11381_p1, %p11573_p12 }
 0x59b   : > { %p11387_p4 = por %p11386_p2, %p11385_p13 }
 0x59c   : > { %p11383_p5 = pneg %p11382_p0 }
 0x59d   : > { %p11389_p8 = por %p11388_p6, %p11387_p4 }
 0x59f   : > { %p11390_p10 = pnand %p11389_p8, %p11383_p5 }
 0x5a1   : > { %11393 = shalt.err (!%p11390_p10)
}
 0x5a2   : > { %s11447_s7 = smov 128   ;;  %s11448_s24 = smov 8   ;;  %9652 = vst.msk [vmem:[%s13771_s13 + $0xd0] sm:$0xf] %vm9599_vm0, %v10238_v37  ;;  %9653 = vst.msk [vmem:[%s13771_s13 + $0xd4] sm:$0xf] %vm9599_vm0, %v10239_v47  ;;  %v5921_v8 = vcombine.low %v15179_v43, %v15168_v31  ;;  %v5922_v30 = vcombine.high %v15179_v43, %v15168_v31 }
 0x5a3   : > { %10633 = dma.vmem_to_hbm [thread:$0]  (%p11573_p12), %s15191_s28, 6144, %s15189_s22, %s9793_s26, %s11447_s7, %s11447_s7, %s11448_s24   ;;  %v16549_v41 = vld [vmem:[#allocation24_spill] sm:$0xff]  ;;  %v4356_v36 = vshrl.u32 %v15142_v34, 16  ;;  %v16550_v5 = vshrl.u32 %v16546_v29, 16  ;;  %v16551_v54 = vshrl.u32 %v16548_v39, 16  ;;  %v16552_v40 = vld [vmem:[#allocation103_spill] sm:$0xff] }
 0x5a4   : > { %9716 = vst.msk [vmem:[%s13771_s13 + $0x1d0] sm:$0xf] %vm9599_vm0, %v10302_v20  ;;  %9717 = vst.msk [vmem:[%s13771_s13 + $0x1d4] sm:$0xf] %vm9599_vm0, %v10303_v24  ;;  %v4353_v25 = vpack.i.b16 %v15142_v34, %v16549_v41  ;;  %v15261_v52 = vpack.i.b16 %v15171_v35, %v16552_v40  ;;  %v4388_v34 = vshrl.u32 %v15171_v35, 16  ;;  %v5929_v13 = vrot.slane %v5921_v8, %v13515_v46  ;;  %v16553_v16 = vld [vmem:[#allocation48_spill] sm:$0xff] }
 0x5a5   : > { %9749 = vst.msk [vmem:[%s13771_s13 + $0x254] sm:$0xf] %vm9599_vm0, %v10335_v55  ;;  %9780 = vst.msk [vmem:[%s13771_s13 + $0x2d0] sm:$0xf] %vm9599_vm0, %v10366_v9  ;;  %v4349_v1 = vpack.i.b16 %v4348_v26, %v16550_v5  ;;  %v4333_v0 = vpack.i.b16 %v4332_v10, %v16551_v54  ;;  %v5936_v48 = vrot.slane %v5922_v30, %v13515_v46  ;;  %v16554_v4 = vld [vmem:[#allocation104_spill] sm:$0xff]  ;;  %v16555_v6 = vshrl.u32 %v16549_v41, 16 }
 0x5a6   : > { %9781 = vst.msk [vmem:[%s13771_s13 + $0x2d4] sm:$0xf] %vm9599_vm0, %v10367_v32  ;;  %v6055_v53 = vcombine.low %v4353_v25, %v16553_v16  ;;  %v15269_v7 = vpack.i.b16 %v15206_v21, %v16554_v4  ;;  %v6056_v57 = vcombine.high %v4353_v25, %v16553_v16  ;;  %v5952_v28 = vcombine.low %v5929_v13, %v15153_v27 }
 0x5a7   : > { %v5988_v58 = vcombine.low %v4333_v0, %v4349_v1  ;;  %v5989_v12 = vcombine.high %v4333_v0, %v4349_v1  ;;  %v15273_v3 = vpack.i.b16 %v4356_v36, %v16555_v6  ;;  %v5953_v62 = vcombine.high %v5929_v13, %v15153_v27  ;;  %v16556_v6 = vld [vmem:[#allocation88_spill] sm:$0xff] }
 0x5a8   : > { %v5968_v23 = vcombine.low %v5936_v48, %v15156_v14  ;;  %v5969_v29 = vcombine.high %v5936_v48, %v15156_v14  ;;  %v6063_v51 = vrot.slane %v6055_v53, %v13515_v46  ;;  %v15284_v38 = vrot.slane %v6056_v57, %v13515_v46 }
 0x5a9   : > { %v5996_v31 = vrot.slane %v5988_v58, %v13515_v46  ;;  %v6003_v26 = vrot.slane %v5989_v12, %v13515_v46  ;;  %v5960_v49 = vrot.slane %v5952_v28, %v13518_v22  ;;  %v5967_v56 = vrot.slane %v5953_v62, %v13518_v22 }
 0x5aa   : > { %v5976_v19 = vrot.slane %v5968_v23, %v13518_v22  ;;  %v5983_v27 = vrot.slane %v5969_v29, %v13518_v22  ;;  %v6086_v57 = vcombine.low %v6063_v51, %v16556_v6 }
 0x5ab   : > { %v6019_v60 = vcombine.low %v5996_v31, %v15160_v50  ;;  %v6020_v14 = vcombine.high %v5996_v31, %v15160_v50  ;;  %v6035_v11 = vcombine.low %v6003_v26, %v15163_v59  ;;  %v6036_v18 = vcombine.high %v6003_v26, %v15163_v59 }
 0x5ac   : > { %v8065_v39 = vcombine.low %v5960_v49, %v5967_v56  ;;  %v10166_v43 = vcombine.high %v5960_v49, %v5967_v56  ;;  %v8081_v33 = vcombine.low %v5976_v19, %v5983_v27  ;;  %v10167_v63 = vcombine.high %v5976_v19, %v5983_v27 }
 0x5ad   : > { %v6027_v42 = vrot.slane %v6019_v60, %v13518_v22  ;;  %v6034_v44 = vrot.slane %v6020_v14, %v13518_v22  ;;  %v6043_v2 = vrot.slane %v6035_v11, %v13518_v22  ;;  %v6050_v61 = vrot.slane %v6036_v18, %v13518_v22  ;;  %v16557_v18 = vld [vmem:[#allocation15_spill] sm:$0xff] }
 0x5ae   : > { %v8072_v15 = vrot.slane %v8065_v39, %v13515_v46  ;;  %v8080_v50 = vrot.slane %v10166_v43, %v13515_v46  ;;  %v8088_v17 = vrot.slane %v8081_v33, %v13515_v46  ;;  %v8096_v59 = vrot.slane %v10167_v63, %v13515_v46  ;;  %v16558_v33 = vld [vmem:[#allocation56_spill] sm:$0xff] }
 0x5af   : > { %v8132_v37 = vcombine.low %v6027_v42, %v6034_v44  ;;  %v10168_v47 = vcombine.high %v6027_v42, %v6034_v44  ;;  %v8148_v20 = vcombine.low %v6043_v2, %v6050_v61  ;;  %v10169_v24 = vcombine.high %v6043_v2, %v6050_v61 }
 0x5b0   : > { %v8097_v55 = vcombine.low %v8072_v15, %v8080_v50  ;;  %v8098_v9 = vcombine.high %v8072_v15, %v8080_v50  ;;  %v8113_v32 = vcombine.low %v8088_v17, %v8096_v59  ;;  %v8114_v10 = vcombine.high %v8088_v17, %v8096_v59 }
 0x5b1   : > { %v8139_v8 = vrot.slane %v8132_v37, %v13515_v46  ;;  %v8147_v30 = vrot.slane %v10168_v47, %v13515_v46  ;;  %v8155_v41 = vrot.slane %v8148_v20, %v13515_v46  ;;  %v8163_v25 = vrot.slane %v10169_v24, %v13515_v46 }
 0x5b2   : > { %v8105_v36 = vrot.slane %v8097_v55, %v13518_v22  ;;  %v8112_v5 = vrot.slane %v8098_v9, %v13518_v22  ;;  %v8121_v1 = vrot.slane %v8113_v32, %v13518_v22  ;;  %v8128_v54 = vrot.slane %v8114_v10, %v13518_v22 }
 0x5b3   : > { %v8164_v0 = vcombine.low %v8139_v8, %v8147_v30  ;;  %v8165_v13 = vcombine.high %v8139_v8, %v8147_v30  ;;  %v8180_v48 = vcombine.low %v8155_v41, %v8163_v25  ;;  %v8181_v16 = vcombine.high %v8155_v41, %v8163_v25 }
 0x5b4   : > { %v8129_v53 = vcombine.low %v8105_v36, %v8121_v1  ;;  %v8130_v58 = vcombine.high %v8105_v36, %v8121_v1  ;;  %v8131_v12 = vcombine.low %v8112_v5, %v8128_v54  ;;  %v6087_v56 = vcombine.high %v6063_v51, %v16556_v6 }
 0x5b5   : > { %v8172_v28 = vrot.slane %v8164_v0, %v13518_v22  ;;  %v8179_v62 = vrot.slane %v8165_v13, %v13518_v22  ;;  %v8188_v23 = vrot.slane %v8180_v48, %v13518_v22  ;;  %v8195_v29 = vrot.slane %v8181_v16, %v13518_v22 }
 0x5b6   : > { %v8936_v31 = vshrl.u32 %v8129_v53, 16  ;;  %v8942_v26 = vshrl.u32 %v8130_v58, 16  ;;  %v8948_v49 = vshrl.u32 %v8131_v12, 16  ;;  %v6094_v14 = vrot.slane %v6086_v57, %v13518_v22 }
 0x5b7   : > { %v8196_v19 = vcombine.low %v8172_v28, %v8188_v23  ;;  %v8197_v27 = vcombine.high %v8172_v28, %v8188_v23  ;;  %v8198_v60 = vcombine.low %v8179_v62, %v8195_v29  ;;  %v6101_v11 = vrot.slane %v6087_v56, %v13518_v22  ;;  %v16561_v23 = vld [vmem:[#allocation67_spill] sm:$0xff] }
 0x5b8   : > { %v6102_v39 = vcombine.low %v15284_v38, %v16557_v18  ;;  %v6103_v43 = vcombine.high %v15284_v38, %v16557_v18  ;;  %v6122_v63 = vcombine.low %v15273_v3, %v16558_v33  ;;  %v6123_v5 = vcombine.high %v15273_v3, %v16558_v33 }
 0x5b9   : > { %v8935_v42 = vpack.i.b16 %v8196_v19, %v8129_v53  ;;  %v8937_v44 = vshrl.u32 %v8196_v19, 16  ;;  %v8941_v2 = vpack.i.b16 %v8197_v27, %v8130_v58  ;;  %v8943_v51 = vshrl.u32 %v8197_v27, 16 }
 0x5ba   : > { %v8947_v61 = vpack.i.b16 %v8198_v60, %v8131_v12  ;;  %v8949_v15 = vshrl.u32 %v8198_v60, 16  ;;  %v6110_v50 = vrot.slane %v6102_v39, %v13518_v22  ;;  %v6117_v17 = vrot.slane %v6103_v43, %v13518_v22  ;;  %v16560_v12 = vld [vmem:[#allocation54_spill] sm:$0xff] }
 0x5bb   : > { %v8938_v59 = vpack.i.b16 %v8937_v44, %v8936_v31  ;;  %v8944_v37 = vpack.i.b16 %v8943_v51, %v8942_v26  ;;  %v10208_v47 = vcombine.low %v8935_v42, %v8935_v42  ;;  %v10209_v38 = vcombine.high %v8935_v42, %v8935_v42 }
 0x5bc   : > { %v8950_v20 = vpack.i.b16 %v8949_v15, %v8948_v49  ;;  %v10272_v24 = vcombine.low %v8941_v2, %v8941_v2  ;;  %v10273_v55 = vcombine.high %v8941_v2, %v8941_v2  ;;  %v10336_v9 = vcombine.low %v8947_v61, %v8947_v61 }
 0x5bd   : > { %v10240_v32 = vcombine.low %v8938_v59, %v8938_v59  ;;  %v10241_v10 = vcombine.high %v8938_v59, %v8938_v59  ;;  %v10304_v8 = vcombine.low %v8944_v37, %v8944_v37  ;;  %v10305_v30 = vcombine.high %v8944_v37, %v8944_v37  ;;  %9622 = vst.msk [vmem:[%s13771_s13 + $0x58] sm:$0xf] %vm9599_vm0, %v10208_v47 }
 0x5be   : > { %9623 = vst.msk [vmem:[%s13771_s13 + $0x5c] sm:$0xf] %vm9599_vm0, %v10209_v38  ;;  %v10337_v41 = vcombine.high %v8947_v61, %v8947_v61  ;;  %v10368_v25 = vcombine.low %v8950_v20, %v8950_v20  ;;  %v10369_v36 = vcombine.high %v8950_v20, %v8950_v20  ;;  %9686 = vst.msk [vmem:[%s13771_s13 + $0x158] sm:$0xf] %vm9599_vm0, %v10272_v24  ;;  %v16559_v16 = vshrl.u32 %v16552_v40, 16 }
 0x5bf   : > { %9687 = vst.msk [vmem:[%s13771_s13 + $0x15c] sm:$0xf] %vm9599_vm0, %v10273_v55  ;;  %9750 = vst.msk [vmem:[%s13771_s13 + $0x258] sm:$0xf] %vm9599_vm0, %v10336_v9  ;;  %v6130_v1 = vrot.slane %v6122_v63, %v13515_v46  ;;  %v8199_v54 = vcombine.low %v6094_v14, %v6101_v11  ;;  %v10170_v0 = vcombine.high %v6094_v14, %v6101_v11  ;;  %v3956_v11 = vpop.permute.xlu1 %3955 }
 0x5c0   : > { %9654 = vst.msk [vmem:[%s13771_s13 + $0xd8] sm:$0xf] %vm9599_vm0, %v10240_v32  ;;  %9655 = vst.msk [vmem:[%s13771_s13 + $0xdc] sm:$0xf] %vm9599_vm0, %v10241_v10  ;;  %v8215_v13 = vcombine.low %v6110_v50, %v6117_v17  ;;  %v6137_v3 = vrot.slane %v6123_v5, %v13515_v46  ;;  %v10171_v48 = vcombine.high %v6110_v50, %v6117_v17 }
 0x5c1   : > { %9718 = vst.msk [vmem:[%s13771_s13 + $0x1d8] sm:$0xf] %vm9599_vm0, %v10304_v8  ;;  %9719 = vst.msk [vmem:[%s13771_s13 + $0x1dc] sm:$0xf] %vm9599_vm0, %v10305_v30  ;;  %v4389_v53 = vpack.i.b16 %v4388_v34, %v16559_v16  ;;  %v6205_v58 = vcombine.high %v15261_v52, %v13579_v45  ;;  %v6153_v6 = vcombine.low %v6130_v1, %v16560_v12  ;;  %v16563_v16 = vld [vmem:[#allocation39_spill] sm:$0xff] }
 0x5c2   : > { %9751 = vst.msk [vmem:[%s13771_s13 + $0x25c] sm:$0xf] %vm9599_vm0, %v10337_v41  ;;  %9782 = vst.msk [vmem:[%s13771_s13 + $0x2d8] sm:$0xf] %vm9599_vm0, %v10368_v25  ;;  %v6154_v57 = vcombine.high %v6130_v1, %v16560_v12  ;;  %v8206_v28 = vrot.slane %v8199_v54, %v13515_v46  ;;  %v8214_v62 = vrot.slane %v10170_v0, %v13515_v46  ;;  %v4396_v1 = vshrl.u32 %v15206_v21, 16  ;;  %v16562_v54 = vld [vmem:[#allocation105_spill] sm:$0xff] }
 0x5c3   : > { %9783 = vst.msk [vmem:[%s13771_s13 + $0x2dc] sm:$0xf] %vm9599_vm0, %v10369_v36  ;;  %v6169_v29 = vcombine.low %v6137_v3, %v16561_v23  ;;  %v6170_v31 = vcombine.high %v6137_v3, %v16561_v23  ;;  %v8222_v40 = vrot.slane %v8215_v13, %v13515_v46  ;;  %v8230_v35 = vrot.slane %v10171_v48, %v13515_v46  ;;  %v15391_v8 = vpop.permute.xlu1 %3957 }
 0x5c4   : > { %v6161_v34 = vrot.slane %v6153_v6, %v13518_v22  ;;  %v6168_v26 = vrot.slane %v6154_v57, %v13518_v22  ;;  %v8231_v49 = vcombine.low %v8206_v28, %v8214_v62  ;;  %v8232_v56 = vcombine.high %v8206_v28, %v8214_v62 }
 0x5c5   : > { %v6177_v19 = vrot.slane %v6169_v29, %v13518_v22  ;;  %v6184_v27 = vrot.slane %v6170_v31, %v13518_v22  ;;  %v8247_v60 = vcombine.low %v8222_v40, %v8230_v35  ;;  %v8248_v14 = vcombine.high %v8222_v40, %v8230_v35  ;;  %v16566_v40 = vld [vmem:[#allocation30_spill] sm:$0xff] }
 0x5c6   : > { %v8239_v18 = vrot.slane %v8231_v49, %v13518_v22  ;;  %v8246_v39 = vrot.slane %v8232_v56, %v13518_v22  ;;  %v8266_v43 = vcombine.low %v6161_v34, %v6168_v26  ;;  %v10172_v33 = vcombine.high %v6161_v34, %v6168_v26 }
 0x5c7   : > { %v8255_v63 = vrot.slane %v8247_v60, %v13518_v22  ;;  %v8262_v42 = vrot.slane %v8248_v14, %v13518_v22  ;;  %v8282_v44 = vcombine.low %v6177_v19, %v6184_v27  ;;  %v10173_v2 = vcombine.high %v6177_v19, %v6184_v27 }
 0x5c8   : > { %v8273_v51 = vrot.slane %v8266_v43, %v13515_v46  ;;  %v8281_v61 = vrot.slane %v10172_v33, %v13515_v46  ;;  %v15380_v15 = vrot.slane %v15261_v52, %v13515_v46  ;;  %v6272_v50 = vcombine.high %v4389_v53, %v13579_v45 }
 0x5c9   : > { %v8263_v17 = vcombine.low %v8239_v18, %v8255_v63  ;;  %v8264_v59 = vcombine.high %v8239_v18, %v8255_v63  ;;  %v8265_v37 = vcombine.low %v8246_v39, %v8262_v42  ;;  %v8289_v47 = vrot.slane %v8282_v44, %v13515_v46 }
 0x5ca   : > { %v8297_v38 = vrot.slane %v10173_v2, %v13515_v46  ;;  %v8298_v20 = vcombine.low %v8273_v51, %v8281_v61  ;;  %v8299_v24 = vcombine.high %v8273_v51, %v8281_v61  ;;  %v15386_v55 = vrot.slane %v6205_v58, %v13515_v46 }
 0x5cb   : > { %v8954_v9 = vshrl.u32 %v8263_v17, 16  ;;  %v8960_v32 = vshrl.u32 %v8264_v59, 16  ;;  %v8966_v10 = vshrl.u32 %v8265_v37, 16  ;;  %v15389_v52 = vrot.slane %v4389_v53, %v13515_v46 }
 0x5cc   : > { %v8306_v30 = vrot.slane %v8298_v20, %v13518_v22  ;;  %v8313_v41 = vrot.slane %v8299_v24, %v13518_v22  ;;  %v8314_v25 = vcombine.low %v8289_v47, %v8297_v38  ;;  %v8315_v36 = vcombine.high %v8289_v47, %v8297_v38 }
 0x5cd   : > { %v15396_v5 = vrot.slane %v6272_v50, %v13515_v46  ;;  %v4377_v0 = vpack.i.b16 %v3956_v11, %v16562_v54  ;;  %v4380_v13 = vshrl.u32 %v3956_v11, 16  ;;  %v15404_v53 = vpack.i.b16 %v15391_v8, %v16563_v16 }
 0x5ce   : > { %v8322_v3 = vrot.slane %v8314_v25, %v13518_v22  ;;  %v8329_v48 = vrot.slane %v8315_v36, %v13518_v22  ;;  %v4404_v58 = vshrl.u32 %v15391_v8, 16  ;;  %v16564_v12 = vshrl.u32 %v16554_v4, 16 }
 0x5cf   : > { %v16565_v57 = vshrl.u32 %v16562_v54, 16  ;;  %v6189_v21 = vcombine.low %v4377_v0, %v15269_v7  ;;  %v6190_v62 = vcombine.high %v4377_v0, %v15269_v7  ;;  %v4419_v35 = vshrl.u32 %v16566_v40, 16 }
 0x5d0   : > { %v4397_v6 = vpack.i.b16 %v4396_v1, %v16564_v12  ;;  %v8330_v23 = vcombine.low %v8306_v30, %v8322_v3  ;;  %v8331_v29 = vcombine.high %v8306_v30, %v8322_v3  ;;  %v8332_v31 = vcombine.low %v8313_v41, %v8329_v48 }
 0x5d1   : > { %v4381_v28 = vpack.i.b16 %v4380_v13, %v16565_v57  ;;  %v6197_v34 = vrot.slane %v6189_v21, %v13515_v46  ;;  %v6204_v26 = vrot.slane %v6190_v62, %v13515_v46  ;;  %v16567_v30 = vshrl.u32 %v16563_v16, 16 }
 0x5d2   : > { %v8953_v4 = vpack.i.b16 %v8330_v23, %v8263_v17  ;;  %v8955_v19 = vshrl.u32 %v8330_v23, 16  ;;  %v8959_v27 = vpack.i.b16 %v8331_v29, %v8264_v59  ;;  %v8961_v60 = vshrl.u32 %v8331_v29, 16 }
 0x5d3   : > { %v6256_v49 = vcombine.low %v4381_v28, %v4397_v6  ;;  %v6257_v56 = vcombine.high %v4381_v28, %v4397_v6  ;;  %v8965_v14 = vpack.i.b16 %v8332_v31, %v8265_v37  ;;  %v8967_v11 = vshrl.u32 %v8332_v31, 16 }
 0x5d4   : > { %v6220_v7 = vcombine.low %v6197_v34, %v15380_v15  ;;  %v6221_v18 = vcombine.high %v6197_v34, %v15380_v15  ;;  %v8956_v39 = vpack.i.b16 %v8955_v19, %v8954_v9  ;;  %v8962_v43 = vpack.i.b16 %v8961_v60, %v8960_v32  ;;  %v4054_v15 = vpop.permute.xlu0 %4053 }
 0x5d5   : > { %v10210_v33 = vcombine.low %v8953_v4, %v8953_v4  ;;  %v10211_v63 = vcombine.high %v8953_v4, %v8953_v4  ;;  %v8968_v42 = vpack.i.b16 %v8967_v11, %v8966_v10  ;;  %v10274_v44 = vcombine.low %v8959_v27, %v8959_v27 }
 0x5d6   : > { %v10275_v2 = vcombine.high %v8959_v27, %v8959_v27  ;;  %v10338_v51 = vcombine.low %v8965_v14, %v8965_v14  ;;  %v10242_v61 = vcombine.low %v8956_v39, %v8956_v39  ;;  %v10243_v50 = vcombine.high %v8956_v39, %v8956_v39 }
 0x5d7   : > { %v10306_v17 = vcombine.low %v8962_v43, %v8962_v43  ;;  %v10307_v59 = vcombine.high %v8962_v43, %v8962_v43  ;;  %9624 = vst.msk [vmem:[%s13771_s13 + $0x60] sm:$0xf] %vm9599_vm0, %v10210_v33  ;;  %9625 = vst.msk [vmem:[%s13771_s13 + $0x64] sm:$0xf] %vm9599_vm0, %v10211_v63  ;;  %v10339_v37 = vcombine.high %v8965_v14, %v8965_v14  ;;  %v4420_v36 = vshrl.u32 %v4054_v15, 16 }
 0x5d8   : > { %v10370_v47 = vcombine.low %v8968_v42, %v8968_v42  ;;  %v10371_v38 = vcombine.high %v8968_v42, %v8968_v42  ;;  %9688 = vst.msk [vmem:[%s13771_s13 + $0x160] sm:$0xf] %vm9599_vm0, %v10274_v44  ;;  %9689 = vst.msk [vmem:[%s13771_s13 + $0x164] sm:$0xf] %vm9599_vm0, %v10275_v2  ;;  %v6228_v20 = vrot.slane %v6220_v7, %v13518_v22 }
 0x5d9   : > { %9752 = vst.msk [vmem:[%s13771_s13 + $0x260] sm:$0xf] %vm9599_vm0, %v10338_v51  ;;  %9656 = vst.msk [vmem:[%s13771_s13 + $0xe0] sm:$0xf] %vm9599_vm0, %v10242_v61  ;;  %v6235_v24 = vrot.slane %v6221_v18, %v13518_v22  ;;  %v6236_v9 = vcombine.low %v6204_v26, %v15386_v55  ;;  %v6237_v32 = vcombine.high %v6204_v26, %v15386_v55 }
 0x5da   : > { %9657 = vst.msk [vmem:[%s13771_s13 + $0xe4] sm:$0xf] %vm9599_vm0, %v10243_v50  ;;  %9720 = vst.msk [vmem:[%s13771_s13 + $0x1e0] sm:$0xf] %vm9599_vm0, %v10306_v17  ;;  %v6264_v10 = vrot.slane %v6256_v49, %v13515_v46  ;;  %v6271_v8 = vrot.slane %v6257_v56, %v13515_v46  ;;  %v15450_v41 = vpack.i.b16 %v4404_v58, %v16567_v30  ;;  %v16568_v30 = vld [vmem:[#allocation68_spill] sm:$0xff] }
 0x5db   : > { %9721 = vst.msk [vmem:[%s13771_s13 + $0x1e4] sm:$0xf] %vm9599_vm0, %v10307_v59  ;;  %9753 = vst.msk [vmem:[%s13771_s13 + $0x264] sm:$0xf] %vm9599_vm0, %v10339_v37  ;;  %v4417_v25 = vpack.i.b16 %v4054_v15, %v16566_v40  ;;  %v6244_v1 = vrot.slane %v6236_v9, %v13518_v22  ;;  %v6251_v55 = vrot.slane %v6237_v32, %v13518_v22 }
 0x5dc   : > { %9784 = vst.msk [vmem:[%s13771_s13 + $0x2e0] sm:$0xf] %vm9599_vm0, %v10370_v47  ;;  %9785 = vst.msk [vmem:[%s13771_s13 + $0x2e4] sm:$0xf] %vm9599_vm0, %v10371_v38  ;;  %v6287_v54 = vcombine.low %v6264_v10, %v15389_v52  ;;  %v6288_v0 = vcombine.high %v6264_v10, %v15389_v52  ;;  %v6303_v13 = vcombine.low %v6271_v8, %v15396_v5 }
 0x5dd   : > { %v6304_v3 = vcombine.high %v6271_v8, %v15396_v5  ;;  %v8333_v48 = vcombine.low %v6228_v20, %v6235_v24  ;;  %v10174_v12 = vcombine.high %v6228_v20, %v6235_v24  ;;  %v8349_v6 = vcombine.low %v6244_v1, %v6251_v55 }
 0x5de   : > { %v6295_v16 = vrot.slane %v6287_v54, %v13518_v22  ;;  %v6302_v58 = vrot.slane %v6288_v0, %v13518_v22  ;;  %v10175_v57 = vcombine.high %v6244_v1, %v6251_v55  ;;  %v6311_v28 = vrot.slane %v6303_v13, %v13518_v22 }
 0x5df   : > { %v6318_v21 = vrot.slane %v6304_v3, %v13518_v22  ;;  %v8340_v62 = vrot.slane %v8333_v48, %v13515_v46  ;;  %v8348_v52 = vrot.slane %v10174_v12, %v13515_v46  ;;  %v8356_v23 = vrot.slane %v8349_v6, %v13515_v46 }
 0x5e0   : > { %v8364_v5 = vrot.slane %v10175_v57, %v13515_v46  ;;  %v8400_v29 = vcombine.low %v6295_v16, %v6302_v58  ;;  %v10176_v31 = vcombine.high %v6295_v16, %v6302_v58  ;;  %v4421_v2 = vpack.i.b16 %v4420_v36, %v4419_v35 }
 0x5e1   : > { %v8365_v34 = vcombine.low %v8340_v62, %v8348_v52  ;;  %v8366_v26 = vcombine.high %v8340_v62, %v8348_v52  ;;  %v8416_v49 = vcombine.low %v6311_v28, %v6318_v21  ;;  %v10177_v56 = vcombine.high %v6311_v28, %v6318_v21 }
 0x5e2   : > { %v8381_v4 = vcombine.low %v8356_v23, %v8364_v5  ;;  %v8382_v19 = vcombine.high %v8356_v23, %v8364_v5  ;;  %v8407_v27 = vrot.slane %v8400_v29, %v13515_v46  ;;  %v8415_v60 = vrot.slane %v10176_v31, %v13515_v46 }
 0x5e3   : > { %v8373_v14 = vrot.slane %v8365_v34, %v13518_v22  ;;  %v8380_v11 = vrot.slane %v8366_v26, %v13518_v22  ;;  %v8423_v7 = vrot.slane %v8416_v49, %v13515_v46  ;;  %v8431_v18 = vrot.slane %v10177_v56, %v13515_v46  ;;  %v16569_v56 = vld [vmem:[#allocation49_spill] sm:$0xff] }
 0x5e4   : > { %v8389_v39 = vrot.slane %v8381_v4, %v13518_v22  ;;  %v8396_v43 = vrot.slane %v8382_v19, %v13518_v22  ;;  %v8432_v33 = vcombine.low %v8407_v27, %v8415_v60  ;;  %v8433_v63 = vcombine.high %v8407_v27, %v8415_v60  ;;  %v4008_v19 = vpop.permute.xlu1 %4007 }
 0x5e5   : > { %v8448_v42 = vcombine.low %v8423_v7, %v8431_v18  ;;  %v8449_v44 = vcombine.high %v8423_v7, %v8431_v18  ;;  %v6323_v51 = vcombine.low %v15404_v53, %v4417_v25  ;;  %v6324_v38 = vcombine.high %v15404_v53, %v4417_v25  ;;  %v16570_v7 = vld [vmem:[#allocation35_spill] sm:$0xff] }
 0x5e6   : > { %v8397_v61 = vcombine.low %v8373_v14, %v8389_v39  ;;  %v8398_v50 = vcombine.high %v8373_v14, %v8389_v39  ;;  %v8399_v17 = vcombine.low %v8380_v11, %v8396_v43  ;;  %v8440_v59 = vrot.slane %v8432_v33, %v13518_v22 }
 0x5e7   : > { %v8447_v15 = vrot.slane %v8433_v63, %v13518_v22  ;;  %v8456_v37 = vrot.slane %v8448_v42, %v13518_v22  ;;  %v8463_v47 = vrot.slane %v8449_v44, %v13518_v22  ;;  %v6331_v40 = vrot.slane %v6323_v51, %v13515_v46  ;;  %v16571_v63 = vld [vmem:[#allocation72_spill] sm:$0xff] }
 0x5e8   : > { %v8972_v20 = vshrl.u32 %v8397_v61, 16  ;;  %v8978_v24 = vshrl.u32 %v8398_v50, 16  ;;  %v8984_v9 = vshrl.u32 %v8399_v17, 16  ;;  %v6338_v8 = vrot.slane %v6324_v38, %v13515_v46 }
 0x5e9   : > { %v8464_v35 = vcombine.low %v8440_v59, %v8456_v37  ;;  %v8465_v32 = vcombine.high %v8440_v59, %v8456_v37  ;;  %v8466_v10 = vcombine.low %v8447_v15, %v8463_v47  ;;  %v6354_v36 = vcombine.low %v6331_v40, %v16568_v30 }
 0x5ea   : > { %v6355_v1 = vcombine.high %v6331_v40, %v16568_v30  ;;  %v6390_v55 = vcombine.low %v15450_v41, %v4421_v2  ;;  %v6391_v54 = vcombine.high %v15450_v41, %v4421_v2  ;;  %v6370_v4 = vcombine.low %v6338_v8, %v16569_v56  ;;  %v16572_v2 = vld [vmem:[#allocation28_spill] sm:$0xff] }
 0x5eb   : > { %v8971_v0 = vpack.i.b16 %v8464_v35, %v8397_v61  ;;  %v8973_v53 = vshrl.u32 %v8464_v35, 16  ;;  %v8977_v25 = vpack.i.b16 %v8465_v32, %v8398_v50  ;;  %v8979_v13 = vshrl.u32 %v8465_v32, 16  ;;  %v3960_v35 = vpop.permute.xlu1 %3959 }
 0x5ec   : > { %v8983_v3 = vpack.i.b16 %v8466_v10, %v8399_v17  ;;  %v8985_v48 = vshrl.u32 %v8466_v10, 16  ;;  %v6362_v12 = vrot.slane %v6354_v36, %v13518_v22  ;;  %v6369_v16 = vrot.slane %v6355_v1, %v13518_v22  ;;  %v16573_v36 = vld [vmem:[#allocation40_spill] sm:$0xff] }
 0x5ed   : > { %v8974_v58 = vpack.i.b16 %v8973_v53, %v8972_v20  ;;  %v8980_v6 = vpack.i.b16 %v8979_v13, %v8978_v24  ;;  %v10212_v57 = vcombine.low %v8971_v0, %v8971_v0  ;;  %v10213_v28 = vcombine.high %v8971_v0, %v8971_v0 }
 0x5ee   : > { %v8986_v41 = vpack.i.b16 %v8985_v48, %v8984_v9  ;;  %v10276_v21 = vcombine.low %v8977_v25, %v8977_v25  ;;  %v10277_v62 = vcombine.high %v8977_v25, %v8977_v25  ;;  %v10340_v52 = vcombine.low %v8983_v3, %v8983_v3 }
 0x5ef   : > { %v10244_v23 = vcombine.low %v8974_v58, %v8974_v58  ;;  %v10245_v5 = vcombine.high %v8974_v58, %v8974_v58  ;;  %v10308_v29 = vcombine.low %v8980_v6, %v8980_v6  ;;  %v10309_v31 = vcombine.high %v8980_v6, %v8980_v6  ;;  %9626 = vst.msk [vmem:[%s13771_s13 + $0x68] sm:$0xf] %vm9599_vm0, %v10212_v57 }
 0x5f0   : > { %9627 = vst.msk [vmem:[%s13771_s13 + $0x6c] sm:$0xf] %vm9599_vm0, %v10213_v28  ;;  %v10341_v34 = vcombine.high %v8983_v3, %v8983_v3  ;;  %v10372_v26 = vcombine.low %v8986_v41, %v8986_v41  ;;  %v10373_v49 = vcombine.high %v8986_v41, %v8986_v41  ;;  %9690 = vst.msk [vmem:[%s13771_s13 + $0x168] sm:$0xf] %vm9599_vm0, %v10276_v21  ;;  %v4435_v18 = vshrl.u32 %v16570_v7, 16 }
 0x5f1   : > { %9691 = vst.msk [vmem:[%s13771_s13 + $0x16c] sm:$0xf] %vm9599_vm0, %v10277_v62  ;;  %9754 = vst.msk [vmem:[%s13771_s13 + $0x268] sm:$0xf] %vm9599_vm0, %v10340_v52  ;;  %v6371_v27 = vcombine.high %v6338_v8, %v16569_v56  ;;  %v6398_v60 = vrot.slane %v6390_v55, %v13515_v46  ;;  %v6405_v14 = vrot.slane %v6391_v54, %v13515_v46  ;;  %v4436_v30 = vshrl.u32 %v4008_v19, 16 }
 0x5f2   : > { %9658 = vst.msk [vmem:[%s13771_s13 + $0xe8] sm:$0xf] %vm9599_vm0, %v10244_v23  ;;  %9659 = vst.msk [vmem:[%s13771_s13 + $0xec] sm:$0xf] %vm9599_vm0, %v10245_v5  ;;  %v8467_v11 = vcombine.low %v6362_v12, %v6369_v16  ;;  %v6378_v39 = vrot.slane %v6370_v4, %v13518_v22  ;;  %v10178_v43 = vcombine.high %v6362_v12, %v6369_v16  ;;  %v4427_v1 = vshrl.u32 %v16573_v36, 16  ;;  %v4056_v5 = vpop.permute.xlu1 %4055 }
 0x5f3   : > { %9722 = vst.msk [vmem:[%s13771_s13 + $0x1e8] sm:$0xf] %vm9599_vm0, %v10308_v29  ;;  %9723 = vst.msk [vmem:[%s13771_s13 + $0x1ec] sm:$0xf] %vm9599_vm0, %v10309_v31  ;;  %v6385_v33 = vrot.slane %v6371_v27, %v13518_v22  ;;  %v6421_v42 = vcombine.low %v6398_v60, %v16571_v63  ;;  %v6422_v44 = vcombine.high %v6398_v60, %v16571_v63 }
 0x5f4   : > { %9755 = vst.msk [vmem:[%s13771_s13 + $0x26c] sm:$0xf] %vm9599_vm0, %v10341_v34  ;;  %9786 = vst.msk [vmem:[%s13771_s13 + $0x2e8] sm:$0xf] %vm9599_vm0, %v10372_v26  ;;  %v6437_v51 = vcombine.low %v6405_v14, %v16572_v2  ;;  %v6438_v61 = vcombine.high %v6405_v14, %v16572_v2  ;;  %v8474_v50 = vrot.slane %v8467_v11, %v13515_v46  ;;  %v16574_v11 = vld [vmem:[#allocation79_spill] sm:$0xff]  ;;  %v4444_v2 = vshrl.u32 %v4056_v5, 16 }
 0x5f5   : > { %9787 = vst.msk [vmem:[%s13771_s13 + $0x2ec] sm:$0xf] %vm9599_vm0, %v10373_v49  ;;  %v8482_v17 = vrot.slane %v10178_v43, %v13515_v46  ;;  %v4433_v59 = vpack.i.b16 %v4008_v19, %v16570_v7  ;;  %v6429_v15 = vrot.slane %v6421_v42, %v13518_v22  ;;  %v6436_v37 = vrot.slane %v6422_v44, %v13518_v22 }
 0x5f6   : > { %v6445_v47 = vrot.slane %v6437_v51, %v13518_v22  ;;  %v8483_v38 = vcombine.low %v6378_v39, %v6385_v33  ;;  %v6452_v20 = vrot.slane %v6438_v61, %v13518_v22  ;;  %v10179_v24 = vcombine.high %v6378_v39, %v6385_v33 }
 0x5f7   : > { %v8499_v9 = vcombine.low %v8474_v50, %v8482_v17  ;;  %v8500_v40 = vcombine.high %v8474_v50, %v8482_v17  ;;  %v8534_v10 = vcombine.low %v6429_v15, %v6436_v37  ;;  %v10180_v8 = vcombine.high %v6429_v15, %v6436_v37 }
 0x5f8   : > { %v8490_v32 = vrot.slane %v8483_v38, %v13515_v46  ;;  %v8498_v55 = vrot.slane %v10179_v24, %v13515_v46  ;;  %v8550_v54 = vcombine.low %v6445_v47, %v6452_v20  ;;  %v6473_v0 = vcombine.high %v4433_v59, %v13579_v45 }
 0x5f9   : > { %v8507_v53 = vrot.slane %v8499_v9, %v13518_v22  ;;  %v8541_v25 = vrot.slane %v8534_v10, %v13515_v46  ;;  %v8549_v13 = vrot.slane %v10180_v8, %v13515_v46  ;;  %v10181_v3 = vcombine.high %v6445_v47, %v6452_v20 }
 0x5fa   : > { %v8514_v48 = vrot.slane %v8500_v40, %v13518_v22  ;;  %v8515_v12 = vcombine.low %v8490_v32, %v8498_v55  ;;  %v8516_v16 = vcombine.high %v8490_v32, %v8498_v55  ;;  %v8557_v58 = vrot.slane %v8550_v54, %v13515_v46 }
 0x5fb   : > { %v8565_v6 = vrot.slane %v10181_v3, %v13515_v46  ;;  %v8566_v57 = vcombine.low %v8541_v25, %v8549_v13  ;;  %v8567_v28 = vcombine.high %v8541_v25, %v8549_v13  ;;  %v15543_v41 = vpack.i.b16 %v4436_v30, %v4435_v18 }
 0x5fc   : > { %v8523_v21 = vrot.slane %v8515_v12, %v13518_v22  ;;  %v8530_v62 = vrot.slane %v8516_v16, %v13518_v22  ;;  %v15548_v52 = vrot.slane %v4433_v59, %v13515_v46  ;;  %v15551_v23 = vrot.slane %v6473_v0, %v13515_v46 }
 0x5fd   : > { %v8574_v29 = vrot.slane %v8566_v57, %v13518_v22  ;;  %v8581_v31 = vrot.slane %v8567_v28, %v13518_v22  ;;  %v8582_v34 = vcombine.low %v8557_v58, %v8565_v6  ;;  %v8583_v26 = vcombine.high %v8557_v58, %v8565_v6 }
 0x5fe   : > { %v8531_v49 = vcombine.low %v8507_v53, %v8523_v21  ;;  %v8532_v56 = vcombine.high %v8507_v53, %v8523_v21  ;;  %v8533_v4 = vcombine.low %v8514_v48, %v8530_v62  ;;  %v4428_v19 = vshrl.u32 %v3960_v35, 16 }
 0x5ff   : > { %v8590_v27 = vrot.slane %v8582_v34, %v13518_v22  ;;  %v8597_v60 = vrot.slane %v8583_v26, %v13518_v22  ;;  %v6540_v14 = vcombine.high %v15543_v41, %v13579_v45  ;;  %v4441_v7 = vpack.i.b16 %v4056_v5, %v16574_v11 }
 0x600   : > { %v8990_v18 = vshrl.u32 %v8531_v49, 16  ;;  %v8996_v39 = vshrl.u32 %v8532_v56, 16  ;;  %v4425_v43 = vpack.i.b16 %v3960_v35, %v16573_v36  ;;  %v4443_v33 = vshrl.u32 %v16574_v11, 16 }
 0x601   : > { %v8598_v63 = vcombine.low %v8574_v29, %v8590_v27  ;;  %v8599_v42 = vcombine.high %v8574_v29, %v8590_v27  ;;  %v8600_v44 = vcombine.low %v8581_v31, %v8597_v60  ;;  %v9002_v51 = vshrl.u32 %v8533_v4, 16 }
 0x602   : > { %v4429_v61 = vpack.i.b16 %v4428_v19, %v4427_v1  ;;  %v6457_v50 = vcombine.low %v4425_v43, %v4441_v7  ;;  %v6458_v17 = vcombine.high %v4425_v43, %v4441_v7  ;;  %v4445_v20 = vpack.i.b16 %v4444_v2, %v4443_v33 }
 0x603   : > { %v8989_v59 = vpack.i.b16 %v8598_v63, %v8531_v49  ;;  %v8991_v15 = vshrl.u32 %v8598_v63, 16  ;;  %v8995_v37 = vpack.i.b16 %v8599_v42, %v8532_v56  ;;  %v8997_v45 = vshrl.u32 %v8599_v42, 16 }
 0x604   : > { %v9001_v47 = vpack.i.b16 %v8600_v44, %v8533_v4  ;;  %v9003_v38 = vshrl.u32 %v8600_v44, 16  ;;  %v6465_v24 = vrot.slane %v6457_v50, %v13515_v46  ;;  %v6472_v3 = vrot.slane %v6458_v17, %v13515_v46 }
 0x605   : > { %v8992_v9 = vpack.i.b16 %v8991_v15, %v8990_v18  ;;  %v8998_v40 = vpack.i.b16 %v8997_v45, %v8996_v39  ;;  %v10214_v35 = vcombine.low %v8989_v59, %v8989_v59  ;;  %v10215_v32 = vcombine.high %v8989_v59, %v8989_v59 }
 0x606   : > { %v9004_v10 = vpack.i.b16 %v9003_v38, %v9002_v51  ;;  %v10278_v8 = vcombine.low %v8995_v37, %v8995_v37  ;;  %v10279_v30 = vcombine.high %v8995_v37, %v8995_v37  ;;  %v10342_v36 = vcombine.low %v9001_v47, %v9001_v47 }
 0x607   : > { %v10246_v1 = vcombine.low %v8992_v9, %v8992_v9  ;;  %v10247_v55 = vcombine.high %v8992_v9, %v8992_v9  ;;  %v10310_v54 = vcombine.low %v8998_v40, %v8998_v40  ;;  %v10311_v0 = vcombine.high %v8998_v40, %v8998_v40  ;;  %9628 = vst.msk [vmem:[%s13771_s13 + $0x70] sm:$0xf] %vm9599_vm0, %v10214_v35 }
 0x608   : > { %9629 = vst.msk [vmem:[%s13771_s13 + $0x74] sm:$0xf] %vm9599_vm0, %v10215_v32  ;;  %v10343_v53 = vcombine.high %v9001_v47, %v9001_v47  ;;  %v10374_v25 = vcombine.low %v9004_v10, %v9004_v10  ;;  %v10375_v13 = vcombine.high %v9004_v10, %v9004_v10  ;;  %9692 = vst.msk [vmem:[%s13771_s13 + $0x170] sm:$0xf] %vm9599_vm0, %v10278_v8 }
 0x609   : > { %9693 = vst.msk [vmem:[%s13771_s13 + $0x174] sm:$0xf] %vm9599_vm0, %v10279_v30  ;;  %9756 = vst.msk [vmem:[%s13771_s13 + $0x270] sm:$0xf] %vm9599_vm0, %v10342_v36  ;;  %v6488_v48 = vcombine.low %v6465_v24, %v15548_v52  ;;  %v6489_v12 = vcombine.high %v6465_v24, %v15548_v52  ;;  %v6524_v16 = vcombine.low %v4429_v61, %v4445_v20 }
 0x60a   : > { %9660 = vst.msk [vmem:[%s13771_s13 + $0xf0] sm:$0xf] %vm9599_vm0, %v10246_v1  ;;  %9661 = vst.msk [vmem:[%s13771_s13 + $0xf4] sm:$0xf] %vm9599_vm0, %v10247_v55  ;;  %v6525_v58 = vcombine.high %v4429_v61, %v4445_v20  ;;  %v6547_v6 = vrot.slane %v15543_v41, %v13515_v46  ;;  %v6554_v57 = vrot.slane %v6540_v14, %v13515_v46 }
 0x60b   : > { %9724 = vst.msk [vmem:[%s13771_s13 + $0x1f0] sm:$0xf] %vm9599_vm0, %v10310_v54  ;;  %9725 = vst.msk [vmem:[%s13771_s13 + $0x1f4] sm:$0xf] %vm9599_vm0, %v10311_v0  ;;  %v6504_v28 = vcombine.low %v6472_v3, %v15551_v23  ;;  %v6505_v21 = vcombine.high %v6472_v3, %v15551_v23  ;;  %v6496_v62 = vrot.slane %v6488_v48, %v13518_v22 }
 0x60c   : > { %9757 = vst.msk [vmem:[%s13771_s13 + $0x274] sm:$0xf] %vm9599_vm0, %v10343_v53  ;;  %9788 = vst.msk [vmem:[%s13771_s13 + $0x2f0] sm:$0xf] %vm9599_vm0, %v10374_v25  ;;  %v6503_v52 = vrot.slane %v6489_v12, %v13518_v22  ;;  %v6532_v5 = vrot.slane %v6524_v16, %v13515_v46  ;;  %v6539_v29 = vrot.slane %v6525_v58, %v13515_v46 }
 0x60d   : > { %9789 = vst.msk [vmem:[%s13771_s13 + $0x2f4] sm:$0xf] %vm9599_vm0, %v10375_v13  ;;  %v6512_v31 = vrot.slane %v6504_v28, %v13518_v22  ;;  %v6519_v34 = vrot.slane %v6505_v21, %v13518_v22 }
 0x60e   : > { %v6555_v26 = vcombine.low %v6532_v5, %v6547_v6  ;;  %v6556_v41 = vcombine.high %v6532_v5, %v6547_v6  ;;  %v6571_v49 = vcombine.low %v6539_v29, %v6554_v57  ;;  %v6572_v56 = vcombine.high %v6539_v29, %v6554_v57 }
 0x60f   : > { %v8601_v4 = vcombine.low %v6496_v62, %v6503_v52  ;;  %v10182_v19 = vcombine.high %v6496_v62, %v6503_v52  ;;  %v8617_v27 = vcombine.low %v6512_v31, %v6519_v34  ;;  %v10183_v23 = vcombine.high %v6512_v31, %v6519_v34 }
 0x610   : > { %v6563_v60 = vrot.slane %v6555_v26, %v13518_v22  ;;  %v6570_v14 = vrot.slane %v6556_v41, %v13518_v22  ;;  %v6579_v11 = vrot.slane %v6571_v49, %v13518_v22  ;;  %v6586_v7 = vrot.slane %v6572_v56, %v13518_v22 }
 0x611   : > { %v8608_v18 = vrot.slane %v8601_v4, %v13515_v46  ;;  %v8616_v39 = vrot.slane %v10182_v19, %v13515_v46  ;;  %v8624_v43 = vrot.slane %v8617_v27, %v13515_v46  ;;  %v8632_v33 = vrot.slane %v10183_v23, %v13515_v46 }
 0x612   : > { %v8668_v63 = vcombine.low %v6563_v60, %v6570_v14  ;;  %v10184_v42 = vcombine.high %v6563_v60, %v6570_v14  ;;  %v8684_v44 = vcombine.low %v6579_v11, %v6586_v7  ;;  %v10185_v2 = vcombine.high %v6579_v11, %v6586_v7 }
 0x613   : > { %v8633_v51 = vcombine.low %v8608_v18, %v8616_v39  ;;  %v8634_v61 = vcombine.high %v8608_v18, %v8616_v39  ;;  %v8649_v50 = vcombine.low %v8624_v43, %v8632_v33  ;;  %v8650_v17 = vcombine.high %v8624_v43, %v8632_v33 }
 0x614   : > { %v8675_v59 = vrot.slane %v8668_v63, %v13515_v46  ;;  %v8683_v15 = vrot.slane %v10184_v42, %v13515_v46  ;;  %v8691_v37 = vrot.slane %v8684_v44, %v13515_v46  ;;  %v8699_v45 = vrot.slane %v10185_v2, %v13515_v46 }
 0x615   : > { %v8641_v47 = vrot.slane %v8633_v51, %v13518_v22  ;;  %v8648_v38 = vrot.slane %v8634_v61, %v13518_v22  ;;  %v8657_v20 = vrot.slane %v8649_v50, %v13518_v22  ;;  %v8664_v24 = vrot.slane %v8650_v17, %v13518_v22 }
 0x616   : > { %v8700_v9 = vcombine.low %v8675_v59, %v8683_v15  ;;  %v8701_v40 = vcombine.high %v8675_v59, %v8683_v15  ;;  %v8716_v35 = vcombine.low %v8691_v37, %v8699_v45  ;;  %v8717_v32 = vcombine.high %v8691_v37, %v8699_v45 }
 0x617   : > { %v8665_v10 = vcombine.low %v8641_v47, %v8657_v20  ;;  %v8666_v8 = vcombine.high %v8641_v47, %v8657_v20  ;;  %v8667_v55 = vcombine.low %v8648_v38, %v8664_v24 }
 0x618   : > { %v8708_v30 = vrot.slane %v8700_v9, %v13518_v22  ;;  %v8715_v36 = vrot.slane %v8701_v40, %v13518_v22  ;;  %v8724_v46 = vrot.slane %v8716_v35, %v13518_v22  ;;  %v8731_v1 = vrot.slane %v8717_v32, %v13518_v22 }
 0x619   : > { %v9008_v25 = vshrl.u32 %v8665_v10, 16  ;;  %v9014_v13 = vshrl.u32 %v8666_v8, 16  ;;  %v9020_v6 = vshrl.u32 %v8667_v55, 16 }
 0x61a   : > { %v8732_v54 = vcombine.low %v8708_v30, %v8724_v46  ;;  %v8733_v0 = vcombine.high %v8708_v30, %v8724_v46  ;;  %v8734_v53 = vcombine.low %v8715_v36, %v8731_v1 }
 0x61c   : > { %v9007_v3 = vpack.i.b16 %v8732_v54, %v8665_v10  ;;  %v9009_v48 = vshrl.u32 %v8732_v54, 16  ;;  %v9013_v12 = vpack.i.b16 %v8733_v0, %v8666_v8  ;;  %v9015_v16 = vshrl.u32 %v8733_v0, 16 }
 0x61d   : > { %v9019_v58 = vpack.i.b16 %v8734_v53, %v8667_v55  ;;  %v9021_v57 = vshrl.u32 %v8734_v53, 16 }
 0x61e   : > { %v9010_v28 = vpack.i.b16 %v9009_v48, %v9008_v25  ;;  %v9016_v21 = vpack.i.b16 %v9015_v16, %v9014_v13  ;;  %v10216_v62 = vcombine.low %v9007_v3, %v9007_v3  ;;  %v10217_v22 = vcombine.high %v9007_v3, %v9007_v3 }
 0x61f   : > { %v9022_v52 = vpack.i.b16 %v9021_v57, %v9020_v6  ;;  %v10280_v5 = vcombine.low %v9013_v12, %v9013_v12  ;;  %v10281_v29 = vcombine.high %v9013_v12, %v9013_v12  ;;  %v10344_v31 = vcombine.low %v9019_v58, %v9019_v58 }
 0x620   : > { %v10248_v34 = vcombine.low %v9010_v28, %v9010_v28  ;;  %v10249_v26 = vcombine.high %v9010_v28, %v9010_v28  ;;  %v10312_v41 = vcombine.low %v9016_v21, %v9016_v21  ;;  %v10313_v49 = vcombine.high %v9016_v21, %v9016_v21  ;;  %9630 = vst.msk [vmem:[%s13771_s13 + $0x78] sm:$0xf] %vm9599_vm0, %v10216_v62 }
 0x621   : > { %9631 = vst.msk [vmem:[%s13771_s13 + $0x7c] sm:$0xf] %vm9599_vm0, %v10217_v22  ;;  %v10345_v56 = vcombine.high %v9019_v58, %v9019_v58  ;;  %v10376_v4 = vcombine.low %v9022_v52, %v9022_v52  ;;  %v10377_v19 = vcombine.high %v9022_v52, %v9022_v52  ;;  %9694 = vst.msk [vmem:[%s13771_s13 + $0x178] sm:$0xf] %vm9599_vm0, %v10280_v5 }
 0x622   : > { %9695 = vst.msk [vmem:[%s13771_s13 + $0x17c] sm:$0xf] %vm9599_vm0, %v10281_v29  ;;  %9758 = vst.msk [vmem:[%s13771_s13 + $0x278] sm:$0xf] %vm9599_vm0, %v10344_v31 }
 0x623   : > { %9662 = vst.msk [vmem:[%s13771_s13 + $0xf8] sm:$0xf] %vm9599_vm0, %v10248_v34  ;;  %9663 = vst.msk [vmem:[%s13771_s13 + $0xfc] sm:$0xf] %vm9599_vm0, %v10249_v26 }
 0x624   : > { %9726 = vst.msk [vmem:[%s13771_s13 + $0x1f8] sm:$0xf] %vm9599_vm0, %v10312_v41  ;;  %9727 = vst.msk [vmem:[%s13771_s13 + $0x1fc] sm:$0xf] %vm9599_vm0, %v10313_v49 }
 0x625   : > { %9759 = vst.msk [vmem:[%s13771_s13 + $0x27c] sm:$0xf] %vm9599_vm0, %v10345_v56  ;;  %9790 = vst.msk [vmem:[%s13771_s13 + $0x2f8] sm:$0xf] %vm9599_vm0, %v10376_v4 }
 0x626   : > { %9791 = vst.msk [vmem:[%s13771_s13 + $0x2fc] sm:$0xf] %vm9599_vm0, %v10377_v19 }
 0x627 PF: > { %s9829_s9 = sand.u32 1, %s11424_s18   ;;  %p16575_p12 = scmp.ne.s32.totalorder %s15962_s25, 0 }
 0x628   : > { %p16576_p11 = scmp.ge.s32.totalorder %s11436_s21, 2  ;;  %s9830_s27 = scalar_lea.sflag [#allocation4], %s9829_s9 }
 0x62a   : > { %p10644_p3 = pnand %p16576_p11, %p16575_p12 }
 0x62c   : > { %11419 = dma.done.wait (!%p10644_p3), %s9830_s27, 6144  }
 0x62d   : > { %11421 = vsyncadd (!%p10644_p3), %s9830_s27, 4294961152  ;;  %p20_p7 = scmp.ge.s32.totalorder %s11535_s30, 4   ;;  %s16577_s18 = smov %s11428_s19 }
 0x62e   : > { %s16578_s19 = smov %s11432_s20  ;;  %s16579_s20 = smov %s11569_s8 }
 0x62f   : > { %s16580_s21 = smov %s11535_s30  ;;  %22 = sbr.rel (!%p20_p7) target bundleno = 6 (0x6), region = 97 }
 0x636   :  { %9843 = vsyncpa [#allocation3], 1 }
 0x637   :  { %9845 = vsyncpa [#allocation3 + $0x1], 1 }
 0x638   :  { %9846 = vsyncpa [#allocation6], 1 }
 0x639   :  { %9847 = vsyncpa [#allocation4], 1 }
 0x63a   :  { %9849 = vsyncpa [#allocation4 + $0x1], 1 }

</bundles_post_ra>
